<compile_context>
chip_gen: v5e
topology: v5e:2x2
jax: 0.10.0
libtpu: 0.0.40
codegen_flags: <defaults>
</compile_context>

<pallas_src>
import numpy as np
import jax
import jax.numpy as jnp
from jax.experimental import pallas as pl
from jax.experimental.pallas import tpu as pltpu


# ----------------------------- Pallas kernel --------------------------------

def _attn_body(x_ref, wqkv_ref, bqkv_ref, bias_ref, wp_ref, bp_ref, mask_ref, o_ref,
               *, num_heads):
    """Bt windows of (S)W-MSA per grid step.

    x_ref:     (Bt, N, C)   bf16 input tokens for Bt windows
    wqkv_ref:  (C, 3C)      bf16 fused qkv weight (transposed; scale folded into q cols)
    bqkv_ref:  (1, 3C)      f32 fused qkv bias (scale folded into q part)
    bias_ref:  (H*N, N)     f32 relative position bias, heads flattened into rows
    wp_ref:    (C, C)       bf16 output-projection weight (transposed)
    bp_ref:    (1, C)       f32 output-projection bias
    mask_ref:  (Bt, N, N)   f32 SW-MSA additive mask (or None for plain W-MSA)
    o_ref:     (Bt, N, C)   output tokens (bf16)
    """
    Bt, N, C = x_ref.shape
    H = num_heads
    hd = C // H
    bf16 = jnp.bfloat16

    # ---- fused q/k/v projection: ONE MXU pass, M = Bt*N, K = C, Nout = 3C ----
    x2 = x_ref[...].reshape(Bt * N, C)                                   # bf16
    qkv = jnp.dot(x2, wqkv_ref[...],
                  preferred_element_type=jnp.float32) + bqkv_ref[0, :]   # (Bt*N, 3C) f32
    q = qkv[:, :C]                    # softmax scale already folded into weight/bias
    k = qkv[:, C:2 * C].astype(bf16).reshape(Bt, N, C)
    v = qkv[:, 2 * C:].astype(bf16).reshape(Bt, N, C)

    # ---- head-channel mask built in-kernel (2-D iota + compare; no DMA'd input) ----
    head_ids = jax.lax.broadcasted_iota(jnp.int32, (H, C), 0)
    chan_ids = jax.lax.broadcasted_iota(jnp.int32, (H, C), 1)
    hmask = jnp.logical_and(chan_ids >= head_ids * hd,
                            chan_ids < (head_ids + 1) * hd)              # (H, C) bool
    hmask_bf = hmask.astype(bf16)

    # ---- head expansion in bf16: row block h of qexp holds q restricted to head-h
    # channels, so ONE batched matmul yields every head's scores (no hd=8 lane slices).
    # Exact: mask is 0/1, so bf16 masking == f32 masking followed by a bf16 cast. ----
    qexp = (q.astype(bf16).reshape(Bt, 1, N, C) * hmask_bf[None, :, None, :]
            ).reshape(Bt, H * N, C)                                       # (Bt, H*N, C)

    # NOTE: k is contracted on its lane dim; any per-window vxpose Mosaic inserts rides
    # the mostly-idle XLU slot here (softmax max/sum are the only other XLU users).
    scores = jnp.einsum("bmc,bnc->bmn", qexp, k,
                        preferred_element_type=jnp.float32)               # (Bt, H*N, N)
    scores = scores + bias_ref[...][None, :, :]
    if mask_ref is not None:
        # SW-MSA additive mask: per-window, shared across heads.
        scores = (scores.reshape(Bt, H, N, N)
                  + mask_ref[...][:, None, :, :]).reshape(Bt, H * N, N)

    # ---- single-pass softmax over all (window, head, query) rows, f32 ----
    scores = scores - jnp.max(scores, axis=-1, keepdims=True)
    p = jnp.exp(scores)
    l = jnp.sum(p, axis=-1, keepdims=True)                                # (Bt, H*N, 1)

    full = jnp.einsum("bmn,bnc->bmc", p.astype(bf16), v,
                      preferred_element_type=jnp.float32)                 # (Bt, H*N, C)
    # normalize the C-wide output (cheaper than dividing the N-wide probabilities);
    # EUP reciprocal is effectively free next to the VPU work.
    full = full * pl.reciprocal(l, approx=True)

    # ---- recombine heads: keep head-h channels of row block h, sum over heads.
    # Pure VPU multiply+add (exact: exactly one head contributes per channel). ----
    out = (full.reshape(Bt, H, N, C)
           * hmask.astype(jnp.float32)[None, :, None, :]).sum(axis=1)     # (Bt, N, C)

    # ---- output projection ----
    y = jnp.dot(out.reshape(Bt * N, C).astype(bf16), wp_ref[...],
                preferred_element_type=jnp.float32) + bp_ref[0, :]
    o_ref[...] = y.reshape(Bt, N, C).astype(o_ref.dtype)


def _make_kernel(num_heads, has_mask):
    if has_mask:
        def kernel(x_ref, wqkv_ref, bqkv_ref, bias_ref, wp_ref, bp_ref, mask_ref, o_ref):
            _attn_body(x_ref, wqkv_ref, bqkv_ref, bias_ref, wp_ref, bp_ref, mask_ref,
                       o_ref, num_heads=num_heads)
    else:
        def kernel(x_ref, wqkv_ref, bqkv_ref, bias_ref, wp_ref, bp_ref, o_ref):
            _attn_body(x_ref, wqkv_ref, bqkv_ref, bias_ref, wp_ref, bp_ref, None,
                       o_ref, num_heads=num_heads)
    return kernel


# --------------------------- block-size / VMEM sizing -------------------------

def _pick_block_windows(B_, N, C, H, *, has_mask=False, vmem_budget_bytes=8 * 1024 * 1024):
    """Windows per grid step, derived from a VMEM working-set budget.

    Targets (in priority order): stay under the budget; >= 8 grid steps when B_ allows
    (>= 4 per v7x TensorCore so double-buffering can hide x/out DMAs); Bt*N >= 256 to
    amortize the ~0.35us/step grid overhead; hard cap of 32 windows per step.
    """
    per_win = (2 * H * N * N * 4        # scores + p (f32)
               + H * N * C * 2          # qexp (bf16)
               + 2 * H * N * C * 4      # full + head recombine (f32)
               + N * 3 * C * 4          # fused qkv projection slab (f32)
               + 2 * N * C * (2 + 2))   # double-buffered x (bf16) + out (bf16) blocks
    if has_mask:
        per_win += 2 * N * N * 4        # double-buffered per-window mask block (f32)
    bt_vmem = max(int(vmem_budget_bytes // per_win), 1)
    bt_steps = max(B_ // 8, 1)          # >= 8 grid steps whenever B_ allows
    bt_amort = -(-256 // N)             # Bt*N >= 256
    bt = min(bt_vmem, bt_steps, 32)
    bt = max(bt, min(bt_amort, bt_vmem))  # amortization floor, never past the budget
    bt = max(min(bt, B_), 1)
    while B_ % bt:                        # must tile the window axis exactly
        bt -= 1
    return bt


def _vmem_estimate(Bt, N, C, H, has_mask):
    blk_io = 2 * (Bt * N * C * 2 + Bt * N * C * 2)          # double-buffered x/out (bf16)
    if has_mask:
        blk_io += 2 * Bt * N * N * 4
    resident = 2 * (C * 3 * C * 2 + 3 * C * 4               # fused qkv w/b
                    + H * N * N * 4                         # rel-pos bias
                    + C * C * 2 + C * 4)                    # proj w/b
    working = (2 * Bt * H * N * N * 4 + Bt * H * N * C * 2
               + 2 * Bt * H * N * C * 4 + Bt * N * 3 * C * 4)
    return blk_io + resident + working


# ------------------------------ host-side glue --------------------------------

def make_relative_position_index(window_size):
    """Replicates the PyTorch buffer computation (numpy, host-side)."""
    Wh, Ww = window_size
    coords = np.stack(np.meshgrid(np.arange(Wh), np.arange(Ww), indexing="ij"))
    coords_flatten = coords.reshape(2, -1)                               # (2, N)
    relative_coords = coords_flatten[:, :, None] - coords_flatten[:, None, :]
    relative_coords = relative_coords.transpose(1, 2, 0).astype(np.int64)
    relative_coords[:, :, 0] += Wh - 1
    relative_coords[:, :, 1] += Ww - 1
    relative_coords[:, :, 0] *= 2 * Ww - 1
    return relative_coords.sum(-1)                                       # (N, N)


def make_shift_attn_mask(Hp, Wp, window_size, shift_size):
    """Replicates BasicLayer.create_mask (numpy, host-side). Returns (nW, N, N) f32."""
    ws = window_size
    img_mask = np.zeros((Hp, Wp), np.float32)
    slices = (slice(0, -ws), slice(-ws, -shift_size), slice(-shift_size, None))
    cnt = 0
    for h in slices:
        for w in slices:
            img_mask[h, w] = cnt
            cnt += 1
    mask_windows = img_mask.reshape(Hp // ws, ws, Wp // ws, ws).transpose(0, 2, 1, 3)
    mask_windows = mask_windows.reshape(-1, ws * ws)                     # (nW, N)
    attn_mask = mask_windows[:, None, :] - mask_windows[:, :, None]      # (nW, N, N)
    return np.where(attn_mask != 0, -100.0, 0.0).astype(np.float32)


def window_attention(x, params, *, window_size, num_heads, attn_mask=None,
                     block_windows=None, out_dtype=jnp.bfloat16,
                     vmem_budget_bytes=8 * 1024 * 1024):
    """x: (B_, N, C) float32; attn_mask: optional (nW, N, N).  Returns (B_, N, C)."""
    B_, N, C = x.shape
    assert N == window_size[0] * window_size[1]
    H = num_heads
    hd = C // H
    scale = hd ** (-0.5)
    has_mask = attn_mask is not None

    if block_windows is None:
        block_windows = _pick_block_windows(B_, N, C, H, has_mask=has_mask,
                                            vmem_budget_bytes=vmem_budget_bytes)
    Bt = block_windows
    assert B_ % Bt == 0, "block_windows must divide the number of windows"
    grid = (B_ // Bt,)

    # --- glue: relative position bias gather -> (H*N, N), heads flattened into rows ---
    rel_index = jnp.asarray(params["relative_position_index"])            # (N, N)
    table = params["relative_position_bias_table"]                        # ((2Wh-1)(2Ww-1), H)
    rel_bias = table[rel_index.reshape(-1)].reshape(N, N, H)
    rel_bias = jnp.transpose(rel_bias, (2, 0, 1)).reshape(H * N, N).astype(jnp.float32)

    # --- fused qkv weight/bias (softmax scale folded into q columns), bf16 for the MXU
    #     (accumulation stays f32 inside the kernel) ---
    qkv_w = params["qkv_w"].astype(jnp.float32)                           # (3C, C)  [q;k;v]
    qkv_b = params["qkv_b"].astype(jnp.float32)                           # (3C,)
    col_scale = jnp.concatenate([jnp.full((C,), scale, jnp.float32),
                                 jnp.ones((2 * C,), jnp.float32)])
    w_qkv_t = (jnp.transpose(qkv_w) * col_scale[None, :]).astype(jnp.bfloat16)   # (C, 3C)
    b_qkv = (qkv_b * col_scale).reshape(1, 3 * C).astype(jnp.float32)
    wp_t = jnp.transpose(params["proj_w"]).astype(jnp.bfloat16)           # (C, C)
    bp = params["proj_b"].reshape(1, C).astype(jnp.float32)

    x_bf16 = x.astype(jnp.bfloat16)

    # NOTE: every input except x (and the mask) uses a constant index_map, so it is
    # DMA'd once and stays resident in VMEM across grid steps.
    in_specs = [
        pl.BlockSpec((Bt, N, C), lambda g: (g, 0, 0)),       # x: Bt windows / step
        pl.BlockSpec((C, 3 * C), lambda g: (0, 0)),          # fused qkv weight (scaled q)
        pl.BlockSpec((1, 3 * C), lambda g: (0, 0)),          # fused qkv bias
        pl.BlockSpec((H * N, N), lambda g: (0, 0)),          # relative position bias
        pl.BlockSpec((C, C), lambda g: (0, 0)),              # proj weight
        pl.BlockSpec((1, C), lambda g: (0, 0)),              # proj bias
    ]
    args = [x_bf16, w_qkv_t, b_qkv, rel_bias, wp_t, bp]
    if has_mask:
        nW = attn_mask.shape[0]
        assert B_ % nW == 0
        # window g uses mask[g % nW] (matches the PyTorch (B, nW, ...) view + broadcast)
        win_mask = attn_mask.astype(jnp.float32)[jnp.arange(B_) % nW]     # (B_, N, N)
        in_specs.append(pl.BlockSpec((Bt, N, N), lambda g: (g, 0, 0)))
        args.append(win_mask)

    vmem_limit = int(min(max(1.25 * _vmem_estimate(Bt, N, C, H, has_mask), 32 * 2**20),
                         48 * 2**20))

    kernel = _make_kernel(H, has_mask)
    return pl.pallas_call(
        kernel,
        out_shape=jax.ShapeDtypeStruct((B_, N, C), out_dtype),
        grid=grid,
        in_specs=in_specs,
        out_specs=pl.BlockSpec((Bt, N, C), lambda g: (g, 0, 0)),
        compiler_params=pltpu.CompilerParams(
            dimension_semantics=("parallel",),
            vmem_limit_bytes=vmem_limit),
    )(*args)


# --------------------------- pure-JAX reference -------------------------------

def window_attention_ref(x, params, *, window_size, num_heads, attn_mask=None):
    B_, N, C = x.shape
    head_dim = C // num_heads
    scale = head_dim ** (-0.5)

    qkv = x @ params["qkv_w"].T + params["qkv_b"]                          # (B_, N, 3C)
    qkv = qkv.reshape(B_, N, 3, num_heads, head_dim).transpose(2, 0, 3, 1, 4)
    q, k, v = qkv[0], qkv[1], qkv[2]                                       # (B_, H, N, hd)
    q = q * scale
    attn = jnp.einsum("bhnd,bhmd->bhnm", q, k)

    rel_index = jnp.asarray(params["relative_position_index"])
    table = params["relative_position_bias_table"]
    rel_bias = table[rel_index.reshape(-1)].reshape(N, N, num_heads)
    rel_bias = jnp.transpose(rel_bias, (2, 0, 1))                          # (H, N, N)
    attn = attn + rel_bias[None]

    if attn_mask is not None:
        nW = attn_mask.shape[0]
        attn = attn.reshape(B_ // nW, nW, num_heads, N, N) + attn_mask[None, :, None, :, :]
        attn = attn.reshape(B_, num_heads, N, N)

    attn = jax.nn.softmax(attn, axis=-1)
    out = jnp.einsum("bhnm,bhmd->bhnd", attn, v)
    out = out.transpose(0, 2, 1, 3).reshape(B_, N, C)
    return out @ params["proj_w"].T + params["proj_b"]


# ---------------------------------- main --------------------------------------

if __name__ == "__main__":
    dim = 32
    num_heads = 4
    window = 8
    window_size = (window, window)
    N = window * window                    # 64 tokens / window
    batch = 2
    Hf = Wf = 32                           # feature-map size (multiple of window)
    nW = (Hf // window) * (Wf // window)   # 16 windows / image
    B_ = batch * nW                        # 32 windows -> Bt=4, grid=(8,)

    key = jax.random.PRNGKey(0)
    k_x, k_tbl, k_qw, k_qb, k_pw, k_pb = jax.random.split(key, 6)

    num_rel = (2 * window - 1) * (2 * window - 1)
    params = {
        # trunc_normal_(std=0.02) approximated by normal * 0.02 (synthetic weights)
        "relative_position_bias_table":
            (jax.random.normal(k_tbl, (num_rel, num_heads), jnp.float32) * 0.02),
        "relative_position_index": make_relative_position_index(window_size),
        "qkv_w": jax.random.normal(k_qw, (3 * dim, dim), jnp.float32) * 0.05,
        "qkv_b": jax.random.normal(k_qb, (3 * dim,), jnp.float32) * 0.05,
        "proj_w": jax.random.normal(k_pw, (dim, dim), jnp.float32) * 0.05,
        "proj_b": jax.random.normal(k_pb, (dim,), jnp.float32) * 0.05,
    }

    x = jax.random.normal(k_x, (B_, N, dim), jnp.float32)

    # --- W-MSA (no mask) ---
    out = window_attention(x, params, window_size=window_size, num_heads=num_heads)
    out = jax.block_until_ready(out)
    ref = window_attention_ref(x, params, window_size=window_size, num_heads=num_heads)
    # bf16 MXU inputs + bf16 output + approx reciprocal (accumulation/softmax stay f32)
    np.testing.assert_allclose(np.asarray(out, np.float32), np.asarray(ref),
                               rtol=2e-2, atol=2e-2)

    # --- SW-MSA (shifted-window additive mask) ---
    attn_mask = jnp.asarray(make_shift_attn_mask(Hf, Wf, window, window // 2))
    out_s = window_attention(x, params, window_size=window_size, num_heads=num_heads,
                             attn_mask=attn_mask)
    out_s = jax.block_until_ready(out_s)
    ref_s = window_attention_ref(x, params, window_size=window_size,
                                 num_heads=num_heads, attn_mask=attn_mask)
    np.testing.assert_allclose(np.asarray(out_s, np.float32), np.asarray(ref_s),
                               rtol=2e-2, atol=2e-2)

    print("KERNEL_OK")
</pallas_src>

<mosaic_0001>
module attributes {stable_mosaic.version = 11 : i64} {
  func.func @kernel(%arg0: i32, %arg1: memref<4x64x32xbf16, #tpu.memory_space<vmem>>, %arg2: memref<32x96xbf16, #tpu.memory_space<vmem>>, %arg3: memref<1x96xf32, #tpu.memory_space<vmem>>, %arg4: memref<256x64xf32, #tpu.memory_space<vmem>>, %arg5: memref<32x32xbf16, #tpu.memory_space<vmem>>, %arg6: memref<1x32xf32, #tpu.memory_space<vmem>>, %arg7: memref<4x64x32xbf16, #tpu.memory_space<vmem>>) attributes {dimension_semantics = [#tpu.dimension_semantics<parallel>], iteration_bounds = array<i64: 8>, scalar_prefetch = 0 : i64, scratch_operands = 0 : i64, tpu.core_type = #tpu.core_type<tc>, window_params = [{transform_indices = @transform_0, window_bounds = array<i64: 4, 64, 32>}, {pipeline_mode = #tpu.pipeline_mode<synchronous>, transform_indices = @transform_1, window_bounds = array<i64: 32, 96>}, {pipeline_mode = #tpu.pipeline_mode<synchronous>, transform_indices = @transform_2, window_bounds = array<i64: 1, 96>}, {pipeline_mode = #tpu.pipeline_mode<synchronous>, transform_indices = @transform_3, window_bounds = array<i64: 256, 64>}, {pipeline_mode = #tpu.pipeline_mode<synchronous>, transform_indices = @transform_4, window_bounds = array<i64: 32, 32>}, {pipeline_mode = #tpu.pipeline_mode<synchronous>, transform_indices = @transform_5, window_bounds = array<i64: 1, 32>}, {transform_indices = @transform_6, window_bounds = array<i64: 4, 64, 32>}]} {
    %c0 = arith.constant 0 : index
    %c0_0 = arith.constant 0 : index
    %c0_1 = arith.constant 0 : index
    %0 = vector.load %arg1[%c0, %c0_0, %c0_1] : memref<4x64x32xbf16, #tpu.memory_space<vmem>>, vector<4x64x32xbf16>
    %1 = vector.shape_cast %0 : vector<4x64x32xbf16> to vector<256x32xbf16>
    %c0_2 = arith.constant 0 : index
    %c0_3 = arith.constant 0 : index
    %2 = vector.load %arg2[%c0_2, %c0_3] : memref<32x96xbf16, #tpu.memory_space<vmem>>, vector<32x96xbf16>
    %cst = arith.constant dense<0.000000e+00> : vector<256x96xf32>
    %3 = tpu.matmul %1, %2, %cst {dimension_numbers = #tpu.dot_dimension_numbers<[1], [0], [0], [1], [0, 0, 1, 1], [], []>} : vector<256x32xbf16>, vector<32x96xbf16>, vector<256x96xf32> -> vector<256x96xf32>
    %c0_4 = arith.constant 0 : index
    %c0_5 = arith.constant 0 : index
    %4 = vector.load %arg3[%c0_4, %c0_5] : memref<1x96xf32, #tpu.memory_space<vmem>>, vector<1x96xf32>
    %5 = vector.shape_cast %4 : vector<1x96xf32> to vector<96xf32>
    %6 = vector.shape_cast %5 : vector<96xf32> to vector<1x96xf32>
    %7 = vector.broadcast %6 : vector<1x96xf32> to vector<256x96xf32>
    %8 = arith.addf %3, %7 : vector<256x96xf32>
    %9 = vector.extract_strided_slice %8 {offsets = [0, 0], sizes = [256, 32], strides = [1, 1]} : vector<256x96xf32> to vector<256x32xf32>
    %10 = vector.extract_strided_slice %8 {offsets = [0, 32], sizes = [256, 32], strides = [1, 1]} : vector<256x96xf32> to vector<256x32xf32>
    %11 = arith.truncf %10 : vector<256x32xf32> to vector<256x32xbf16>
    %12 = vector.shape_cast %11 : vector<256x32xbf16> to vector<4x64x32xbf16>
    %13 = vector.extract_strided_slice %8 {offsets = [0, 64], sizes = [256, 32], strides = [1, 1]} : vector<256x96xf32> to vector<256x32xf32>
    %14 = arith.truncf %13 : vector<256x32xf32> to vector<256x32xbf16>
    %15 = vector.shape_cast %14 : vector<256x32xbf16> to vector<4x64x32xbf16>
    %16 = tpu.iota {dimensions = array<i32: 0>} : vector<4x32xi32>
    %17 = tpu.iota {dimensions = array<i32: 1>} : vector<4x32xi32>
    %c8_i32 = arith.constant 8 : i32
    %18 = vector.broadcast %c8_i32 : i32 to vector<4x32xi32>
    %19 = arith.muli %16, %18 : vector<4x32xi32>
    %20 = arith.cmpi sge, %17, %19 : vector<4x32xi32>
    %c1_i32 = arith.constant 1 : i32
    %21 = vector.broadcast %c1_i32 : i32 to vector<4x32xi32>
    %22 = arith.addi %16, %21 : vector<4x32xi32>
    %c8_i32_6 = arith.constant 8 : i32
    %23 = vector.broadcast %c8_i32_6 : i32 to vector<4x32xi32>
    %24 = arith.muli %22, %23 : vector<4x32xi32>
    %25 = arith.cmpi slt, %17, %24 : vector<4x32xi32>
    %26 = arith.andi %20, %25 : vector<4x32xi1>
    %27 = arith.extui %26 : vector<4x32xi1> to vector<4x32xi32>
    %28 = arith.sitofp %27 : vector<4x32xi32> to vector<4x32xf32>
    %29 = arith.truncf %28 : vector<4x32xf32> to vector<4x32xbf16>
    %30 = arith.truncf %9 : vector<256x32xf32> to vector<256x32xbf16>
    %31 = vector.shape_cast %30 : vector<256x32xbf16> to vector<4x1x64x32xbf16>
    %32 = vector.shape_cast %29 : vector<4x32xbf16> to vector<1x4x1x32xbf16>
    %33 = vector.broadcast %31 : vector<4x1x64x32xbf16> to vector<4x4x64x32xbf16>
    %34 = vector.broadcast %32 : vector<1x4x1x32xbf16> to vector<4x4x64x32xbf16>
    %35 = arith.mulf %33, %34 : vector<4x4x64x32xbf16>
    %36 = vector.shape_cast %35 : vector<4x4x64x32xbf16> to vector<4x256x32xbf16>
    "tpu.trace_start"() <{level = 10 : i32, message = "bmc,bnc->bmn"}> : () -> ()
    %cst_7 = arith.constant dense<0.000000e+00> : vector<4x256x64xf32>
    %37 = tpu.matmul %36, %12, %cst_7 {dimension_numbers = #tpu.dot_dimension_numbers<[2], [2], [1], [1], [0, 0, 0, 1, 1, 1], [0], [0]>} : vector<4x256x32xbf16>, vector<4x64x32xbf16>, vector<4x256x64xf32> -> vector<4x256x64xf32>
    "tpu.trace_stop"() : () -> ()
    %c0_8 = arith.constant 0 : index
    %c0_9 = arith.constant 0 : index
    %38 = vector.load %arg4[%c0_8, %c0_9] : memref<256x64xf32, #tpu.memory_space<vmem>>, vector<256x64xf32>
    %39 = vector.shape_cast %38 : vector<256x64xf32> to vector<1x256x64xf32>
    %40 = vector.broadcast %39 : vector<1x256x64xf32> to vector<4x256x64xf32>
    %41 = arith.addf %37, %40 : vector<4x256x64xf32>
    %cst_10 = arith.constant dense<0xFF800000> : vector<4x256xf32>
    %42 = vector.multi_reduction <maximumf>, %41, %cst_10 [2] : vector<4x256x64xf32> to vector<4x256xf32>
    %43 = vector.shape_cast %42 : vector<4x256xf32> to vector<4x256x1xf32>
    %44 = vector.broadcast %43 : vector<4x256x1xf32> to vector<4x256x64xf32>
    %45 = arith.subf %41, %44 : vector<4x256x64xf32>
    %46 = math.exp %45 : vector<4x256x64xf32>
    %cst_11 = arith.constant dense<0.000000e+00> : vector<4x256xf32>
    %47 = vector.multi_reduction <add>, %46, %cst_11 [2] : vector<4x256x64xf32> to vector<4x256xf32>
    %48 = vector.shape_cast %47 : vector<4x256xf32> to vector<4x256x1xf32>
    %49 = arith.truncf %46 : vector<4x256x64xf32> to vector<4x256x64xbf16>
    "tpu.trace_start"() <{level = 10 : i32, message = "bmn,bnc->bmc"}> : () -> ()
    %cst_12 = arith.constant dense<0.000000e+00> : vector<4x256x32xf32>
    %50 = tpu.matmul %49, %15, %cst_12 {dimension_numbers = #tpu.dot_dimension_numbers<[2], [1], [1], [2], [0, 0, 0, 1, 1, 2], [0], [0]>} : vector<4x256x64xbf16>, vector<4x64x32xbf16>, vector<4x256x32xf32> -> vector<4x256x32xf32>
    "tpu.trace_stop"() : () -> ()
    %51 = tpu.reciprocal %48 {approx = true} : vector<4x256x1xf32> -> vector<4x256x1xf32>
    %52 = vector.broadcast %51 : vector<4x256x1xf32> to vector<4x256x32xf32>
    %53 = arith.mulf %50, %52 : vector<4x256x32xf32>
    %54 = vector.shape_cast %53 : vector<4x256x32xf32> to vector<4x4x64x32xf32>
    %55 = arith.extui %26 : vector<4x32xi1> to vector<4x32xi32>
    %56 = arith.sitofp %55 : vector<4x32xi32> to vector<4x32xf32>
    %57 = vector.shape_cast %56 : vector<4x32xf32> to vector<1x4x1x32xf32>
    %58 = vector.broadcast %57 : vector<1x4x1x32xf32> to vector<4x4x64x32xf32>
    %59 = arith.mulf %54, %58 : vector<4x4x64x32xf32>
    %cst_13 = arith.constant dense<0.000000e+00> : vector<4x64x32xf32>
    %60 = vector.multi_reduction <add>, %59, %cst_13 [1] : vector<4x4x64x32xf32> to vector<4x64x32xf32>
    %61 = vector.shape_cast %60 : vector<4x64x32xf32> to vector<256x32xf32>
    %62 = arith.truncf %61 : vector<256x32xf32> to vector<256x32xbf16>
    %c0_14 = arith.constant 0 : index
    %c0_15 = arith.constant 0 : index
    %63 = vector.load %arg5[%c0_14, %c0_15] : memref<32x32xbf16, #tpu.memory_space<vmem>>, vector<32x32xbf16>
    %cst_16 = arith.constant dense<0.000000e+00> : vector<256x32xf32>
    %64 = tpu.matmul %62, %63, %cst_16 {dimension_numbers = #tpu.dot_dimension_numbers<[1], [0], [0], [1], [0, 0, 1, 1], [], []>} : vector<256x32xbf16>, vector<32x32xbf16>, vector<256x32xf32> -> vector<256x32xf32>
    %c0_17 = arith.constant 0 : index
    %c0_18 = arith.constant 0 : index
    %65 = vector.load %arg6[%c0_17, %c0_18] : memref<1x32xf32, #tpu.memory_space<vmem>>, vector<1x32xf32>
    %66 = vector.shape_cast %65 : vector<1x32xf32> to vector<32xf32>
    %67 = vector.shape_cast %66 : vector<32xf32> to vector<1x32xf32>
    %68 = vector.broadcast %67 : vector<1x32xf32> to vector<256x32xf32>
    %69 = arith.addf %64, %68 : vector<256x32xf32>
    %70 = vector.shape_cast %69 : vector<256x32xf32> to vector<4x64x32xf32>
    %71 = arith.truncf %70 : vector<4x64x32xf32> to vector<4x64x32xbf16>
    %c0_19 = arith.constant 0 : index
    %c0_20 = arith.constant 0 : index
    %c0_21 = arith.constant 0 : index
    %72 = vector.load %arg7[%c0_19, %c0_20, %c0_21] : memref<4x64x32xbf16, #tpu.memory_space<vmem>>, vector<4x64x32xbf16>
    tpu.vector_store %arg7[%c0_19, %c0_20, %c0_21], %71 {strides = array<i32>} : memref<4x64x32xbf16, #tpu.memory_space<vmem>>, vector<4x64x32xbf16>,
    return
  }
  func.func @transform_0(%arg0: i32) -> (i32, i32, i32) {
    %c0_i32 = arith.constant 0 : i32
    %c0_i32_0 = arith.constant 0 : i32
    %c0_i32_1 = arith.constant 0 : i32
    return %arg0, %c0_i32, %c0_i32_0 : i32, i32, i32
  }
  func.func @transform_1(%arg0: i32) -> (i32, i32) {
    %c0_i32 = arith.constant 0 : i32
    %c0_i32_0 = arith.constant 0 : i32
    %c0_i32_1 = arith.constant 0 : i32
    return %c0_i32, %c0_i32_0 : i32, i32
  }
  func.func @transform_2(%arg0: i32) -> (i32, i32) {
    %c0_i32 = arith.constant 0 : i32
    %c0_i32_0 = arith.constant 0 : i32
    %c0_i32_1 = arith.constant 0 : i32
    return %c0_i32, %c0_i32_0 : i32, i32
  }
  func.func @transform_3(%arg0: i32) -> (i32, i32) {
    %c0_i32 = arith.constant 0 : i32
    %c0_i32_0 = arith.constant 0 : i32
    %c0_i32_1 = arith.constant 0 : i32
    return %c0_i32, %c0_i32_0 : i32, i32
  }
  func.func @transform_4(%arg0: i32) -> (i32, i32) {
    %c0_i32 = arith.constant 0 : i32
    %c0_i32_0 = arith.constant 0 : i32
    %c0_i32_1 = arith.constant 0 : i32
    return %c0_i32, %c0_i32_0 : i32, i32
  }
  func.func @transform_5(%arg0: i32) -> (i32, i32) {
    %c0_i32 = arith.constant 0 : i32
    %c0_i32_0 = arith.constant 0 : i32
    %c0_i32_1 = arith.constant 0 : i32
    return %c0_i32, %c0_i32_0 : i32, i32
  }
  func.func @transform_6(%arg0: i32) -> (i32, i32, i32) {
    %c0_i32 = arith.constant 0 : i32
    %c0_i32_0 = arith.constant 0 : i32
    %c0_i32_1 = arith.constant 0 : i32
    return %arg0, %c0_i32, %c0_i32_0 : i32, i32, i32
  }
}

</mosaic_0001>

<bundles_post_ra>
// kernel: tpu_custom_call.1
= control target key start
LH: loop header
LB: loop body
LE: loop exit
PB: predicated region body
PF: predicated region fallthrough
CT: control target
= control target key end

     0   :  { %s5961_s21 = smov 0   ;;  %s10147_s0 = inlined_call_operand.vmem [shape: bf16[32,64,32], index: 0, kind: input, shape index: {}]   ;;  %s10148_s1 = inlined_call_operand.vmem [shape: bf16[32,96], index: 1, kind: input, shape index: {}]   ;;  %s10149_s2 = inlined_call_operand.vmem [shape: f32[1,96], index: 2, kind: input, shape index: {}]   ;;  %s10150_s3 = inlined_call_operand.vmem [shape: f32[256,64], index: 3, kind: input, shape index: {}]   ;;  %s10151_s4 = inlined_call_operand.vmem [shape: bf16[32,32], index: 4, kind: input, shape index: {}]   ;;  %s10152_s5 = inlined_call_operand.vmem [shape: f32[1,32], index: 5, kind: input, shape index: {}]   ;;  %s10153_s6 = inlined_call_operand.vmem [shape: bf16[32,64,32], index: 6, kind: output, shape index: {}]  }
   0x1 LB: > { %s5080_s22 = sadd.s32 4294967295, %s5921_s21   ;;  %p5084_p0 = scmp.ge.s32.totalorder %s5921_s21, 1  ;;  %s5921_s21 = sphi %s5961_s21, %s16_s21  }
   0x2   : > { %p214_p1 = scmp.lt.s32.totalorder %s5921_s21, 9 }
   0x4   : > { %p215_p2 = pnand %p5084_p0, %p214_p1 }
   0x6   : > { %218 = sbr.rel (%p215_p2) target bundleno = 1492 (0x5d4), region = 44 }
   0xb   : > { %v5355_v0 = vld [vmem:[%s10148_s1 + $0x8] sm:$0xff]  ;;  %s5085_s25 = sshll.u32 %s5080_s22, 2  ;;  %v5354_v1 = vld [vmem:[%s10148_s1] sm:$0xff]  ;;  %vm393_vm0 = vcmask 261120   ;;  %v563_v12 = vlaneseq  ;;  %v5923_v22 = vmov 0.0   ;;  %vm583_vm4 = vcmask 1041409  }
   0xc   : > { %p247_p3 = scmp.lt.s32.totalorder %s5085_s25, 31  ;;  %448 = vmatpush.bf16.msra.mxu0 %v5355_v0  ;;  %5358 = vmatpush.bf16.msra.mxu3 %v5355_v0  ;;  %vm578_vm5 = vcmask 1040384   ;;  %v6022_v40 = vld [vmem:[%s10149_s2] ss:$0 sm:$0xff]  ;;  %s5924_s10 = smov 96   ;;  %vm1967_vm6 = vcmask 523264  }
   0xd   : > { %v564_v15 = vshrl.u32 %v563_v12, 7  ;;  %v566_v17 = vand.u32 127, %v563_v12  ;;  %s5925_s11 = smov 64   ;;  %vm4989_vm7 = vcmask 257024  }
   0xe   : > { %s10977_s25 = smov (!%p247_p3, %s5085_s25), 31 }
   0xf   : > { %s5336_s28 = sshll.u32 %s10977_s25, 5  ;;  %v569_v16 = vadd.s32 1, %v564_v15  ;;  %v567_v18 = vmul.u32 8, %v564_v15 }
  0x10   : > { %449 = vmatpush.bf16.msra.mxu0 %v5354_v1  ;;  %5359 = vmatpush.bf16.msra.mxu3 %v5354_v1  ;;  %s5983_s7 = scalar_lea.vmem %s10147_s0, %s5336_s28  ;;  %s9624_s8 = scalar_lea.vmem %s10153_s6, %s5336_s28 }
  0x11   : > { %v5338_v2 = vld [vmem:[%s5983_s7] sm:$0xff]  ;;  %v5347_v3 = vld [vmem:[%s5983_s7 + $0x48] sm:$0xff]  ;;  %v5348_v5 = vld [vmem:[%s5983_s7 + $0x50] sm:$0xff]  ;;  %v570_v19 = vmul.u32 8, %v569_v16  ;;  %vm568_vm1 = vcmp.ge.s32.totalorder %v566_v17, %v567_v18 }
  0x12   : > { %v5339_v4 = vld [vmem:[%s5983_s7 + $0x8] sm:$0xff]  ;;  %v5340_v6 = vld [vmem:[%s5983_s7 + $0x10] sm:$0xff]  ;;  %v5349_v7 = vld [vmem:[%s5983_s7 + $0x58] sm:$0xff] }
  0x13   : > { %5163 = vmatmul.msk.bf16.vlgmr.msra.gmra.mxu0 %vm393_vm0, %v5338_v2  ;;  %5172 = vmatmul.msk.bf16.vlgmr.msra.gmra.mxu3 %vm393_vm0, %v5347_v3  ;;  %v5341_v8 = vld [vmem:[%s5983_s7 + $0x18] sm:$0xff]  ;;  %v5350_v9 = vld [vmem:[%s5983_s7 + $0x60] sm:$0xff]  ;;  %v5351_v11 = vld [vmem:[%s5983_s7 + $0x68] sm:$0xff]  ;;  %vm571_vm2 = vcmp.lt.s32.totalorder %v566_v17, %v570_v19 }
  0x14   : > { %v5342_v10 = vld [vmem:[%s5983_s7 + $0x20] sm:$0xff]  ;;  %v5343_v13 = vld [vmem:[%s5983_s7 + $0x28] sm:$0xff]  ;;  %v5352_v14 = vld [vmem:[%s5983_s7 + $0x70] sm:$0xff] }
  0x15   : > { %v5344_v20 = vld [vmem:[%s5983_s7 + $0x30] sm:$0xff]  ;;  %v5353_v21 = vld [vmem:[%s5983_s7 + $0x78] sm:$0xff]  ;;  %vm572_vm3 = vmand %vm568_vm1, %vm571_vm2 }
  0x16   : > { %v6011_v23 = vsel %vm572_vm3, 1.0, %v5923_v22  ;;  %v5345_v27 = vld [vmem:[%s5983_s7 + $0x38] sm:$0xff] }
  0x17   : > { %10379 = vst [vmem:[#allocation2_spill] sm:$0xff] %v6011_v23  ;;  %v575_v24 = vpack.c.bf16 %v6011_v23, %v6011_v23 }
  0x19   : > { %v577_v25 = vrot.slane %v575_v24, 3 }
  0x1b   : > { %v584_v26 = vsel %vm583_vm4, %v575_v24, %v577_v25  ;;  %v581_v28 = vsel %vm578_vm5, %v575_v24, %v577_v25 }
  0x1c   : > { %v586_v29 = vrot.slane %v584_v26, 1  ;;  %v588_v30 = vunpack.i.h.s16 %v581_v28  ;;  %v5180_v32 = vpack.i.b16 %v581_v28, %v581_v28 }
  0x1e   : > { %v590_v31 = vunpack.i.h.s16 %v586_v29  ;;  %v5181_v33 = vpack.i.b16 %v586_v29, %v586_v29  ;;  %v592_v34 = vpack.i.b16 %v588_v30, %v588_v30  ;;  %v595_v36 = vperm.slane %v5180_v32, 0 }
  0x20   : > { %v594_v35 = vpack.i.b16 %v590_v31, %v590_v31  ;;  %v597_v37 = vperm.slane %v5181_v33, 0  ;;  %v596_v38 = vperm.slane %v592_v34, 0  ;;  %v600_v41 = vpack.i.b16 %v595_v36, %v595_v36 }
  0x22   : > { %v598_v39 = vperm.slane %v594_v35, 0  ;;  %v608_v42 = vpack.i.b16 %v597_v37, %v597_v37  ;;  %v604_v43 = vpack.i.b16 %v596_v38, %v596_v38  ;;  %v602_v47 = vperm.slane %v600_v41, 0 }
  0x23   : > { %5164 = vmatmul.msk.bf16.gmra.mxu0 %vm393_vm0, %v5339_v4  ;;  %5173 = vmatmul.msk.bf16.gmra.mxu3 %vm393_vm0, %v5348_v5 }
  0x24   : > { %v612_v45 = vpack.i.b16 %v598_v39, %v598_v39  ;;  %v610_v49 = vperm.slane %v608_v42, 0  ;;  %v606_v50 = vperm.slane %v604_v43, 0  ;;  %v6030_v54 = vunpack.c.l.bf16 %v602_v47 }
  0x26   : > { %v614_v51 = vperm.slane %v612_v45, 0  ;;  %v6032_v55 = vunpack.c.l.bf16 %v610_v49  ;;  %v6034_v56 = vunpack.c.l.bf16 %v606_v50 }
  0x28   : > { %v6036_v58 = vunpack.c.l.bf16 %v614_v51 }
  0x33   : > { %5165 = vmatmul.msk.bf16.gmra.mxu0 %vm393_vm0, %v5340_v6  ;;  %5174 = vmatmul.msk.bf16.gmra.mxu3 %vm393_vm0, %v5349_v7 }
  0x43   : > { %5166 = vmatmul.msk.bf16.gmra.mxu0 %vm393_vm0, %v5341_v8  ;;  %5175 = vmatmul.msk.bf16.gmra.mxu3 %vm393_vm0, %v5350_v9 }
  0x53   : > { %5167 = vmatmul.msk.bf16.gmra.mxu0 %vm393_vm0, %v5342_v10  ;;  %5176 = vmatmul.msk.bf16.gmra.mxu3 %vm393_vm0, %v5351_v11 }
  0x63   : > { %5168 = vmatmul.msk.bf16.gmra.mxu0 %vm393_vm0, %v5343_v13  ;;  %5177 = vmatmul.msk.bf16.gmra.mxu3 %vm393_vm0, %v5352_v14  ;;  %v5346_v13 = vld [vmem:[%s5983_s7 + $0x40] sm:$0xff] }
  0x73   : > { %5169 = vmatmul.msk.bf16.gmra.mxu0 %vm393_vm0, %v5344_v20  ;;  %5178 = vmatmul.msk.bf16.gmra.mxu3 %vm393_vm0, %v5353_v21 }
  0x83   : > { %5170 = vmatmul.msk.bf16.gmra.mxu0 %vm393_vm0, %v5345_v27 }
  0x90   : > { %v451_v44 = vpop.f32.mrf.mxu0 }
  0x91   : > { %v452_v46 = vadd.f32 %v6022_v40, %v451_v44 }
  0x93   : > { %v6025_v48 = vpack.c.bf16 %v452_v46, %v452_v46  ;;  %5171 = vmatmul.msk.bf16.gmra.mxu0 %vm393_vm0, %v5346_v13 }
  0x95   : > { %v615_v52 = vunpack.c.l.bf16 %v6025_v48 }
  0x96   : > { %v6028_v53 = vpop.f32.mrf.mxu3 }
  0x97   : > { %v651_v60 = vmul.f32 %v6030_v54, %v615_v52  ;;  %v667_v62 = vmul.f32 %v6032_v55, %v615_v52  ;;  %v659_v63 = vmul.f32 %v6034_v56, %v615_v52  ;;  %v675_v0 = vmul.f32 %v6036_v58, %v615_v52 }
  0x98   : > { %v453_v57 = vpop.f32.mrf.mxu0 }
  0x99   : > { %v454_v59 = vadd.f32 %v6022_v40, %v453_v57  ;;  %v779_v3 = vpack.c.bf16 %v651_v60, %v651_v60  ;;  %v795_v6 = vpack.c.bf16 %v667_v62, %v667_v62  ;;  %v787_v7 = vpack.c.bf16 %v659_v63, %v659_v63 }
  0x9a   : > { %v803_v11 = vpack.c.bf16 %v675_v0, %v675_v0 }
  0x9b   : > { %v6040_v61 = vpack.c.bf16 %v454_v59, %v454_v59  ;;  %v6054_v16 = vunpack.c.l.b16 %v779_v3  ;;  %v6059_v21 = vunpack.c.l.b16 %v795_v6  ;;  %v6061_v22 = vunpack.c.l.b16 %v787_v7 }
  0x9c   : > { %v6067_v26 = vunpack.c.l.b16 %v803_v11 }
  0x9d   : > { %v616_v1 = vunpack.c.l.bf16 %v6040_v61  ;;  %10380 = vst [vmem:[#allocation3_spill] sm:$0xff] %v6061_v22  ;;  %v1028_v3 = vunpack.c.l.b16 %v6040_v61  ;;  %v1027_v61 = vunpack.c.l.b16 %v6025_v48 }
  0x9e   : > { %v6046_v2 = vpop.f32.mrf.mxu3  ;;  %10382 = vst [vmem:[#allocation5_spill] sm:$0xff] %v6067_v26 }
  0x9f   : > { %v652_v4 = vmul.f32 %v6030_v54, %v616_v1  ;;  %v668_v5 = vmul.f32 %v6032_v55, %v616_v1  ;;  %v660_v9 = vmul.f32 %v6034_v56, %v616_v1  ;;  %v676_v10 = vmul.f32 %v6036_v58, %v616_v1 }
  0xa0   : > { %v456_v8 = vpop.f32.mrf.mxu0 }
  0xa1   : > { %v457_v12 = vadd.f32 %v6022_v40, %v456_v8  ;;  %v780_v14 = vpack.c.bf16 %v652_v4, %v652_v4  ;;  %v796_v15 = vpack.c.bf16 %v668_v5, %v668_v5  ;;  %v788_v17 = vpack.c.bf16 %v660_v9, %v660_v9 }
  0xa2   : > { %v804_v18 = vpack.c.bf16 %v676_v10, %v676_v10 }
  0xa3   : > { %v533_v19 = vpack.c.bf16 %v457_v12, %v457_v12  ;;  %v6057_v20 = vunpack.c.l.b16 %v780_v14  ;;  %v6063_v24 = vunpack.c.l.b16 %v796_v15  ;;  %v6065_v25 = vunpack.c.l.b16 %v788_v17 }
  0xa4   : > { %v6069_v27 = vunpack.c.l.b16 %v804_v18 }
  0xa5   : > { %10381 = vst [vmem:[#allocation4_spill] sm:$0xff] %v6065_v25  ;;  %v617_v29 = vunpack.c.l.bf16 %v533_v19  ;;  %v1029_v42 = vunpack.c.l.b16 %v533_v19 }
  0xa6   : > { %10383 = vst [vmem:[#allocation6_spill] sm:$0xff] %v6069_v27  ;;  %v6073_v30 = vpop.f32.mrf.mxu3 }
  0xa7   : > { %v653_v36 = vmul.f32 %v6030_v54, %v617_v29  ;;  %v669_v37 = vmul.f32 %v6032_v55, %v617_v29  ;;  %v661_v39 = vmul.f32 %v6034_v56, %v617_v29  ;;  %v677_v41 = vmul.f32 %v6036_v58, %v617_v29 }
  0xa8   : > { %v458_v34 = vpop.f32.mrf.mxu0 }
  0xa9   : > { %v459_v35 = vadd.f32 %v6022_v40, %v458_v34  ;;  %v781_v46 = vpack.c.bf16 %v653_v36, %v653_v36  ;;  %v797_v47 = vpack.c.bf16 %v669_v37, %v669_v37  ;;  %v789_v52 = vpack.c.bf16 %v661_v39, %v661_v39 }
  0xaa   : > { %v805_v62 = vpack.c.bf16 %v677_v41, %v677_v41 }
  0xab   : > { %v534_v38 = vpack.c.bf16 %v459_v35, %v459_v35  ;;  %v6098_v4 = vunpack.c.l.b16 %v781_v46  ;;  %v6104_v9 = vunpack.c.l.b16 %v797_v47  ;;  %v6106_v10 = vunpack.c.l.b16 %v789_v52 }
  0xac   : > { %v6112_v13 = vunpack.c.l.b16 %v805_v62  ;;  %v6128_v35 = vpack.c.b16 %v1028_v3, %v1027_v61  ;;  %v499_v46 = vadd.f32 %v6022_v40, %v6046_v2 }
  0xad   : > { %v618_v43 = vunpack.c.l.bf16 %v534_v38  ;;  %v1030_v44 = vunpack.c.l.b16 %v534_v38  ;;  %10384 = vst [vmem:[#allocation7_spill] sm:$0xff] %v6104_v9 }
  0xae   : > { %v6086_v45 = vpop.f32.mrf.mxu3  ;;  %10385 = vst [vmem:[#allocation8_spill] sm:$0xff] %v6106_v10 }
  0xaf   : > { %v6088_v49 = vpack.c.b16 %v1030_v44, %v1029_v42  ;;  %v654_v50 = vmul.f32 %v6030_v54, %v618_v43  ;;  %v670_v51 = vmul.f32 %v6032_v55, %v618_v43  ;;  %v662_v59 = vmul.f32 %v6034_v56, %v618_v43  ;;  %10387 = vst [vmem:[#allocation10_spill] sm:$0xff] %v6112_v13 }
  0xb0   : > { %v461_v57 = vpop.f32.mrf.mxu0  ;;  %v678_v60 = vmul.f32 %v6036_v58, %v618_v43  ;;  %v497_v43 = vadd.f32 %v6022_v40, %v6028_v53 }
  0xb1   : > { %v462_v63 = vadd.f32 %v6022_v40, %v461_v57  ;;  %1041 = vrot.lane.b32.xlu1 %v6088_v49, %s5924_s10  ;;  %v782_v0 = vpack.c.bf16 %v654_v50, %v654_v50  ;;  %v798_v1 = vpack.c.bf16 %v670_v51, %v670_v51  ;;  %v790_v5 = vpack.c.bf16 %v662_v59, %v662_v59 }
  0xb2   : > { %v806_v6 = vpack.c.bf16 %v678_v60, %v678_v60 }
  0xb3   : > { %v6100_v7 = vpack.c.bf16 %v462_v63, %v462_v63  ;;  %v6102_v8 = vunpack.c.l.b16 %v782_v0  ;;  %v6108_v11 = vunpack.c.l.b16 %v798_v1  ;;  %v6110_v12 = vunpack.c.l.b16 %v790_v5 }
  0xb4   : > { %v6114_v14 = vunpack.c.l.b16 %v806_v6  ;;  %v6150_v0 = vpack.c.bf16 %v497_v43, %v497_v43  ;;  %v6153_v5 = vpack.c.bf16 %v499_v46, %v499_v46 }
  0xb5   : > { %10386 = vst [vmem:[#allocation9_spill] sm:$0xff] %v6110_v12  ;;  %v619_v17 = vunpack.c.l.bf16 %v6100_v7 }
  0xb6   : > { %10388 = vst [vmem:[#allocation11_spill] sm:$0xff] %v6114_v14  ;;  %v6120_v18 = vpop.f32.mrf.mxu3 }
  0xb7   : > { %v655_v37 = vmul.f32 %v6030_v54, %v619_v17  ;;  %v671_v39 = vmul.f32 %v6032_v55, %v619_v17  ;;  %v663_v41 = vmul.f32 %v6034_v56, %v619_v17  ;;  %v679_v42 = vmul.f32 %v6036_v58, %v619_v17  ;;  %10389 = vst [vmem:[#allocation12_spill] sm:$0xff] %v6150_v0 }
  0xb8   : > { %v463_v36 = vpop.f32.mrf.mxu0  ;;  %10390 = vst [vmem:[#allocation13_spill] sm:$0xff] %v6153_v5 }
  0xb9   : > { %v464_v48 = vadd.f32 %v6022_v40, %v463_v36  ;;  %1039 = vrot.lane.b32.xlu1 %v6128_v35, %s5924_s10  ;;  %v783_v50 = vpack.c.bf16 %v655_v37, %v655_v37  ;;  %v799_v57 = vpack.c.bf16 %v671_v39, %v671_v39  ;;  %v791_v59 = vpack.c.bf16 %v663_v41, %v663_v41 }
  0xba   : > { %v807_v53 = vpack.c.bf16 %v679_v42, %v679_v42 }
  0xbb   : > { %v6134_v38 = vpack.c.bf16 %v464_v48, %v464_v48  ;;  %v6155_v6 = vunpack.c.l.b16 %v783_v50  ;;  %v6159_v37 = vunpack.c.l.b16 %v799_v57  ;;  %v6161_v39 = vunpack.c.l.b16 %v791_v59 }
  0xbc   : > { %v6167_v43 = vunpack.c.l.b16 %v807_v53  ;;  %v1543_v53 = vunpack.c.l.b16 %v6150_v0 }
  0xbd   : > { %v620_v44 = vunpack.c.l.bf16 %v6134_v38  ;;  %10391 = vst [vmem:[#allocation14_spill] sm:$0xff] %v6155_v6 }
  0xbe   : > { %v6144_v47 = vpop.f32.mrf.mxu3  ;;  %10393 = vst [vmem:[#allocation16_spill] sm:$0xff] %v6159_v37 }
  0xbf   : > { %v656_v51 = vmul.f32 %v6030_v54, %v620_v44  ;;  %v672_v52 = vmul.f32 %v6032_v55, %v620_v44  ;;  %v664_v62 = vmul.f32 %v6034_v56, %v620_v44  ;;  %v680_v63 = vmul.f32 %v6036_v58, %v620_v44  ;;  %10394 = vst [vmem:[#allocation17_spill] sm:$0xff] %v6161_v39 }
  0xc0   : > { %v466_v60 = vpop.f32.mrf.mxu0  ;;  %10397 = vst [vmem:[#allocation20_spill] sm:$0xff] %v6167_v43 }
  0xc1   : > { %v467_v1 = vadd.f32 %v6022_v40, %v466_v60  ;;  %v784_v2 = vpack.c.bf16 %v656_v51, %v656_v51  ;;  %v800_v3 = vpack.c.bf16 %v672_v52, %v672_v52  ;;  %v792_v61 = vpack.c.bf16 %v664_v62, %v664_v62 }
  0xc2   : > { %v808_v17 = vpack.c.bf16 %v680_v63, %v680_v63  ;;  %v1032_v52 = vunpack.c.l.b16 %v6134_v38 }
  0xc3   : > { %v537_v36 = vpack.c.bf16 %v467_v1, %v467_v1  ;;  %v6157_v48 = vunpack.c.l.b16 %v784_v2  ;;  %v6163_v41 = vunpack.c.l.b16 %v800_v3  ;;  %v6165_v42 = vunpack.c.l.b16 %v792_v61 }
  0xc4   : > { %v6169_v44 = vunpack.c.l.b16 %v808_v17  ;;  %v1544_v1 = vunpack.c.l.b16 %v6153_v5  ;;  %v502_v2 = vadd.f32 %v6022_v40, %v6073_v30 }
  0xc5   : > { %10392 = vst [vmem:[#allocation15_spill] sm:$0xff] %v6157_v48  ;;  %v621_v46 = vunpack.c.l.bf16 %v537_v36 }
  0xc6   : > { %10395 = vst [vmem:[#allocation18_spill] sm:$0xff] %v6163_v41  ;;  %v511_v51 = vpop.f32.mrf.mxu3  ;;  %v6194_v32 = vpack.c.bf16 %v502_v2, %v502_v2  ;;  %v6197_v30 = vpack.c.b16 %v1544_v1, %v1543_v53 }
  0xc7   : > { %10396 = vst [vmem:[#allocation19_spill] sm:$0xff] %v6165_v42  ;;  %v512_v60 = vadd.f32 %v6022_v40, %v511_v51  ;;  %v657_v62 = vmul.f32 %v6030_v54, %v621_v46  ;;  %v673_v63 = vmul.f32 %v6032_v55, %v621_v46  ;;  %v665_v59 = vmul.f32 %v6034_v56, %v621_v46 }
  0xc8   : > { %10398 = vst [vmem:[#allocation21_spill] sm:$0xff] %v6169_v44  ;;  %v468_v3 = vpop.f32.mrf.mxu0  ;;  %v681_v34 = vmul.f32 %v6036_v58, %v621_v46 }
  0xc9   : > { %v6186_v61 = vpack.c.bf16 %v512_v60, %v512_v60  ;;  %v469_v17 = vadd.f32 %v6022_v40, %v468_v3  ;;  %v785_v57 = vpack.c.bf16 %v657_v62, %v657_v62  ;;  %v801_v51 = vpack.c.bf16 %v673_v63, %v673_v63  ;;  %10399 = vst [vmem:[#allocation22_spill] sm:$0xff] %v6194_v32 }
  0xca   : > { %v1033_v60 = vunpack.c.l.b16 %v537_v36  ;;  %v793_v3 = vpack.c.bf16 %v665_v59, %v665_v59  ;;  %v809_v63 = vpack.c.bf16 %v681_v34, %v681_v34 }
  0xcb   : > { %v6192_v29 = vunpack.c.l.bf16 %v6186_v61  ;;  %v538_v33 = vpack.c.bf16 %v469_v17, %v469_v17  ;;  %v6199_v31 = vunpack.c.l.b16 %v785_v57  ;;  %v6201_v62 = vunpack.c.l.b16 %v801_v51 }
  0xcc   : > { %v6221_v28 = vunpack.c.l.b16 %v793_v3 }
  0xcd   : > { %v622_v50 = vunpack.c.l.bf16 %v538_v33  ;;  %v1034_v19 = vunpack.c.l.b16 %v538_v33  ;;  %10400 = vst [vmem:[#allocation23_spill] sm:$0xff] %v6199_v31  ;;  %v747_v46 = vmul.f32 %v6030_v54, %v6192_v29  ;;  %v755_v59 = vmul.f32 %v6034_v56, %v6192_v29 }
  0xce   : > { %v513_v15 = vpop.f32.mrf.mxu3  ;;  %10401 = vst [vmem:[#allocation24_spill] sm:$0xff] %v6201_v62  ;;  %v763_v1 = vmul.f32 %v6032_v55, %v6192_v29 }
  0xcf   : > { %v514_v2 = vadd.f32 %v6022_v40, %v513_v15  ;;  %v6206_v17 = vpack.c.b16 %v1034_v19, %v1033_v60  ;;  %v658_v38 = vmul.f32 %v6030_v54, %v622_v50  ;;  %v674_v36 = vmul.f32 %v6032_v55, %v622_v50  ;;  %10402 = vst [vmem:[#allocation25_spill] sm:$0xff] %v6221_v28 }
  0xd0   : > { %v471_v53 = vpop.f32.mrf.mxu0  ;;  %v666_v33 = vmul.f32 %v6034_v56, %v622_v50  ;;  %v682_v57 = vmul.f32 %v6036_v58, %v622_v50  ;;  %v6223_v50 = vunpack.c.l.b16 %v809_v63 }
  0xd1   : > { %v6216_v34 = vpack.c.bf16 %v514_v2, %v514_v2  ;;  %v472_v15 = vadd.f32 %v6022_v40, %v471_v53  ;;  %1045 = vrot.lane.b32.xlu0 %v6206_v17, %s5924_s10  ;;  %v786_v19 = vpack.c.bf16 %v658_v38, %v658_v38  ;;  %v802_v51 = vpack.c.bf16 %v674_v36, %v674_v36 }
  0xd2   : > { %v794_v60 = vpack.c.bf16 %v666_v33, %v666_v33  ;;  %v810_v23 = vpack.c.bf16 %v682_v57, %v682_v57  ;;  %10403 = vst [vmem:[#allocation26_spill] sm:$0xff] %v6223_v50  ;;  %v875_v2 = vpack.c.bf16 %v747_v46, %v747_v46  ;;  %v883_v38 = vpack.c.bf16 %v755_v59, %v755_v59 }
  0xd3   : > { %v640_v43 = vunpack.c.l.bf16 %v6216_v34  ;;  %v539_v44 = vpack.c.bf16 %v472_v15, %v472_v15  ;;  %v6226_v39 = vunpack.c.l.b16 %v786_v19  ;;  %v6228_v42 = vunpack.c.l.b16 %v802_v51 }
  0xd4   : > { %v6230_v53 = vunpack.c.l.b16 %v794_v60  ;;  %v6232_v5 = vunpack.c.l.b16 %v810_v23  ;;  %v1031_v36 = vunpack.c.l.b16 %v6100_v7  ;;  %v891_v33 = vpack.c.bf16 %v763_v1, %v763_v1 }
  0xd5   : > { %10404 = vst [vmem:[#allocation27_spill] sm:$0xff] %v6226_v39  ;;  %v6235_v3 = vunpack.c.l.bf16 %v539_v44  ;;  %v748_v46 = vmul.f32 %v6030_v54, %v640_v43  ;;  %v756_v51 = vmul.f32 %v6034_v56, %v640_v43  ;;  %v764_v1 = vmul.f32 %v6032_v55, %v640_v43 }
  0xd6   : > { %10405 = vst [vmem:[#allocation28_spill] sm:$0xff] %v6228_v42  ;;  %v516_v57 = vpop.f32.mrf.mxu3  ;;  %v6247_v59 = vpack.c.b16 %v1032_v52, %v1031_v36  ;;  %v504_v60 = vadd.f32 %v6022_v40, %v6086_v45  ;;  %v6253_v0 = vunpack.c.l.b16 %v875_v2  ;;  %v6255_v13 = vunpack.c.l.b16 %v883_v38 }
  0xd7   : > { %10406 = vst [vmem:[#allocation29_spill] sm:$0xff] %v6230_v53  ;;  %v517_v7 = vadd.f32 %v6022_v40, %v516_v57  ;;  %v876_v63 = vpack.c.bf16 %v748_v46, %v748_v46  ;;  %v884_v52 = vpack.c.bf16 %v756_v51, %v756_v51  ;;  %v683_v36 = vmul.f32 %v6030_v54, %v6235_v3 }
  0xd8   : > { %10407 = vst [vmem:[#allocation30_spill] sm:$0xff] %v6232_v5  ;;  %v473_v15 = vpop.f32.mrf.mxu0  ;;  %v892_v45 = vpack.c.bf16 %v764_v1, %v764_v1  ;;  %v6266_v50 = vunpack.c.l.b16 %v891_v33  ;;  %v691_v2 = vmul.f32 %v6034_v56, %v6235_v3  ;;  %v1284_v51 = vunpack.c.l.b16 %v539_v44 }
  0xd9   : > { %10408 = vst [vmem:[#allocation31_spill] sm:$0xff] %v6253_v0  ;;  %v6257_v19 = vpack.c.bf16 %v517_v7, %v517_v7  ;;  %v474_v23 = vadd.f32 %v6022_v40, %v473_v15  ;;  %1043 = vrot.lane.b32.xlu0 %v6247_v59, %s5924_s10  ;;  %v6264_v57 = vunpack.c.l.b16 %v876_v63  ;;  %v6273_v15 = vunpack.c.l.b16 %v884_v52 }
  0xda   : > { %10409 = vst [vmem:[#allocation32_spill] sm:$0xff] %v6255_v13  ;;  %v771_v7 = vmul.f32 %v6036_v58, %v6192_v29  ;;  %v6279_v5 = vunpack.c.l.b16 %v892_v45  ;;  %v772_v33 = vmul.f32 %v6036_v58, %v640_v43  ;;  %v811_v14 = vpack.c.bf16 %v683_v36, %v683_v36 }
  0xdb   : > { %10410 = vst [vmem:[#allocation33_spill] sm:$0xff] %v6264_v57  ;;  %v6271_v38 = vunpack.c.l.bf16 %v6257_v19  ;;  %v540_v46 = vpack.c.bf16 %v474_v23, %v474_v23  ;;  %v819_v45 = vpack.c.bf16 %v691_v2, %v691_v2  ;;  %v6307_v44 = vpack.c.bf16 %v504_v60, %v504_v60 }
  0xdc   : > { %10411 = vst [vmem:[#allocation34_spill] sm:$0xff] %v6266_v50  ;;  %v900_v12 = vpack.c.bf16 %v772_v33, %v772_v33  ;;  %v6309_v50 = vunpack.c.l.b16 %v811_v14 }
  0xdd   : > { %10412 = vst [vmem:[#allocation35_spill] sm:$0xff] %v6273_v15  ;;  %v6282_v1 = vunpack.c.l.bf16 %v540_v46  ;;  %v1285_v28 = vunpack.c.l.b16 %v540_v46  ;;  %v749_v53 = vmul.f32 %v6030_v54, %v6271_v38  ;;  %v757_v29 = vmul.f32 %v6034_v56, %v6271_v38 }
  0xde   : > { %10413 = vst [vmem:[#allocation36_spill] sm:$0xff] %v6279_v5  ;;  %v518_v52 = vpop.f32.mrf.mxu3  ;;  %v765_v10 = vmul.f32 %v6032_v55, %v6271_v38  ;;  %v899_v15 = vpack.c.bf16 %v771_v7, %v771_v7 }
  0xdf   : > { %v519_v43 = vadd.f32 %v6022_v40, %v518_v52  ;;  %v6293_v63 = vpack.c.b16 %v1285_v28, %v1284_v51  ;;  %v684_v46 = vmul.f32 %v6030_v54, %v6282_v1  ;;  %v877_v13 = vpack.c.bf16 %v749_v53, %v749_v53  ;;  %10414 = vst [vmem:[#allocation37_spill] sm:$0xff] %v6307_v44 }
  0xe0   : > { %v476_v23 = vpop.f32.mrf.mxu0  ;;  %v692_v36 = vmul.f32 %v6034_v56, %v6282_v1  ;;  %v885_v51 = vpack.c.bf16 %v757_v29, %v757_v29  ;;  %v1545_v52 = vunpack.c.l.b16 %v6194_v32  ;;  %10415 = vst [vmem:[#allocation38_spill] sm:$0xff] %v6309_v50  ;;  %v6322_v29 = vunpack.c.l.b16 %v900_v12 }
  0xe1   : > { %v6301_v26 = vpack.c.bf16 %v519_v43, %v519_v43  ;;  %v477_v2 = vadd.f32 %v6022_v40, %v476_v23  ;;  %1296 = vrot.lane.b32.xlu1 %v6293_v63, %s5924_s10  ;;  %v812_v28 = vpack.c.bf16 %v684_v46, %v684_v46  ;;  %v893_v43 = vpack.c.bf16 %v765_v10, %v765_v10 }
  0xe2   : > { %v820_v53 = vpack.c.bf16 %v692_v36, %v692_v36  ;;  %v6316_v23 = vunpack.c.l.b16 %v819_v45  ;;  %v6320_v46 = vunpack.c.l.b16 %v899_v15  ;;  %10420 = vst [vmem:[#allocation43_spill] sm:$0xff] %v6322_v29  ;;  %v6328_v36 = vunpack.c.l.b16 %v877_v13 }
  0xe3   : > { %v6312_v5 = vunpack.c.l.bf16 %v6301_v26  ;;  %v541_v7 = vpack.c.bf16 %v477_v2, %v477_v2  ;;  %v6314_v33 = vunpack.c.l.b16 %v812_v28  ;;  %v6330_v32 = vunpack.c.l.b16 %v885_v51 }
  0xe4   : > { %10417 = vst [vmem:[#allocation40_spill] sm:$0xff] %v6316_v23  ;;  %v6318_v27 = vunpack.c.l.b16 %v820_v53  ;;  %v6343_v51 = vunpack.c.l.b16 %v893_v43  ;;  %v1546_v23 = vunpack.c.l.b16 %v6307_v44  ;;  %v700_v12 = vmul.f32 %v6032_v55, %v6282_v1 }
  0xe5   : > { %10416 = vst [vmem:[#allocation39_spill] sm:$0xff] %v6314_v33  ;;  %v6324_v60 = vunpack.c.l.bf16 %v541_v7  ;;  %v750_v14 = vmul.f32 %v6030_v54, %v6312_v5  ;;  %v758_v45 = vmul.f32 %v6034_v56, %v6312_v5  ;;  %v766_v15 = vmul.f32 %v6032_v55, %v6312_v5 }
  0xe6   : > { %10418 = vst [vmem:[#allocation41_spill] sm:$0xff] %v6318_v27  ;;  %v521_v2 = vpop.f32.mrf.mxu3  ;;  %v1286_v33 = vunpack.c.l.b16 %v541_v7 }
  0xe7   : > { %10419 = vst [vmem:[#allocation42_spill] sm:$0xff] %v6320_v46  ;;  %v522_v28 = vadd.f32 %v6022_v40, %v521_v2  ;;  %v878_v53 = vpack.c.bf16 %v750_v14, %v750_v14  ;;  %v685_v13 = vmul.f32 %v6030_v54, %v6324_v60  ;;  %v886_v25 = vpack.c.bf16 %v758_v45, %v758_v45 }
  0xe8   : > { %10421 = vst [vmem:[#allocation44_spill] sm:$0xff] %v6328_v36  ;;  %v478_v22 = vpop.f32.mrf.mxu0  ;;  %v894_v10 = vpack.c.bf16 %v766_v15, %v766_v15  ;;  %v693_v50 = vmul.f32 %v6034_v56, %v6324_v60  ;;  %v699_v15 = vmul.f32 %v6032_v55, %v6235_v3 }
  0xe9   : > { %10422 = vst [vmem:[#allocation45_spill] sm:$0xff] %v6330_v32  ;;  %v559_v27 = vpack.c.bf16 %v522_v28, %v522_v28  ;;  %v479_v2 = vadd.f32 %v6022_v40, %v478_v22  ;;  %1555 = vrot.lane.b32.xlu1 %v6197_v30, %s5924_s10  ;;  %v6353_v14 = vunpack.c.l.b16 %v878_v53  ;;  %v6355_v43 = vunpack.c.l.b16 %v886_v25 }
  0xea   : > { %10423 = vst [vmem:[#allocation46_spill] sm:$0xff] %v6343_v51  ;;  %v6357_v45 = vunpack.c.l.b16 %v894_v10  ;;  %v813_v29 = vpack.c.bf16 %v685_v13, %v685_v13  ;;  %v821_v10 = vpack.c.bf16 %v693_v50, %v693_v50  ;;  %v827_v36 = vpack.c.bf16 %v699_v15, %v699_v15 }
  0xeb   : > { %10424 = vst [vmem:[#allocation47_spill] sm:$0xff] %v6353_v14  ;;  %v6363_v46 = vunpack.c.l.bf16 %v559_v27  ;;  %v542_v28 = vpack.c.bf16 %v479_v2, %v479_v2  ;;  %v6375_v2 = vpack.c.b16 %v1546_v23, %v1545_v52  ;;  %v828_v53 = vpack.c.bf16 %v700_v12, %v700_v12 }
  0xec   : > { %10425 = vst [vmem:[#allocation48_spill] sm:$0xff] %v6355_v43  ;;  %v1802_v13 = vunpack.c.l.b16 %v559_v27  ;;  %v6388_v23 = vunpack.c.l.b16 %v821_v10 }
  0xed   : > { %10426 = vst [vmem:[#allocation49_spill] sm:$0xff] %v6357_v45  ;;  %v6371_v44 = vunpack.c.l.bf16 %v542_v28  ;;  %v1287_v0 = vunpack.c.l.b16 %v542_v28  ;;  %v751_v57 = vmul.f32 %v6030_v54, %v6363_v46  ;;  %v759_v22 = vmul.f32 %v6034_v56, %v6363_v46 }
  0xee   : > { %v523_v62 = vpop.f32.mrf.mxu3  ;;  %v6384_v28 = vunpack.c.l.b16 %v813_v29  ;;  %10428 = vst [vmem:[#allocation51_spill] sm:$0xff] %v6388_v23  ;;  %v767_v15 = vmul.f32 %v6032_v55, %v6363_v46  ;;  %v6395_v29 = vunpack.c.l.b16 %v827_v36  ;;  %v6397_v45 = vunpack.c.l.b16 %v828_v53 }
  0xef   : > { %v524_v32 = vadd.f32 %v6022_v40, %v523_v62  ;;  %v6380_v25 = vpack.c.b16 %v1287_v0, %v1286_v33  ;;  %v686_v50 = vmul.f32 %v6030_v54, %v6371_v44  ;;  %v694_v52 = vmul.f32 %v6034_v56, %v6371_v44 }
  0xf0   : > { %v481_v7 = vpop.f32.mrf.mxu0  ;;  %10427 = vst [vmem:[#allocation50_spill] sm:$0xff] %v6384_v28  ;;  %v879_v0 = vpack.c.bf16 %v751_v57, %v751_v57  ;;  %v887_v33 = vpack.c.bf16 %v759_v22, %v759_v22  ;;  %v773_v22 = vmul.f32 %v6036_v58, %v6271_v38 }
  0xf1   : > { %v560_v12 = vpack.c.bf16 %v524_v32, %v524_v32  ;;  %v482_v27 = vadd.f32 %v6022_v40, %v481_v7  ;;  %1298 = vrot.lane.b32.xlu0 %v6380_v25, %s5924_s10  ;;  %v814_v62 = vpack.c.bf16 %v686_v50, %v686_v50  ;;  %v822_v51 = vpack.c.bf16 %v694_v52, %v694_v52 }
  0xf2   : > { %10429 = vst [vmem:[#allocation52_spill] sm:$0xff] %v6395_v29  ;;  %v895_v7 = vpack.c.bf16 %v767_v15, %v767_v15  ;;  %v774_v52 = vmul.f32 %v6036_v58, %v6312_v5  ;;  %v6431_v5 = vunpack.c.l.b16 %v879_v0  ;;  %v901_v28 = vpack.c.bf16 %v773_v22, %v773_v22 }
  0xf3   : > { %10430 = vst [vmem:[#allocation53_spill] sm:$0xff] %v6397_v45  ;;  %v6399_v43 = vunpack.c.l.bf16 %v560_v12  ;;  %v1803_v10 = vunpack.c.l.b16 %v560_v12  ;;  %v6401_v14 = vpack.c.bf16 %v482_v27, %v482_v27  ;;  %v6403_v42 = vunpack.c.l.b16 %v814_v62 }
  0xf4   : > { %v6405_v32 = vunpack.c.l.b16 %v822_v51  ;;  %10433 = vst [vmem:[#allocation56_spill] sm:$0xff] %v6431_v5  ;;  %v6435_v45 = vunpack.c.l.b16 %v895_v7 }
  0xf5   : > { %10431 = vst [vmem:[#allocation54_spill] sm:$0xff] %v6403_v42  ;;  %v6412_v36 = vunpack.c.l.bf16 %v6401_v14  ;;  %v6414_v53 = vpack.c.b16 %v1803_v10, %v1802_v13  ;;  %v752_v50 = vmul.f32 %v6030_v54, %v6399_v43  ;;  %v760_v12 = vmul.f32 %v6034_v56, %v6399_v43 }
  0xf6   : > { %10432 = vst [vmem:[#allocation55_spill] sm:$0xff] %v6405_v32  ;;  %v526_v51 = vpop.f32.mrf.mxu3  ;;  %v768_v13 = vmul.f32 %v6032_v55, %v6399_v43  ;;  %v6433_v10 = vunpack.c.l.b16 %v887_v33 }
  0xf7   : > { %v527_v27 = vadd.f32 %v6022_v40, %v526_v51  ;;  %1814 = vrot.lane.b32.xlu1 %v6414_v53, %s5924_s10  ;;  %v880_v62 = vpack.c.bf16 %v752_v50, %v752_v50  ;;  %v888_v15 = vpack.c.bf16 %v760_v12, %v760_v12  ;;  %10435 = vst [vmem:[#allocation58_spill] sm:$0xff] %v6435_v45 }
  0xf8   : > { %10434 = vst [vmem:[#allocation57_spill] sm:$0xff] %v6433_v10  ;;  %v483_v57 = vpop.f32.mrf.mxu0  ;;  %v896_v29 = vpack.c.bf16 %v768_v13, %v768_v13  ;;  %v687_v0 = vmul.f32 %v6030_v54, %v6412_v36  ;;  %v902_v50 = vpack.c.bf16 %v774_v52, %v774_v52  ;;  %v1288_v13 = vunpack.c.l.b16 %v6401_v14 }
  0xf9   : > { %v561_v38 = vpack.c.bf16 %v527_v27, %v527_v27  ;;  %v484_v23 = vadd.f32 %v6022_v40, %v483_v57  ;;  %1557 = vrot.lane.b32.xlu0 %v6375_v2, %s5924_s10  ;;  %v6440_v51 = vunpack.c.l.b16 %v880_v62  ;;  %v6442_v32 = vunpack.c.l.b16 %v888_v15 }
  0xfa   : > { %v6446_v33 = vunpack.c.l.b16 %v896_v29  ;;  %v695_v57 = vmul.f32 %v6034_v56, %v6412_v36  ;;  %v6458_v27 = vunpack.c.l.b16 %v901_v28  ;;  %v815_v22 = vpack.c.bf16 %v687_v0, %v687_v0 }
  0xfb   : > { %10436 = vst [vmem:[#allocation59_spill] sm:$0xff] %v6440_v51  ;;  %v6448_v12 = vunpack.c.l.bf16 %v561_v38  ;;  %v544_v7 = vpack.c.bf16 %v484_v23, %v484_v23  ;;  %v6467_v5 = vunpack.c.l.b16 %v902_v50  ;;  %v702_v14 = vmul.f32 %v6032_v55, %v6371_v44 }
  0xfc   : > { %10437 = vst [vmem:[#allocation60_spill] sm:$0xff] %v6442_v32  ;;  %v823_v29 = vpack.c.bf16 %v695_v57, %v695_v57  ;;  %v6482_v31 = vunpack.c.l.b16 %v815_v22 }
  0xfd   : > { %10438 = vst [vmem:[#allocation61_spill] sm:$0xff] %v6446_v33  ;;  %v6461_v52 = vunpack.c.l.bf16 %v544_v7  ;;  %v753_v23 = vmul.f32 %v6030_v54, %v6448_v12  ;;  %v761_v42 = vmul.f32 %v6034_v56, %v6448_v12  ;;  %v1289_v45 = vunpack.c.l.b16 %v544_v7 }
  0xfe   : > { %10439 = vst [vmem:[#allocation62_spill] sm:$0xff] %v6458_v27  ;;  %v528_v62 = vpop.f32.mrf.mxu3  ;;  %v769_v50 = vmul.f32 %v6032_v55, %v6448_v12  ;;  %v6490_v9 = vunpack.c.l.b16 %v823_v29 }
  0xff   : > { %10440 = vst [vmem:[#allocation63_spill] sm:$0xff] %v6467_v5  ;;  %v529_v15 = vadd.f32 %v6022_v40, %v528_v62  ;;  %3332 = vrot.lane.b32.xlu1 %v6247_v59, %s5925_s11  ;;  %v688_v28 = vmul.f32 %v6030_v54, %v6461_v52  ;;  %v696_v0 = vmul.f32 %v6034_v56, %v6461_v52  ;;  %v1804_v62 = vunpack.c.l.b16 %v561_v38 }
 0x100   : > { %v486_v33 = vpop.f32.mrf.mxu0  ;;  %v881_v51 = vpack.c.bf16 %v753_v23, %v753_v23  ;;  %v889_v57 = vpack.c.bf16 %v761_v42, %v761_v42  ;;  %v6488_v48 = vpack.c.b16 %v1289_v45, %v1288_v13  ;;  %10441 = vst [vmem:[#allocation64_spill] sm:$0xff] %v6490_v9  ;;  %v10443_v5 = vunpack.c.l.b16 %v6257_v19 }
 0x101   : > { %v562_v10 = vpack.c.bf16 %v529_v15, %v529_v15  ;;  %v487_v32 = vadd.f32 %v6022_v40, %v486_v33  ;;  %v816_v59 = vpack.c.bf16 %v688_v28, %v688_v28  ;;  %v824_v7 = vpack.c.bf16 %v696_v0, %v696_v0 }
 0x102   : > { %v897_v15 = vpack.c.bf16 %v769_v50, %v769_v50  ;;  %v6515_v28 = vunpack.c.l.b16 %v881_v51  ;;  %v6517_v0 = vunpack.c.l.b16 %v889_v57  ;;  %v703_v19 = vmul.f32 %v6032_v55, %v6412_v36 }
 0x103   : > { %v6484_v39 = vunpack.c.l.bf16 %v562_v10  ;;  %v1805_v37 = vunpack.c.l.b16 %v562_v10  ;;  %v545_v41 = vpack.c.bf16 %v487_v32, %v487_v32  ;;  %v6486_v6 = vunpack.c.l.b16 %v816_v59 }
 0x104   : > { %v6492_v38 = vunpack.c.l.b16 %v824_v7  ;;  %v701_v10 = vmul.f32 %v6032_v55, %v6324_v60  ;;  %v6519_v7 = vunpack.c.l.b16 %v897_v15  ;;  %v830_v15 = vpack.c.bf16 %v702_v14, %v702_v14 }
 0x105   : > { %v6494_v33 = vunpack.c.l.bf16 %v545_v41  ;;  %v6496_v23 = vpack.c.b16 %v1805_v37, %v1804_v62  ;;  %v754_v42 = vmul.f32 %v6030_v54, %v6484_v39  ;;  %v762_v45 = vmul.f32 %v6034_v56, %v6484_v39 }
 0x106   : > { %10442 = vst [vmem:[#allocation65_spill] sm:$0xff] %v6492_v38  ;;  %v770_v13 = vmul.f32 %v6032_v55, %v6484_v39  ;;  %v1801_v37 = vunpack.c.l.b16 %v6301_v26  ;;  %v831_v38 = vpack.c.bf16 %v703_v19, %v703_v19 }
 0x107   : > { %1816 = vrot.lane.b32.xlu0 %v6496_v23, %s5924_s10  ;;  %3561 = vrot.lane.b32.xlu1 %v6488_v48, %s5925_s11  ;;  %v882_v29 = vpack.c.bf16 %v754_v42, %v754_v42  ;;  %v890_v62 = vpack.c.bf16 %v762_v45, %v762_v45  ;;  %v689_v32 = vmul.f32 %v6030_v54, %v6494_v33 }
 0x108   : > { %v488_v50 = vpop.f32.mrf.mxu0  ;;  %v898_v59 = vpack.c.bf16 %v770_v13, %v770_v13  ;;  %v697_v51 = vmul.f32 %v6034_v56, %v6494_v33  ;;  %v829_v45 = vpack.c.bf16 %v701_v10, %v701_v10  ;;  %v1290_v13 = vunpack.c.l.b16 %v545_v41 }
 0x109   : > { %v489_v26 = vadd.f32 %v6022_v40, %v488_v50  ;;  %v6524_v22 = vunpack.c.l.b16 %v882_v29  ;;  %v6530_v57 = vunpack.c.l.b16 %v890_v62  ;;  %v1807_v9 = vpack.c.b16 %v1801_v37, %v10443_v5 }
 0x10a   : > { %v6532_v42 = vunpack.c.l.b16 %v898_v59  ;;  %v6542_v62 = vunpack.c.l.b16 %v829_v45  ;;  %v6544_v59 = vunpack.c.l.b16 %v830_v15  ;;  %v704_v5 = vmul.f32 %v6032_v55, %v6461_v52 }
 0x10b   : > { %v546_v27 = vpack.c.bf16 %v489_v26, %v489_v26  ;;  %v817_v14 = vpack.c.bf16 %v689_v32, %v689_v32  ;;  %v825_v37 = vpack.c.bf16 %v697_v51, %v697_v51  ;;  %v507_v32 = vadd.f32 %v6022_v40, %v6120_v18 }
 0x10c   : > { %10444 = vst [vmem:[#allocation66_spill] sm:$0xff] %v6542_v62  ;;  %v832_v50 = vpack.c.bf16 %v704_v5, %v704_v5  ;;  %v509_v51 = vadd.f32 %v6022_v40, %v6144_v47  ;;  %v776_v26 = vmul.f32 %v6036_v58, %v6399_v43  ;;  %v6573_v29 = vunpack.c.l.b16 %v831_v38 }
 0x10d   : > { %v6546_v10 = vunpack.c.l.bf16 %v546_v27  ;;  %v1291_v41 = vunpack.c.l.b16 %v546_v27  ;;  %v6577_v5 = vunpack.c.l.b16 %v817_v14  ;;  %v6581_v47 = vunpack.c.l.b16 %v825_v37 }
 0x10e   : > { %v6575_v19 = vunpack.c.l.b16 %v832_v50  ;;  %v707_v37 = vmul.f32 %v6036_v58, %v6235_v3 }
 0x10f   : > { %1812 = vrot.lane.b32.xlu0 %v1807_v9, %s5924_s10  ;;  %3790 = vrot.lane.b32.xlu1 %v6375_v2, %s5925_s11  ;;  %v6557_v45 = vpack.c.b16 %v1291_v41, %v1290_v13  ;;  %v690_v27 = vmul.f32 %v6030_v54, %v6546_v10  ;;  %v698_v15 = vmul.f32 %v6034_v56, %v6546_v10 }
 0x110   : > { %v775_v41 = vmul.f32 %v6036_v58, %v6363_v46  ;;  %v835_v3 = vpack.c.bf16 %v707_v37, %v707_v37  ;;  %v777_v37 = vmul.f32 %v6036_v58, %v6448_v12 }
 0x111   : > { %1302 = vrot.lane.b32.xlu2 %v6557_v45, %s5924_s10  ;;  %v818_v2 = vpack.c.bf16 %v690_v27, %v690_v27  ;;  %v826_v13 = vpack.c.bf16 %v698_v15, %v698_v15  ;;  %v904_v15 = vpack.c.bf16 %v776_v26, %v776_v26 }
 0x112   : > { %v903_v27 = vpack.c.bf16 %v775_v41, %v775_v41  ;;  %v708_v41 = vmul.f32 %v6036_v58, %v6282_v1  ;;  %v491_v1 = vpop.f32.mrf.mxu0 }
 0x113   : > { %v6579_v18 = vunpack.c.l.b16 %v818_v2  ;;  %v6583_v62 = vunpack.c.l.b16 %v826_v13  ;;  %v6593_v14 = vunpack.c.l.b16 %v904_v15  ;;  %v6597_v2 = vpack.c.bf16 %v507_v32, %v507_v32 }
 0x114   : > { %v6591_v50 = vunpack.c.l.b16 %v903_v27  ;;  %v6599_v13 = vpack.c.bf16 %v509_v51, %v509_v51  ;;  %v836_v27 = vpack.c.bf16 %v708_v41, %v708_v41  ;;  %v6613_v15 = vunpack.c.l.b16 %v835_v3 }
 0x115   : > { %v1547_v32 = vunpack.c.l.b16 %v6597_v2  ;;  %v778_v41 = vmul.f32 %v6036_v58, %v6484_v39  ;;  %v1798_v3 = vunpack.c.l.b16 %v6186_v61 }
 0x116   : > { %v1548_v51 = vunpack.c.l.b16 %v6599_v13  ;;  %10445 = vst [vmem:[#allocation67_spill] sm:$0xff] %v6613_v15 }
 0x117   : > { %3334 = vrot.lane.b32.xlu0 %v6206_v17, %s5925_s11  ;;  %4021 = vrot.lane.b32.xlu1 %v6496_v23, %s5925_s11  ;;  %v6615_v17 = vunpack.c.l.b16 %v836_v27  ;;  %v1799_v27 = vunpack.c.l.b16 %v6216_v34  ;;  %v906_v46 = vpack.c.bf16 %v778_v41, %v778_v41 }
 0x118   : > { %v1552_v23 = vpack.c.b16 %v1548_v51, %v1547_v32  ;;  %v709_v32 = vmul.f32 %v6036_v58, %v6324_v60  ;;  %v710_v60 = vmul.f32 %v6036_v58, %v6371_v44 }
 0x119   : > { %1300 = vrot.lane.b32.xlu2 %v6488_v48, %s5924_s10  ;;  %10446 = vst [vmem:[#allocation68_spill] sm:$0xff] %v6615_v17  ;;  %v6634_v48 = vunpack.c.l.b16 %v906_v46  ;;  %v1806_v12 = vpack.c.b16 %v1799_v27, %v1798_v3  ;;  %v10562_v17 = vld [vmem:[#allocation64_spill] sm:$0xff] }
 0x11a   : > { %v493_v26 = vpop.f32.mrf.mxu0  ;;  %v837_v46 = vpack.c.bf16 %v709_v32, %v709_v32 }
 0x11c   : > { %v6650_v3 = vunpack.c.l.b16 %v837_v46 }
 0x11e   : > { %10447 = vst [vmem:[#allocation69_spill] sm:$0xff] %v6650_v3 }
 0x11f   : > { %3328 = vrot.lane.b32.xlu0 %v6128_v35, %s5925_s11  ;;  %4017 = vrot.lane.b32.xlu1 %v1807_v9, %s5925_s11  ;;  %v905_v35 = vpack.c.bf16 %v777_v37, %v777_v37  ;;  %v492_v9 = vadd.f32 %v6022_v40, %v491_v1  ;;  %v5889_v40 = vld [vmem:[%s10149_s2] ss:$0 sm:$0xff]  ;;  %v838_v37 = vpack.c.bf16 %v710_v60, %v710_v60 }
 0x120   : > { %v494_v34 = vadd.f32 %v5889_v40, %v493_v26 }
 0x121   : > { %1559 = vrot.lane.b32.xlu2 %v1552_v23, %s5924_s10  ;;  %v6632_v51 = vunpack.c.l.b16 %v905_v35  ;;  %v547_v39 = vpack.c.bf16 %v492_v9, %v492_v9  ;;  %v6652_v27 = vunpack.c.l.b16 %v838_v37 }
 0x122   : > { %v548_v1 = vpack.c.bf16 %v494_v34, %v494_v34 }
 0x123   : > { %10448 = vst [vmem:[#allocation70_spill] sm:$0xff] %v6652_v27 }
 0x124   : > { %v6648_v41 = vunpack.c.l.bf16 %v548_v1 }
 0x126   : > { %v716_v44 = vmul.f32 %v6030_v54, %v6648_v41  ;;  %v724_v32 = vmul.f32 %v6034_v56, %v6648_v41  ;;  %v732_v40 = vmul.f32 %v6032_v55, %v6648_v41 }
 0x127   : > { %3559 = vrot.lane.b32.xlu0 %v6380_v25, %s5925_s11  ;;  %v6646_v25 = vunpack.c.l.bf16 %v547_v39 }
 0x128   : > { %v844_v60 = vpack.c.bf16 %v716_v44, %v716_v44  ;;  %v852_v37 = vpack.c.bf16 %v724_v32, %v724_v32  ;;  %v860_v61 = vpack.c.bf16 %v732_v40, %v732_v40  ;;  %v1541_v32 = vunpack.c.l.b16 %v547_v39 }
 0x129   : > { %1810 = vrot.lane.b32.xlu2 %v1806_v12, %s5924_s10  ;;  %v715_v26 = vmul.f32 %v6030_v54, %v6646_v25  ;;  %v723_v9 = vmul.f32 %v6034_v56, %v6646_v25 }
 0x12a   : > { %v6673_v43 = vunpack.c.l.b16 %v844_v60  ;;  %v6677_v27 = vunpack.c.l.b16 %v852_v37  ;;  %v6681_v15 = vunpack.c.l.b16 %v860_v61  ;;  %v1042_v37 = vpop.permute.xlu1 %1041 }
 0x12b   : > { %v843_v34 = vpack.c.bf16 %v715_v26, %v715_v26  ;;  %v851_v46 = vpack.c.bf16 %v723_v9, %v723_v9  ;;  %v711_v26 = vmul.f32 %v6036_v58, %v6412_v36  ;;  %v712_v36 = vmul.f32 %v6036_v58, %v6461_v52 }
 0x12c   : > { %v705_v52 = vmul.f32 %v6032_v55, %v6494_v33 }
 0x12d   : > { %v6671_v38 = vunpack.c.l.b16 %v843_v34  ;;  %v6675_v3 = vunpack.c.l.b16 %v851_v46  ;;  %v839_v61 = vpack.c.bf16 %v711_v26, %v711_v26  ;;  %v840_v34 = vpack.c.bf16 %v712_v36, %v712_v36 }
 0x12e   : > { %v706_v26 = vmul.f32 %v6032_v55, %v6546_v10 }
 0x12f   : > { %3792 = vrot.lane.b32.xlu0 %v1552_v23, %s5925_s11  ;;  %v731_v23 = vmul.f32 %v6032_v55, %v6646_v25  ;;  %v1517_v44 = vpack.c.b16 %v6673_v43, %v6671_v38  ;;  %v1521_v9 = vpack.c.b16 %v6677_v27, %v6675_v3  ;;  %v6697_v60 = vunpack.c.l.b16 %v839_v61  ;;  %v10497_v43 = vld [vmem:[#allocation20_spill] sm:$0xff]  ;;  %v6971_v3 = vld [vmem:[%s10150_s3 + $0x20] sm:$0xff] }
 0x130   : > { %v6699_v46 = vunpack.c.l.b16 %v840_v34  ;;  %v834_v61 = vpack.c.bf16 %v706_v26, %v706_v26  ;;  %v1099_v26 = vsel %vm393_vm0, %v1042_v37, 0 }
 0x131   : > { %3330 = vrot.lane.b32.xlu2 %v6088_v49, %s5925_s11  ;;  %v859_v35 = vpack.c.bf16 %v731_v23, %v731_v23  ;;  %v1542_v23 = vunpack.c.l.b16 %v548_v1  ;;  %10449 = vst [vmem:[#allocation71_spill] sm:$0xff] %v6697_v60  ;;  %v713_v1 = vmul.f32 %v6036_v58, %v6494_v33 }
 0x132   : > { %10450 = vst [vmem:[#allocation72_spill] sm:$0xff] %v6699_v46  ;;  %v6719_v33 = vunpack.c.l.b16 %v834_v61  ;;  %v10555_v46 = vld [vmem:[#allocation58_spill] sm:$0xff] }
 0x133   : > { %v6679_v49 = vunpack.c.l.b16 %v859_v35  ;;  %v1549_v40 = vpack.c.b16 %v1542_v23, %v1541_v32  ;;  %v833_v32 = vpack.c.bf16 %v705_v52, %v705_v52  ;;  %v841_v23 = vpack.c.bf16 %v713_v1, %v713_v1  ;;  %v1040_v1 = vpop.permute.xlu1 %1039 }
 0x137   : > { %4019 = vrot.lane.b32.xlu0 %v6414_v53, %s5925_s11 }
 0x139   : > { %3557 = vrot.lane.b32.xlu2 %v6293_v63, %s5925_s11 }
 0x13f   : > { %3786 = vrot.lane.b32.xlu0 %v1549_v40, %s5925_s11 }
 0x141   : > { %3788 = vrot.lane.b32.xlu2 %v6197_v30, %s5925_s11  ;;  %v714_v30 = vmul.f32 %v6036_v58, %v6546_v10  ;;  %v10462_v10 = vld [vmem:[#allocation16_spill] sm:$0xff] }
 0x143   : > { %v1046_v39 = vpop.permute.xlu0 %1045  ;;  %v842_v34 = vpack.c.bf16 %v714_v30, %v714_v30  ;;  %v1096_v30 = vsel %vm393_vm0, %v1040_v1, 0  ;;  %v10453_v1 = vpack.c.b16 %v6057_v20, %v6054_v16  ;;  %v10456_v16 = vld [vmem:[#allocation7_spill] sm:$0xff] }
 0x144   : > { %v1105_v63 = vsel %vm393_vm0, %v1046_v39, 0  ;;  %v10457_v20 = vpack.c.b16 %v6108_v11, %v10456_v16 }
 0x145   : > { %1111 = vmatpush.bf16.xpose.msra.mxu1 %v1105_v63  ;;  %5360 = vmatpush.bf16.xpose.msra.mxu2 %v1105_v63  ;;  %v6717_v63 = vunpack.c.l.b16 %v833_v32  ;;  %v6723_v53 = vunpack.c.l.b16 %v842_v34 }
 0x147   : > { %10452 = vst [vmem:[#allocation74_spill] sm:$0xff] %v6723_v53 }
 0x149   : > { %4015 = vrot.lane.b32.xlu2 %v1806_v12, %s5925_s11  ;;  %v6721_v12 = vunpack.c.l.b16 %v841_v23  ;;  %v739_v23 = vmul.f32 %v6036_v58, %v6646_v25  ;;  %v10454_v25 = vpack.c.b16 %v6063_v24, %v6059_v21 }
 0x14b   : > { %v1044_v36 = vpop.permute.xlu0 %1043  ;;  %10451 = vst [vmem:[#allocation73_spill] sm:$0xff] %v6721_v12  ;;  %v867_v61 = vpack.c.bf16 %v739_v23, %v739_v23 }
 0x14c   : > { %v1102_v39 = vsel %vm393_vm0, %v1044_v36, 0  ;;  %v740_v36 = vmul.f32 %v6036_v58, %v6648_v41 }
 0x14d   : > { %1112 = vmatpush.bf16.xpose.msra.mxu1 %v1102_v39  ;;  %5361 = vmatpush.bf16.xpose.msra.mxu2 %v1102_v39  ;;  %v6738_v34 = vunpack.c.l.b16 %v867_v61 }
 0x151   : > { %3563 = vrot.lane.b32.xlu2 %v6557_v45, %s5925_s11  ;;  %v868_v45 = vpack.c.bf16 %v740_v36, %v740_v36 }
 0x153   : > { %v1297_v32 = vpop.permute.xlu1 %1296  ;;  %v6740_v37 = vunpack.c.l.b16 %v868_v45  ;;  %v10455_v45 = vpack.c.b16 %v6102_v8, %v6098_v4 }
 0x155   : > { %1113 = vmatpush.bf16.xpose.msra.mxu1 %v1099_v26  ;;  %5362 = vmatpush.bf16.xpose.msra.mxu2 %v1099_v26 }
 0x159   : > { %1553 = vrot.lane.b32.xlu2 %v1549_v40, %s5924_s10 }
 0x15b   : > { %v1556_v39 = vpop.permute.xlu1 %1555 }
 0x15d   : > { %1114 = vmatpush.bf16.xpose.msra.mxu1 %v1096_v30  ;;  %5363 = vmatpush.bf16.xpose.msra.mxu2 %v1096_v30 }
 0x163   : > { %v1299_v41 = vpop.permute.xlu0 %1298 }
 0x164   : > { %5182 = vmatmul.msk.bf16.vlgmr.msra.gmra.mxu1 %vm393_vm0, %v10453_v1  ;;  %5190 = vmatmul.msk.bf16.vlgmr.msra.gmra.mxu2 %vm393_vm0, %v10454_v25 }
 0x169   : > { %v1815_v30 = vpop.permute.xlu1 %1814 }
 0x16a   : > { %v1873_v11 = vsel %vm393_vm0, %v1815_v30, 0 }
 0x16b   : > { %v1303_v26 = vpop.permute.xlu2 %1302  ;;  %v1558_v36 = vpop.permute.xlu0 %1557 }
 0x16c   : > { %v1362_v23 = vsel %vm393_vm0, %v1303_v26, 0 }
 0x16d   : > { %1368 = vmatpush.bf16.xpose.msrb.mxu2 %v1362_v23  ;;  %v1356_v23 = vsel %vm393_vm0, %v1299_v41, 0  ;;  %v1353_v41 = vsel %vm393_vm0, %v1297_v32, 0 }
 0x171   : > { %v3333_v24 = vpop.permute.xlu1 %3332 }
 0x173   : > { %v1301_v61 = vpop.permute.xlu2 %1300 }
 0x174   : > { %5183 = vmatmul.msk.bf16.gmra.mxu1 %vm393_vm0, %v10455_v45  ;;  %5191 = vmatmul.msk.bf16.gmra.mxu2 %vm393_vm0, %v10457_v20  ;;  %v1359_v21 = vsel %vm393_vm0, %v1301_v61, 0  ;;  %v10458_v61 = vld [vmem:[#allocation15_spill] sm:$0xff]  ;;  %v10459_v20 = vld [vmem:[#allocation14_spill] sm:$0xff] }
 0x175   : > { %1369 = vmatpush.bf16.xpose.msrb.mxu2 %v1359_v21  ;;  %v10460_v21 = vpack.c.b16 %v10458_v61, %v10459_v20  ;;  %v1613_v61 = vsel %vm393_vm0, %v1556_v39, 0 }
 0x179   : > { %v1817_v1 = vpop.permute.xlu0 %1816  ;;  %v3562_v8 = vpop.permute.xlu1 %3561 }
 0x17a   : > { %v1876_v25 = vsel %vm393_vm0, %v1817_v1, 0  ;;  %v10461_v1 = vld [vmem:[#allocation18_spill] sm:$0xff] }
 0x17b   : > { %v1560_v26 = vpop.permute.xlu2 %1559  ;;  %1882 = vmatpush.bf16.xpose.msrb.mxu0 %v1876_v25  ;;  %v10463_v25 = vpack.c.b16 %v10461_v1, %v10462_v10  ;;  %v10465_v1 = vld [vmem:[#allocation23_spill] sm:$0xff] }
 0x17c   : > { %v1619_v4 = vsel %vm393_vm0, %v1560_v26, 0  ;;  %v1616_v26 = vsel %vm393_vm0, %v1558_v36, 0 }
 0x17d   : > { %1370 = vmatpush.bf16.xpose.msrb.mxu2 %v1356_v23  ;;  %1625 = vmatpush.bf16.xpose.msrb.mxu3 %v1619_v4 }
 0x181   : > { %v1813_v45 = vpop.permute.xlu0 %1812  ;;  %v3791_v30 = vpop.permute.xlu1 %3790 }
 0x182   : > { %v1870_v4 = vsel %vm393_vm0, %v1813_v45, 0  ;;  %v10468_v45 = vld [vmem:[#allocation24_spill] sm:$0xff] }
 0x183   : > { %v1811_v16 = vpop.permute.xlu2 %1810  ;;  %1883 = vmatpush.bf16.xpose.msrb.mxu0 %v1873_v11 }
 0x184   : > { %5184 = vmatmul.msk.bf16.gmra.mxu1 %vm393_vm0, %v10460_v21  ;;  %5192 = vmatmul.msk.bf16.gmra.mxu2 %vm393_vm0, %v10463_v25  ;;  %v1867_v20 = vsel %vm393_vm0, %v1811_v16, 0  ;;  %v10464_v21 = vld [vmem:[#allocation27_spill] sm:$0xff] }
 0x185   : > { %1371 = vmatpush.bf16.xpose.msrb.mxu2 %v1353_v41  ;;  %1626 = vmatpush.bf16.xpose.msrb.mxu3 %v1616_v26  ;;  %v10466_v25 = vpack.c.b16 %v10464_v21, %v10465_v1  ;;  %v10467_v41 = vld [vmem:[#allocation28_spill] sm:$0xff]  ;;  %v10474_v21 = vld [vmem:[#allocation3_spill] sm:$0xff] }
 0x186   : > { %v10469_v26 = vpack.c.b16 %v10467_v41, %v10468_v45  ;;  %v10477_v41 = vld [vmem:[#allocation5_spill] sm:$0xff] }
 0x189   : > { %v3335_v23 = vpop.permute.xlu0 %3334  ;;  %v4022_v36 = vpop.permute.xlu1 %4021 }
 0x18a   : > { %3392 = vmatpush.bf16.msrb.mxu1 %v3335_v23  ;;  %v10471_v23 = vld [vmem:[#allocation31_spill] sm:$0xff] }
 0x18b   : > { %v3331_v11 = vpop.permute.xlu2 %3330  ;;  %1884 = vmatpush.bf16.xpose.msrb.mxu0 %v1870_v4 }
 0x18d   : > { %1627 = vmatpush.bf16.xpose.msrb.mxu3 %v1613_v61 }
 0x18e   : > { %3393 = vmatpush.bf16.msrb.mxu1 %v3333_v24  ;;  %v10470_v24 = vld [vmem:[#allocation33_spill] sm:$0xff] }
 0x18f   : > { %v10472_v4 = vpack.c.b16 %v10470_v24, %v10471_v23 }
 0x191   : > { %v3329_v10 = vpop.permute.xlu0 %3328  ;;  %v4018_v23 = vpop.permute.xlu1 %4017 }
 0x192   : > { %3394 = vmatpush.bf16.msrb.mxu1 %v3331_v11 }
 0x193   : > { %v3558_v32 = vpop.permute.xlu2 %3557  ;;  %1885 = vmatpush.bf16.xpose.msrb.mxu0 %v1867_v20  ;;  %v10473_v20 = vld [vmem:[#allocation4_spill] sm:$0xff] }
 0x194   : > { %5185 = vmatmul.msk.bf16.gmra.mxu1 %vm393_vm0, %v10466_v25  ;;  %5193 = vmatmul.msk.bf16.gmra.mxu2 %vm393_vm0, %v10469_v26  ;;  %v10475_v1 = vpack.c.b16 %v10473_v20, %v10474_v21  ;;  %v10476_v25 = vld [vmem:[#allocation6_spill] sm:$0xff]  ;;  %v10480_v26 = vld [vmem:[#allocation44_spill] sm:$0xff]  ;;  %v10482_v20 = vld [vmem:[#allocation9_spill] sm:$0xff] }
 0x195   : > { %v10478_v45 = vpack.c.b16 %v10476_v25, %v10477_v41  ;;  %v10483_v21 = vld [vmem:[#allocation8_spill] sm:$0xff]  ;;  %v10485_v25 = vld [vmem:[#allocation11_spill] sm:$0xff]  ;;  %v10486_v41 = vld [vmem:[#allocation10_spill] sm:$0xff] }
 0x196   : > { %3395 = vmatpush.bf16.msrb.mxu1 %v3329_v10 }
 0x199   : > { %v3560_v39 = vpop.permute.xlu0 %3559 }
 0x19a   : > { %5230 = vmatmul.msk.bf16.vlgmr.msrb.gmra.mxu0 %vm393_vm0, %v10472_v4 }
 0x19b   : > { %4079 = vmatpush.bf16.msra.mxu0 %v4022_v36  ;;  %v3789_v16 = vpop.permute.xlu2 %3788  ;;  %v10479_v36 = vld [vmem:[#allocation47_spill] sm:$0xff] }
 0x19c   : > { %v10481_v52 = vpack.c.b16 %v10479_v36, %v10480_v26  ;;  %v10490_v26 = vld [vmem:[#allocation59_spill] sm:$0xff] }
 0x1a1   : > { %v3793_v11 = vpop.permute.xlu0 %3792 }
 0x1a3   : > { %v4016_v61 = vpop.permute.xlu2 %4015 }
 0x1a4   : > { %5186 = vmatmul.msk.bf16.gmra.mxu1 %vm393_vm0, %v10475_v1  ;;  %5194 = vmatmul.msk.bf16.gmra.mxu2 %vm393_vm0, %v10478_v45  ;;  %v10484_v1 = vpack.c.b16 %v10482_v20, %v10483_v21  ;;  %v10487_v45 = vpack.c.b16 %v10485_v25, %v10486_v41  ;;  %v10493_v21 = vld [vmem:[#allocation19_spill] sm:$0xff]  ;;  %v10499_v41 = vld [vmem:[#allocation22_spill] sm:$0xff] }
 0x1a9   : > { %v4020_v10 = vpop.permute.xlu0 %4019 }
 0x1aa   : > { %5231 = vmatmul.msk.bf16.gmra.mxu0 %vm393_vm0, %v10481_v52 }
 0x1ab   : > { %4080 = vmatpush.bf16.msra.mxu0 %v4020_v10  ;;  %v3564_v24 = vpop.permute.xlu2 %3563  ;;  %v10488_v10 = vld [vmem:[#allocation12_spill] sm:$0xff] }
 0x1ac   : > { %3621 = vmatpush.bf16.msra.mxu2 %v3564_v24  ;;  %v10491_v24 = vld [vmem:[#allocation56_spill] sm:$0xff] }
 0x1af   : > { %4081 = vmatpush.bf16.msra.mxu0 %v4018_v23  ;;  %v10492_v23 = vpack.c.b16 %v10490_v26, %v10491_v24 }
 0x1b0   : > { %3622 = vmatpush.bf16.msra.mxu2 %v3562_v8  ;;  %v6813_v8 = vunpack.c.l.bf16 %v10488_v10 }
 0x1b3   : > { %4082 = vmatpush.bf16.msra.mxu0 %v4016_v61  ;;  %v1554_v4 = vpop.permute.xlu2 %1553  ;;  %v10489_v61 = vld [vmem:[#allocation13_spill] sm:$0xff] }
 0x1b4   : > { %5187 = vmatmul.msk.bf16.gmra.mxu1 %vm393_vm0, %v10484_v1  ;;  %5195 = vmatmul.msk.bf16.gmra.mxu2 %vm393_vm0, %v10487_v45  ;;  %v1610_v52 = vsel %vm393_vm0, %v1554_v4, 0  ;;  %v6816_v36 = vunpack.c.l.bf16 %v10489_v61  ;;  %v10494_v1 = vld [vmem:[#allocation17_spill] sm:$0xff]  ;;  %v6839_v45 = vunpack.c.l.bf16 %v10499_v41  ;;  %v10501_v61 = vpack.c.b16 %v6524_v22, %v6515_v28  ;;  %v10506_v22 = vld [vmem:[#allocation26_spill] sm:$0xff] }
 0x1b5   : > { %3623 = vmatpush.bf16.msra.mxu2 %v3560_v39  ;;  %1628 = vmatpush.bf16.xpose.msrb.mxu3 %v1610_v52  ;;  %v10495_v25 = vpack.c.b16 %v10493_v21, %v10494_v1  ;;  %v10500_v52 = vld [vmem:[#allocation37_spill] sm:$0xff]  ;;  %v10505_v21 = vld [vmem:[#allocation30_spill] sm:$0xff] }
 0x1b6   : > { %v718_v39 = vmul.f32 %v6030_v54, %v6816_v36  ;;  %v6842_v10 = vunpack.c.l.bf16 %v10500_v52  ;;  %v719_v24 = vmul.f32 %v6030_v54, %v6839_v45  ;;  %v10507_v28 = vpack.c.b16 %v10505_v21, %v10506_v22 }
 0x1b8   : > { %v846_v20 = vpack.c.bf16 %v718_v39, %v718_v39 }
 0x1b9   : > { %3624 = vmatpush.bf16.msra.mxu2 %v3558_v32  ;;  %v717_v32 = vmul.f32 %v6030_v54, %v6813_v8 }
 0x1ba   : > { %5232 = vmatmul.msk.bf16.gmra.mxu0 %vm393_vm0, %v10492_v23  ;;  %v720_v23 = vmul.f32 %v6030_v54, %v6842_v10 }
 0x1bb   : > { %v845_v4 = vpack.c.bf16 %v717_v32, %v717_v32  ;;  %v847_v32 = vpack.c.bf16 %v719_v24, %v719_v24 }
 0x1bc   : > { %5214 = vmatmul.msk.bf16.vlgmr.msrb.gmra.mxu3 %vm393_vm0, %v1517_v44  ;;  %v848_v39 = vpack.c.bf16 %v720_v23, %v720_v23 }
 0x1bd   : > { %3850 = vmatpush.bf16.msra.mxu3 %v3793_v11  ;;  %v3787_v11 = vpop.permute.xlu0 %3786  ;;  %v1487_v44 = vunpack.c.l.b16 %v845_v4  ;;  %v10503_v4 = vld [vmem:[#allocation25_spill] sm:$0xff]  ;;  %v1489_v1 = vunpack.c.l.b16 %v847_v32  ;;  %v10512_v32 = vld [vmem:[#allocation39_spill] sm:$0xff] }
 0x1c1   : > { %3851 = vmatpush.bf16.msra.mxu3 %v3791_v30  ;;  %v10496_v30 = vld [vmem:[#allocation21_spill] sm:$0xff] }
 0x1c2   : > { %v10498_v38 = vpack.c.b16 %v10496_v30, %v10497_v43  ;;  %v6862_v30 = vunpack.c.l.bf16 %v6597_v2  ;;  %v6865_v43 = vunpack.c.l.bf16 %v6599_v13  ;;  %v6879_v2 = vld [vmem:[%s10150_s3] sm:$0xff] }
 0x1c3   : > { %10511 = vst [vmem:[#allocation7_spill] sm:$0xff] %v6879_v2 }
 0x1c4   : > { %5188 = vmatmul.msk.bf16.gmra.mxu1 %vm393_vm0, %v10495_v25  ;;  %5196 = vmatmul.msk.bf16.gmra.mxu2 %vm393_vm0, %v10498_v38  ;;  %v1490_v25 = vunpack.c.l.b16 %v848_v39  ;;  %v10508_v38 = vld [vmem:[#allocation35_spill] sm:$0xff]  ;;  %v721_v52 = vmul.f32 %v6030_v54, %v6862_v30  ;;  %v10513_v39 = vld [vmem:[#allocation38_spill] sm:$0xff] }
 0x1c5   : > { %3852 = vmatpush.bf16.msra.mxu3 %v3789_v16  ;;  %v1488_v16 = vunpack.c.l.b16 %v846_v20 }
 0x1c6   : > { %v1519_v41 = vpack.c.b16 %v1490_v25, %v1489_v1  ;;  %v849_v24 = vpack.c.bf16 %v721_v52, %v721_v52 }
 0x1c7   : > { %v1518_v26 = vpack.c.b16 %v1488_v16, %v1487_v44  ;;  %v10509_v44 = vld [vmem:[#allocation32_spill] sm:$0xff] }
 0x1c8   : > { %v10510_v16 = vpack.c.b16 %v10508_v38, %v10509_v44  ;;  %v10516_v44 = vld [vmem:[#allocation48_spill] sm:$0xff] }
 0x1c9   : > { %3853 = vmatpush.bf16.msra.mxu3 %v3787_v11  ;;  %v10502_v11 = vld [vmem:[#allocation29_spill] sm:$0xff] }
 0x1ca   : > { %5233 = vmatmul.msk.bf16.gmra.mxu0 %vm393_vm0, %v10501_v61  ;;  %v10504_v20 = vpack.c.b16 %v10502_v11, %v10503_v4  ;;  %v722_v61 = vmul.f32 %v6030_v54, %v6865_v43  ;;  %v10514_v11 = vpack.c.b16 %v10512_v32, %v10513_v39  ;;  %v923_v4 = vld [vmem:[%s10150_s3 + $0x80] sm:$0xff]  ;;  %v6920_v32 = vld [vmem:[%s10150_s3 + $0x10] sm:$0xff] }
 0x1cc   : > { %5215 = vmatmul.msk.bf16.gmra.mxu3 %vm393_vm0, %v1518_v26  ;;  %v850_v23 = vpack.c.bf16 %v722_v61, %v722_v61 }
 0x1ce   : > { %v1492_v21 = vunpack.c.l.b16 %v850_v23 }
 0x1d4   : > { %5189 = vmatmul.msk.bf16.gmra.mxu1 %vm393_vm0, %v10504_v20  ;;  %5197 = vmatmul.msk.bf16.gmra.mxu2 %vm393_vm0, %v10507_v28  ;;  %v1491_v20 = vunpack.c.l.b16 %v849_v24  ;;  %v6896_v28 = vld [vmem:[%s10150_s3 + $0x8] sm:$0xff] }
 0x1d5   : > { %v6915_v24 = vld [vmem:[%s10150_s3 + $0x88] sm:$0xff] }
 0x1d6   : > { %v1520_v52 = vpack.c.b16 %v1492_v21, %v1491_v20  ;;  %10519 = vst [vmem:[#allocation14_spill] sm:$0xff] %v6915_v24  ;;  %v10522_v20 = vld [vmem:[#allocation50_spill] sm:$0xff] }
 0x1da   : > { %5234 = vmatmul.msk.bf16.gmra.mxu0 %vm393_vm0, %v10510_v16  ;;  %v10517_v16 = vld [vmem:[#allocation45_spill] sm:$0xff] }
 0x1dc   : > { %5216 = vmatmul.msk.bf16.gmra.mxu3 %vm393_vm0, %v1519_v41  ;;  %v10518_v41 = vpack.c.b16 %v10516_v44, %v10517_v16  ;;  %v925_v44 = vld [vmem:[%s10150_s3 + $0x90] sm:$0xff] }
 0x1e1   : > { %v1116_v13 = vpop.f32.mrf.mxu1 }
 0x1e2   : > { %v6882_v26 = vadd.f32 %v1116_v13, %v6879_v2 }
 0x1e4   : > { %5198 = vmatmul.msk.bf16.vlgmr.msrb.gmra.mxu2 %vm393_vm0, %v10514_v11  ;;  %v1968_v54 = vsel %vm1967_vm6, %v6882_v26, -inf }
 0x1e5   : > { %1969 = vmax.xlane.f32.xlu1 %v1968_v54 }
 0x1e7   : > { %v1156_v22 = vpop.f32.mrf.mxu2 }
 0x1e8   : > { %v6898_v1 = vadd.f32 %v1156_v22, %v923_v4  ;;  %v10521_v4 = vld [vmem:[#allocation54_spill] sm:$0xff] }
 0x1e9   : > { %v1118_v25 = vpop.f32.mrf.mxu1  ;;  %v10523_v21 = vpack.c.b16 %v10521_v4, %v10522_v20 }
 0x1ea   : > { %10515 = vst [vmem:[#allocation15_spill] sm:$0xff] %v6898_v1  ;;  %v6901_v38 = vadd.f32 %v1118_v25, %v6896_v28  ;;  %5235 = vmatmul.msk.bf16.gmra.mxu0 %vm393_vm0, %v10518_v41  ;;  %v2016_v13 = vsel %vm1967_vm6, %v6898_v1, -inf  ;;  %v6942_v41 = vld [vmem:[%s10150_s3 + $0x18] sm:$0xff] }
 0x1ec   : > { %5217 = vmatmul.msk.bf16.gmra.mxu3 %vm393_vm0, %v1520_v52  ;;  %v1971_v61 = vsel %vm1967_vm6, %v6901_v38, -inf }
 0x1ed   : > { %1972 = vmax.xlane.f32.xlu2 %v1971_v61  ;;  %2017 = vmax.xlane.f32.xlu1 %v2016_v13 }
 0x1ef   : > { %v1158_v23 = vpop.f32.mrf.mxu2 }
 0x1f0   : > { %v6923_v39 = vadd.f32 %v1158_v23, %v6915_v24  ;;  %v10525_v23 = vld [vmem:[#allocation60_spill] sm:$0xff] }
 0x1f1   : > { %v1121_v11 = vpop.f32.mrf.mxu1 }
 0x1f2   : > { %10520 = vst [vmem:[#allocation18_spill] sm:$0xff] %v6923_v39  ;;  %v6926_v54 = vadd.f32 %v1121_v11, %v6920_v32  ;;  %v2019_v25 = vsel %vm1967_vm6, %v6923_v39, -inf  ;;  %v10526_v11 = vld [vmem:[#allocation57_spill] sm:$0xff] }
 0x1f3   : > { %v10527_v4 = vpack.c.b16 %v10525_v23, %v10526_v11 }
 0x1f4   : > { %5199 = vmatmul.msk.bf16.gmra.mxu2 %vm393_vm0, %v10523_v21  ;;  %v1974_v22 = vsel %vm1967_vm6, %v6926_v54, -inf }
 0x1f5   : > { %1975 = vmax.xlane.f32.xlu0 %v1974_v22  ;;  %2020 = vmax.xlane.f32.xlu2 %v2019_v25  ;;  %v926_v22 = vld [vmem:[%s10150_s3 + $0x98] sm:$0xff]  ;;  %v725_v25 = vmul.f32 %v6034_v56, %v6813_v8 }
 0x1f7   : > { %v1161_v16 = vpop.f32.mrf.mxu2  ;;  %v853_v11 = vpack.c.bf16 %v725_v25, %v725_v25 }
 0x1f8   : > { %v6944_v52 = vadd.f32 %v1161_v16, %v925_v44  ;;  %v726_v44 = vmul.f32 %v6034_v56, %v6816_v36 }
 0x1f9   : > { %v1123_v61 = vpop.f32.mrf.mxu1 }
 0x1fa   : > { %10524 = vst [vmem:[#allocation16_spill] sm:$0xff] %v6944_v52  ;;  %v6947_v13 = vadd.f32 %v1123_v61, %v6942_v41  ;;  %5236 = vmatmul.msk.bf16.gmra.mxu0 %vm393_vm0, %v10527_v4  ;;  %v2022_v20 = vsel %vm1967_vm6, %v6944_v52, -inf  ;;  %v854_v4 = vpack.c.bf16 %v726_v44, %v726_v44  ;;  %v10531_v44 = vpack.c.b16 %v6530_v57, %v6517_v0  ;;  %v10542_v52 = vld [vmem:[#allocation40_spill] sm:$0xff] }
 0x1fb   : > { %2023 = vmax.xlane.f32.xlu1 %v2022_v20  ;;  %v10529_v20 = vpack.c.b16 %v6486_v6, %v6482_v31  ;;  %v727_v0 = vmul.f32 %v6034_v56, %v6839_v45 }
 0x1fc   : > { %5218 = vmatmul.msk.bf16.gmra.mxu3 %vm393_vm0, %v1521_v9  ;;  %v1977_v21 = vsel %vm1967_vm6, %v6947_v13, -inf }
 0x1fd   : > { %1978 = vmax.xlane.f32.xlu2 %v1977_v21 }
 0x1ff   : > { %v1163_v16 = vpop.f32.mrf.mxu2 }
 0x200   : > { %v6973_v27 = vadd.f32 %v1163_v16, %v926_v22  ;;  %v927_v22 = vld [vmem:[%s10150_s3 + $0xa0] sm:$0xff]  ;;  %v1495_v16 = vunpack.c.l.b16 %v853_v11  ;;  %v728_v11 = vmul.f32 %v6034_v56, %v6842_v10 }
 0x201   : > { %v1126_v9 = vpop.f32.mrf.mxu1 }
 0x202   : > { %10528 = vst [vmem:[#allocation27_spill] sm:$0xff] %v6973_v27  ;;  %v6976_v61 = vadd.f32 %v1126_v9, %v6971_v3  ;;  %v2025_v23 = vsel %vm1967_vm6, %v6973_v27, -inf  ;;  %v1496_v9 = vunpack.c.l.b16 %v854_v4 }
 0x203   : > { %2026 = vmax.xlane.f32.xlu0 %v2025_v23  ;;  %v7000_v23 = vld [vmem:[%s10150_s3 + $0x28] sm:$0xff] }
 0x204   : > { %5200 = vmatmul.msk.bf16.gmra.mxu2 %vm393_vm0, %v10529_v20  ;;  %v1980_v21 = vsel %vm1967_vm6, %v6976_v61, -inf  ;;  %v1522_v6 = vpack.c.b16 %v1496_v9, %v1495_v16  ;;  %10532 = vst [vmem:[#allocation28_spill] sm:$0xff] %v7000_v23  ;;  %v7016_v20 = vld [vmem:[%s10150_s3 + $0x30] sm:$0xff]  ;;  %v855_v16 = vpack.c.bf16 %v727_v0, %v727_v0 }
 0x205   : > { %1981 = vmax.xlane.f32.xlu1 %v1980_v21  ;;  %v929_v0 = vld [vmem:[%s10150_s3 + $0xb0] sm:$0xff] }
 0x207   : > { %v1166_v40 = vpop.f32.mrf.mxu2 }
 0x208   : > { %v6989_v35 = vadd.f32 %v1166_v40, %v927_v22  ;;  %v928_v40 = vld [vmem:[%s10150_s3 + $0xa8] sm:$0xff] }
 0x209   : > { %v1128_v25 = vpop.f32.mrf.mxu1 }
 0x20a   : > { %10530 = vst [vmem:[#allocation23_spill] sm:$0xff] %v6989_v35  ;;  %5237 = vmatmul.msk.bf16.gmra.mxu0 %vm393_vm0, %v10531_v44  ;;  %v2028_v31 = vsel %vm1967_vm6, %v6989_v35, -inf  ;;  %v7009_v57 = vadd.f32 %v1128_v25, %v7000_v23 }
 0x20b   : > { %2029 = vmax.xlane.f32.xlu2 %v2028_v31  ;;  %v856_v31 = vpack.c.bf16 %v728_v11, %v728_v11  ;;  %v7039_v11 = vld [vmem:[%s10150_s3 + $0x38] sm:$0xff] }
 0x20c   : > { %5219 = vmatmul.msk.bf16.gmra.mxu3 %vm393_vm0, %v1522_v6  ;;  %v1983_v25 = vsel %vm1967_vm6, %v7009_v57, -inf  ;;  %v10534_v6 = vpack.c.b16 %v6579_v18, %v6577_v5 }
 0x20f   : > { %v1168_v4 = vpop.f32.mrf.mxu2 }
 0x210   : > { %v7018_v21 = vadd.f32 %v1168_v4, %v928_v40  ;;  %v1497_v4 = vunpack.c.l.b16 %v855_v16 }
 0x211   : > { %v1131_v22 = vpop.f32.mrf.mxu1 }
 0x212   : > { %10533 = vst [vmem:[#allocation24_spill] sm:$0xff] %v7018_v21  ;;  %v7021_v9 = vadd.f32 %v1131_v22, %v7016_v20  ;;  %v2031_v44 = vsel %vm1967_vm6, %v7018_v21, -inf  ;;  %v1498_v22 = vunpack.c.l.b16 %v856_v31 }
 0x213   : > { %1984 = vmax.xlane.f32.xlu2 %v1983_v25  ;;  %2032 = vmax.xlane.f32.xlu1 %v2031_v44  ;;  %v10536_v44 = vld [vmem:[#allocation36_spill] sm:$0xff] }
 0x214   : > { %5201 = vmatmul.msk.bf16.gmra.mxu2 %vm393_vm0, %v10534_v6  ;;  %v1986_v40 = vsel %vm1967_vm6, %v7021_v9, -inf  ;;  %v10537_v6 = vld [vmem:[#allocation34_spill] sm:$0xff]  ;;  %v1523_v16 = vpack.c.b16 %v1498_v22, %v1497_v4  ;;  %v730_v4 = vmul.f32 %v6034_v56, %v6865_v43 }
 0x215   : > { %1987 = vmax.xlane.f32.xlu0 %v1986_v40  ;;  %v10538_v40 = vpack.c.b16 %v10536_v44, %v10537_v6 }
 0x217   : > { %v1171_v35 = vpop.f32.mrf.mxu2  ;;  %v1887_v21 = vpop.f32.mrf.mxu0 }
 0x218   : > { %v7041_v5 = vadd.f32 %v1171_v35, %v929_v0  ;;  %v930_v35 = vld [vmem:[%s10150_s3 + $0xb8] sm:$0xff]  ;;  %v729_v0 = vmul.f32 %v6034_v56, %v6862_v30  ;;  %v7063_v44 = vadd.f32 %v1887_v21, %v6879_v2 }
 0x219   : > { %v1133_v18 = vpop.f32.mrf.mxu1 }
 0x21a   : > { %10535 = vst [vmem:[#allocation33_spill] sm:$0xff] %v7041_v5  ;;  %v7044_v25 = vadd.f32 %v1133_v18, %v7039_v11  ;;  %5238 = vmatmul.msk.bf16.gmra.mxu0 %vm393_vm0, %v10538_v40  ;;  %v2034_v31 = vsel %vm1967_vm6, %v7041_v5, -inf  ;;  %v10541_v5 = vld [vmem:[#allocation41_spill] sm:$0xff]  ;;  %v2256_v56 = vsel %vm1967_vm6, %v7063_v44, -inf }
 0x21b   : > { %10539 = vst [vmem:[#allocation31_spill] sm:$0xff] %v7063_v44  ;;  %v10543_v39 = vpack.c.b16 %v10541_v5, %v10542_v52  ;;  %v10547_v5 = vld [vmem:[#allocation46_spill] sm:$0xff] }
 0x21c   : > { %5220 = vmatmul.msk.bf16.gmra.mxu3 %vm393_vm0, %v1523_v16  ;;  %v1989_v27 = vsel %vm1967_vm6, %v7044_v25, -inf  ;;  %v857_v16 = vpack.c.bf16 %v729_v0, %v729_v0  ;;  %v7081_v0 = vld [vmem:[%s10150_s3 + $0x48] sm:$0xff] }
 0x21d   : > { %2035 = vmax.xlane.f32.xlu0 %v2034_v31  ;;  %1990 = vmax.xlane.f32.xlu1 %v1989_v27  ;;  %v858_v31 = vpack.c.bf16 %v730_v4, %v730_v4 }
 0x21f   : > { %v1173_v22 = vpop.f32.mrf.mxu2  ;;  %v1889_v18 = vpop.f32.mrf.mxu0 }
 0x220   : > { %v7065_v6 = vadd.f32 %v1173_v22, %v930_v35  ;;  %v7076_v21 = vadd.f32 %v1889_v18, %v6896_v28  ;;  %v1499_v35 = vunpack.c.l.b16 %v857_v16  ;;  %v1500_v22 = vunpack.c.l.b16 %v858_v31  ;;  %v7095_v31 = vld [vmem:[%s10150_s3 + $0x40] sm:$0xff] }
 0x221   : > { %v1136_v40 = vpop.f32.mrf.mxu1 }
 0x222   : > { %10540 = vst [vmem:[#allocation4_spill] sm:$0xff] %v7065_v6  ;;  %v2037_v27 = vsel %vm1967_vm6, %v7065_v6, -inf  ;;  %v2259_v18 = vsel %vm1967_vm6, %v7076_v21, -inf  ;;  %v1524_v16 = vpack.c.b16 %v1500_v22, %v1499_v35  ;;  %v10552_v6 = vld [vmem:[#allocation51_spill] sm:$0xff] }
 0x223   : > { %2038 = vmax.xlane.f32.xlu2 %v2037_v27  ;;  %10544 = vst [vmem:[#allocation3_spill] sm:$0xff] %v7076_v21 }
 0x224   : > { %5202 = vmatmul.msk.bf16.gmra.mxu2 %vm393_vm0, %v10543_v39  ;;  %v10546_v39 = vld [vmem:[#allocation49_spill] sm:$0xff] }
 0x225   : > { %2257 = vmax.xlane.f32.xlu0 %v2256_v56  ;;  %v10548_v27 = vpack.c.b16 %v10546_v39, %v10547_v5  ;;  %v7104_v39 = vadd.f32 %v1136_v40, %v7095_v31 }
 0x227   : > { %v1176_v1 = vpop.f32.mrf.mxu2  ;;  %v1892_v12 = vpop.f32.mrf.mxu0  ;;  %10549 = vst [vmem:[#allocation5_spill] sm:$0xff] %v7104_v39 }
 0x229   : > { %v1138_v4 = vpop.f32.mrf.mxu1 }
 0x22a   : > { %v7084_v52 = vadd.f32 %v1138_v4, %v7081_v0  ;;  %5239 = vmatmul.msk.bf16.gmra.mxu0 %vm393_vm0, %v10548_v27  ;;  %v932_v4 = vld [vmem:[%s10150_s3 + $0xc8] sm:$0xff] }
 0x22b   : > { %2260 = vmax.xlane.f32.xlu2 %v2259_v18  ;;  %v1992_v18 = vsel %vm1967_vm6, %v7104_v39, -inf }
 0x22c   : > { %10545 = vst [vmem:[#allocation6_spill] sm:$0xff] %v7084_v52  ;;  %5221 = vmatmul.msk.bf16.gmra.mxu3 %vm393_vm0, %v1524_v16  ;;  %v1995_v56 = vsel %vm1967_vm6, %v7084_v52, -inf  ;;  %v10551_v16 = vld [vmem:[#allocation55_spill] sm:$0xff] }
 0x22d   : > { %1996 = vmax.xlane.f32.xlu0 %v1995_v56  ;;  %v10553_v53 = vpack.c.b16 %v10551_v16, %v10552_v6  ;;  %v10557_v6 = vpack.c.b16 %v6681_v15, %v6679_v49 }
 0x22f   : > { %v1178_v35 = vpop.f32.mrf.mxu2  ;;  %v1894_v22 = vpop.f32.mrf.mxu0 }
 0x230   : > { %v7106_v5 = vadd.f32 %v1178_v35, %v932_v4  ;;  %v10554_v35 = vld [vmem:[#allocation61_spill] sm:$0xff] }
 0x231   : > { %v1141_v27 = vpop.f32.mrf.mxu1  ;;  %v10556_v24 = vpack.c.b16 %v10554_v35, %v10555_v46 }
 0x232   : > { %10550 = vst [vmem:[#allocation47_spill] sm:$0xff] %v7106_v5  ;;  %v2043_v56 = vsel %vm1967_vm6, %v7106_v5, -inf }
 0x233   : > { %1993 = vmax.xlane.f32.xlu2 %v1992_v18  ;;  %v734_v18 = vmul.f32 %v6032_v55, %v6816_v36 }
 0x234   : > { %5203 = vmatmul.msk.bf16.gmra.mxu2 %vm393_vm0, %v10553_v53  ;;  %v733_v53 = vmul.f32 %v6032_v55, %v6813_v8 }
 0x235   : > { %2044 = vmax.xlane.f32.xlu0 %v2043_v56  ;;  %v862_v35 = vpack.c.bf16 %v734_v18, %v734_v18 }
 0x236   : > { %v861_v49 = vpack.c.bf16 %v733_v53, %v733_v53 }
 0x237   : > { %v7116_v40 = vpop.f32.mrf.mxu2  ;;  %v7118_v60 = vpop.f32.mrf.mxu0  ;;  %v1504_v52 = vunpack.c.l.b16 %v862_v35 }
 0x238   : > { %v1503_v18 = vunpack.c.l.b16 %v861_v49  ;;  %v736_v49 = vmul.f32 %v6032_v55, %v6842_v10 }
 0x239   : > { %v7120_v4 = vpop.f32.mrf.mxu1 }
 0x23a   : > { %5240 = vmatmul.msk.bf16.gmra.mxu0 %vm393_vm0, %v10556_v24 }
 0x23c   : > { %5222 = vmatmul.msk.bf16.gmra.mxu3 %vm393_vm0, %v10557_v6  ;;  %v931_v6 = vld [vmem:[%s10150_s3 + $0xc0] sm:$0xff] }
 0x23d   : > { %v7158_v53 = vadd.f32 %v1176_v1, %v931_v6  ;;  %v1526_v1 = vpack.c.b16 %v1504_v52, %v1503_v18 }
 0x23f   : > { %v7134_v16 = vpop.f32.mrf.mxu2  ;;  %v1630_v56 = vpop.f32.mrf.mxu3  ;;  %10564 = vst [vmem:[#allocation11_spill] sm:$0xff] %v7158_v53 }
 0x240   : > { %v7137_v5 = vadd.f32 %v1630_v56, %v6879_v2  ;;  %v1899_v46 = vpop.f32.mrf.mxu0  ;;  %v7152_v56 = vld [vmem:[%s10150_s3 + $0x60] sm:$0xff]  ;;  %v10561_v2 = vld [vmem:[#allocation65_spill] sm:$0xff] }
 0x241   : > { %v7140_v24 = vadd.f32 %v1899_v46, %v7000_v23  ;;  %10560 = vst [vmem:[#allocation8_spill] sm:$0xff] %v7152_v56  ;;  %v1146_v46 = vpop.f32.mrf.mxu1 }
 0x242   : > { %10558 = vst [vmem:[#allocation44_spill] sm:$0xff] %v7137_v5  ;;  %v2160_v15 = vsel %vm1967_vm6, %v7137_v5, -inf  ;;  %v10563_v5 = vpack.c.b16 %v10561_v2, %v10562_v17  ;;  %v7161_v21 = vadd.f32 %v1146_v46, %v7152_v56  ;;  %v2040_v2 = vsel %vm1967_vm6, %v7158_v53, -inf }
 0x243   : > { %10559 = vst [vmem:[#allocation9_spill] sm:$0xff] %v7140_v24  ;;  %v2271_v39 = vsel %vm1967_vm6, %v7140_v24, -inf  ;;  %2161 = vmax.xlane.f32.xlu1 %v2160_v15 }
 0x244   : > { %2272 = vmax.xlane.f32.xlu0 %v2271_v39  ;;  %5204 = vmatmul.msk.bf16.gmra.mxu2 %vm393_vm0, %v10563_v5  ;;  %10565 = vst [vmem:[#allocation10_spill] sm:$0xff] %v7161_v21  ;;  %v10566_v39 = vpack.c.b16 %v6532_v42, %v6519_v7  ;;  %v2004_v5 = vsel %vm1967_vm6, %v7161_v21, -inf  ;;  %v735_v42 = vmul.f32 %v6032_v55, %v6839_v45 }
 0x246   : > { %v863_v18 = vpack.c.bf16 %v735_v42, %v735_v42 }
 0x247   : > { %v7163_v15 = vpop.f32.mrf.mxu2  ;;  %v1632_v24 = vpop.f32.mrf.mxu3 }
 0x248   : > { %v7166_v44 = vadd.f32 %v1632_v24, %v6896_v28  ;;  %v7180_v24 = vadd.f32 %v1892_v12, %v6920_v32  ;;  %v7182_v7 = vpop.f32.mrf.mxu0  ;;  %v1505_v42 = vunpack.c.l.b16 %v863_v18 }
 0x24a   : > { %5241 = vmatmul.msk.bf16.gmra.mxu0 %vm393_vm0, %v10566_v39  ;;  %v2163_v17 = vsel %vm1967_vm6, %v7166_v44, -inf  ;;  %10567 = vst [vmem:[#allocation12_spill] sm:$0xff] %v7180_v24  ;;  %v2262_v12 = vsel %vm1967_vm6, %v7180_v24, -inf  ;;  %v864_v39 = vpack.c.bf16 %v736_v49, %v736_v49 }
 0x24b   : > { %2164 = vmax.xlane.f32.xlu2 %v2163_v17  ;;  %2041 = vmax.xlane.f32.xlu1 %v2040_v2  ;;  %v7200_v17 = vld [vmem:[%s10150_s3 + $0x50] sm:$0xff]  ;;  %v10569_v2 = vpack.c.b16 %v6583_v62, %v6581_v47  ;;  %v10573_v62 = vld [vmem:[#allocation42_spill] sm:$0xff] }
 0x24c   : > { %2005 = vmax.xlane.f32.xlu0 %v2004_v5  ;;  %5223 = vmatmul.msk.bf16.gmra.mxu3 %vm393_vm0, %v1526_v1  ;;  %v7207_v1 = vadd.f32 %v1894_v22, %v6942_v41  ;;  %v7210_v5 = vadd.f32 %v1141_v27, %v7200_v17  ;;  %v1506_v49 = vunpack.c.l.b16 %v864_v39  ;;  %v933_v39 = vld [vmem:[%s10150_s3 + $0xd0] sm:$0xff] }
 0x24e   : > { %10570 = vst [vmem:[#allocation59_spill] sm:$0xff] %v7207_v1  ;;  %v2265_v22 = vsel %vm1967_vm6, %v7207_v1, -inf  ;;  %v1998_v27 = vsel %vm1967_vm6, %v7210_v5, -inf  ;;  %v1527_v18 = vpack.c.b16 %v1506_v49, %v1505_v42 }
 0x24f   : > { %v7188_v52 = vpop.f32.mrf.mxu2  ;;  %v1635_v35 = vpop.f32.mrf.mxu3  ;;  %10571 = vst [vmem:[#allocation56_spill] sm:$0xff] %v7210_v5 }
 0x250   : > { %v7191_v6 = vadd.f32 %v1635_v35, %v6920_v32  ;;  %v7214_v21 = vpop.f32.mrf.mxu0 }
 0x252   : > { %10568 = vst [vmem:[#allocation13_spill] sm:$0xff] %v7191_v6  ;;  %v2166_v46 = vsel %vm1967_vm6, %v7191_v6, -inf  ;;  %v10572_v6 = vld [vmem:[#allocation43_spill] sm:$0xff] }
 0x253   : > { %2167 = vmax.xlane.f32.xlu2 %v2166_v46  ;;  %2263 = vmax.xlane.f32.xlu1 %v2262_v12  ;;  %v10574_v47 = vpack.c.b16 %v10572_v6, %v10573_v62  ;;  %v737_v6 = vmul.f32 %v6032_v55, %v6862_v30 }
 0x254   : > { %5205 = vmatmul.msk.bf16.gmra.mxu2 %vm393_vm0, %v10569_v2  ;;  %v738_v2 = vmul.f32 %v6032_v55, %v6865_v43 }
 0x257   : > { %v7212_v35 = vpop.f32.mrf.mxu2  ;;  %v1637_v53 = vpop.f32.mrf.mxu3 }
 0x258   : > { %v1970_v46 = vpop.xlane.xlu1 %1969  ;;  %v7237_v42 = vadd.f32 %v1637_v53, %v6942_v41  ;;  %v7253_v53 = vld [vmem:[%s10150_s3 + $0x58] sm:$0xff] }
 0x259   : > { %v2352_v12 = vsub.f32 %v6882_v26, %v1970_v46  ;;  %v7234_v46 = vadd.f32 %v7116_v40, %v933_v39 }
 0x25a   : > { %5242 = vmatmul.msk.bf16.gmra.mxu0 %vm393_vm0, %v10574_v47  ;;  %10576 = vst [vmem:[#allocation17_spill] sm:$0xff] %v7237_v42  ;;  %v2169_v40 = vsel %vm1967_vm6, %v7237_v42, -inf  ;;  %v7267_v42 = vadd.f32 %v7118_v60, %v6971_v3  ;;  %v10585_v60 = vld [vmem:[#allocation62_spill] sm:$0xff] }
 0x25b   : > { %2266 = vmax.xlane.f32.xlu2 %v2265_v22  ;;  %1999 = vmax.xlane.f32.xlu1 %v1998_v27  ;;  %v2480_v26 = vmul.f32 1.442695, %v2352_v12  ;;  %10575 = vst [vmem:[#allocation19_spill] sm:$0xff] %v7234_v46  ;;  %v865_v22 = vpack.c.bf16 %v737_v6, %v737_v6  ;;  %v866_v27 = vpack.c.bf16 %v738_v2, %v738_v2  ;;  %v2046_v55 = vsel %vm1967_vm6, %v7234_v46, -inf }
 0x25c   : > { %5224 = vmatmul.msk.bf16.gmra.mxu3 %vm393_vm0, %v1527_v18  ;;  %v7244_v18 = vpop.f32.mrf.mxu0  ;;  %v7261_v46 = vadd.f32 %v7120_v4, %v7253_v53  ;;  %10581 = vst [vmem:[#allocation20_spill] sm:$0xff] %v7267_v42 }
 0x25d   : > { %5377 = vpow2.f32 %v2480_v26  ;;  %v10577_v26 = vld [vmem:[#allocation53_spill] sm:$0xff]  ;;  %v1507_v2 = vunpack.c.l.b16 %v865_v22 }
 0x25e   : > { %10580 = vst [vmem:[#allocation21_spill] sm:$0xff] %v7261_v46  ;;  %v2001_v24 = vsel %vm1967_vm6, %v7261_v46, -inf }
 0x25f   : > { %v7239_v49 = vpop.f32.mrf.mxu2  ;;  %v7241_v62 = vpop.f32.mrf.mxu3 }
 0x260   : > { %v1973_v47 = vpop.xlane.xlu2 %1972 }
 0x261   : > { %v2353_v12 = vsub.f32 %v6901_v38, %v1973_v47  ;;  %v10578_v38 = vld [vmem:[#allocation52_spill] sm:$0xff]  ;;  %v1508_v47 = vunpack.c.l.b16 %v866_v27 }
 0x262   : > { %v10579_v6 = vpack.c.b16 %v10577_v26, %v10578_v38 }
 0x263   : > { %v2482_v39 = vmul.f32 1.442695, %v2353_v12  ;;  %2047 = vmax.xlane.f32.xlu2 %v2046_v55  ;;  %2170 = vmax.xlane.f32.xlu1 %v2169_v40  ;;  %v7263_v5 = vpop.eup %5377  ;;  %v1528_v27 = vpack.c.b16 %v1508_v47, %v1507_v2  ;;  %v936_v2 = vld [vmem:[%s10150_s3 + $0xe8] sm:$0xff] }
 0x264   : > { %5206 = vmatmul.msk.bf16.gmra.mxu2 %vm393_vm0, %v10579_v6  ;;  %v3120_v4 = vpack.c.bf16 %v7263_v5, %v7263_v5  ;;  %v10584_v6 = vld [vmem:[#allocation63_spill] sm:$0xff]  ;;  %v7299_v47 = vpop.f32.mrf.mxu0 }
 0x265   : > { %5379 = vpow2.f32 %v2482_v39  ;;  %v7274_v39 = vpop.f32.mrf.mxu1  ;;  %v10586_v1 = vpack.c.b16 %v10584_v6, %v10585_v60  ;;  %v7303_v6 = vpop.xlane.xlu1 %2017  ;;  %v7307_v60 = vadd.f32 %v7188_v52, %v936_v2 }
 0x266   : > { %10588 = vst [vmem:[#allocation25_spill] sm:$0xff] %v7303_v6 }
 0x267   : > { %v7269_v12 = vpop.f32.mrf.mxu2  ;;  %v1642_v55 = vpop.f32.mrf.mxu3  ;;  %10589 = vst [vmem:[#allocation30_spill] sm:$0xff] %v7307_v60 }
 0x268   : > { %v7272_v40 = vadd.f32 %v1642_v55, %v7000_v23  ;;  %v1976_v26 = vpop.xlane.xlu0 %1975  ;;  %v7276_v22 = vpop.xlane.xlu2 %2020 }
 0x269   : > { %10583 = vst [vmem:[#allocation37_spill] sm:$0xff] %v7276_v22  ;;  %v2354_v38 = vsub.f32 %v6926_v54, %v1976_v26  ;;  %v2268_v54 = vsel %vm1967_vm6, %v7267_v42, -inf }
 0x26a   : > { %10582 = vst [vmem:[#allocation22_spill] sm:$0xff] %v7272_v40  ;;  %5243 = vmatmul.msk.bf16.gmra.mxu0 %vm393_vm0, %v10586_v1  ;;  %v2175_v55 = vsel %vm1967_vm6, %v7272_v40, -inf  ;;  %v934_v1 = vld [vmem:[%s10150_s3 + $0xd8] sm:$0xff] }
 0x26b   : > { %v7289_v56 = vpop.eup %5379  ;;  %2176 = vmax.xlane.f32.xlu0 %v2175_v55  ;;  %2002 = vmax.xlane.f32.xlu2 %v2001_v24  ;;  %v2484_v24 = vmul.f32 1.442695, %v2354_v38  ;;  %v3280_v55 = vunpack.c.l.b16 %v3120_v4  ;;  %v7310_v40 = vadd.f32 %v7134_v16, %v934_v1  ;;  %v2055_v16 = vsel %vm1967_vm6, %v7307_v60, -inf  ;;  %v7326_v4 = vld [vmem:[%s10150_s3 + $0x70] sm:$0xff]  ;;  %v10591_v38 = vld [vmem:[#allocation66_spill] sm:$0xff] }
 0x26c   : > { %10587 = vst [vmem:[#allocation29_spill] sm:$0xff] %v7289_v56  ;;  %v3121_v26 = vpack.c.bf16 %v7289_v56, %v7289_v56  ;;  %2269 = vmax.xlane.f32.xlu1 %v2268_v54  ;;  %5225 = vmatmul.msk.bf16.gmra.mxu3 %vm393_vm0, %v1528_v27  ;;  %v10592_v2 = vpack.c.b16 %v6544_v59, %v10591_v38 }
 0x26d   : > { %10590 = vst [vmem:[#allocation26_spill] sm:$0xff] %v7310_v40  ;;  %5381 = vpow2.f32 %v2484_v24  ;;  %v7338_v54 = vadd.f32 %v7214_v21, %v7039_v11 }
 0x26e   : > { %v3281_v22 = vunpack.c.l.b16 %v3121_v26  ;;  %v7343_v26 = vpop.f32.mrf.mxu0 }
 0x26f   : > { %v7312_v42 = vpop.f32.mrf.mxu2  ;;  %v1645_v46 = vpop.f32.mrf.mxu3  ;;  %v2277_v21 = vsel %vm1967_vm6, %v7338_v54, -inf }
 0x270   : > { %v7315_v23 = vadd.f32 %v1645_v46, %v7016_v20  ;;  %v3312_v56 = vpack.c.b16 %v3281_v22, %v3280_v55  ;;  %v1979_v6 = vpop.xlane.xlu2 %1978  ;;  %v1151_v46 = vpop.f32.mrf.mxu1  ;;  %v2049_v22 = vsel %vm1967_vm6, %v7310_v40, -inf }
 0x271   : > { %v2355_v27 = vsub.f32 %v6947_v13, %v1979_v6  ;;  %v7330_v13 = vpop.xlane.xlu1 %2023  ;;  %v7341_v1 = vadd.f32 %v1151_v46, %v7326_v4  ;;  %v7347_v6 = vadd.f32 %v7241_v62, %v6971_v3  ;;  %v935_v62 = vld [vmem:[%s10150_s3 + $0xe0] sm:$0xff] }
 0x272   : > { %5246 = vmatmul.msk.bf16.vlgmr.msrb.gmra.mxu1 %vm1967_vm6, %v3312_v56  ;;  %v2178_v52 = vsel %vm1967_vm6, %v7315_v23, -inf }
 0x273   : > { %2179 = vmax.xlane.f32.xlu0 %v2178_v52  ;;  %2056 = vmax.xlane.f32.xlu2 %v2055_v16  ;;  %v2486_v56 = vmul.f32 1.442695, %v2355_v27  ;;  %v7351_v59 = vpop.eup %5381  ;;  %v10593_v27 = vpack.c.b16 %v6593_v14, %v6591_v50  ;;  %v2010_v52 = vsel %vm1967_vm6, %v7341_v1, -inf  ;;  %v937_v16 = vld [vmem:[%s10150_s3 + $0xf0] sm:$0xff]  ;;  %v2172_v50 = vsel %vm1967_vm6, %v7347_v6, -inf }
 0x274   : > { %2050 = vmax.xlane.f32.xlu1 %v2049_v22  ;;  %5207 = vmatmul.msk.bf16.gmra.mxu2 %vm393_vm0, %v10592_v2  ;;  %v3122_v14 = vpack.c.bf16 %v7351_v59, %v7351_v59  ;;  %v7380_v2 = vadd.f32 %v7163_v15, %v935_v62 }
 0x275   : > { %5383 = vpow2.f32 %v2486_v56  ;;  %v10594_v56 = vpack.c.b16 %v6740_v37, %v6738_v34 }
 0x276   : > { %10595 = vst [vmem:[#allocation35_spill] sm:$0xff] %v7380_v2  ;;  %v3282_v62 = vunpack.c.l.b16 %v3122_v14 }
 0x277   : > { %v7349_v24 = vpop.f32.mrf.mxu2  ;;  %v1647_v55 = vpop.f32.mrf.mxu3 }
 0x278   : > { %v7392_v34 = vadd.f32 %v1647_v55, %v7039_v11  ;;  %v7406_v11 = vld [vmem:[%s10150_s3 + $0x78] sm:$0xff] }
 0x279   : > { %v1982_v22 = vpop.xlane.xlu1 %1981 }
 0x27a   : > { %5244 = vmatmul.msk.bf16.gmra.mxu0 %vm393_vm0, %v10593_v27  ;;  %v7383_v27 = vadd.f32 %v7212_v35, %v937_v16  ;;  %v2356_v37 = vsub.f32 %v6976_v61, %v1982_v22  ;;  %v7397_v35 = vpop.f32.mrf.mxu0  ;;  %v7399_v16 = vpop.xlane.xlu0 %2026  ;;  %v2181_v14 = vsel %vm1967_vm6, %v7392_v34, -inf  ;;  %v10598_v22 = vpack.c.b16 %v6575_v19, %v6573_v29 }
 0x27b   : > { %2278 = vmax.xlane.f32.xlu0 %v2277_v21  ;;  %2011 = vmax.xlane.f32.xlu2 %v2010_v52  ;;  %v7371_v46 = vpop.eup %5383  ;;  %v741_v52 = vmul.f32 %v6036_v58, %v6813_v8  ;;  %v1153_v61 = vpop.f32.mrf.mxu1 }
 0x27c   : > { %2173 = vmax.xlane.f32.xlu1 %v2172_v50  ;;  %5226 = vmatmul.msk.bf16.gmra.mxu3 %vm393_vm0, %v10594_v56  ;;  %v3123_v38 = vpack.c.bf16 %v7371_v46, %v7371_v46  ;;  %10596 = vst [vmem:[#allocation32_spill] sm:$0xff] %v7383_v27  ;;  %v742_v50 = vmul.f32 %v6036_v58, %v6816_v36  ;;  %v2058_v8 = vsel %vm1967_vm6, %v7383_v27, -inf  ;;  %v2488_v55 = vmul.f32 1.442695, %v2356_v37 }
 0x27d   : > { %v7422_v37 = vadd.f32 %v7182_v7, %v7016_v20  ;;  %v10600_v7 = vpack.c.b16 %v6634_v48, %v6632_v51  ;;  %v7456_v51 = vadd.f32 %v7299_v47, %v7081_v0 }
 0x27e   : > { %v7385_v21 = vpop.xlane.xlu2 %2029  ;;  %v3283_v60 = vunpack.c.l.b16 %v3123_v38  ;;  %v870_v36 = vpack.c.bf16 %v742_v50, %v742_v50  ;;  %v7418_v38 = vadd.f32 %v1153_v61, %v7406_v11  ;;  %5385 = vpow2.f32 %v2488_v55 }
 0x27f   : > { %10597 = vst [vmem:[#allocation39_spill] sm:$0xff] %v7385_v21  ;;  %v7395_v56 = vpop.f32.mrf.mxu2  ;;  %v1650_v15 = vpop.f32.mrf.mxu3  ;;  %v869_v21 = vpack.c.bf16 %v741_v52, %v741_v52 }
 0x280   : > { %v3313_v40 = vpack.c.b16 %v3283_v60, %v3282_v62  ;;  %v2052_v60 = vsel %vm1967_vm6, %v7380_v2, -inf  ;;  %v7425_v62 = vadd.f32 %v1650_v15, %v7095_v31  ;;  %v2013_v15 = vsel %vm1967_vm6, %v7418_v38, -inf }
 0x281   : > { %v1511_v50 = vunpack.c.l.b16 %v869_v21 }
 0x282   : > { %5247 = vmatmul.msk.bf16.gmra.mxu1 %vm1967_vm6, %v3313_v40  ;;  %v1512_v40 = vunpack.c.l.b16 %v870_v36  ;;  %v7434_v21 = vpop.f32.mrf.mxu0  ;;  %v2274_v36 = vsel %vm1967_vm6, %v7422_v37, -inf }
 0x283   : > { %2059 = vmax.xlane.f32.xlu0 %v2058_v8  ;;  %2182 = vmax.xlane.f32.xlu2 %v2181_v14 }
 0x284   : > { %2053 = vmax.xlane.f32.xlu1 %v2052_v60  ;;  %5208 = vmatmul.msk.bf16.gmra.mxu2 %vm393_vm0, %v10598_v22  ;;  %v1530_v55 = vpack.c.b16 %v1512_v40, %v1511_v50  ;;  %v7449_v22 = vld [vmem:[%s10150_s3 + $0x68] sm:$0xff]  ;;  %v7451_v48 = vpop.eup %5385 }
 0x285   : > { %10601 = vst [vmem:[#allocation48_spill] sm:$0xff] %v7451_v48 }
 0x286   : > { %v1985_v52 = vpop.xlane.xlu2 %1984  ;;  %v7432_v60 = vpop.xlane.xlu1 %2032 }
 0x287   : > { %v2357_v8 = vsub.f32 %v7009_v57, %v1985_v52  ;;  %v7428_v14 = vpop.f32.mrf.mxu2  ;;  %v7430_v29 = vpop.f32.mrf.mxu3  ;;  %10599 = vst [vmem:[#allocation38_spill] sm:$0xff] %v7432_v60  ;;  %v2184_v57 = vsel %vm1967_vm6, %v7425_v62, -inf  ;;  %v7460_v52 = vadd.f32 %v7274_v39, %v7449_v22  ;;  %v3124_v39 = vpack.c.bf16 %v7451_v48, %v7451_v48 }
 0x288   : > { %v1988_v19 = vpop.xlane.xlu0 %1987  ;;  %v10604_v60 = vpack.c.b16 %v6719_v33, %v6717_v63  ;;  %v10606_v33 = vld [vmem:[#allocation31_spill] sm:$0xff] }
 0x289   : > { %v2490_v61 = vmul.f32 1.442695, %v2357_v8  ;;  %v2358_v50 = vsub.f32 %v7021_v9, %v1988_v19 }
 0x28a   : > { %5245 = vmatmul.msk.bf16.gmra.mxu0 %vm393_vm0, %v10600_v7  ;;  %v744_v7 = vmul.f32 %v6036_v58, %v6842_v10  ;;  %v7487_v48 = vpop.f32.mrf.mxu0 }
 0x28b   : > { %5387 = vpow2.f32 %v2490_v61  ;;  %2014 = vmax.xlane.f32.xlu0 %v2013_v15  ;;  %2185 = vmax.xlane.f32.xlu2 %v2184_v57  ;;  %v743_v61 = vmul.f32 %v6036_v58, %v6839_v45 }
 0x28c   : > { %2275 = vmax.xlane.f32.xlu1 %v2274_v36  ;;  %5227 = vmatmul.msk.bf16.gmra.mxu3 %vm393_vm0, %v1530_v55  ;;  %v2283_v36 = vsel %vm1967_vm6, %v7456_v51, -inf  ;;  %v2492_v55 = vmul.f32 1.442695, %v2358_v50  ;;  %v872_v2 = vpack.c.bf16 %v744_v7, %v744_v7  ;;  %v7495_v50 = vadd.f32 %v7312_v42, %v6896_v28 }
 0x28d   : > { %v871_v27 = vpack.c.bf16 %v743_v61, %v743_v61  ;;  %v7501_v7 = vadd.f32 %v7244_v18, %v7095_v31  ;;  %v2736_v18 = vsel %vm1967_vm6, %v7263_v5, 0.0 }
 0x28e   : > { %v2067_v28 = vsel %vm1967_vm6, %v7495_v50, -inf }
 0x28f   : > { %v7463_v40 = vpop.f32.mrf.mxu2  ;;  %v1655_v8 = vpop.f32.mrf.mxu3 }
 0x290   : > { %v7470_v15 = vadd.f32 %v1655_v8, %v7200_v17  ;;  %v7472_v47 = vpop.xlane.xlu0 %2035  ;;  %v1991_v9 = vpop.xlane.xlu1 %1990  ;;  %v2007_v8 = vsel %vm1967_vm6, %v7460_v52, -inf }
 0x291   : > { %10602 = vst [vmem:[#allocation45_spill] sm:$0xff] %v7472_v47  ;;  %v7476_v57 = vpop.eup %5387  ;;  %v2359_v19 = vsub.f32 %v7044_v25, %v1991_v9  ;;  %v3284_v25 = vunpack.c.l.b16 %v3124_v39 }
 0x292   : > { %10603 = vst [vmem:[#allocation54_spill] sm:$0xff] %v7476_v57  ;;  %v2190_v45 = vsel %vm1967_vm6, %v7470_v15, -inf  ;;  %v3125_v10 = vpack.c.bf16 %v7476_v57, %v7476_v57 }
 0x293   : > { %2284 = vmax.xlane.f32.xlu0 %v2283_v36  ;;  %v2494_v47 = vmul.f32 1.442695, %v2359_v19  ;;  %2191 = vmax.xlane.f32.xlu2 %v2190_v45  ;;  %v1513_v19 = vunpack.c.l.b16 %v871_v27  ;;  %v1514_v45 = vunpack.c.l.b16 %v872_v2  ;;  %v938_v2 = vld [vmem:[%s10150_s3 + $0xf8] sm:$0xff] }
 0x294   : > { %2008 = vmax.xlane.f32.xlu1 %v2007_v8  ;;  %v3285_v9 = vunpack.c.l.b16 %v3125_v10  ;;  %5209 = vmatmul.msk.bf16.gmra.mxu2 %vm393_vm0, %v10604_v60 }
 0x295   : > { %5389 = vpow2.f32 %v2494_v47  ;;  %v2280_v47 = vsel %vm1967_vm6, %v7501_v7, -inf }
 0x296   : > { %v7497_v36 = vpop.xlane.xlu2 %2038  ;;  %v3314_v61 = vpack.c.b16 %v3285_v9, %v3284_v25  ;;  %5391 = vpow2.f32 %v2492_v55  ;;  %v1531_v55 = vpack.c.b16 %v1514_v45, %v1513_v19  ;;  %v7521_v25 = vadd.f32 %v7349_v24, %v6920_v32  ;;  %v7523_v9 = vpop.f32.mrf.mxu0  ;;  %v10610_v32 = vld [vmem:[#allocation3_spill] sm:$0xff] }
 0x297   : > { %10605 = vst [vmem:[#allocation50_spill] sm:$0xff] %v7497_v36  ;;  %v1657_v39 = vpop.f32.mrf.mxu3  ;;  %v1388_v63 = vpop.f32.mrf.mxu2  ;;  %v745_v19 = vmul.f32 %v6036_v58, %v6862_v30  ;;  %v746_v45 = vmul.f32 %v6036_v58, %v6865_v43 }
 0x298   : > { %v2258_v10 = vpop.xlane.xlu0 %2257  ;;  %5248 = vmatmul.msk.bf16.gmra.mxu1 %vm1967_vm6, %v3314_v61  ;;  %v2070_v58 = vsel %vm1967_vm6, %v7521_v25, -inf }
 0x299   : > { %v2448_v60 = vsub.f32 %v10606_v33, %v2258_v10  ;;  %v7532_v10 = vadd.f32 %v7239_v49, %v938_v2  ;;  %v7536_v33 = vadd.f32 %v7428_v14, %v6971_v3  ;;  %v873_v49 = vpack.c.bf16 %v745_v19, %v745_v19 }
 0x29a   : > { %v874_v2 = vpack.c.bf16 %v746_v45, %v746_v45  ;;  %v7559_v45 = vadd.f32 %v1657_v39, %v7253_v53 }
 0x29b   : > { %v2672_v42 = vmul.f32 1.442695, %v2448_v60  ;;  %2068 = vmax.xlane.f32.xlu0 %v2067_v28  ;;  %v7511_v27 = vpop.eup %5389  ;;  %2737 = vadd.xlane.f32.xlu2 %v2736_v18  ;;  %10609 = vst [vmem:[#allocation36_spill] sm:$0xff] %v7532_v10  ;;  %v10611_v18 = vld [vmem:[#allocation6_spill] sm:$0xff] }
 0x29c   : > { %10607 = vst [vmem:[#allocation60_spill] sm:$0xff] %v7511_v27  ;;  %2281 = vmax.xlane.f32.xlu1 %v2280_v47  ;;  %v7516_v8 = vpop.eup %5391  ;;  %5228 = vmatmul.msk.bf16.gmra.mxu3 %vm393_vm0, %v1531_v55  ;;  %v3127_v61 = vpack.c.bf16 %v7511_v27, %v7511_v27  ;;  %v10616_v27 = vld [vmem:[#allocation7_spill] sm:$0xff] }
 0x29d   : > { %10608 = vst [vmem:[#allocation57_spill] sm:$0xff] %v7516_v8  ;;  %5393 = vpow2.f32 %v2672_v42  ;;  %v3126_v47 = vpack.c.bf16 %v7516_v8, %v7516_v8  ;;  %v2061_v42 = vsel %vm1967_vm6, %v7532_v10, -inf  ;;  %v7563_v10 = vadd.f32 %v7269_v12, %v10616_v27 }
 0x29e   : > { %v2261_v5 = vpop.xlane.xlu2 %2260  ;;  %v3287_v43 = vunpack.c.l.b16 %v3127_v61  ;;  %v10614_v61 = vld [vmem:[#allocation67_spill] sm:$0xff] }
 0x29f   : > { %v2449_v24 = vsub.f32 %v10610_v32, %v2261_v5  ;;  %v7539_v60 = vpop.f32.mrf.mxu3  ;;  %v7546_v3 = vpop.f32.mrf.mxu2  ;;  %v2076_v5 = vsel %vm1967_vm6, %v7536_v33, -inf  ;;  %v3286_v32 = vunpack.c.l.b16 %v3126_v47  ;;  %v7566_v47 = vadd.f32 %v1388_v63, %v7016_v20 }
 0x2a0   : > { %v1997_v28 = vpop.xlane.xlu0 %1996  ;;  %v2193_v20 = vsel %vm1967_vm6, %v7559_v45, -inf  ;;  %v2064_v63 = vsel %vm1967_vm6, %v7563_v10, -inf }
 0x2a1   : > { %v2674_v30 = vmul.f32 1.442695, %v2449_v24  ;;  %v2361_v55 = vsub.f32 %v10611_v18, %v1997_v28  ;;  %v10613_v28 = vld [vmem:[#allocation68_spill] sm:$0xff]  ;;  %v3315_v18 = vpack.c.b16 %v3287_v43, %v3286_v32  ;;  %10617 = vst [vmem:[#allocation41_spill] sm:$0xff] %v7566_v47  ;;  %v2082_v27 = vsel %vm1967_vm6, %v7566_v47, -inf }
 0x2a2   : > { %v10615_v19 = vpack.c.b16 %v10613_v28, %v10614_v61  ;;  %v7569_v61 = vpop.f32.mrf.mxu0 }
 0x2a3   : > { %5395 = vpow2.f32 %v2674_v30  ;;  %v2498_v14 = vmul.f32 1.442695, %v2361_v55  ;;  %2071 = vmax.xlane.f32.xlu0 %v2070_v58  ;;  %2077 = vmax.xlane.f32.xlu2 %v2076_v5  ;;  %v7552_v24 = vpop.eup %5393  ;;  %v1515_v55 = vunpack.c.l.b16 %v873_v49  ;;  %v1516_v58 = vunpack.c.l.b16 %v874_v2 }
 0x2a4   : > { %2062 = vmax.xlane.f32.xlu1 %v2061_v42  ;;  %10612 = vst [vmem:[#allocation34_spill] sm:$0xff] %v7552_v24  ;;  %5210 = vmatmul.msk.bf16.gmra.mxu2 %vm393_vm0, %v10615_v19  ;;  %v10618_v42 = vld [vmem:[#allocation5_spill] sm:$0xff]  ;;  %v3216_v39 = vpack.c.bf16 %v7552_v24, %v7552_v24 }
 0x2a5   : > { %5397 = vpow2.f32 %v2498_v14  ;;  %v1532_v2 = vpack.c.b16 %v1516_v58, %v1515_v55 }
 0x2a6   : > { %v1994_v30 = vpop.xlane.xlu2 %1993  ;;  %v3967_v14 = vunpack.c.l.b16 %v3216_v39 }
 0x2a7   : > { %v2360_v5 = vsub.f32 %v10618_v42, %v1994_v30  ;;  %v1662_v28 = vpop.f32.mrf.mxu3  ;;  %v1393_v30 = vpop.f32.mrf.mxu2 }
 0x2a8   : > { %5249 = vmatmul.msk.bf16.gmra.mxu1 %vm1967_vm6, %v3315_v18  ;;  %v7589_v18 = vadd.f32 %v7397_v35, %v7253_v53 }
 0x2a9   : > { %v7574_v43 = vpop.eup %5395  ;;  %v2496_v49 = vmul.f32 1.442695, %v2360_v5  ;;  %v7593_v5 = vadd.f32 %v7430_v29, %v7081_v0 }
 0x2aa   : > { %10619 = vst [vmem:[#allocation40_spill] sm:$0xff] %v7574_v43  ;;  %v3217_v12 = vpack.c.bf16 %v7574_v43, %v7574_v43  ;;  %v7602_v39 = vpop.f32.mrf.mxu0  ;;  %v7654_v43 = vpop.xlane.xlu0 %2044 }
 0x2ab   : > { %5399 = vpow2.f32 %v2496_v49  ;;  %2194 = vmax.xlane.f32.xlu0 %v2193_v20  ;;  %2083 = vmax.xlane.f32.xlu2 %v2082_v27  ;;  %v7584_v19 = vpop.eup %5397  ;;  %v2187_v0 = vsel %vm1967_vm6, %v7593_v5, -inf  ;;  %v10621_v27 = vld [vmem:[#allocation69_spill] sm:$0xff] }
 0x2ac   : > { %v3968_v32 = vunpack.c.l.b16 %v3217_v12  ;;  %2065 = vmax.xlane.f32.xlu1 %v2064_v63  ;;  %5229 = vmatmul.msk.bf16.gmra.mxu3 %vm393_vm0, %v1532_v2  ;;  %v3129_v55 = vpack.c.bf16 %v7584_v19, %v7584_v19  ;;  %v2289_v12 = vsel %vm1967_vm6, %v7589_v18, -inf  ;;  %v10620_v63 = vld [vmem:[#allocation70_spill] sm:$0xff] }
 0x2ad   : > { %v10622_v2 = vpack.c.b16 %v10620_v63, %v10621_v27 }
 0x2ae   : > { %v3999_v42 = vpack.c.b16 %v3968_v32, %v3967_v14  ;;  %v3289_v20 = vunpack.c.l.b16 %v3129_v55  ;;  %v7616_v14 = vadd.f32 %v7487_v48, %v7449_v22 }
 0x2af   : > { %v7595_v49 = vpop.f32.mrf.mxu3  ;;  %v7622_v24 = vpop.f32.mrf.mxu2 }
 0x2b0   : > { %5294 = vmatmul.msk.bf16.vlgmr.msra.gmra.mxu0 %vm1967_vm6, %v3999_v42  ;;  %10623 = vst [vmem:[#allocation49_spill] sm:$0xff] %v7616_v14  ;;  %v2295_v48 = vsel %vm1967_vm6, %v7616_v14, -inf }
 0x2b1   : > { %v7600_v58 = vpop.eup %5399 }
 0x2b2   : > { %v3128_v35 = vpack.c.bf16 %v7600_v58, %v7600_v58 }
 0x2b3   : > { %2290 = vmax.xlane.f32.xlu0 %v2289_v12  ;;  %v7620_v12 = vadd.f32 %v7395_v56, %v6942_v41  ;;  %v1929_v56 = vpop.f32.mrf.mxu0 }
 0x2b4   : > { %2188 = vmax.xlane.f32.xlu1 %v2187_v0  ;;  %v3288_v29 = vunpack.c.l.b16 %v3128_v35  ;;  %5211 = vmatmul.msk.bf16.gmra.mxu2 %vm393_vm0, %v10622_v2  ;;  %v10624_v0 = vld [vmem:[#allocation44_spill] sm:$0xff] }
 0x2b6   : > { %v2162_v32 = vpop.xlane.xlu1 %2161  ;;  %v3316_v42 = vpack.c.b16 %v3289_v20, %v3288_v29  ;;  %v2073_v29 = vsel %vm1967_vm6, %v7620_v12, -inf  ;;  %v7636_v20 = vadd.f32 %v1662_v28, %v7449_v22 }
 0x2b7   : > { %v2416_v35 = vsub.f32 %v10624_v0, %v2162_v32  ;;  %v1667_v55 = vpop.f32.mrf.mxu3  ;;  %v10628_v0 = vld [vmem:[#allocation14_spill] sm:$0xff]  ;;  %v2273_v36 = vpop.xlane.xlu0 %2272 }
 0x2b8   : > { %5250 = vmatmul.msk.bf16.gmra.mxu1 %vm1967_vm6, %v3316_v42  ;;  %v7627_v63 = vadd.f32 %v1667_v55, %v7406_v11  ;;  %10626 = vst [vmem:[#allocation55_spill] sm:$0xff] %v7636_v20  ;;  %v7642_v42 = vadd.f32 %v7343_v26, %v7200_v17  ;;  %v2199_v28 = vsel %vm1967_vm6, %v7636_v20, -inf }
 0x2b9   : > { %v2608_v27 = vmul.f32 1.442695, %v2416_v35  ;;  %v7645_v35 = vadd.f32 %v1929_v56, %v10628_v0  ;;  %v10631_v56 = vld [vmem:[#allocation72_spill] sm:$0xff] }
 0x2ba   : > { %10625 = vst [vmem:[#allocation46_spill] sm:$0xff] %v7627_v63  ;;  %v2205_v41 = vsel %vm1967_vm6, %v7627_v63, -inf  ;;  %v2286_v26 = vsel %vm1967_vm6, %v7642_v42, -inf  ;;  %v10636_v63 = vld [vmem:[#allocation8_spill] sm:$0xff] }
 0x2bb   : > { %2296 = vmax.xlane.f32.xlu0 %v2295_v48  ;;  %2206 = vmax.xlane.f32.xlu2 %v2205_v41  ;;  %10627 = vst [vmem:[#allocation51_spill] sm:$0xff] %v7642_v42  ;;  %5401 = vpow2.f32 %v2608_v27  ;;  %v2307_v27 = vsel %vm1967_vm6, %v7645_v35, -inf  ;;  %v7672_v47 = vadd.f32 %v7434_v21, %v10636_v63 }
 0x2bc   : > { %2074 = vmax.xlane.f32.xlu1 %v2073_v29  ;;  %10629 = vst [vmem:[#allocation61_spill] sm:$0xff] %v7645_v35  ;;  %v7650_v29 = vpop.f32.mrf.mxu2 }
 0x2bd   : > { %10637 = vst [vmem:[#allocation64_spill] sm:$0xff] %v7672_v47 }
 0x2be   : > { %v2165_v2 = vpop.xlane.xlu2 %2164  ;;  %v7638_v32 = vpop.xlane.xlu1 %2041 }
 0x2bf   : > { %v2417_v55 = vsub.f32 %v7166_v44, %v2165_v2  ;;  %v7648_v48 = vpop.f32.mrf.mxu3  ;;  %v10632_v2 = vld [vmem:[#allocation71_spill] sm:$0xff] }
 0x2c0   : > { %v10633_v0 = vpack.c.b16 %v10631_v56, %v10632_v2 }
 0x2c1   : > { %v2610_v41 = vmul.f32 1.442695, %v2417_v55  ;;  %v7660_v44 = vpop.eup %5401  ;;  %v10634_v55 = vld [vmem:[#allocation28_spill] sm:$0xff] }
 0x2c2   : > { %10630 = vst [vmem:[#allocation58_spill] sm:$0xff] %v7660_v44  ;;  %v7668_v8 = vadd.f32 %v7463_v40, %v10634_v55  ;;  %v3184_v56 = vpack.c.bf16 %v7660_v44, %v7660_v44 }
 0x2c3   : > { %5403 = vpow2.f32 %v2610_v41  ;;  %2200 = vmax.xlane.f32.xlu0 %v2199_v28  ;;  %2308 = vmax.xlane.f32.xlu2 %v2307_v27  ;;  %v10639_v27 = vld [vmem:[#allocation12_spill] sm:$0xff] }
 0x2c4   : > { %2287 = vmax.xlane.f32.xlu1 %v2286_v26  ;;  %5212 = vmatmul.msk.bf16.gmra.mxu2 %vm393_vm0, %v10633_v0  ;;  %10635 = vst [vmem:[#allocation65_spill] sm:$0xff] %v7668_v8  ;;  %v7675_v26 = vadd.f32 %v1393_v30, %v7095_v31  ;;  %v2079_v55 = vsel %vm1967_vm6, %v7668_v8, -inf  ;;  %v7686_v21 = vpop.f32.mrf.mxu2  ;;  %v2292_v31 = vsel %vm1967_vm6, %v7672_v47, -inf }
 0x2c6   : > { %v2168_v41 = vpop.xlane.xlu2 %2167  ;;  %v2264_v28 = vpop.xlane.xlu1 %2263  ;;  %10638 = vst [vmem:[#allocation43_spill] sm:$0xff] %v7675_v26  ;;  %v2088_v30 = vsel %vm1967_vm6, %v7675_v26, -inf }
 0x2c7   : > { %v2450_v35 = vsub.f32 %v10639_v27, %v2264_v28  ;;  %v1672_v2 = vpop.f32.mrf.mxu3  ;;  %v3738_v28 = vunpack.c.l.b16 %v3184_v56  ;;  %v10643_v56 = vld [vmem:[#allocation59_spill] sm:$0xff] }
 0x2c9   : > { %v7680_v0 = vpop.eup %5403  ;;  %v2676_v20 = vmul.f32 1.442695, %v2450_v35  ;;  %v7699_v35 = vld [vmem:[%s10150_s3 + $0x88] sm:$0xff] }
 0x2ca   : > { %10640 = vst [vmem:[#allocation42_spill] sm:$0xff] %v7680_v0  ;;  %v3185_v40 = vpack.c.bf16 %v7680_v0, %v7680_v0  ;;  %v7694_v0 = vadd.f32 %v7595_v49, %v7326_v4 }
 0x2cb   : > { %2080 = vmax.xlane.f32.xlu0 %v2079_v55  ;;  %2089 = vmax.xlane.f32.xlu2 %v2088_v30  ;;  %5405 = vpow2.f32 %v2676_v20  ;;  %v7702_v55 = vadd.f32 %v7699_v35, %v1672_v2 }
 0x2cc   : > { %v3739_v27 = vunpack.c.l.b16 %v3185_v40  ;;  %2293 = vmax.xlane.f32.xlu1 %v2292_v31  ;;  %10641 = vst [vmem:[#allocation53_spill] sm:$0xff] %v7694_v0  ;;  %v10644_v31 = vld [vmem:[#allocation13_spill] sm:$0xff]  ;;  %v2202_v20 = vsel %vm1967_vm6, %v7694_v0, -inf }
 0x2cd   : > { %10642 = vst [vmem:[#allocation52_spill] sm:$0xff] %v7702_v55  ;;  %v2418_v30 = vsub.f32 %v10644_v31, %v2168_v41  ;;  %v2211_v2 = vsel %vm1967_vm6, %v7702_v55, -inf  ;;  %v7717_v41 = vpop.xlane.xlu0 %2005 }
 0x2ce   : > { %v3770_v44 = vpack.c.b16 %v3739_v27, %v3738_v28  ;;  %v2267_v57 = vpop.xlane.xlu2 %2266  ;;  %v2000_v14 = vpop.xlane.xlu1 %1999  ;;  %v10645_v28 = vld [vmem:[#allocation29_spill] sm:$0xff] }
 0x2cf   : > { %v2451_v40 = vsub.f32 %v10643_v56, %v2267_v57  ;;  %v7706_v26 = vpop.f32.mrf.mxu3  ;;  %v2739_v27 = vsel %vm1967_vm6, %v10645_v28, 0.0  ;;  %v2612_v47 = vmul.f32 1.442695, %v2418_v30  ;;  %v10647_v56 = vld [vmem:[#allocation74_spill] sm:$0xff]  ;;  %v7733_v28 = vadd.f32 %v7539_v60, %v10636_v63 }
 0x2d0   : > { %5278 = vmatmul.msk.bf16.vlgmr.msra.gmra.mxu3 %vm1967_vm6, %v3770_v44  ;;  %v7719_v44 = vpop.f32.mrf.mxu2 }
 0x2d1   : > { %v2678_v49 = vmul.f32 1.442695, %v2451_v40  ;;  %v7715_v57 = vpop.eup %5405  ;;  %v10648_v40 = vld [vmem:[#allocation73_spill] sm:$0xff]  ;;  %10652 = vst [vmem:[#allocation31_spill] sm:$0xff] %v7733_v28  ;;  %v2196_v63 = vsel %vm1967_vm6, %v7733_v28, -inf }
 0x2d2   : > { %10646 = vst [vmem:[#allocation63_spill] sm:$0xff] %v7715_v57  ;;  %v10649_v31 = vpack.c.b16 %v10647_v56, %v10648_v40  ;;  %v3218_v55 = vpack.c.bf16 %v7715_v57, %v7715_v57  ;;  %v10654_v56 = vld [vmem:[#allocation56_spill] sm:$0xff] }
 0x2d3   : > { %5407 = vpow2.f32 %v2678_v49  ;;  %2203 = vmax.xlane.f32.xlu0 %v2202_v20  ;;  %2212 = vmax.xlane.f32.xlu2 %v2211_v2  ;;  %v7727_v49 = vadd.f32 %v7569_v61, %v7406_v11  ;;  %v2362_v40 = vsub.f32 %v10654_v56, %v2000_v14  ;;  %v10656_v61 = vld [vmem:[#allocation9_spill] sm:$0xff] }
 0x2d4   : > { %2740 = vadd.xlane.f32.xlu1 %v2739_v27  ;;  %5213 = vmatmul.msk.bf16.gmra.mxu2 %vm393_vm0, %v10649_v31  ;;  %v10653_v27 = vld [vmem:[#allocation17_spill] sm:$0xff]  ;;  %5409 = vpow2.f32 %v2612_v47  ;;  %v2453_v8 = vsub.f32 %v10656_v61, %v2273_v36  ;;  %v7763_v61 = vld [vmem:[%s10150_s3 + $0x80] sm:$0xff] }
 0x2d5   : > { %10650 = vst [vmem:[#allocation62_spill] sm:$0xff] %v7727_v49  ;;  %v2301_v14 = vsel %vm1967_vm6, %v7727_v49, -inf  ;;  %v10665_v49 = vld [vmem:[#allocation15_spill] sm:$0xff] }
 0x2d6   : > { %v7729_v20 = vpop.xlane.xlu2 %2047  ;;  %v2171_v30 = vpop.xlane.xlu1 %2170  ;;  %v2682_v56 = vmul.f32 1.442695, %v2453_v8 }
 0x2d7   : > { %10651 = vst [vmem:[#allocation66_spill] sm:$0xff] %v7729_v20  ;;  %v2419_v2 = vsub.f32 %v10653_v27, %v2171_v30  ;;  %v1677_v31 = vpop.f32.mrf.mxu3  ;;  %v7745_v20 = vld [vmem:[%s10150_s3 + $0x98] sm:$0xff]  ;;  %v2500_v30 = vmul.f32 1.442695, %v2362_v40  ;;  %v3969_v27 = vunpack.c.l.b16 %v3218_v55 }
 0x2d8   : > { %v7748_v60 = vadd.f32 %v7745_v20, %v1677_v31  ;;  %v10661_v55 = vld [vmem:[#allocation21_spill] sm:$0xff] }
 0x2d9   : > { %v7739_v0 = vpop.eup %5407  ;;  %v2614_v42 = vmul.f32 1.442695, %v2419_v2 }
 0x2da   : > { %10655 = vst [vmem:[#allocation3_spill] sm:$0xff] %v7739_v0  ;;  %v3219_v47 = vpack.c.bf16 %v7739_v0, %v7739_v0  ;;  %v2217_v36 = vsel %vm1967_vm6, %v7748_v60, -inf  ;;  %v7758_v31 = vpop.eup %5409 }
 0x2db   : > { %10657 = vst [vmem:[#allocation6_spill] sm:$0xff] %v7748_v60  ;;  %2302 = vmax.xlane.f32.xlu0 %v2301_v14  ;;  %5411 = vpow2.f32 %v2614_v42  ;;  %2218 = vmax.xlane.f32.xlu2 %v2217_v36  ;;  %v7767_v14 = vadd.f32 %v7763_v61, %v7602_v39  ;;  %v7771_v42 = vadd.f32 %v7523_v9, %v7326_v4  ;;  %v10662_v36 = vld [vmem:[#allocation20_spill] sm:$0xff]  ;;  %v10664_v9 = vld [vmem:[#allocation25_spill] sm:$0xff] }
 0x2dc   : > { %2197 = vmax.xlane.f32.xlu1 %v2196_v63  ;;  %v3970_v2 = vunpack.c.l.b16 %v3219_v47  ;;  %10658 = vst [vmem:[#allocation68_spill] sm:$0xff] %v7758_v31  ;;  %5413 = vpow2.f32 %v2500_v30  ;;  %v7774_v63 = vpop.f32.mrf.mxu2  ;;  %v3186_v39 = vpack.c.bf16 %v7758_v31, %v7758_v31 }
 0x2dd   : > { %10659 = vst [vmem:[#allocation67_spill] sm:$0xff] %v7767_v14  ;;  %5415 = vpow2.f32 %v2682_v56  ;;  %v2304_v30 = vsel %vm1967_vm6, %v7767_v14, -inf  ;;  %v2298_v56 = vsel %vm1967_vm6, %v7771_v42, -inf }
 0x2de   : > { %v2177_v57 = vpop.xlane.xlu0 %2176  ;;  %v2003_v0 = vpop.xlane.xlu2 %2002  ;;  %v4000_v40 = vpack.c.b16 %v3970_v2, %v3969_v27  ;;  %10660 = vst [vmem:[#allocation7_spill] sm:$0xff] %v7771_v42 }
 0x2df   : > { %v2363_v8 = vsub.f32 %v10661_v55, %v2003_v0  ;;  %v2270_v47 = vpop.xlane.xlu1 %2269  ;;  %v7777_v28 = vpop.f32.mrf.mxu3  ;;  %v2368_v0 = vsub.f32 %v10665_v49, %v10664_v9  ;;  %v3740_v49 = vunpack.c.l.b16 %v3186_v39  ;;  %v7811_v39 = vld [vmem:[%s10150_s3 + $0x90] sm:$0xff] }
 0x2e0   : > { %v2452_v60 = vsub.f32 %v10662_v36, %v2270_v47  ;;  %5295 = vmatmul.msk.bf16.gmra.mxu0 %vm1967_vm6, %v4000_v40  ;;  %v2763_v40 = vsel %vm1967_vm6, %v7584_v19, 0.0 }
 0x2e1   : > { %v2502_v27 = vmul.f32 1.442695, %v2363_v8  ;;  %v7782_v2 = vpop.eup %5411  ;;  %v1932_v8 = vpop.f32.mrf.mxu0  ;;  %v2512_v9 = vmul.f32 1.442695, %v2368_v0 }
 0x2e2   : > { %10663 = vst [vmem:[#allocation5_spill] sm:$0xff] %v7782_v2  ;;  %v2680_v55 = vmul.f32 1.442695, %v2452_v60  ;;  %v3187_v47 = vpack.c.bf16 %v7782_v2, %v7782_v2  ;;  %v7794_v36 = vpop.eup %5413  ;;  %v7814_v0 = vadd.f32 %v7811_v39, %v1932_v8 }
 0x2e3   : > { %2305 = vmax.xlane.f32.xlu0 %v2304_v30  ;;  %5417 = vpow2.f32 %v2502_v27  ;;  %2764 = vadd.xlane.f32.xlu2 %v2763_v40  ;;  %10666 = vst [vmem:[#allocation70_spill] sm:$0xff] %v7794_v36  ;;  %v5893_v30 = vld [vmem:[%s10150_s3 + $0x38] sm:$0xff]  ;;  %v7806_v27 = vpop.eup %5415  ;;  %v3130_v40 = vpack.c.bf16 %v7794_v36, %v7794_v36  ;;  %v7846_v36 = vadd.f32 %v7763_v61, %v7648_v48 }
 0x2e4   : > { %2299 = vmax.xlane.f32.xlu1 %v2298_v56  ;;  %5419 = vpow2.f32 %v2680_v55  ;;  %v3741_v60 = vunpack.c.l.b16 %v3187_v47  ;;  %v7800_v2 = vadd.f32 %v5893_v30, %v7546_v3  ;;  %10669 = vst [vmem:[#allocation14_spill] sm:$0xff] %v7806_v27  ;;  %v7818_v55 = vadd.f32 %v7650_v29, %v7200_v17  ;;  %v10672_v30 = vld [vmem:[#allocation22_spill] sm:$0xff]  ;;  %v7830_v42 = vpop.f32.mrf.mxu2 }
 0x2e5   : > { %10670 = vst [vmem:[#allocation72_spill] sm:$0xff] %v7814_v0  ;;  %5421 = vpow2.f32 %v2512_v9  ;;  %v3221_v8 = vpack.c.bf16 %v7806_v27, %v7806_v27 }
 0x2e6   : > { %10667 = vst [vmem:[#allocation69_spill] sm:$0xff] %v7800_v2  ;;  %v7802_v31 = vpop.xlane.xlu0 %2179  ;;  %v7804_v19 = vpop.xlane.xlu2 %2056  ;;  %v3771_v47 = vpack.c.b16 %v3741_v60, %v3740_v49  ;;  %v2085_v17 = vsel %vm1967_vm6, %v7800_v2, -inf  ;;  %v2310_v60 = vsel %vm1967_vm6, %v7814_v0, -inf  ;;  %v7853_v0 = vld [vmem:[%s10150_s3 + $0xa8] sm:$0xff] }
 0x2e7   : > { %10668 = vst [vmem:[#allocation44_spill] sm:$0xff] %v7804_v19  ;;  %v7820_v3 = vpop.xlane.xlu1 %2050  ;;  %v1682_v56 = vpop.f32.mrf.mxu3  ;;  %v2421_v19 = vsub.f32 %v10672_v30, %v2177_v57  ;;  %v2094_v57 = vsel %vm1967_vm6, %v7818_v55, -inf  ;;  %v3290_v30 = vunpack.c.l.b16 %v3130_v40 }
 0x2e8   : > { %10671 = vst [vmem:[#allocation71_spill] sm:$0xff] %v7818_v55  ;;  %5279 = vmatmul.msk.bf16.gmra.mxu3 %vm1967_vm6, %v3771_v47  ;;  %v3972_v55 = vunpack.c.l.b16 %v3221_v8 }
 0x2e9   : > { %v7826_v14 = vpop.eup %5417  ;;  %v2618_v47 = vmul.f32 1.442695, %v2421_v19 }
 0x2ea   : > { %10673 = vst [vmem:[#allocation28_spill] sm:$0xff] %v7826_v14  ;;  %v7834_v29 = vpop.eup %5419  ;;  %v3131_v49 = vpack.c.bf16 %v7826_v14, %v7826_v14 }
 0x2eb   : > { %10674 = vst [vmem:[#allocation8_spill] sm:$0xff] %v7834_v29  ;;  %2086 = vmax.xlane.f32.xlu0 %v2085_v17  ;;  %v3220_v9 = vpack.c.bf16 %v7834_v29, %v7834_v29  ;;  %2311 = vmax.xlane.f32.xlu2 %v2310_v60  ;;  %5423 = vpow2.f32 %v2618_v47 }
 0x2ec   : > { %2095 = vmax.xlane.f32.xlu1 %v2094_v57  ;;  %v3291_v27 = vunpack.c.l.b16 %v3131_v49  ;;  %v7856_v57 = vadd.f32 %v7853_v0, %v1682_v56  ;;  %v7858_v49 = vpop.eup %5421 }
 0x2ed   : > { %v3971_v14 = vunpack.c.l.b16 %v3220_v9  ;;  %v2208_v9 = vsel %vm1967_vm6, %v7846_v36, -inf  ;;  %v2784_v56 = vsel %vm1967_vm6, %v7858_v49, 0.0 }
 0x2ee   : > { %v2279_v2 = vpop.xlane.xlu0 %2278  ;;  %v7848_v17 = vpop.xlane.xlu2 %2011  ;;  %10675 = vst [vmem:[#allocation12_spill] sm:$0xff] %v7856_v57  ;;  %v3317_v40 = vpack.c.b16 %v3291_v27, %v3290_v30  ;;  %v2223_v27 = vsel %vm1967_vm6, %v7856_v57, -inf  ;;  %v7914_v57 = vadd.f32 %v7830_v42, %v7326_v4 }
 0x2ef   : > { %v2174_v19 = vpop.xlane.xlu1 %2173  ;;  %v7861_v60 = vpop.f32.mrf.mxu3  ;;  %v4001_v29 = vpack.c.b16 %v3972_v55, %v3971_v14  ;;  %v5896_v14 = vld [vmem:[%s10150_s3 + $0x48] sm:$0xff] }
 0x2f0   : > { %v2420_v48 = vsub.f32 %v7347_v6, %v2174_v19  ;;  %5251 = vmatmul.msk.bf16.gmra.mxu1 %vm1967_vm6, %v3317_v40  ;;  %v1934_v6 = vpop.f32.mrf.mxu0  ;;  %v1410_v30 = vpop.f32.mrf.mxu2  ;;  %v7875_v55 = vadd.f32 %v5896_v14, %v7622_v24  ;;  %v7886_v40 = vadd.f32 %v7774_v63, %v7449_v22 }
 0x2f1   : > { %5296 = vmatmul.msk.bf16.gmra.mxu0 %vm1967_vm6, %v4001_v29  ;;  %v7879_v47 = vpop.eup %5423  ;;  %v7882_v19 = vadd.f32 %v7745_v20, %v1934_v6 }
 0x2f2   : > { %v2616_v8 = vmul.f32 1.442695, %v2420_v48  ;;  %10677 = vst [vmem:[#allocation13_spill] sm:$0xff] %v7879_v47  ;;  %v3189_v14 = vpack.c.bf16 %v7879_v47, %v7879_v47  ;;  %v2091_v6 = vsel %vm1967_vm6, %v7875_v55, -inf  ;;  %v2103_v63 = vsel %vm1967_vm6, %v7886_v40, -inf }
 0x2f3   : > { %2209 = vmax.xlane.f32.xlu0 %v2208_v9  ;;  %2224 = vmax.xlane.f32.xlu2 %v2223_v27  ;;  %10678 = vst [vmem:[#allocation29_spill] sm:$0xff] %v7886_v40  ;;  %v2422_v9 = vsub.f32 %v7315_v23, %v7802_v31  ;;  %v2313_v23 = vsel %vm1967_vm6, %v7882_v19, -inf  ;;  %v10681_v40 = vld [vmem:[#allocation10_spill] sm:$0xff] }
 0x2f4   : > { %2785 = vadd.xlane.f32.xlu1 %v2784_v56  ;;  %5425 = vpow2.f32 %v2616_v8  ;;  %v2455_v56 = vsub.f32 %v7338_v54, %v2279_v2  ;;  %v7908_v2 = vadd.f32 %v7811_v39, %v7706_v26  ;;  %v3743_v47 = vunpack.c.l.b16 %v3189_v14 }
 0x2f6   : > { %v7877_v29 = vpop.xlane.xlu0 %2059  ;;  %v2183_v48 = vpop.xlane.xlu2 %2182  ;;  %v2686_v31 = vmul.f32 1.442695, %v2455_v56  ;;  %v2214_v4 = vsel %vm1967_vm6, %v7908_v2, -inf }
 0x2f7   : > { %10676 = vst [vmem:[#allocation59_spill] sm:$0xff] %v7877_v29  ;;  %v7888_v8 = vpop.xlane.xlu1 %2053  ;;  %v2423_v24 = vsub.f32 %v7392_v34, %v2183_v48  ;;  %v1687_v27 = vpop.f32.mrf.mxu3  ;;  %v2620_v34 = vmul.f32 1.442695, %v2422_v9  ;;  %v7917_v9 = vadd.f32 %v1410_v30, %v7406_v11  ;;  %v2106_v11 = vsel %vm1967_vm6, %v7914_v57, -inf }
 0x2f8   : > { %v1413_v48 = vpop.f32.mrf.mxu2 }
 0x2f9   : > { %v2622_v22 = vmul.f32 1.442695, %v2423_v24  ;;  %10680 = vst [vmem:[#allocation73_spill] sm:$0xff] %v7917_v9  ;;  %v2109_v42 = vsel %vm1967_vm6, %v7917_v9, -inf }
 0x2fa   : > { %v7898_v29 = vpop.eup %5425 }
 0x2fb   : > { %10679 = vst [vmem:[#allocation74_spill] sm:$0xff] %v7898_v29  ;;  %2092 = vmax.xlane.f32.xlu0 %v2091_v6  ;;  %v3188_v54 = vpack.c.bf16 %v7898_v29, %v7898_v29  ;;  %2104 = vmax.xlane.f32.xlu2 %v2103_v63  ;;  %5427 = vpow2.f32 %v2622_v22  ;;  %v7942_v22 = vadd.f32 %v7763_v61, %v1413_v48  ;;  %v10687_v48 = vld [vmem:[#allocation47_spill] sm:$0xff] }
 0x2fc   : > { %2314 = vmax.xlane.f32.xlu1 %v2313_v23  ;;  %5429 = vpow2.f32 %v2620_v34  ;;  %v7947_v34 = vld [vmem:[%s10150_s3 + $0xb8] sm:$0xff] }
 0x2fd   : > { %v3742_v6 = vunpack.c.l.b16 %v3188_v54  ;;  %v2364_v54 = vsub.f32 %v10681_v40, %v7717_v41  ;;  %5431 = vpow2.f32 %v2686_v31  ;;  %10685 = vst [vmem:[#allocation21_spill] sm:$0xff] %v7942_v22  ;;  %v7950_v31 = vadd.f32 %v7947_v34, %v1687_v27 }
 0x2fe   : > { %v7910_v24 = vpop.xlane.xlu0 %2014  ;;  %v7919_v63 = vpop.xlane.xlu2 %2185 }
 0x2ff   : > { %v2276_v56 = vpop.xlane.xlu1 %2275  ;;  %v1690_v23 = vpop.f32.mrf.mxu3  ;;  %v3772_v29 = vpack.c.b16 %v3743_v47, %v3742_v6  ;;  %v2504_v30 = vmul.f32 1.442695, %v2364_v54  ;;  %10686 = vst [vmem:[#allocation20_spill] sm:$0xff] %v7950_v31  ;;  %v2377_v54 = vsub.f32 %v10687_v48, %v7654_v43  ;;  %v2112_v43 = vsel %vm1967_vm6, %v7942_v22, -inf  ;;  %v7979_v48 = vld [vmem:[%s10150_s3 + $0xa0] sm:$0xff] }
 0x300   : > { %v2454_v26 = vsub.f32 %v7422_v37, %v2276_v56  ;;  %v7952_v56 = vpop.f32.mrf.mxu2 }
 0x301   : > { %5280 = vmatmul.msk.bf16.gmra.mxu3 %vm1967_vm6, %v3772_v29  ;;  %v7931_v37 = vpop.eup %5427  ;;  %v7937_v29 = vadd.f32 %v7686_v21, %v7253_v53 }
 0x302   : > { %v2684_v14 = vmul.f32 1.442695, %v2454_v26  ;;  %10682 = vst [vmem:[#allocation17_spill] sm:$0xff] %v7931_v37  ;;  %v7933_v41 = vpop.eup %5429  ;;  %v3191_v53 = vpack.c.bf16 %v7931_v37, %v7931_v37 }
 0x303   : > { %2215 = vmax.xlane.f32.xlu0 %v2214_v4  ;;  %2107 = vmax.xlane.f32.xlu2 %v2106_v11  ;;  %10683 = vst [vmem:[#allocation56_spill] sm:$0xff] %v7933_v41  ;;  %v7939_v40 = vpop.eup %5431  ;;  %v3190_v27 = vpack.c.bf16 %v7933_v41, %v7933_v41 }
 0x304   : > { %2110 = vmax.xlane.f32.xlu1 %v2109_v42  ;;  %5433 = vpow2.f32 %v2684_v14  ;;  %10684 = vst [vmem:[#allocation9_spill] sm:$0xff] %v7939_v40  ;;  %v3223_v4 = vpack.c.bf16 %v7939_v40, %v7939_v40  ;;  %v2097_v42 = vsel %vm1967_vm6, %v7937_v29, -inf }
 0x305   : > { %5435 = vpow2.f32 %v2504_v30  ;;  %v3744_v37 = vunpack.c.l.b16 %v3190_v27 }
 0x306   : > { %v2285_v47 = vpop.xlane.xlu0 %2284  ;;  %v7960_v14 = vpop.xlane.xlu2 %2191 }
 0x307   : > { %v2009_v6 = vpop.xlane.xlu1 %2008  ;;  %v2457_v21 = vsub.f32 %v7456_v51, %v2285_v47  ;;  %v1692_v61 = vpop.f32.mrf.mxu3 }
 0x308   : > { %v2365_v26 = vsub.f32 %v7460_v52, %v2009_v6  ;;  %v2229_v52 = vsel %vm1967_vm6, %v7950_v31, -inf  ;;  %v3745_v6 = vunpack.c.l.b16 %v3191_v53  ;;  %v2367_v53 = vsub.f32 %v7418_v38, %v7910_v24  ;;  %v1418_v22 = vpop.f32.mrf.mxu2 }
 0x309   : > { %v2690_v47 = vmul.f32 1.442695, %v2457_v21 }
 0x30a   : > { %v2506_v11 = vmul.f32 1.442695, %v2365_v26  ;;  %v7968_v51 = vpop.eup %5433  ;;  %v2530_v26 = vmul.f32 1.442695, %v2377_v54  ;;  %v7994_v54 = vld [vmem:[%s10150_s3 + $0xc0] sm:$0xff] }
 0x30b   : > { %10688 = vst [vmem:[#allocation25_spill] sm:$0xff] %v7968_v51  ;;  %2098 = vmax.xlane.f32.xlu0 %v2097_v42  ;;  %v3222_v30 = vpack.c.bf16 %v7968_v51, %v7968_v51  ;;  %2230 = vmax.xlane.f32.xlu2 %v2229_v52  ;;  %v7983_v42 = vadd.f32 %v7979_v48, %v7777_v28  ;;  %v3974_v51 = vunpack.c.l.b16 %v3223_v4  ;;  %v7987_v21 = vpop.eup %5435  ;;  %v8002_v28 = vld [vmem:[%s10150_s3 + $0xc8] sm:$0xff] }
 0x30c   : > { %2113 = vmax.xlane.f32.xlu1 %v2112_v43  ;;  %5437 = vpow2.f32 %v2506_v11  ;;  %v7997_v11 = vadd.f32 %v7994_v54, %v1690_v23  ;;  %v8005_v27 = vadd.f32 %v8002_v28, %v1692_v61  ;;  %v3773_v52 = vpack.c.b16 %v3745_v6, %v3744_v37 }
 0x30d   : > { %v3973_v41 = vunpack.c.l.b16 %v3222_v30  ;;  %5439 = vpow2.f32 %v2690_v47  ;;  %v2366_v30 = vsub.f32 %v7341_v1, %v7848_v17  ;;  %v3132_v23 = vpack.c.bf16 %v7987_v21, %v7987_v21 }
 0x30e   : > { %v7985_v40 = vpop.xlane.xlu0 %2068  ;;  %10689 = vst [vmem:[#allocation15_spill] sm:$0xff] %v7997_v11  ;;  %5441 = vpow2.f32 %v2530_v26  ;;  %v2220_v61 = vsel %vm1967_vm6, %v7983_v42, -inf  ;;  %v2510_v37 = vmul.f32 1.442695, %v2367_v53  ;;  %v2232_v1 = vsel %vm1967_vm6, %v7997_v11, -inf  ;;  %v5901_v26 = vld [vmem:[%s10150_s3 + $0x60] sm:$0xff] }
 0x30f   : > { %10690 = vst [vmem:[#allocation22_spill] sm:$0xff] %v8005_v27  ;;  %v2282_v4 = vpop.xlane.xlu1 %2281  ;;  %v1695_v24 = vpop.f32.mrf.mxu3  ;;  %v4002_v43 = vpack.c.b16 %v3974_v51, %v3973_v41  ;;  %v2235_v17 = vsel %vm1967_vm6, %v8005_v27, -inf  ;;  %v2508_v47 = vmul.f32 1.442695, %v2366_v30  ;;  %v8032_v53 = vadd.f32 %v5901_v26, %v7719_v44  ;;  %v10695_v44 = vld [vmem:[#allocation18_spill] sm:$0xff] }
 0x310   : > { %v2456_v38 = vsub.f32 %v7501_v7, %v2282_v4  ;;  %v8018_v41 = vpop.xlane.xlu2 %2737 }
 0x311   : > { %5281 = vmatmul.msk.bf16.gmra.mxu3 %vm1967_vm6, %v3773_v52  ;;  %5297 = vmatmul.msk.bf16.gmra.mxu0 %vm1967_vm6, %v4002_v43  ;;  %10691 = vst [vmem:[#allocation10_spill] sm:$0xff] %v8018_v41 }
 0x312   : > { %v2688_v31 = vmul.f32 1.442695, %v2456_v38  ;;  %v8016_v7 = vpop.eup %5437  ;;  %v3292_v38 = vunpack.c.l.b16 %v3132_v23 }
 0x313   : > { %2221 = vmax.xlane.f32.xlu0 %v2220_v61  ;;  %v3133_v51 = vpack.c.bf16 %v8016_v7, %v8016_v7  ;;  %2233 = vmax.xlane.f32.xlu2 %v2232_v1  ;;  %v8026_v6 = vpop.eup %5439  ;;  %v10694_v1 = vld [vmem:[#allocation37_spill] sm:$0xff] }
 0x314   : > { %5443 = vpow2.f32 %v2688_v31  ;;  %2236 = vmax.xlane.f32.xlu1 %v2235_v17  ;;  %10692 = vst [vmem:[#allocation47_spill] sm:$0xff] %v8026_v6  ;;  %v8039_v31 = vld [vmem:[%s10150_s3 + $0xd0] sm:$0xff]  ;;  %v8046_v61 = vpop.eup %5441  ;;  %v2369_v17 = vsub.f32 %v10695_v44, %v10694_v1  ;;  %v1420_v44 = vpop.f32.mrf.mxu2 }
 0x315   : > { %v3293_v52 = vunpack.c.l.b16 %v3133_v51  ;;  %5445 = vpow2.f32 %v2510_v37  ;;  %v8042_v43 = vadd.f32 %v8039_v31, %v1695_v24  ;;  %v3225_v37 = vpack.c.bf16 %v8026_v6, %v8026_v6 }
 0x316   : > { %v8034_v4 = vpop.xlane.xlu0 %2071  ;;  %5447 = vpow2.f32 %v2508_v47  ;;  %v2385_v51 = vsub.f32 %v7495_v50, %v7985_v40  ;;  %v2100_v24 = vsel %vm1967_vm6, %v8032_v53, -inf  ;;  %v2811_v47 = vsel %vm1967_vm6, %v8046_v61, 0.0 }
 0x317   : > { %10693 = vst [vmem:[#allocation75_spill] sm:$0xff] %v8042_v43  ;;  %v8044_v30 = vpop.xlane.xlu1 %2062  ;;  %v8050_v26 = vpop.f32.mrf.mxu3  ;;  %v3318_v23 = vpack.c.b16 %v3293_v52, %v3292_v38  ;;  %v2238_v38 = vsel %vm1967_vm6, %v8042_v43, -inf  ;;  %v2514_v52 = vmul.f32 1.442695, %v2369_v17  ;;  %v3976_v11 = vunpack.c.l.b16 %v3225_v37  ;;  %v8086_v37 = vld [vmem:[%s10150_s3 + $0xe0] sm:$0xff] }
 0x318   : > { %v2546_v40 = vmul.f32 1.442695, %v2385_v51  ;;  %v2424_v51 = vsub.f32 %v7425_v62, %v7919_v63  ;;  %v2760_v62 = vsel %vm1967_vm6, %v7600_v58, 0.0  ;;  %v8102_v63 = vpop.f32.mrf.mxu1 }
 0x319   : > { %5252 = vmatmul.msk.bf16.gmra.mxu1 %vm1967_vm6, %v3318_v23  ;;  %v8069_v23 = vpop.xlane.xlu2 %2077  ;;  %5449 = vpow2.f32 %v2514_v52 }
 0x31a   : > { %v8056_v27 = vpop.eup %5443  ;;  %5451 = vpow2.f32 %v2546_v40  ;;  %v2624_v52 = vmul.f32 1.442695, %v2424_v51 }
 0x31b   : > { %10696 = vst [vmem:[#allocation37_spill] sm:$0xff] %v8056_v27  ;;  %v3224_v1 = vpack.c.bf16 %v8056_v27, %v8056_v27  ;;  %2101 = vmax.xlane.f32.xlu0 %v2100_v24  ;;  %2812 = vadd.xlane.f32.xlu2 %v2811_v47  ;;  %v8067_v50 = vpop.eup %5445  ;;  %v8076_v27 = vadd.f32 %v7811_v39, %v1418_v22  ;;  %v10699_v22 = vld [vmem:[#allocation16_spill] sm:$0xff] }
 0x31c   : > { %2239 = vmax.xlane.f32.xlu1 %v2238_v38  ;;  %v8073_v24 = vpop.eup %5447  ;;  %v3135_v17 = vpack.c.bf16 %v8067_v50, %v8067_v50  ;;  %10700 = vst [vmem:[#allocation16_spill] sm:$0xff] %v8102_v63 }
 0x31d   : > { %v3975_v6 = vunpack.c.l.b16 %v3224_v1  ;;  %10697 = vst [vmem:[#allocation18_spill] sm:$0xff] %v8076_v27 }
 0x31e   : > { %v8071_v41 = vpop.xlane.xlu0 %2194 }
 0x31f   : > { %v2066_v9 = vpop.xlane.xlu1 %2065  ;;  %v4003_v43 = vpack.c.b16 %v3976_v11, %v3975_v6  ;;  %v1700_v1 = vpop.f32.mrf.mxu3  ;;  %v2370_v11 = vsub.f32 %v10699_v22, %v7330_v13  ;;  %v3134_v6 = vpack.c.bf16 %v8073_v24, %v8073_v24  ;;  %v3295_v13 = vunpack.c.l.b16 %v3135_v17 }
 0x320   : > { %v2384_v47 = vsub.f32 %v7563_v10, %v2066_v9  ;;  %v8089_v39 = vadd.f32 %v8086_v37, %v1700_v1  ;;  %v2118_v10 = vsel %vm1967_vm6, %v8076_v27, -inf  ;;  %v8104_v40 = vpop.eup %5449 }
 0x321   : > { %5298 = vmatmul.msk.bf16.gmra.mxu0 %vm1967_vm6, %v4003_v43  ;;  %v2516_v43 = vmul.f32 1.442695, %v2370_v11  ;;  %v3294_v1 = vunpack.c.l.b16 %v3134_v6  ;;  %v8110_v22 = vpop.eup %5451  ;;  %v2386_v11 = vsub.f32 %v7521_v25, %v8034_v4  ;;  %v2745_v25 = vsel %vm1967_vm6, %v7371_v46, 0.0  ;;  %v10704_v4 = vld [vmem:[#allocation27_spill] sm:$0xff] }
 0x322   : > { %10698 = vst [vmem:[#allocation76_spill] sm:$0xff] %v8089_v39  ;;  %v2544_v38 = vmul.f32 1.442695, %v2384_v47  ;;  %v2244_v9 = vsel %vm1967_vm6, %v8089_v39, -inf  ;;  %v8106_v47 = vpop.f32.mrf.mxu2  ;;  %v8115_v39 = vpop.xlane.xlu2 %2083  ;;  %v3153_v6 = vpack.c.bf16 %v8110_v22, %v8110_v22 }
 0x323   : > { %2761 = vadd.xlane.f32.xlu0 %v2760_v62  ;;  %2119 = vmax.xlane.f32.xlu2 %v2118_v10  ;;  %10701 = vst [vmem:[#allocation77_spill] sm:$0xff] %v8110_v22  ;;  %v8113_v62 = vadd.f32 %v7745_v20, %v1420_v44  ;;  %v8120_v10 = vpop.f32.mrf.mxu0  ;;  %v2787_v20 = vsel %vm1967_vm6, %v8104_v40, 0.0  ;;  %v10746_v22 = vld [vmem:[#allocation33_spill] sm:$0xff] }
 0x324   : > { %2245 = vmax.xlane.f32.xlu1 %v2244_v9  ;;  %5453 = vpow2.f32 %v2544_v38  ;;  %v3319_v38 = vpack.c.b16 %v3295_v13, %v3294_v1 }
 0x325   : > { %10702 = vst [vmem:[#allocation78_spill] sm:$0xff] %v8113_v62  ;;  %5455 = vpow2.f32 %v2624_v52  ;;  %v2371_v52 = vsub.f32 %v10704_v4, %v7399_v16  ;;  %v3510_v16 = vunpack.c.l.b16 %v3153_v6  ;;  %v2426_v6 = vsub.f32 %v7470_v15, %v7960_v14 }
 0x326   : > { %v8108_v58 = vpop.xlane.xlu0 %2290  ;;  %5457 = vpow2.f32 %v2516_v43  ;;  %v2548_v43 = vmul.f32 1.442695, %v2386_v11  ;;  %v3137_v11 = vpack.c.bf16 %v8104_v40, %v8104_v40 }
 0x327   : > { %v2189_v51 = vpop.xlane.xlu1 %2188  ;;  %v2518_v27 = vmul.f32 1.442695, %v2371_v52  ;;  %v3136_v52 = vpack.c.bf16 %v7858_v49, %v7858_v49 }
 0x328   : > { %v2425_v17 = vsub.f32 %v7593_v5, %v2189_v51  ;;  %v2121_v5 = vsel %vm1967_vm6, %v8113_v62, -inf  ;;  %v8142_v51 = vld [vmem:[%s10150_s3 + $0xb0] sm:$0xff] }
 0x329   : > { %5253 = vmatmul.msk.bf16.gmra.mxu1 %vm1967_vm6, %v3319_v38  ;;  %v8146_v46 = vadd.f32 %v8142_v51, %v7861_v60  ;;  %v2427_v38 = vsub.f32 %v7559_v45, %v8071_v41 }
 0x32a   : > { %v2626_v9 = vmul.f32 1.442695, %v2425_v17  ;;  %v8127_v44 = vpop.eup %5453  ;;  %v8148_v17 = vpop.f32.mrf.mxu1 }
 0x32b   : > { %10703 = vst [vmem:[#allocation79_spill] sm:$0xff] %v8127_v44  ;;  %2788 = vadd.xlane.f32.xlu0 %v2787_v20  ;;  %v3152_v13 = vpack.c.bf16 %v8127_v44, %v8127_v44  ;;  %2122 = vmax.xlane.f32.xlu2 %v2121_v5  ;;  %v8137_v1 = vpop.eup %5455  ;;  %v10708_v5 = vld [vmem:[#allocation11_spill] sm:$0xff]  ;;  %v2226_v15 = vsel %vm1967_vm6, %v8146_v46, -inf  ;;  %v1939_v49 = vpop.f32.mrf.mxu0 }
 0x32c   : > { %5459 = vpow2.f32 %v2626_v9  ;;  %2746 = vadd.xlane.f32.xlu1 %v2745_v25  ;;  %10705 = vst [vmem:[#allocation27_spill] sm:$0xff] %v8137_v1  ;;  %v2376_v25 = vsub.f32 %v10708_v5, %v7638_v32  ;;  %v8160_v60 = vpop.eup %5457  ;;  %v3192_v40 = vpack.c.bf16 %v8137_v1, %v8137_v1  ;;  %v2459_v32 = vsub.f32 %v7589_v18, %v8108_v58 }
 0x32d   : > { %10706 = vst [vmem:[#allocation80_spill] sm:$0xff] %v8146_v46  ;;  %v3509_v9 = vunpack.c.l.b16 %v3152_v13  ;;  %5461 = vpow2.f32 %v2548_v43  ;;  %v2630_v5 = vmul.f32 1.442695, %v2427_v38  ;;  %v2742_v18 = vsel %vm1967_vm6, %v7351_v59, 0.0 }
 0x32e   : > { %10707 = vst [vmem:[#allocation81_spill] sm:$0xff] %v8148_v17  ;;  %v8152_v20 = vpop.xlane.xlu0 %2296  ;;  %v8158_v4 = vpop.xlane.xlu2 %2206  ;;  %v2790_v58 = vsel %vm1967_vm6, %v8160_v60, 0.0  ;;  %5463 = vpow2.f32 %v2518_v27  ;;  %v3297_v43 = vunpack.c.l.b16 %v3137_v11  ;;  %v3746_v38 = vunpack.c.l.b16 %v3192_v40 }
 0x32f   : > { %v2075_v44 = vpop.xlane.xlu1 %2074  ;;  %v8164_v17 = vpop.f32.mrf.mxu2  ;;  %v3541_v45 = vpack.c.b16 %v3510_v16, %v3509_v9  ;;  %v2694_v16 = vmul.f32 1.442695, %v2459_v32  ;;  %v3296_v59 = vunpack.c.l.b16 %v3136_v52  ;;  %v8193_v27 = vadd.f32 %v7853_v0, %v1939_v49  ;;  %v10713_v32 = vld [vmem:[#allocation39_spill] sm:$0xff] }
 0x330   : > { %v2387_v41 = vsub.f32 %v7620_v12, %v2075_v44  ;;  %v2528_v12 = vmul.f32 1.442695, %v2376_v25  ;;  %v2628_v44 = vmul.f32 1.442695, %v2426_v6  ;;  %v8186_v25 = vadd.f32 %v7699_v35, %v7952_v56  ;;  %v10714_v35 = vld [vmem:[#allocation23_spill] sm:$0xff] }
 0x331   : > { %5262 = vmatmul.msk.bf16.vlgmr.msra.gmra.mxu2 %vm1967_vm6, %v3541_v45  ;;  %10712 = vst [vmem:[#allocation84_spill] sm:$0xff] %v8193_v27  ;;  %v2388_v11 = vsub.f32 %v7536_v33, %v8069_v23  ;;  %v2372_v56 = vsub.f32 %v10714_v35, %v10713_v32  ;;  %v10716_v52 = vld [vmem:[#allocation51_spill] sm:$0xff]  ;;  %v10717_v33 = vld [vmem:[#allocation26_spill] sm:$0xff] }
 0x332   : > { %v8171_v13 = vpop.eup %5459  ;;  %v2550_v62 = vmul.f32 1.442695, %v2387_v41  ;;  %10710 = vst [vmem:[#allocation82_spill] sm:$0xff] %v8186_v25  ;;  %v2379_v23 = vsub.f32 %v10717_v33, %v7820_v3  ;;  %v2319_v3 = vsel %vm1967_vm6, %v8193_v27, -inf  ;;  %v10721_v35 = vld [vmem:[#allocation38_spill] sm:$0xff] }
 0x333   : > { %10709 = vst [vmem:[#allocation11_spill] sm:$0xff] %v8171_v13  ;;  %v3193_v14 = vpack.c.bf16 %v8171_v13, %v8171_v13  ;;  %2227 = vmax.xlane.f32.xlu0 %v2226_v15  ;;  %2743 = vadd.xlane.f32.xlu2 %v2742_v18  ;;  %v8190_v41 = vpop.eup %5461 }
 0x334   : > { %2791 = vadd.xlane.f32.xlu1 %v2790_v58  ;;  %5465 = vpow2.f32 %v2550_v62  ;;  %10711 = vst [vmem:[#allocation83_spill] sm:$0xff] %v8190_v41  ;;  %v3154_v18 = vpack.c.bf16 %v8190_v41, %v8190_v41  ;;  %v2534_v33 = vmul.f32 1.442695, %v2379_v23  ;;  %v10727_v23 = vld [vmem:[#allocation64_spill] sm:$0xff] }
 0x335   : > { %v3747_v9 = vunpack.c.l.b16 %v3193_v14  ;;  %5467 = vpow2.f32 %v2630_v5  ;;  %v8201_v5 = vpop.f32.mrf.mxu1  ;;  %v3320_v14 = vpack.c.b16 %v3297_v43, %v3296_v59 }
 0x336   : > { %v8188_v45 = vpop.xlane.xlu0 %2200  ;;  %5469 = vpow2.f32 %v2528_v12  ;;  %v8197_v62 = vpop.xlane.xlu2 %2308  ;;  %10715 = vst [vmem:[#allocation39_spill] sm:$0xff] %v8201_v5 }
 0x337   : > { %v2288_v6 = vpop.xlane.xlu1 %2287  ;;  %v3774_v40 = vpack.c.b16 %v3747_v9, %v3746_v38  ;;  %5471 = vpow2.f32 %v2628_v44  ;;  %v8205_v12 = vpop.eup %5463  ;;  %v2115_v44 = vsel %vm1967_vm6, %v8186_v25, -inf  ;;  %v10719_v38 = vld [vmem:[#allocation28_spill] sm:$0xff] }
 0x338   : > { %v2458_v15 = vsub.f32 %v10716_v52, %v2288_v6  ;;  %5473 = vpow2.f32 %v2694_v16  ;;  %v8211_v58 = vpop.f32.mrf.mxu2  ;;  %v2552_v16 = vmul.f32 1.442695, %v2388_v11  ;;  %v2769_v9 = vsel %vm1967_vm6, %v10719_v38, 0.0  ;;  %v10722_v52 = vld [vmem:[#allocation24_spill] sm:$0xff] }
 0x339   : > { %5282 = vmatmul.msk.bf16.gmra.mxu3 %vm1967_vm6, %v3774_v40  ;;  %5254 = vmatmul.msk.bf16.gmra.mxu1 %vm1967_vm6, %v3320_v14  ;;  %v2520_v6 = vmul.f32 1.442695, %v2372_v56  ;;  %v2373_v11 = vsub.f32 %v10722_v52, %v10721_v35  ;;  %v3138_v14 = vpack.c.bf16 %v8160_v60, %v8160_v60  ;;  %v3511_v38 = vunpack.c.l.b16 %v3154_v18 }
 0x33a   : > { %v2692_v49 = vmul.f32 1.442695, %v2458_v15  ;;  %v8216_v43 = vpop.eup %5465  ;;  %v3139_v60 = vpack.c.bf16 %v8205_v12, %v8205_v12 }
 0x33b   : > { %10718 = vst [vmem:[#allocation23_spill] sm:$0xff] %v8216_v43  ;;  %2116 = vmax.xlane.f32.xlu0 %v2115_v44  ;;  %v8222_v59 = vpop.eup %5467  ;;  %v3155_v40 = vpack.c.bf16 %v8216_v43, %v8216_v43  ;;  %2770 = vadd.xlane.f32.xlu2 %v2769_v9  ;;  %v8238_v9 = vadd.f32 %v7979_v48, %v8120_v10  ;;  %v2522_v1 = vmul.f32 1.442695, %v2373_v11  ;;  %v8256_v43 = vpop.f32.mrf.mxu3 }
 0x33c   : > { %10720 = vst [vmem:[#allocation51_spill] sm:$0xff] %v8222_v59  ;;  %2320 = vmax.xlane.f32.xlu1 %v2319_v3  ;;  %v8226_v32 = vpop.eup %5469  ;;  %5475 = vpow2.f32 %v2692_v49  ;;  %v3195_v3 = vpack.c.bf16 %v8222_v59, %v8222_v59  ;;  %v10726_v49 = vld [vmem:[#allocation65_spill] sm:$0xff] }
 0x33d   : > { %v8230_v15 = vpop.eup %5471  ;;  %v3512_v56 = vunpack.c.l.b16 %v3155_v40  ;;  %10725 = vst [vmem:[#allocation38_spill] sm:$0xff] %v8238_v9  ;;  %5477 = vpow2.f32 %v2552_v16  ;;  %v10728_v16 = vld [vmem:[#allocation49_spill] sm:$0xff]  ;;  %v2808_v11 = vsel %vm1967_vm6, %v8226_v32, 0.0 }
 0x33e   : > { %10723 = vst [vmem:[#allocation26_spill] sm:$0xff] %v8230_v15  ;;  %v2081_v44 = vpop.xlane.xlu0 %2080  ;;  %v8234_v13 = vpop.eup %5473  ;;  %5479 = vpow2.f32 %v2520_v6  ;;  %v3194_v10 = vpack.c.bf16 %v8230_v15, %v8230_v15  ;;  %v2461_v41 = vsub.f32 %v10728_v16, %v8152_v20 }
 0x33f   : > { %10724 = vst [vmem:[#allocation28_spill] sm:$0xff] %v8234_v13  ;;  %v2389_v35 = vsub.f32 %v10726_v49, %v2081_v44  ;;  %v8243_v52 = vpop.xlane.xlu2 %2089  ;;  %v2294_v5 = vpop.xlane.xlu1 %2293  ;;  %v3542_v40 = vpack.c.b16 %v3512_v56, %v3511_v38  ;;  %5481 = vpow2.f32 %v2534_v33  ;;  %v3227_v49 = vpack.c.bf16 %v8234_v13, %v8234_v13 }
 0x340   : > { %v2460_v18 = vsub.f32 %v10727_v23, %v2294_v5  ;;  %v8252_v44 = vpop.f32.mrf.mxu1  ;;  %v10730_v5 = vld [vmem:[#allocation54_spill] sm:$0xff]  ;;  %v2316_v33 = vsel %vm1967_vm6, %v8238_v9, -inf  ;;  %v3749_v56 = vunpack.c.l.b16 %v3195_v3  ;;  %v3748_v13 = vunpack.c.l.b16 %v3194_v10 }
 0x341   : > { %v2554_v59 = vmul.f32 1.442695, %v2389_v35  ;;  %10729 = vst [vmem:[#allocation24_spill] sm:$0xff] %v8252_v44  ;;  %5263 = vmatmul.msk.bf16.gmra.mxu2 %vm1967_vm6, %v3542_v40  ;;  %v2751_v6 = vsel %vm1967_vm6, %v10730_v5, 0.0  ;;  %v8267_v35 = vpop.f32.mrf.mxu2  ;;  %v3299_v40 = vunpack.c.l.b16 %v3139_v60  ;;  %v2698_v5 = vmul.f32 1.442695, %v2461_v41 }
 0x342   : > { %v8263_v38 = vpop.eup %5475  ;;  %v2696_v20 = vmul.f32 1.442695, %v2460_v18  ;;  %v8278_v18 = vld [vmem:[%s10150_s3 + $0xd8] sm:$0xff]  ;;  %v3775_v10 = vpack.c.b16 %v3749_v56, %v3748_v13 }
 0x343   : > { %10731 = vst [vmem:[#allocation65_spill] sm:$0xff] %v8263_v38  ;;  %5483 = vpow2.f32 %v2554_v59  ;;  %2809 = vadd.xlane.f32.xlu0 %v2808_v11  ;;  %v3226_v23 = vpack.c.bf16 %v8263_v38, %v8263_v38  ;;  %2317 = vmax.xlane.f32.xlu2 %v2316_v33  ;;  %v8271_v16 = vpop.eup %5477  ;;  %v8282_v3 = vadd.f32 %v8278_v18, %v8050_v26  ;;  %v3978_v33 = vunpack.c.l.b16 %v3227_v49 }
 0x344   : > { %2752 = vadd.xlane.f32.xlu1 %v2751_v6  ;;  %10732 = vst [vmem:[#allocation64_spill] sm:$0xff] %v8271_v16  ;;  %5485 = vpow2.f32 %v2522_v1  ;;  %v8273_v59 = vpop.eup %5479  ;;  %v3298_v6 = vunpack.c.l.b16 %v3138_v14  ;;  %v3156_v15 = vpack.c.bf16 %v8271_v16, %v8271_v16  ;;  %v10736_v14 = vld [vmem:[#allocation55_spill] sm:$0xff] }
 0x345   : > { %10733 = vst [vmem:[#allocation49_spill] sm:$0xff] %v8282_v3  ;;  %v3977_v60 = vunpack.c.l.b16 %v3226_v23  ;;  %5487 = vpow2.f32 %v2696_v20  ;;  %v8290_v38 = vpop.eup %5481  ;;  %v2429_v23 = vsub.f32 %v10736_v14, %v8188_v45  ;;  %v2241_v20 = vsel %vm1967_vm6, %v8282_v3, -inf  ;;  %v10745_v3 = vld [vmem:[#allocation45_spill] sm:$0xff] }
 0x346   : > { %v8284_v11 = vpop.xlane.xlu0 %2203  ;;  %v3321_v44 = vpack.c.b16 %v3299_v40, %v3298_v6  ;;  %5489 = vpow2.f32 %v2698_v5  ;;  %v2796_v40 = vsel %vm1967_vm6, %v8273_v59, 0.0  ;;  %v2817_v45 = vsel %vm1967_vm6, %v8290_v38, 0.0  ;;  %v1705_v5 = vpop.f32.mrf.mxu3 }
 0x347   : > { %v8286_v1 = vpop.xlane.xlu2 %2212  ;;  %v8288_v41 = vpop.xlane.xlu1 %2740  ;;  %v4004_v9 = vpack.c.b16 %v3978_v33, %v3977_v60  ;;  %v3513_v6 = vunpack.c.l.b16 %v3156_v15  ;;  %v8317_v33 = vadd.f32 %v7979_v48, %v8106_v47  ;;  %v8328_v15 = vld [vmem:[%s10150_s3 + $0xf0] sm:$0xff]  ;;  %v2374_v27 = vsub.f32 %v10746_v22, %v10745_v3 }
 0x348   : > { %10734 = vst [vmem:[#allocation54_spill] sm:$0xff] %v8288_v41  ;;  %v8299_v49 = vpop.f32.mrf.mxu1  ;;  %v10740_v41 = vld [vmem:[#allocation50_spill] sm:$0xff] }
 0x349   : > { %v8294_v26 = vpop.eup %5483  ;;  %5283 = vmatmul.msk.bf16.gmra.mxu3 %vm1967_vm6, %v3775_v10  ;;  %10737 = vst [vmem:[#allocation55_spill] sm:$0xff] %v8299_v49  ;;  %5255 = vmatmul.msk.bf16.gmra.mxu1 %vm1967_vm6, %v3321_v44  ;;  %v8319_v10 = vpop.f32.mrf.mxu2 }
 0x34a   : > { %10735 = vst [vmem:[#allocation85_spill] sm:$0xff] %v8294_v26  ;;  %v3157_v13 = vpack.c.bf16 %v8294_v26, %v8294_v26  ;;  %5299 = vmatmul.msk.bf16.gmra.mxu0 %vm1967_vm6, %v4004_v9  ;;  %v8307_v56 = vpop.eup %5485  ;;  %v2634_v9 = vmul.f32 1.442695, %v2429_v23  ;;  %v10741_v26 = vld [vmem:[#allocation4_spill] sm:$0xff]  ;;  %v8331_v23 = vadd.f32 %v8328_v15, %v1705_v5  ;;  %v3140_v5 = vpack.c.bf16 %v8273_v59, %v8273_v59 }
 0x34b   : > { %2242 = vmax.xlane.f32.xlu0 %v2241_v20  ;;  %2818 = vadd.xlane.f32.xlu2 %v2817_v45  ;;  %v8313_v44 = vpop.eup %5487  ;;  %v2375_v16 = vsub.f32 %v10741_v26, %v10740_v41  ;;  %v3141_v47 = vpack.c.bf16 %v8307_v56, %v8307_v56  ;;  %v10743_v41 = vld [vmem:[#allocation62_spill] sm:$0xff] }
 0x34c   : > { %2797 = vadd.xlane.f32.xlu1 %v2796_v40  ;;  %v3514_v60 = vunpack.c.l.b16 %v3157_v13  ;;  %10738 = vst [vmem:[#allocation86_spill] sm:$0xff] %v8313_v44  ;;  %v8321_v20 = vpop.eup %5489  ;;  %v8337_v40 = vpop.f32.mrf.mxu0  ;;  %v3228_v45 = vpack.c.bf16 %v8313_v44, %v8313_v44  ;;  %5491 = vpow2.f32 %v2634_v9  ;;  %v2124_v44 = vsel %vm1967_vm6, %v8317_v33, -inf }
 0x34d   : > { %10739 = vst [vmem:[#allocation87_spill] sm:$0xff] %v8321_v20  ;;  %v3229_v25 = vpack.c.bf16 %v8321_v20, %v8321_v20  ;;  %v2526_v46 = vmul.f32 1.442695, %v2375_v16  ;;  %v3301_v9 = vunpack.c.l.b16 %v3141_v47  ;;  %v10749_v16 = vld [vmem:[#allocation41_spill] sm:$0xff]  ;;  %v3300_v20 = vunpack.c.l.b16 %v3140_v5 }
 0x34e   : > { %v2303_v14 = vpop.xlane.xlu0 %2302  ;;  %v3543_v49 = vpack.c.b16 %v3514_v60, %v3513_v6  ;;  %10742 = vst [vmem:[#allocation50_spill] sm:$0xff] %v8331_v23  ;;  %v10744_v6 = vld [vmem:[#allocation31_spill] sm:$0xff] }
 0x34f   : > { %v8333_v13 = vpop.xlane.xlu2 %2218  ;;  %v2198_v48 = vpop.xlane.xlu1 %2197  ;;  %v2463_v26 = vsub.f32 %v10743_v41, %v2303_v14  ;;  %v2250_v14 = vsel %vm1967_vm6, %v8331_v23, -inf  ;;  %v3979_v41 = vunpack.c.l.b16 %v3228_v45  ;;  %v3980_v23 = vunpack.c.l.b16 %v3229_v25 }
 0x350   : > { %v2428_v60 = vsub.f32 %v10744_v6, %v2198_v48  ;;  %v10747_v48 = vld [vmem:[#allocation48_spill] sm:$0xff]  ;;  %v8356_v3 = vpop.f32.mrf.mxu1  ;;  %v2524_v6 = vmul.f32 1.442695, %v2374_v27  ;;  %v10751_v27 = vld [vmem:[#allocation53_spill] sm:$0xff]  ;;  %v3322_v5 = vpack.c.b16 %v3301_v9, %v3300_v20 }
 0x351   : > { %5264 = vmatmul.msk.bf16.gmra.mxu2 %vm1967_vm6, %v3543_v49  ;;  %v2748_v22 = vsel %vm1967_vm6, %v10747_v48, 0.0  ;;  %10748 = vst [vmem:[#allocation4_spill] sm:$0xff] %v8356_v3  ;;  %v2702_v59 = vmul.f32 1.442695, %v2463_v26  ;;  %v8360_v49 = vadd.f32 %v7853_v0, %v8164_v17  ;;  %v8368_v26 = vadd.f32 %v7947_v34, %v8267_v35  ;;  %v8374_v17 = vpop.f32.mrf.mxu2 }
 0x352   : > { %v2632_v63 = vmul.f32 1.442695, %v2428_v60  ;;  %v2390_v60 = vsub.f32 %v10749_v16, %v8115_v39  ;;  %v8364_v48 = vpop.eup %5491  ;;  %v10753_v39 = vld [vmem:[#allocation7_spill] sm:$0xff]  ;;  %v4005_v25 = vpack.c.b16 %v3980_v23, %v3979_v41 }
 0x353   : > { %2125 = vmax.xlane.f32.xlu0 %v2124_v44  ;;  %2749 = vadd.xlane.f32.xlu2 %v2748_v22  ;;  %10750 = vst [vmem:[#allocation62_spill] sm:$0xff] %v8364_v48  ;;  %v3197_v16 = vpack.c.bf16 %v8364_v48, %v8364_v48  ;;  %v2133_v23 = vsel %vm1967_vm6, %v8368_v26, -inf }
 0x354   : > { %2251 = vmax.xlane.f32.xlu1 %v2250_v14  ;;  %5493 = vpow2.f32 %v2632_v63  ;;  %v2430_v63 = vsub.f32 %v10751_v27, %v8284_v11  ;;  %v1944_v22 = vpop.f32.mrf.mxu0  ;;  %v2556_v35 = vmul.f32 1.442695, %v2390_v60 }
 0x355   : > { %5495 = vpow2.f32 %v2526_v46  ;;  %v10754_v46 = vld [vmem:[#allocation46_spill] sm:$0xff] }
 0x356   : > { %v2306_v44 = vpop.xlane.xlu0 %2305  ;;  %5497 = vpow2.f32 %v2702_v59  ;;  %v2431_v14 = vsub.f32 %v10754_v46, %v8158_v4  ;;  %v2127_v59 = vsel %vm1967_vm6, %v8360_v49, -inf  ;;  %v2636_v20 = vmul.f32 1.442695, %v2430_v63 }
 0x357   : > { %v8372_v47 = vpop.xlane.xlu2 %2764  ;;  %v2300_v0 = vpop.xlane.xlu1 %2299  ;;  %5499 = vpow2.f32 %v2524_v6  ;;  %v2775_v4 = vsel %vm1967_vm6, %v8016_v7, 0.0  ;;  %v8396_v6 = vadd.f32 %v7947_v34, %v1944_v22  ;;  %v8405_v7 = vld [vmem:[%s10150_s3 + $0xe8] sm:$0xff]  ;;  %v8415_v46 = vadd.f32 %v8142_v51, %v8211_v58 }
 0x358   : > { %10752 = vst [vmem:[#allocation31_spill] sm:$0xff] %v8372_v47  ;;  %v2462_v45 = vsub.f32 %v10753_v39, %v2300_v0  ;;  %v2638_v60 = vmul.f32 1.442695, %v2431_v14  ;;  %v8400_v0 = vpop.f32.mrf.mxu1  ;;  %v8409_v39 = vadd.f32 %v8405_v7, %v8256_v43  ;;  %v10758_v14 = vld [vmem:[#allocation67_spill] sm:$0xff] }
 0x359   : > { %5256 = vmatmul.msk.bf16.gmra.mxu1 %vm1967_vm6, %v3322_v5  ;;  %10757 = vst [vmem:[#allocation48_spill] sm:$0xff] %v8400_v0  ;;  %v2464_v22 = vsub.f32 %v10758_v14, %v2306_v44  ;;  %v2130_v14 = vsel %vm1967_vm6, %v8415_v46, -inf }
 0x35a   : > { %v2700_v11 = vmul.f32 1.442695, %v2462_v45  ;;  %5300 = vmatmul.msk.bf16.gmra.mxu0 %vm1967_vm6, %v4005_v25  ;;  %v8385_v27 = vpop.eup %5493  ;;  %v3751_v25 = vunpack.c.l.b16 %v3197_v16  ;;  %v10760_v16 = vld [vmem:[#allocation61_spill] sm:$0xff] }
 0x35b   : > { %10755 = vst [vmem:[#allocation45_spill] sm:$0xff] %v8385_v27  ;;  %2128 = vmax.xlane.f32.xlu0 %v2127_v59  ;;  %v3196_v9 = vpack.c.bf16 %v8385_v27, %v8385_v27  ;;  %2776 = vadd.xlane.f32.xlu2 %v2775_v4  ;;  %v8393_v41 = vpop.eup %5495 }
 0x35c   : > { %5501 = vpow2.f32 %v2700_v11  ;;  %2134 = vmax.xlane.f32.xlu1 %v2133_v23  ;;  %v8398_v63 = vpop.eup %5497  ;;  %v3143_v43 = vpack.c.bf16 %v8393_v41, %v8393_v41 }
 0x35d   : > { %10756 = vst [vmem:[#allocation33_spill] sm:$0xff] %v8398_v63  ;;  %5503 = vpow2.f32 %v2556_v35  ;;  %v3750_v5 = vunpack.c.l.b16 %v3196_v9  ;;  %v8411_v34 = vpop.eup %5499  ;;  %v10759_v35 = vld [vmem:[#allocation69_spill] sm:$0xff]  ;;  %v2465_v9 = vsub.f32 %v10760_v16, %v8197_v62  ;;  %v3231_v58 = vpack.c.bf16 %v8398_v63, %v8398_v63 }
 0x35e   : > { %v2087_v45 = vpop.xlane.xlu0 %2086  ;;  %5505 = vpow2.f32 %v2636_v20  ;;  %v3142_v44 = vpack.c.bf16 %v8411_v34, %v8411_v34  ;;  %v2704_v62 = vmul.f32 1.442695, %v2464_v22  ;;  %v8450_v22 = vadd.f32 %v8142_v51, %v8337_v40  ;;  %v10767_v40 = vld [vmem:[#allocation66_spill] sm:$0xff] }
 0x35f   : > { %v2391_v11 = vsub.f32 %v10759_v35, %v2087_v45  ;;  %v8419_v59 = vpop.xlane.xlu2 %2311  ;;  %v8421_v23 = vpop.xlane.xlu1 %2095  ;;  %v3776_v4 = vpack.c.b16 %v3751_v25, %v3750_v5  ;;  %5507 = vpow2.f32 %v2638_v60  ;;  %v2325_v5 = vsel %vm1967_vm6, %v8396_v6, -inf }
 0x360   : > { %v8433_v45 = vpop.f32.mrf.mxu2  ;;  %v2247_v60 = vsel %vm1967_vm6, %v8409_v39, -inf  ;;  %v2706_v16 = vmul.f32 1.442695, %v2465_v9  ;;  %v3982_v27 = vunpack.c.l.b16 %v3231_v58  ;;  %v3302_v0 = vunpack.c.l.b16 %v3142_v44 }
 0x361   : > { %v2558_v20 = vmul.f32 1.442695, %v2391_v11  ;;  %5284 = vmatmul.msk.bf16.gmra.mxu3 %vm1967_vm6, %v3776_v4  ;;  %v3303_v11 = vunpack.c.l.b16 %v3143_v43 }
 0x362   : > { %v8429_v48 = vpop.eup %5501 }
 0x363   : > { %10761 = vst [vmem:[#allocation41_spill] sm:$0xff] %v8429_v48  ;;  %v3230_v25 = vpack.c.bf16 %v8429_v48, %v8429_v48  ;;  %5509 = vpow2.f32 %v2558_v20  ;;  %2248 = vmax.xlane.f32.xlu0 %v2247_v60  ;;  %v8444_v35 = vpop.eup %5503  ;;  %2131 = vmax.xlane.f32.xlu2 %v2130_v14  ;;  %v10764_v20 = vld [vmem:[#allocation43_spill] sm:$0xff] }
 0x364   : > { %10762 = vst [vmem:[#allocation53_spill] sm:$0xff] %v8444_v35  ;;  %2326 = vmax.xlane.f32.xlu1 %v2325_v5  ;;  %v8446_v4 = vpop.eup %5505  ;;  %v2392_v60 = vsub.f32 %v10764_v20, %v8243_v52  ;;  %v8458_v5 = vadd.f32 %v8002_v28, %v8374_v17  ;;  %5511 = vpow2.f32 %v2704_v62  ;;  %v3158_v52 = vpack.c.bf16 %v8444_v35, %v8444_v35  ;;  %v10770_v17 = vld [vmem:[#allocation44_spill] sm:$0xff]  ;;  %v10771_v62 = vld [vmem:[#allocation30_spill] sm:$0xff] }
 0x365   : > { %10763 = vst [vmem:[#allocation7_spill] sm:$0xff] %v8446_v4  ;;  %v3981_v63 = vunpack.c.l.b16 %v3230_v25  ;;  %v8454_v3 = vpop.eup %5507  ;;  %v10768_v25 = vld [vmem:[#allocation19_spill] sm:$0xff]  ;;  %v3198_v44 = vpack.c.bf16 %v8446_v4, %v8446_v4  ;;  %v3323_v20 = vpack.c.b16 %v3303_v11, %v3302_v0  ;;  %5513 = vpow2.f32 %v2706_v16  ;;  %v10774_v0 = vld [vmem:[#allocation70_spill] sm:$0xff] }
 0x366   : > { %v2210_v48 = vpop.xlane.xlu0 %2209  ;;  %10765 = vst [vmem:[#allocation46_spill] sm:$0xff] %v8454_v3  ;;  %v2378_v14 = vsub.f32 %v10768_v25, %v10767_v40  ;;  %v3199_v40 = vpack.c.bf16 %v8454_v3, %v8454_v3  ;;  %v2560_v25 = vmul.f32 1.442695, %v2392_v60  ;;  %v2766_v11 = vsel %vm1967_vm6, %v10774_v0, 0.0 }
 0x367   : > { %10766 = vst [vmem:[#allocation67_spill] sm:$0xff] %v8458_v5  ;;  %v2432_v43 = vsub.f32 %v7846_v36, %v2210_v48  ;;  %v8461_v9 = vpop.xlane.xlu2 %2224  ;;  %v8463_v58 = vpop.xlane.xlu1 %2785  ;;  %v4006_v51 = vpack.c.b16 %v3982_v27, %v3981_v63  ;;  %v2381_v36 = vsub.f32 %v10771_v62, %v10770_v17  ;;  %v10773_v27 = vld [vmem:[#allocation52_spill] sm:$0xff]  ;;  %v2322_v60 = vsel %vm1967_vm6, %v8450_v22, -inf }
 0x368   : > { %v8475_v48 = vpop.f32.mrf.mxu1  ;;  %v2433_v63 = vsub.f32 %v10773_v27, %v8286_v1  ;;  %v8487_v17 = vpop.f32.mrf.mxu0  ;;  %v2139_v1 = vsel %vm1967_vm6, %v8458_v5, -inf  ;;  %v2532_v62 = vmul.f32 1.442695, %v2378_v14  ;;  %5515 = vpow2.f32 %v2560_v25 }
 0x369   : > { %v8471_v28 = vpop.eup %5509  ;;  %10772 = vst [vmem:[#allocation61_spill] sm:$0xff] %v8475_v48  ;;  %5257 = vmatmul.msk.bf16.gmra.mxu1 %vm1967_vm6, %v3323_v20  ;;  %v2640_v16 = vmul.f32 1.442695, %v2432_v43  ;;  %v1440_v27 = vpop.f32.mrf.mxu2  ;;  %v3515_v20 = vunpack.c.l.b16 %v3158_v52  ;;  %v2538_v48 = vmul.f32 1.442695, %v2381_v36 }
 0x36a   : > { %10769 = vst [vmem:[#allocation69_spill] sm:$0xff] %v8471_v28  ;;  %v3159_v35 = vpack.c.bf16 %v8471_v28, %v8471_v28  ;;  %5301 = vmatmul.msk.bf16.gmra.mxu0 %vm1967_vm6, %v4006_v51  ;;  %v3752_v51 = vunpack.c.l.b16 %v3198_v44  ;;  %v8493_v3 = vpop.eup %5511  ;;  %v2642_v0 = vmul.f32 1.442695, %v2433_v63  ;;  %v3753_v28 = vunpack.c.l.b16 %v3199_v40 }
 0x36b   : > { %2767 = vadd.xlane.f32.xlu0 %v2766_v11  ;;  %2323 = vmax.xlane.f32.xlu2 %v2322_v60  ;;  %10775 = vst [vmem:[#allocation43_spill] sm:$0xff] %v8493_v3  ;;  %v8495_v5 = vpop.eup %5513  ;;  %v8499_v11 = vadd.f32 %v7994_v54, %v8319_v10  ;;  %5517 = vpow2.f32 %v2640_v16  ;;  %v3232_v44 = vpack.c.bf16 %v8493_v3, %v8493_v3  ;;  %v10777_v54 = vld [vmem:[#allocation72_spill] sm:$0xff]  ;;  %v10785_v3 = vld [vmem:[#allocation35_spill] sm:$0xff] }
 0x36c   : > { %2140 = vmax.xlane.f32.xlu1 %v2139_v1  ;;  %v3516_v4 = vunpack.c.l.b16 %v3159_v35  ;;  %10776 = vst [vmem:[#allocation66_spill] sm:$0xff] %v8495_v5  ;;  %v3144_v35 = vpack.c.bf16 %v8226_v32, %v8226_v32  ;;  %5519 = vpow2.f32 %v2532_v62  ;;  %v3777_v36 = vpack.c.b16 %v3753_v28, %v3752_v51 }
 0x36d   : > { %5521 = vpow2.f32 %v2642_v0  ;;  %v2466_v10 = vsub.f32 %v10777_v54, %v8419_v59  ;;  %v3145_v40 = vpack.c.bf16 %v8046_v61, %v8046_v61  ;;  %v3233_v32 = vpack.c.bf16 %v8495_v5, %v8495_v5  ;;  %v10778_v59 = vld [vmem:[#allocation57_spill] sm:$0xff]  ;;  %v10780_v0 = vld [vmem:[#allocation71_spill] sm:$0xff] }
 0x36e   : > { %v2093_v43 = vpop.xlane.xlu0 %2092  ;;  %v3544_v47 = vpack.c.b16 %v3516_v4, %v3515_v20  ;;  %5523 = vpow2.f32 %v2538_v48  ;;  %v2754_v16 = vsel %vm1967_vm6, %v10778_v59, 0.0  ;;  %v8525_v61 = vpop.eup %5515  ;;  %v3304_v48 = vunpack.c.l.b16 %v3144_v35 }
 0x36f   : > { %v2393_v14 = vsub.f32 %v7875_v55, %v2093_v43  ;;  %v8502_v52 = vpop.xlane.xlu2 %2104  ;;  %v2315_v4 = vpop.xlane.xlu1 %2314  ;;  %v3983_v1 = vunpack.c.l.b16 %v3232_v44  ;;  %v2708_v62 = vmul.f32 1.442695, %v2466_v10  ;;  %v2394_v43 = vsub.f32 %v10780_v0, %v8421_v23 }
 0x370   : > { %5265 = vmatmul.msk.bf16.gmra.mxu2 %vm1967_vm6, %v3544_v47  ;;  %v2467_v55 = vsub.f32 %v7882_v19, %v2315_v4  ;;  %v2793_v47 = vsel %vm1967_vm6, %v8205_v12, 0.0  ;;  %v8519_v28 = vpop.f32.mrf.mxu1  ;;  %v2136_v19 = vsel %vm1967_vm6, %v8499_v11, -inf  ;;  %v8529_v12 = vpop.f32.mrf.mxu0  ;;  %v3305_v4 = vunpack.c.l.b16 %v3145_v40 }
 0x371   : > { %v2562_v63 = vmul.f32 1.442695, %v2393_v14  ;;  %5285 = vmatmul.msk.bf16.gmra.mxu3 %vm1967_vm6, %v3777_v36  ;;  %v8527_v60 = vpop.eup %5517  ;;  %v8533_v51 = vpop.f32.mrf.mxu2  ;;  %v3984_v36 = vunpack.c.l.b16 %v3233_v32  ;;  %v8540_v35 = vadd.f32 %v8278_v18, %v1440_v27  ;;  %v10782_v27 = vld [vmem:[#allocation6_spill] sm:$0xff] }
 0x372   : > { %v2710_v25 = vmul.f32 1.442695, %v2467_v55  ;;  %10779 = vst [vmem:[#allocation19_spill] sm:$0xff] %v8527_v60  ;;  %v8531_v20 = vpop.eup %5519  ;;  %v3160_v55 = vpack.c.bf16 %v8525_v61, %v8525_v61  ;;  %v3200_v23 = vpack.c.bf16 %v8527_v60, %v8527_v60  ;;  %v3324_v32 = vpack.c.b16 %v3305_v4, %v3304_v48 }
 0x373   : > { %5525 = vpow2.f32 %v2562_v63  ;;  %2794 = vadd.xlane.f32.xlu0 %v2793_v47  ;;  %2137 = vmax.xlane.f32.xlu2 %v2136_v19  ;;  %v8537_v54 = vpop.eup %5521  ;;  %v4007_v47 = vpack.c.b16 %v3984_v36, %v3983_v1  ;;  %v2814_v48 = vsel %vm1967_vm6, %v8531_v20, 0.0  ;;  %v2145_v0 = vsel %vm1967_vm6, %v8540_v35, -inf }
 0x374   : > { %2755 = vadd.xlane.f32.xlu1 %v2754_v16  ;;  %10781 = vst [vmem:[#allocation44_spill] sm:$0xff] %v8537_v54  ;;  %5527 = vpow2.f32 %v2710_v25  ;;  %v8545_v10 = vpop.eup %5523  ;;  %v2435_v25 = vsub.f32 %v10782_v27, %v8333_v13  ;;  %v2564_v16 = vmul.f32 1.442695, %v2394_v43 }
 0x375   : > { %5529 = vpow2.f32 %v2708_v62  ;;  %v2823_v13 = vsel %vm1967_vm6, %v8545_v10, 0.0  ;;  %v3517_v62 = vunpack.c.l.b16 %v3160_v55  ;;  %v8581_v55 = vadd.f32 %v8039_v31, %v8433_v45 }
 0x376   : > { %v2216_v14 = vpop.xlane.xlu0 %2215  ;;  %5531 = vpow2.f32 %v2564_v16 }
 0x377   : > { %v2434_v44 = vsub.f32 %v7908_v2, %v2216_v14  ;;  %v8543_v63 = vpop.xlane.xlu2 %2107  ;;  %v8551_v40 = vpop.xlane.xlu1 %2110  ;;  %v3201_v2 = vpack.c.bf16 %v8537_v54, %v8537_v54  ;;  %v3754_v14 = vunpack.c.l.b16 %v3200_v23 }
 0x378   : > { %v8571_v36 = vpop.f32.mrf.mxu1 }
 0x379   : > { %v8553_v59 = vpop.eup %5525  ;;  %5258 = vmatmul.msk.bf16.gmra.mxu1 %vm1967_vm6, %v3324_v32  ;;  %v2644_v1 = vmul.f32 1.442695, %v2434_v44  ;;  %v2646_v32 = vmul.f32 1.442695, %v2435_v25  ;;  %v3755_v27 = vunpack.c.l.b16 %v3201_v2  ;;  %v3147_v25 = vpack.c.bf16 %v8290_v38, %v8290_v38  ;;  %v1445_v2 = vpop.f32.mrf.mxu2 }
 0x37a   : > { %v3161_v19 = vpack.c.bf16 %v8553_v59, %v8553_v59  ;;  %5302 = vmatmul.msk.bf16.gmra.mxu0 %vm1967_vm6, %v4007_v47  ;;  %v8569_v4 = vpop.eup %5527  ;;  %v2772_v38 = vsel %vm1967_vm6, %v7987_v21, 0.0  ;;  %v10787_v21 = vld [vmem:[#allocation29_spill] sm:$0xff] }
 0x37b   : > { %2815 = vadd.xlane.f32.xlu0 %v2814_v48  ;;  %2824 = vadd.xlane.f32.xlu2 %v2823_v13  ;;  %10783 = vst [vmem:[#allocation30_spill] sm:$0xff] %v8569_v4  ;;  %v8573_v5 = vpop.eup %5529  ;;  %v8575_v48 = vpop.f32.mrf.mxu0  ;;  %5533 = vpow2.f32 %v2644_v1  ;;  %v3235_v16 = vpack.c.bf16 %v8569_v4, %v8569_v4  ;;  %v2781_v1 = vsel %vm1967_vm6, %v8067_v50, 0.0 }
 0x37c   : > { %2146 = vmax.xlane.f32.xlu1 %v2145_v0  ;;  %v3518_v43 = vunpack.c.l.b16 %v3161_v19  ;;  %10784 = vst [vmem:[#allocation52_spill] sm:$0xff] %v8573_v5  ;;  %v2380_v0 = vsub.f32 %v10785_v3, %v7888_v8  ;;  %v3778_v8 = vpack.c.b16 %v3755_v27, %v3754_v14  ;;  %5535 = vpow2.f32 %v2646_v32 }
 0x37d   : > { %v3146_v3 = vpack.c.bf16 %v8531_v20, %v8531_v20  ;;  %v3307_v20 = vunpack.c.l.b16 %v3147_v25  ;;  %v3986_v14 = vunpack.c.l.b16 %v3235_v16 }
 0x37e   : > { %v2099_v47 = vpop.xlane.xlu0 %2098  ;;  %v3545_v44 = vpack.c.b16 %v3518_v43, %v3517_v62  ;;  %v2536_v45 = vmul.f32 1.442695, %v2380_v0  ;;  %v2142_v62 = vsel %vm1967_vm6, %v8581_v55, -inf  ;;  %v8604_v43 = vpop.eup %5531 }
 0x37f   : > { %v2395_v23 = vsub.f32 %v7937_v29, %v2099_v47  ;;  %v8584_v19 = vpop.xlane.xlu2 %2230  ;;  %v8590_v13 = vpop.xlane.xlu1 %2113  ;;  %v3234_v29 = vpack.c.bf16 %v8573_v5, %v8573_v5  ;;  %v3306_v0 = vunpack.c.l.b16 %v3146_v3  ;;  %v3162_v16 = vpack.c.bf16 %v8604_v43, %v8604_v43 }
 0x380   : > { %5266 = vmatmul.msk.bf16.gmra.mxu2 %vm1967_vm6, %v3545_v44  ;;  %v8608_v47 = vpop.f32.mrf.mxu1  ;;  %v2397_v44 = vsub.f32 %v10787_v21, %v8502_v52 }
 0x381   : > { %v2566_v31 = vmul.f32 1.442695, %v2395_v23  ;;  %5286 = vmatmul.msk.bf16.gmra.mxu3 %vm1967_vm6, %v3778_v8  ;;  %v8606_v32 = vpop.eup %5533  ;;  %v3985_v50 = vunpack.c.l.b16 %v3234_v29  ;;  %v8615_v8 = vadd.f32 %v8405_v7, %v1445_v2  ;;  %v3325_v3 = vpack.c.b16 %v3307_v20, %v3306_v0  ;;  %v8634_v21 = vpop.f32.mrf.mxu2 }
 0x382   : > { %10786 = vst [vmem:[#allocation70_spill] sm:$0xff] %v8606_v32  ;;  %v8612_v23 = vpop.eup %5535  ;;  %v2799_v20 = vsel %vm1967_vm6, %v8307_v56, 0.0 }
 0x383   : > { %5537 = vpow2.f32 %v2566_v31  ;;  %2773 = vadd.xlane.f32.xlu0 %v2772_v38  ;;  %2143 = vmax.xlane.f32.xlu2 %v2142_v62  ;;  %10788 = vst [vmem:[#allocation72_spill] sm:$0xff] %v8612_v23  ;;  %v3202_v38 = vpack.c.bf16 %v8606_v32, %v8606_v32  ;;  %v4008_v29 = vpack.c.b16 %v3986_v14, %v3985_v50  ;;  %v8630_v62 = vpop.f32.mrf.mxu0  ;;  %v1707_v14 = vpop.f32.mrf.mxu3  ;;  %v2151_v0 = vsel %vm1967_vm6, %v8615_v8, -inf }
 0x384   : > { %2782 = vadd.xlane.f32.xlu1 %v2781_v1  ;;  %5539 = vpow2.f32 %v2536_v45  ;;  %10789 = vst [vmem:[#allocation57_spill] sm:$0xff] %v8615_v8  ;;  %v10790_v45 = vld [vmem:[#allocation12_spill] sm:$0xff]  ;;  %v2778_v50 = vsel %vm1967_vm6, %v8073_v24, 0.0 }
 0x385   : > { %v2437_v2 = vsub.f32 %v10790_v45, %v8461_v9  ;;  %v3756_v4 = vunpack.c.l.b16 %v3202_v38 }
 0x386   : > { %v2222_v27 = vpop.xlane.xlu0 %2221 }
 0x387   : > { %v2436_v31 = vsub.f32 %v7983_v42, %v2222_v27  ;;  %v8618_v25 = vpop.xlane.xlu2 %2233  ;;  %v8624_v52 = vpop.xlane.xlu1 %2236  ;;  %v3203_v42 = vpack.c.bf16 %v8612_v23, %v8612_v23  ;;  %v2570_v27 = vmul.f32 1.442695, %v2397_v44  ;;  %v3519_v44 = vunpack.c.l.b16 %v3162_v16 }
 0x389   : > { %v8626_v1 = vpop.eup %5537  ;;  %5259 = vmatmul.msk.bf16.gmra.mxu1 %vm1967_vm6, %v3325_v3  ;;  %v2648_v9 = vmul.f32 1.442695, %v2436_v31  ;;  %v2650_v31 = vmul.f32 1.442695, %v2437_v2  ;;  %5541 = vpow2.f32 %v2570_v27  ;;  %v3757_v38 = vunpack.c.l.b16 %v3203_v42  ;;  %v8666_v2 = vpop.f32.mrf.mxu1  ;;  %v10795_v27 = vld [vmem:[#allocation59_spill] sm:$0xff] }
 0x38a   : > { %v3163_v5 = vpack.c.bf16 %v8626_v1, %v8626_v1  ;;  %5303 = vmatmul.msk.bf16.gmra.mxu0 %vm1967_vm6, %v4008_v29  ;;  %v5540_v3 = vpop.eup %5539  ;;  %v5908_v29 = vld [vmem:[%s10150_s3 + $0xc0] sm:$0xff] }
 0x38b   : > { %2800 = vadd.xlane.f32.xlu0 %v2799_v20  ;;  %2779 = vadd.xlane.f32.xlu2 %v2778_v50  ;;  %v8650_v56 = vadd.f32 %v5908_v29, %v8487_v17  ;;  %v8655_v20 = vld [vmem:[%s10150_s3 + $0xf8] sm:$0xff]  ;;  %v8664_v17 = vadd.f32 %v8086_v37, %v8533_v51  ;;  %5543 = vpow2.f32 %v2648_v9  ;;  %v3779_v42 = vpack.c.b16 %v3757_v38, %v3756_v4  ;;  %v8765_v54 = vpop.f32.mrf.mxu0 }
 0x38c   : > { %2152 = vmax.xlane.f32.xlu1 %v2151_v0  ;;  %v3520_v45 = vunpack.c.l.b16 %v3163_v5  ;;  %v8658_v24 = vadd.f32 %v8655_v20, %v1707_v14  ;;  %v10793_v0 = vld [vmem:[#allocation36_spill] sm:$0xff]  ;;  %v3148_v14 = vpack.c.bf16 %v5540_v3, %v5540_v3  ;;  %5545 = vpow2.f32 %v2650_v31  ;;  %v1450_v31 = vpop.f32.mrf.mxu2 }
 0x38d   : > { %10791 = vst [vmem:[#allocation71_spill] sm:$0xff] %v8650_v56  ;;  %v2383_v50 = vsub.f32 %v10793_v0, %v8044_v30  ;;  %v3149_v37 = vpack.c.bf16 %v8545_v10, %v8545_v10  ;;  %v2328_v9 = vsel %vm1967_vm6, %v8650_v56, -inf  ;;  %v2148_v4 = vsel %vm1967_vm6, %v8664_v17, -inf }
 0x38e   : > { %10792 = vst [vmem:[#allocation6_spill] sm:$0xff] %v8658_v24  ;;  %v2102_v5 = vpop.xlane.xlu0 %2101  ;;  %v3546_v16 = vpack.c.b16 %v3520_v45, %v3519_v44  ;;  %v10796_v44 = vld [vmem:[#allocation32_spill] sm:$0xff]  ;;  %v2398_v10 = vsub.f32 %v7914_v57, %v8543_v63 }
 0x38f   : > { %10794 = vst [vmem:[#allocation35_spill] sm:$0xff] %v8664_v17  ;;  %v2396_v29 = vsub.f32 %v8032_v53, %v2102_v5  ;;  %v8669_v23 = vpop.xlane.xlu2 %2812  ;;  %v8671_v32 = vpop.xlane.xlu1 %2239  ;;  %v2382_v30 = vsub.f32 %v10796_v44, %v10795_v27  ;;  %v2253_v53 = vsel %vm1967_vm6, %v8658_v24, -inf  ;;  %v2542_v51 = vmul.f32 1.442695, %v2383_v50  ;;  %v10798_v50 = vld [vmem:[#allocation73_spill] sm:$0xff]  ;;  %v10814_v24 = vld [vmem:[#allocation82_spill] sm:$0xff] }
 0x390   : > { %5267 = vmatmul.msk.bf16.gmra.mxu2 %vm1967_vm6, %v3546_v16  ;;  %v8685_v5 = vpop.eup %5541  ;;  %v3308_v16 = vunpack.c.l.b16 %v3148_v14  ;;  %v3309_v27 = vunpack.c.l.b16 %v3149_v37  ;;  %v2572_v63 = vmul.f32 1.442695, %v2398_v10  ;;  %v2820_v10 = vsel %vm1967_vm6, %v5540_v3, 0.0 }
 0x391   : > { %v2568_v45 = vmul.f32 1.442695, %v2396_v29  ;;  %5287 = vmatmul.msk.bf16.gmra.mxu3 %vm1967_vm6, %v3779_v42  ;;  %v8689_v38 = vpop.eup %5543  ;;  %v2540_v0 = vmul.f32 1.442695, %v2382_v30  ;;  %v2399_v29 = vsub.f32 %v10798_v50, %v8551_v40  ;;  %v3165_v57 = vpack.c.bf16 %v8685_v5, %v8685_v5 }
 0x392   : > { %10797 = vst [vmem:[#allocation29_spill] sm:$0xff] %v8689_v38  ;;  %v8695_v44 = vpop.eup %5545  ;;  %v3204_v14 = vpack.c.bf16 %v8689_v38, %v8689_v38  ;;  %v3326_v37 = vpack.c.b16 %v3309_v27, %v3308_v16  ;;  %v2805_v16 = vsel %vm1967_vm6, %v8393_v41, 0.0 }
 0x393   : > { %5547 = vpow2.f32 %v2568_v45  ;;  %2254 = vmax.xlane.f32.xlu0 %v2253_v53  ;;  %2149 = vmax.xlane.f32.xlu2 %v2148_v4  ;;  %10799 = vst [vmem:[#allocation12_spill] sm:$0xff] %v8695_v44  ;;  %v8698_v45 = vadd.f32 %v8655_v20, %v1450_v31  ;;  %v3205_v4 = vpack.c.bf16 %v8695_v44, %v8695_v44  ;;  %v10801_v44 = vld [vmem:[#allocation20_spill] sm:$0xff] }
 0x394   : > { %2329 = vmax.xlane.f32.xlu1 %v2328_v9  ;;  %5549 = vpow2.f32 %v2542_v51  ;;  %v2574_v51 = vmul.f32 1.442695, %v2399_v29  ;;  %v3522_v29 = vunpack.c.l.b16 %v3165_v57  ;;  %v3758_v27 = vunpack.c.l.b16 %v3204_v14 }
 0x395   : > { %10800 = vst [vmem:[#allocation36_spill] sm:$0xff] %v8698_v45  ;;  %5551 = vpow2.f32 %v2540_v0  ;;  %v2157_v50 = vsel %vm1967_vm6, %v8698_v45, -inf  ;;  %v3759_v60 = vunpack.c.l.b16 %v3205_v4 }
 0x396   : > { %v8693_v42 = vpop.xlane.xlu0 %2761  ;;  %v8700_v53 = vpop.f32.mrf.mxu1  ;;  %5553 = vpow2.f32 %v2572_v63  ;;  %v8731_v63 = vadd.f32 %v8328_v15, %v8634_v21 }
 0x397   : > { %v8706_v30 = vpop.xlane.xlu2 %2119  ;;  %v8708_v40 = vpop.xlane.xlu1 %2245  ;;  %5555 = vpow2.f32 %v2574_v51 }
 0x398   : > { %10802 = vst [vmem:[#allocation59_spill] sm:$0xff] %v8731_v63 }
 0x399   : > { %v8710_v9 = vpop.eup %5547  ;;  %5260 = vmatmul.msk.bf16.gmra.mxu1 %vm1967_vm6, %v3326_v37  ;;  %v2439_v37 = vsub.f32 %v10801_v44, %v8584_v19  ;;  %v3780_v19 = vpack.c.b16 %v3759_v60, %v3758_v27  ;;  %v10804_v27 = vld [vmem:[#allocation10_spill] sm:$0xff] }
 0x39a   : > { %v3164_v31 = vpack.c.bf16 %v8710_v9, %v8710_v9  ;;  %v5550_v38 = vpop.eup %5549  ;;  %5557 = vrcp.f32 %v10804_v27 }
 0x39b   : > { %2821 = vadd.xlane.f32.xlu0 %v2820_v10  ;;  %2806 = vadd.xlane.f32.xlu2 %v2805_v16  ;;  %v5357_v10 = vld [vmem:[%s10151_s4 + $0x8] sm:$0xff]  ;;  %v5552_v41 = vpop.eup %5551  ;;  %v3151_v14 = vpack.c.bf16 %v5550_v38, %v5550_v38  ;;  %v10803_v16 = vld [vmem:[#allocation60_spill] sm:$0xff] }
 0x39c   : > { %2158 = vmax.xlane.f32.xlu1 %v2157_v50  ;;  %v3521_v0 = vunpack.c.l.b16 %v3164_v31  ;;  %4874 = vmatpush.bf16.msra.mxu1 %v5357_v10  ;;  %v8740_v44 = vpop.eup %5553  ;;  %v3150_v4 = vpack.c.bf16 %v5552_v41, %v5552_v41  ;;  %v2654_v50 = vmul.f32 1.442695, %v2439_v37  ;;  %v2757_v15 = vsel %vm1967_vm6, %v10803_v16, 0.0  ;;  %v10805_v16 = vld [vmem:[#allocation21_spill] sm:$0xff] }
 0x39d   : > { %v8745_v21 = vpop.eup %5555  ;;  %v3311_v60 = vunpack.c.l.b16 %v3151_v14  ;;  %v3166_v37 = vpack.c.bf16 %v8740_v44, %v8740_v44 }
 0x39e   : > { %v8724_v56 = vpop.xlane.xlu0 %2788  ;;  %v3547_v3 = vpack.c.b16 %v3522_v29, %v3521_v0  ;;  %v8733_v57 = vpop.f32.mrf.mxu1  ;;  %v2154_v0 = vsel %vm1967_vm6, %v8731_v63, -inf  ;;  %v2829_v29 = vsel %vm1967_vm6, %v5550_v38, 0.0  ;;  %5559 = vpow2.f32 %v2654_v50  ;;  %v10808_v50 = vld [vmem:[#allocation15_spill] sm:$0xff] }
 0x39f   : > { %v8735_v51 = vpop.xlane.xlu2 %2122  ;;  %v8737_v31 = vpop.xlane.xlu1 %2746  ;;  %5561 = vrcp.f32 %v8693_v42  ;;  %v3523_v42 = vunpack.c.l.b16 %v3166_v37 }
 0x3a0   : > { %5268 = vmatmul.msk.bf16.gmra.mxu2 %vm1967_vm6, %v3547_v3  ;;  %v3167_v3 = vpack.c.bf16 %v8745_v21, %v8745_v21 }
 0x3a1   : > { %5288 = vmatmul.msk.bf16.gmra.mxu3 %vm1967_vm6, %v3780_v19  ;;  %v3310_v19 = vunpack.c.l.b16 %v3150_v4  ;;  %v2440_v4 = vsub.f32 %v10808_v50, %v8618_v25  ;;  %v5910_v25 = vld [vmem:[%s10150_s3 + $0xc8] sm:$0xff]  ;;  %v10813_v50 = vld [vmem:[#allocation16_spill] sm:$0xff] }
 0x3a3   : > { %2758 = vadd.xlane.f32.xlu0 %v2757_v15  ;;  %2155 = vmax.xlane.f32.xlu2 %v2154_v0  ;;  %v2400_v15 = vsub.f32 %v10805_v16, %v8590_v13  ;;  %v10807_v0 = vld [vmem:[#allocation80_spill] sm:$0xff]  ;;  %v3327_v63 = vpack.c.b16 %v3311_v60, %v3310_v19  ;;  %v2802_v13 = vsel %vm1967_vm6, %v8411_v34, 0.0  ;;  %v3524_v16 = vunpack.c.l.b16 %v3167_v3  ;;  %v10812_v3 = vld [vmem:[#allocation2_spill] sm:$0xff] }
 0x3a4   : > { %2830 = vadd.xlane.f32.xlu1 %v2829_v29  ;;  %v2856_v60 = vsel %vm1967_vm6, %v8525_v61, 0.0 }
 0x3a5   : > { %v3548_v61 = vpack.c.b16 %v3524_v16, %v3523_v42 }
 0x3a6   : > { %v2228_v10 = vpop.xlane.xlu0 %2227  ;;  %v8758_v38 = vpop.f32.mrf.mxu1 }
 0x3a7   : > { %10806 = vst [vmem:[#allocation32_spill] sm:$0xff] %v8758_v38  ;;  %v2438_v14 = vsub.f32 %v10807_v0, %v2228_v10  ;;  %v8761_v29 = vpop.xlane.xlu2 %2743  ;;  %v8763_v27 = vpop.xlane.xlu1 %2791  ;;  %v2576_v10 = vmul.f32 1.442695, %v2400_v15  ;;  %v2826_v0 = vsel %vm1967_vm6, %v5552_v41, 0.0  ;;  %v4421_v41 = vrot.slane %v10812_v3, 1 }
 0x3a8   : > { %v5558_v38 = vpop.eup %5557  ;;  %v2656_v15 = vmul.f32 1.442695, %v2440_v4 }
 0x3a9   : > { %v2652_v45 = vmul.f32 1.442695, %v2438_v14  ;;  %5261 = vmatmul.msk.bf16.gmra.mxu1 %vm1967_vm6, %v3327_v63  ;;  %v8775_v19 = vpop.eup %5559  ;;  %v8781_v63 = vadd.f32 %v5910_v25, %v8529_v12  ;;  %v8791_v12 = vperm.slane %v10812_v3, 0 }
 0x3aa   : > { %10809 = vst [vmem:[#allocation73_spill] sm:$0xff] %v8775_v19  ;;  %v5562_v34 = vpop.eup %5561 }
 0x3ab   : > { %5563 = vpow2.f32 %v2652_v45  ;;  %2803 = vadd.xlane.f32.xlu0 %v2802_v13  ;;  %10810 = vst [vmem:[#allocation20_spill] sm:$0xff] %v8781_v63  ;;  %2827 = vadd.xlane.f32.xlu2 %v2826_v0  ;;  %v10811_v45 = vld [vmem:[#allocation22_spill] sm:$0xff]  ;;  %v4292_v13 = vmul.f32 %v5558_v38, %v10813_v50  ;;  %v3207_v0 = vpack.c.bf16 %v8775_v19, %v8775_v19  ;;  %v2331_v38 = vsel %vm1967_vm6, %v8781_v63, -inf  ;;  %v10818_v50 = vld [vmem:[#allocation23_spill] sm:$0xff] }
 0x3ac   : > { %2857 = vadd.xlane.f32.xlu1 %v2856_v60  ;;  %v2441_v37 = vsub.f32 %v10811_v45, %v8624_v52  ;;  %5565 = vpow2.f32 %v2576_v10  ;;  %v4300_v52 = vmul.f32 %v5562_v34, %v8519_v28  ;;  %v10816_v10 = vld [vmem:[#allocation84_spill] sm:$0xff]  ;;  %v8805_v45 = vperm.slane %v4421_v41, 0 }
 0x3ad   : > { %5567 = vrcp.f32 %v8463_v58  ;;  %v4422_v34 = vrot.slane %v10812_v3, 2  ;;  %v2841_v58 = vsel %vm1967_vm6, %v10818_v50, 0.0  ;;  %v4432_v50 = vmul.f32 %v8791_v12, %v4292_v13 }
 0x3ae   : > { %v2117_v14 = vpop.xlane.xlu0 %2116  ;;  %v8787_v17 = vpop.f32.mrf.mxu1  ;;  %5569 = vpow2.f32 %v2656_v15  ;;  %v4440_v41 = vmul.f32 %v8805_v45, %v4300_v52 }
 0x3af   : > { %v2401_v8 = vsub.f32 %v10814_v24, %v2117_v14  ;;  %v8796_v60 = vpop.xlane.xlu2 %2770  ;;  %v2321_v4 = vpop.xlane.xlu1 %2320  ;;  %v2658_v24 = vmul.f32 1.442695, %v2441_v37  ;;  %v10817_v14 = vld [vmem:[#allocation77_spill] sm:$0xff] }
 0x3b0   : > { %5269 = vmatmul.msk.bf16.gmra.mxu2 %vm1967_vm6, %v3548_v61  ;;  %v2469_v25 = vsub.f32 %v10816_v10, %v2321_v4  ;;  %v2835_v61 = vsel %vm1967_vm6, %v10817_v14, 0.0  ;;  %v1959_v37 = vpop.f32.mrf.mxu0  ;;  %v3761_v10 = vunpack.c.l.b16 %v3207_v0  ;;  %v8823_v14 = vperm.slane %v4422_v34, 0  ;;  %v10822_v0 = vld [vmem:[#allocation18_spill] sm:$0xff] }
 0x3b1   : > { %v8801_v42 = vpop.eup %5563  ;;  %v2578_v16 = vmul.f32 1.442695, %v2401_v8  ;;  %v10819_v8 = vld [vmem:[#allocation78_spill] sm:$0xff]  ;;  %v8829_v52 = vadd.f32 %v8405_v7, %v1959_v37  ;;  %v4561_v13 = vsel %vm393_vm0, %v4440_v41, 0.0  ;;  %v8843_v37 = vpop.f32.mrf.mxu3 }
 0x3b2   : > { %10815 = vst [vmem:[#allocation60_spill] sm:$0xff] %v8801_v42  ;;  %v3206_v28 = vpack.c.bf16 %v8801_v42, %v8801_v42  ;;  %v2403_v4 = vsub.f32 %v10819_v8, %v8735_v51  ;;  %v8817_v42 = vpop.eup %5565 }
 0x3b3   : > { %5571 = vpow2.f32 %v2578_v16  ;;  %2332 = vmax.xlane.f32.xlu0 %v2331_v38  ;;  %2836 = vadd.xlane.f32.xlu2 %v2835_v61  ;;  %v8821_v38 = vadd.f32 %v8278_v18, %v8630_v62  ;;  %v2714_v16 = vmul.f32 1.442695, %v2469_v25  ;;  %v5568_v61 = vpop.eup %5567  ;;  %10821 = vst [vmem:[#allocation21_spill] sm:$0xff] %v8829_v52  ;;  %v3168_v18 = vpack.c.bf16 %v8817_v42, %v8817_v42 }
 0x3b4   : > { %2842 = vadd.xlane.f32.xlu1 %v2841_v58  ;;  %v3760_v15 = vunpack.c.l.b16 %v3206_v28  ;;  %5573 = vpow2.f32 %v2658_v24  ;;  %v2402_v28 = vsub.f32 %v10822_v0, %v8706_v30  ;;  %v8833_v8 = vpop.eup %5569  ;;  %v2582_v62 = vmul.f32 1.442695, %v2403_v4  ;;  %10823 = vst [vmem:[#allocation80_spill] sm:$0xff] %v8843_v37  ;;  %v8845_v30 = vpop.f32.mrf.mxu2 }
 0x3b5   : > { %10820 = vst [vmem:[#allocation10_spill] sm:$0xff] %v8821_v38  ;;  %5575 = vpow2.f32 %v2714_v16  ;;  %v2337_v4 = vsel %vm1967_vm6, %v8821_v38, -inf  ;;  %v4560_v0 = vsel %vm393_vm0, %v4432_v50, 0.0 }
 0x3b6   : > { %v8826_v19 = vpop.xlane.xlu0 %2809  ;;  %v3781_v51 = vpack.c.b16 %v3761_v10, %v3760_v15  ;;  %v3437_v58 = vpop.f32.mrf.mxu1  ;;  %10824 = vst [vmem:[#allocation15_spill] sm:$0xff] %v8845_v30  ;;  %v10825_v15 = vld [vmem:[#allocation38_spill] sm:$0xff]  ;;  %v2580_v16 = vmul.f32 1.442695, %v2402_v28  ;;  %v4562_v37 = vadd.f32 %v4561_v13, %v4560_v0  ;;  %5577 = vpow2.f32 %v2582_v62  ;;  %v10829_v62 = vld [vmem:[#allocation75_spill] sm:$0xff] }
 0x3b7   : > { %v4308_v24 = vmul.f32 %v5568_v61, %v3437_v58  ;;  %v2318_v25 = vpop.xlane.xlu2 %2317  ;;  %v8838_v34 = vpop.xlane.xlu1 %2752 }
 0x3b8   : > { %5289 = vmatmul.msk.bf16.gmra.mxu3 %vm1967_vm6, %v3781_v51  ;;  %v2468_v10 = vsub.f32 %v10825_v15, %v2318_v25  ;;  %v10826_v51 = vld [vmem:[#allocation79_spill] sm:$0xff]  ;;  %v2343_v25 = vsel %vm1967_vm6, %v8829_v52, -inf }
 0x3b9   : > { %v8841_v7 = vpop.eup %5571  ;;  %v4448_v61 = vmul.f32 %v8823_v14, %v4308_v24  ;;  %v2832_v58 = vsel %vm1967_vm6, %v10826_v51, 0.0  ;;  %v3525_v24 = vunpack.c.l.b16 %v3168_v18  ;;  %v3208_v51 = vpack.c.bf16 %v8833_v8, %v8833_v8  ;;  %v10830_v18 = vld [vmem:[#allocation49_spill] sm:$0xff] }
 0x3ba   : > { %v3169_v41 = vpack.c.bf16 %v8841_v7, %v8841_v7  ;;  %v8856_v63 = vpop.eup %5573  ;;  %v2712_v30 = vmul.f32 1.442695, %v2468_v10 }
 0x3bb   : > { %10827 = vst [vmem:[#allocation22_spill] sm:$0xff] %v8856_v63  ;;  %2833 = vadd.xlane.f32.xlu0 %v2832_v58  ;;  %v4563_v15 = vsel %vm393_vm0, %v4448_v61, 0.0  ;;  %2338 = vmax.xlane.f32.xlu2 %v2337_v4  ;;  %v3209_v28 = vpack.c.bf16 %v8856_v63, %v8856_v63  ;;  %v8867_v0 = vpop.eup %5575  ;;  %v2442_v61 = vsub.f32 %v10829_v62, %v8671_v32  ;;  %v2859_v32 = vsel %vm1967_vm6, %v8553_v59, 0.0 }
 0x3bc   : > { %2344 = vmax.xlane.f32.xlu1 %v2343_v25  ;;  %v3526_v38 = vunpack.c.l.b16 %v3169_v41  ;;  %v8861_v50 = vadd.f32 %v4563_v15, %v4562_v37  ;;  %5579 = vpow2.f32 %v2712_v30  ;;  %10828 = vst [vmem:[#allocation2_spill] sm:$0xff] %v8867_v0  ;;  %v3237_v25 = vpack.c.bf16 %v8867_v0, %v8867_v0 }
 0x3bd   : > { %5581 = vpow2.f32 %v2580_v16  ;;  %v3762_v16 = vunpack.c.l.b16 %v3208_v51  ;;  %v3763_v15 = vunpack.c.l.b16 %v3209_v28  ;;  %v2660_v62 = vmul.f32 1.442695, %v2442_v61  ;;  %v5911_v51 = vld [vmem:[%s10150_s3 + $0xd0] sm:$0xff] }
 0x3be   : > { %v2243_v13 = vpop.xlane.xlu0 %2242  ;;  %v3549_v10 = vpack.c.b16 %v3526_v38, %v3525_v24  ;;  %v8871_v4 = vpop.f32.mrf.mxu1  ;;  %5583 = vrcp.f32 %v8763_v27  ;;  %v8904_v28 = vadd.f32 %v5911_v51, %v8575_v48  ;;  %v2871_v51 = vsel %vm1967_vm6, %v8685_v5, 0.0 }
 0x3bf   : > { %v2443_v37 = vsub.f32 %v10830_v18, %v2243_v13  ;;  %v8874_v41 = vpop.xlane.xlu2 %2818  ;;  %v8876_v30 = vpop.xlane.xlu1 %2797 }
 0x3c0   : > { %5270 = vmatmul.msk.bf16.gmra.mxu2 %vm1967_vm6, %v3549_v10  ;;  %v8880_v38 = vpop.eup %5577  ;;  %v8888_v13 = vpop.f32.mrf.mxu3  ;;  %v10834_v10 = vld [vmem:[#allocation83_spill] sm:$0xff]  ;;  %10836 = vst [vmem:[#allocation77_spill] sm:$0xff] %v8904_v28 }
 0x3c1   : > { %v2662_v58 = vmul.f32 1.442695, %v2443_v37  ;;  %10832 = vst [vmem:[#allocation82_spill] sm:$0xff] %v8888_v13  ;;  %v8890_v18 = vpop.f32.mrf.mxu2  ;;  %v2838_v27 = vsel %vm1967_vm6, %v10834_v10, 0.0  ;;  %v10835_v37 = vld [vmem:[#allocation64_spill] sm:$0xff]  ;;  %v3171_v61 = vpack.c.bf16 %v8880_v38, %v8880_v38  ;;  %v3782_v13 = vpack.c.b16 %v3763_v15, %v3762_v16 }
 0x3c2   : > { %v8886_v24 = vpop.eup %5579  ;;  %10833 = vst [vmem:[#allocation84_spill] sm:$0xff] %v8890_v18  ;;  %v2844_v52 = vsel %vm1967_vm6, %v10835_v37, 0.0 }
 0x3c3   : > { %10831 = vst [vmem:[#allocation16_spill] sm:$0xff] %v8886_v24  ;;  %2860 = vadd.xlane.f32.xlu0 %v2859_v32  ;;  %v3236_v0 = vpack.c.bf16 %v8886_v24, %v8886_v24  ;;  %2839 = vadd.xlane.f32.xlu2 %v2838_v27  ;;  %v8898_v59 = vpop.eup %5581  ;;  %5585 = vpow2.f32 %v2662_v58  ;;  %v3988_v32 = vunpack.c.l.b16 %v3237_v25  ;;  %v3528_v16 = vunpack.c.l.b16 %v3171_v61  ;;  %v5912_v61 = vld [vmem:[%s10150_s3 + $0xe0] sm:$0xff] }
 0x3c4   : > { %2845 = vadd.xlane.f32.xlu1 %v2844_v52  ;;  %v5584_v24 = vpop.eup %5583  ;;  %5587 = vpow2.f32 %v2660_v62  ;;  %v3170_v18 = vpack.c.bf16 %v8898_v59, %v8898_v59 }
 0x3c5   : > { %v3987_v10 = vunpack.c.l.b16 %v3236_v0  ;;  %v2334_v0 = vsel %vm1967_vm6, %v8904_v28, -inf }
 0x3c6   : > { %v2126_v37 = vpop.xlane.xlu0 %2125  ;;  %v3442_v52 = vpop.f32.mrf.mxu1 }
 0x3c7   : > { %v2404_v27 = vsub.f32 %v8317_v33, %v2126_v37  ;;  %v8911_v63 = vmul.f32 %v5584_v24, %v3442_v52  ;;  %v8913_v48 = vpop.xlane.xlu2 %2749  ;;  %v8915_v58 = vpop.xlane.xlu1 %2251  ;;  %v4009_v25 = vpack.c.b16 %v3988_v32, %v3987_v10  ;;  %v2865_v24 = vsel %vm1967_vm6, %v8626_v1, 0.0 }
 0x3c8   : > { %5290 = vmatmul.msk.bf16.gmra.mxu3 %vm1967_vm6, %v3782_v13  ;;  %v8923_v33 = vpop.f32.mrf.mxu3  ;;  %v1962_v13 = vpop.f32.mrf.mxu0  ;;  %v3527_v32 = vunpack.c.l.b16 %v3170_v18  ;;  %v8937_v52 = vadd.f32 %v5912_v61, %v8765_v54  ;;  %v5913_v18 = vld [vmem:[%s10150_s3 + $0xf0] sm:$0xff] }
 0x3c9   : > { %5304 = vmatmul.msk.bf16.gmra.mxu0 %vm1967_vm6, %v4009_v25  ;;  %v8921_v15 = vpop.eup %5585  ;;  %10837 = vst [vmem:[#allocation23_spill] sm:$0xff] %v8923_v33  ;;  %v2584_v62 = vmul.f32 1.442695, %v2404_v27  ;;  %v8931_v37 = vpop.f32.mrf.mxu2  ;;  %v8944_v25 = vadd.f32 %v5913_v18, %v1962_v13 }
 0x3ca   : > { %v8929_v10 = vpop.eup %5587  ;;  %10838 = vst [vmem:[#allocation78_spill] sm:$0xff] %v8931_v37  ;;  %v3211_v1 = vpack.c.bf16 %v8921_v15, %v8921_v15  ;;  %v3550_v5 = vpack.c.b16 %v3528_v16, %v3527_v32 }
 0x3cb   : > { %2335 = vmax.xlane.f32.xlu0 %v2334_v0  ;;  %2866 = vadd.xlane.f32.xlu2 %v2865_v24  ;;  %10839 = vst [vmem:[#allocation18_spill] sm:$0xff] %v8937_v52  ;;  %v10841_v0 = vld [vmem:[#allocation76_spill] sm:$0xff]  ;;  %5589 = vpow2.f32 %v2584_v62  ;;  %v3210_v61 = vpack.c.bf16 %v8929_v10, %v8929_v10 }
 0x3cc   : > { %2872 = vadd.xlane.f32.xlu1 %v2871_v51  ;;  %10840 = vst [vmem:[#allocation38_spill] sm:$0xff] %v8944_v25  ;;  %v2444_v24 = vsub.f32 %v10841_v0, %v8708_v40  ;;  %5591 = vrcp.f32 %v8876_v30  ;;  %v3765_v32 = vunpack.c.l.b16 %v3211_v1  ;;  %v2862_v40 = vsel %vm1967_vm6, %v8604_v43, 0.0 }
 0x3cd   : > { %v3764_v18 = vunpack.c.l.b16 %v3210_v61 }
 0x3ce   : > { %v2129_v27 = vpop.xlane.xlu0 %2128  ;;  %v8948_v51 = vpop.f32.mrf.mxu1  ;;  %v2664_v62 = vmul.f32 1.442695, %v2444_v24 }
 0x3cf   : > { %v2405_v54 = vsub.f32 %v8360_v49, %v2129_v27  ;;  %v8953_v33 = vpop.xlane.xlu2 %2776  ;;  %v2135_v16 = vpop.xlane.xlu1 %2134  ;;  %v2340_v49 = vsel %vm1967_vm6, %v8937_v52, -inf  ;;  %v2346_v27 = vsel %vm1967_vm6, %v8944_v25, -inf  ;;  %v3783_v0 = vpack.c.b16 %v3765_v32, %v3764_v18  ;;  %v10858_v52 = vld [vmem:[#allocation27_spill] sm:$0xff] }
 0x3d0   : > { %5271 = vmatmul.msk.bf16.gmra.mxu2 %vm1967_vm6, %v3550_v5  ;;  %v8965_v30 = vpop.f32.mrf.mxu3  ;;  %v2407_v24 = vsub.f32 %v8368_v26, %v2135_v16  ;;  %v10844_v16 = vld [vmem:[#allocation85_spill] sm:$0xff]  ;;  %v2952_v28 = vsel %vm1967_vm6, %v10858_v52, 0.0 }
 0x3d1   : > { %v2586_v13 = vmul.f32 1.442695, %v2405_v54  ;;  %v8963_v5 = vpop.eup %5589  ;;  %10842 = vst [vmem:[#allocation79_spill] sm:$0xff] %v8965_v30  ;;  %v8967_v43 = vpop.f32.mrf.mxu2 }
 0x3d2   : > { %v5592_v54 = vpop.eup %5591  ;;  %10843 = vst [vmem:[#allocation75_spill] sm:$0xff] %v8967_v43 }
 0x3d3   : > { %5593 = vpow2.f32 %v2586_v13  ;;  %2863 = vadd.xlane.f32.xlu0 %v2862_v40  ;;  %2341 = vmax.xlane.f32.xlu2 %v2340_v49  ;;  %v3172_v40 = vpack.c.bf16 %v8963_v5, %v8963_v5 }
 0x3d4   : > { %2347 = vmax.xlane.f32.xlu1 %v2346_v27  ;;  %5595 = vpow2.f32 %v2664_v62 }
 0x3d6   : > { %v2249_v1 = vpop.xlane.xlu0 %2248  ;;  %v3447_v13 = vpop.f32.mrf.mxu1 }
 0x3d7   : > { %v2445_v37 = vsub.f32 %v8409_v39, %v2249_v1  ;;  %v8973_v49 = vmul.f32 %v5592_v54, %v3447_v13  ;;  %v2132_v61 = vpop.xlane.xlu2 %2131  ;;  %v2327_v27 = vpop.xlane.xlu1 %2326  ;;  %v2874_v39 = vsel %vm1967_vm6, %v8740_v44, 0.0  ;;  %v2847_v1 = vsel %vm1967_vm6, %v10844_v16, 0.0 }
 0x3d8   : > { %5291 = vmatmul.msk.bf16.gmra.mxu3 %vm1967_vm6, %v3783_v0  ;;  %v2406_v62 = vsub.f32 %v8415_v46, %v2132_v61  ;;  %v2471_v18 = vsub.f32 %v8396_v6, %v2327_v27  ;;  %v1964_v54 = vpop.f32.mrf.mxu0  ;;  %v2590_v13 = vmul.f32 1.442695, %v2407_v24  ;;  %v3529_v46 = vunpack.c.l.b16 %v3172_v40  ;;  %v8990_v27 = vpop.f32.mrf.mxu3 }
 0x3d9   : > { %v8976_v30 = vpop.eup %5593  ;;  %v2666_v32 = vmul.f32 1.442695, %v2445_v37  ;;  %v2868_v37 = vsel %vm1967_vm6, %v8710_v9, 0.0  ;;  %10846 = vst [vmem:[#allocation83_spill] sm:$0xff] %v8990_v27  ;;  %v8993_v16 = vadd.f32 %v8655_v20, %v1964_v54  ;;  %v10852_v27 = vld [vmem:[#allocation54_spill] sm:$0xff] }
 0x3da   : > { %v3173_v26 = vpack.c.bf16 %v8976_v30, %v8976_v30  ;;  %v2588_v0 = vmul.f32 1.442695, %v2406_v62  ;;  %v8988_v6 = vpop.eup %5595  ;;  %v2718_v44 = vmul.f32 1.442695, %v2471_v18 }
 0x3db   : > { %5597 = vpow2.f32 %v2666_v32  ;;  %2848 = vadd.xlane.f32.xlu0 %v2847_v1  ;;  %2869 = vadd.xlane.f32.xlu2 %v2868_v37  ;;  %10845 = vst [vmem:[#allocation49_spill] sm:$0xff] %v8988_v6  ;;  %v3212_v9 = vpack.c.bf16 %v8988_v6, %v8988_v6  ;;  %v9004_v1 = vpop.f32.mrf.mxu2  ;;  %v2349_v54 = vsel %vm1967_vm6, %v8993_v16, -inf  ;;  %v10850_v37 = vld [vmem:[#allocation69_spill] sm:$0xff] }
 0x3dc   : > { %v3530_v61 = vunpack.c.l.b16 %v3173_v26  ;;  %2875 = vadd.xlane.f32.xlu1 %v2874_v39  ;;  %5599 = vpow2.f32 %v2588_v0  ;;  %10847 = vst [vmem:[#allocation64_spill] sm:$0xff] %v8993_v16 }
 0x3dd   : > { %5601 = vpow2.f32 %v2590_v13  ;;  %10849 = vst [vmem:[#allocation85_spill] sm:$0xff] %v9004_v1  ;;  %v10853_v1 = vld [vmem:[#allocation31_spill] sm:$0xff] }
 0x3de   : > { %v8995_v24 = vpop.xlane.xlu0 %2767  ;;  %v3551_v32 = vpack.c.b16 %v3530_v61, %v3529_v46  ;;  %v8997_v62 = vpop.f32.mrf.mxu1  ;;  %5603 = vpow2.f32 %v2718_v44  ;;  %v2853_v46 = vsel %vm1967_vm6, %v10850_v37, 0.0  ;;  %v10851_v61 = vld [vmem:[#allocation58_spill] sm:$0xff] }
 0x3df   : > { %v2324_v40 = vpop.xlane.xlu2 %2323  ;;  %v2141_v26 = vpop.xlane.xlu1 %2140  ;;  %5605 = vrcp.f32 %v10852_v27  ;;  %v10856_v27 = vld [vmem:[#allocation67_spill] sm:$0xff] }
 0x3e0   : > { %5272 = vmatmul.msk.bf16.gmra.mxu2 %vm1967_vm6, %v3551_v32  ;;  %v2470_v20 = vsub.f32 %v8450_v22, %v2324_v40  ;;  %v2928_v32 = vsel %vm1967_vm6, %v10851_v61, 0.0  ;;  %v3766_v22 = vunpack.c.l.b16 %v3212_v9 }
 0x3e1   : > { %v9002_v39 = vpop.eup %5597 }
 0x3e2   : > { %10848 = vst [vmem:[#allocation76_spill] sm:$0xff] %v9002_v39  ;;  %v3213_v18 = vpack.c.bf16 %v9002_v39, %v9002_v39  ;;  %v9011_v13 = vpop.eup %5599  ;;  %v2716_v0 = vmul.f32 1.442695, %v2470_v20 }
 0x3e3   : > { %2350 = vmax.xlane.f32.xlu0 %v2349_v54  ;;  %2854 = vadd.xlane.f32.xlu2 %v2853_v46  ;;  %v9018_v40 = vpop.eup %5601  ;;  %v3174_v20 = vpack.c.bf16 %v9011_v13, %v9011_v13  ;;  %v9027_v54 = vpop.f32.mrf.mxu3 }
 0x3e4   : > { %v3767_v44 = vunpack.c.l.b16 %v3213_v18  ;;  %2929 = vadd.xlane.f32.xlu1 %v2928_v32  ;;  %5607 = vpow2.f32 %v2716_v0  ;;  %v9025_v6 = vpop.eup %5603  ;;  %10855 = vst [vmem:[#allocation58_spill] sm:$0xff] %v9027_v54  ;;  %v2409_v18 = vsub.f32 %v10856_v27, %v2141_v26  ;;  %v3175_v9 = vpack.c.bf16 %v9018_v40, %v9018_v40  ;;  %v10857_v54 = vld [vmem:[#allocation53_spill] sm:$0xff]  ;;  %v9044_v16 = vpop.f32.mrf.mxu2 }
 0x3e5   : > { %5609 = vrcp.f32 %v10853_v1  ;;  %10854 = vst [vmem:[#allocation69_spill] sm:$0xff] %v9025_v6  ;;  %v5606_v32 = vpop.eup %5605  ;;  %v2850_v26 = vsel %vm1967_vm6, %v10857_v54, 0.0 }
 0x3e6   : > { %v9023_v43 = vpop.xlane.xlu0 %2794  ;;  %v3784_v37 = vpack.c.b16 %v3767_v44, %v3766_v22  ;;  %v9030_v46 = vpop.f32.mrf.mxu1  ;;  %v3531_v44 = vunpack.c.l.b16 %v3174_v20  ;;  %v3239_v22 = vpack.c.bf16 %v9025_v6, %v9025_v6  ;;  %v2594_v25 = vmul.f32 1.442695, %v2409_v18 }
 0x3e7   : > { %v2138_v0 = vpop.xlane.xlu2 %2137  ;;  %v9034_v61 = vpop.xlane.xlu1 %2755  ;;  %5611 = vrcp.f32 %v8724_v56  ;;  %v5356_v56 = vld [vmem:[%s10151_s4] sm:$0xff] }
 0x3e8   : > { %5292 = vmatmul.msk.bf16.gmra.mxu3 %vm1967_vm6, %v3784_v37  ;;  %v2408_v1 = vsub.f32 %v8499_v11, %v2138_v0  ;;  %v2883_v11 = vsel %vm1967_vm6, %v8841_v7, 0.0  ;;  %v3532_v37 = vunpack.c.l.b16 %v3175_v9  ;;  %v10859_v0 = vld [vmem:[#allocation81_spill] sm:$0xff]  ;;  %v3990_v18 = vunpack.c.l.b16 %v3239_v22  ;;  %4875 = vmatpush.bf16.msra.mxu1 %v5356_v56 }
 0x3e9   : > { %v4293_v6 = vmul.f32 %v5606_v32, %v10859_v0  ;;  %v4423_v22 = vrot.slane %v10812_v3, 3 }
 0x3ea   : > { %v9042_v27 = vpop.eup %5607  ;;  %v2592_v39 = vmul.f32 1.442695, %v2408_v1  ;;  %v3552_v7 = vpack.c.b16 %v3532_v37, %v3531_v44 }
 0x3eb   : > { %2851 = vadd.xlane.f32.xlu0 %v2850_v26  ;;  %v5610_v20 = vpop.eup %5609  ;;  %v3238_v54 = vpack.c.bf16 %v9042_v27, %v9042_v27  ;;  %2953 = vadd.xlane.f32.xlu2 %v2952_v28  ;;  %v4433_v44 = vmul.f32 %v8791_v12, %v4293_v6  ;;  %v2880_v6 = vsel %vm1967_vm6, %v8817_v42, 0.0 }
 0x3ec   : > { %2884 = vadd.xlane.f32.xlu1 %v2883_v11  ;;  %5613 = vpow2.f32 %v2592_v39  ;;  %v4301_v9 = vmul.f32 %v5610_v20, %v8571_v36  ;;  %v10860_v36 = vld [vmem:[#allocation42_spill] sm:$0xff] }
 0x3ed   : > { %5615 = vrcp.f32 %v8826_v19  ;;  %v3989_v52 = vunpack.c.l.b16 %v3238_v54  ;;  %v5612_v32 = vpop.eup %5611  ;;  %v4567_v42 = vsel %vm393_vm0, %v4433_v44, 0.0 }
 0x3ee   : > { %v9055_v1 = vpop.xlane.xlu0 %2815  ;;  %5617 = vpow2.f32 %v2594_v25  ;;  %v9061_v26 = vpop.f32.mrf.mxu1  ;;  %v2931_v25 = vsel %vm1967_vm6, %v10860_v36, 0.0  ;;  %v4441_v11 = vmul.f32 %v8805_v45, %v4301_v9  ;;  %v4309_v54 = vmul.f32 %v5612_v32, %v8871_v4 }
 0x3ef   : > { %5619 = vrcp.f32 %v8953_v33  ;;  %v9064_v28 = vpop.xlane.xlu2 %2824  ;;  %v2147_v39 = vpop.xlane.xlu1 %2146  ;;  %v4010_v19 = vpack.c.b16 %v3990_v18, %v3989_v52 }
 0x3f0   : > { %5273 = vmatmul.msk.bf16.gmra.mxu2 %vm1967_vm6, %v3552_v7  ;;  %5621 = vrcp.f32 %v8913_v48  ;;  %v2886_v48 = vsel %vm1967_vm6, %v8898_v59, 0.0  ;;  %v9090_v59 = vperm.slane %v4423_v22, 0  ;;  %v4568_v4 = vsel %vm393_vm0, %v4441_v11, 0.0 }
 0x3f1   : > { %5305 = vmatmul.msk.bf16.gmra.mxu0 %vm1967_vm6, %v4010_v19  ;;  %5623 = vrcp.f32 %v8838_v34  ;;  %v2411_v7 = vsub.f32 %v8540_v35, %v2147_v39  ;;  %v2877_v39 = vsel %vm1967_vm6, %v8745_v21, 0.0 }
 0x3f2   : > { %v9073_v33 = vpop.eup %5613  ;;  %5625 = vrcp.f32 %v8669_v23  ;;  %v4449_v23 = vmul.f32 %v8823_v14, %v4309_v54 }
 0x3f3   : > { %v9077_v20 = vpop.f32.mrf.mxu2  ;;  %2932 = vadd.xlane.f32.xlu0 %v2931_v25  ;;  %v5616_v37 = vpop.eup %5615  ;;  %2881 = vadd.xlane.f32.xlu2 %v2880_v6  ;;  %5627 = vrcp.f32 %v8737_v31  ;;  %v3176_v34 = vpack.c.bf16 %v9073_v33, %v9073_v33  ;;  %v2598_v6 = vmul.f32 1.442695, %v2411_v7  ;;  %v10863_v7 = vld [vmem:[#allocation50_spill] sm:$0xff] }
 0x3f4   : > { %2887 = vadd.xlane.f32.xlu1 %v2886_v48  ;;  %v9084_v3 = vpop.eup %5617 }
 0x3f5   : > { %v5620_v0 = vpop.eup %5619  ;;  %v3177_v31 = vpack.c.bf16 %v9084_v3, %v9084_v3  ;;  %v3533_v22 = vunpack.c.l.b16 %v3176_v34 }
 0x3f6   : > { %v2774_v18 = vpop.xlane.xlu0 %2773  ;;  %v5622_v52 = vpop.eup %5621  ;;  %v4305_v44 = vmul.f32 %v5620_v0, %v8733_v57  ;;  %v2895_v57 = vsel %vm1967_vm6, %v8976_v30, 0.0 }
 0x3f7   : > { %v3457_v56 = vpop.f32.mrf.mxu1  ;;  %5629 = vrcp.f32 %v2774_v18  ;;  %v2144_v19 = vpop.xlane.xlu2 %2143  ;;  %v3534_v34 = vunpack.c.l.b16 %v3177_v31 }
 0x3f8   : > { %5631 = vrcp.f32 %v8761_v29  ;;  %v4316_v9 = vmul.f32 %v5616_v37, %v3457_v56  ;;  %v9099_v32 = vpop.xlane.xlu1 %2782  ;;  %v5624_v36 = vpop.eup %5623  ;;  %v2410_v35 = vsub.f32 %v8581_v55, %v2144_v19  ;;  %v10861_v29 = vld [vmem:[#allocation55_spill] sm:$0xff]  ;;  %v2901_v55 = vsel %vm1967_vm6, %v9018_v40, 0.0 }
 0x3f9   : > { %5633 = vrcp.f32 %v8796_v60  ;;  %v4296_v25 = vmul.f32 %v5622_v52, %v10861_v29  ;;  %v5626_v48 = vpop.eup %5625  ;;  %v10862_v60 = vld [vmem:[#allocation4_spill] sm:$0xff]  ;;  %v2446_v56 = vsub.f32 %v10863_v7, %v8915_v58  ;;  %v4445_v30 = vmul.f32 %v8805_v45, %v4305_v44 }
 0x3fa   : > { %5635 = vrcp.f32 %v8995_v24  ;;  %v4456_v11 = vmul.f32 %v9090_v59, %v4316_v9  ;;  %v2596_v37 = vmul.f32 1.442695, %v2410_v35  ;;  %v9115_v21 = vpop.eup %5627  ;;  %v4297_v0 = vmul.f32 %v5624_v36, %v10862_v60 }
 0x3fb   : > { %v9109_v54 = vpop.f32.mrf.mxu2  ;;  %2878 = vadd.xlane.f32.xlu0 %v2877_v39  ;;  %v4570_v24 = vsel %vm393_vm0, %v4449_v23, 0.0  ;;  %2896 = vadd.xlane.f32.xlu2 %v2895_v57  ;;  %v4436_v19 = vmul.f32 %v8791_v12, %v4296_v25  ;;  %v3553_v36 = vpack.c.b16 %v3534_v34, %v3533_v22  ;;  %v4569_v39 = vadd.f32 %v4568_v4, %v4567_v42 }
 0x3fc   : > { %v4565_v18 = vsel %vm393_vm0, %v4456_v11, 0.0  ;;  %2902 = vadd.xlane.f32.xlu1 %v2901_v55  ;;  %5637 = vpow2.f32 %v2596_v37  ;;  %v2668_v22 = vmul.f32 1.442695, %v2446_v56  ;;  %v4596_v42 = vsel %vm393_vm0, %v4445_v30, 0.0  ;;  %v9146_v55 = vpop.f32.mrf.mxu3 }
 0x3fd   : > { %v5630_v52 = vpop.eup %5629  ;;  %v9124_v9 = vadd.f32 %v4565_v18, %v8861_v50  ;;  %5639 = vrcp.f32 %v9023_v43  ;;  %v4452_v50 = vmul.f32 %v8823_v14, %v8973_v49  ;;  %v4571_v43 = vadd.f32 %v4570_v24, %v4569_v39  ;;  %10864 = vst [vmem:[#allocation54_spill] sm:$0xff] %v9146_v55  ;;  %v10926_v55 = vld [vmem:[#allocation84_spill] sm:$0xff] }
 0x3fe   : > { %v5632_v40 = vpop.eup %5631  ;;  %v4304_v23 = vmul.f32 %v5630_v52, %v8700_v53  ;;  %v9129_v31 = vpop.xlane.xlu0 %2800  ;;  %5641 = vpow2.f32 %v2598_v6  ;;  %v4437_v53 = vmul.f32 %v8791_v12, %v4297_v0  ;;  %v2889_v6 = vsel %vm1967_vm6, %v8880_v38, 0.0 }
 0x3ff   : > { %v5634_v35 = vpop.eup %5633  ;;  %v3459_v58 = vpop.f32.mrf.mxu1  ;;  %v4588_v49 = vsel %vm393_vm0, %v4436_v19, 0.0  ;;  %5643 = vrcp.f32 %v9055_v1  ;;  %v2898_v0 = vsel %vm1967_vm6, %v9011_v13, 0.0  ;;  %v2904_v24 = vsel %vm1967_vm6, %v9073_v33, 0.0  ;;  %v10865_v33 = vld [vmem:[#allocation39_spill] sm:$0xff] }
 0x400   : > { %v5636_v29 = vpop.eup %5635  ;;  %v4444_v44 = vmul.f32 %v8805_v45, %v4304_v23  ;;  %v4317_v11 = vmul.f32 %v5626_v48, %v3459_v58  ;;  %v9134_v37 = vpop.xlane.xlu2 %2779  ;;  %5274 = vmatmul.msk.bf16.gmra.mxu2 %vm1967_vm6, %v3553_v36  ;;  %v4591_v18 = vsel %vm393_vm0, %v4452_v50, 0.0  ;;  %v4303_v56 = vmul.f32 %v5634_v35, %v8666_v2  ;;  %v10867_v2 = vld [vmem:[#allocation57_spill] sm:$0xff] }
 0x401   : > { %v2153_v25 = vpop.xlane.xlu1 %2152  ;;  %v4302_v52 = vmul.f32 %v5636_v29, %v8608_v47  ;;  %v4595_v30 = vsel %vm393_vm0, %v4437_v53, 0.0  ;;  %v4294_v23 = vmul.f32 %v5632_v40, %v10865_v33  ;;  %v10866_v47 = vld [vmem:[#allocation11_spill] sm:$0xff]  ;;  %5645 = vpow2.f32 %v2668_v22 }
 0x402   : > { %v4457_v4 = vmul.f32 %v9090_v59, %v4317_v11  ;;  %v4589_v48 = vsel %vm393_vm0, %v4444_v44, 0.0  ;;  %v9144_v57 = vpop.eup %5637  ;;  %v2955_v58 = vsel %vm1967_vm6, %v10866_v47, 0.0  ;;  %v9169_v29 = vadd.f32 %v4596_v42, %v4595_v30  ;;  %v10868_v11 = vld [vmem:[#allocation6_spill] sm:$0xff] }
 0x403   : > { %v9149_v60 = vpop.f32.mrf.mxu2  ;;  %2890 = vadd.xlane.f32.xlu0 %v2889_v6  ;;  %v4590_v38 = vadd.f32 %v4589_v48, %v4588_v49  ;;  %v5640_v34 = vpop.eup %5639  ;;  %2899 = vadd.xlane.f32.xlu2 %v2898_v0  ;;  %v3178_v36 = vpack.c.bf16 %v9144_v57, %v9144_v57  ;;  %v2413_v35 = vsub.f32 %v10867_v2, %v2153_v25  ;;  %5647 = vrcp.f32 %v8874_v41  ;;  %v10870_v0 = vld [vmem:[#allocation35_spill] sm:$0xff] }
 0x404   : > { %v4572_v7 = vsel %vm393_vm0, %v4457_v4, 0.0  ;;  %2905 = vadd.xlane.f32.xlu1 %v2904_v24  ;;  %v9158_v1 = vpop.eup %5641  ;;  %v4442_v4 = vmul.f32 %v8805_v45, %v4302_v52  ;;  %v4311_v6 = vmul.f32 %v5640_v34, %v8948_v51  ;;  %v2892_v34 = vsel %vm1967_vm6, %v8963_v5, 0.0  ;;  %v9198_v5 = vpop.f32.mrf.mxu3 }
 0x405   : > { %v4573_v13 = vadd.f32 %v4572_v7, %v4571_v43  ;;  %v9162_v19 = vadd.f32 %v4591_v18, %v4590_v38  ;;  %v10869_v43 = vld [vmem:[#allocation24_spill] sm:$0xff]  ;;  %v3179_v49 = vpack.c.bf16 %v9158_v1, %v9158_v1  ;;  %v5644_v22 = vpop.eup %5643  ;;  %v3535_v38 = vunpack.c.l.b16 %v3178_v36  ;;  %10872 = vst [vmem:[#allocation31_spill] sm:$0xff] %v9198_v5 }
 0x406   : > { %v2255_v39 = vpop.xlane.xlu0 %2254  ;;  %v4295_v40 = vmul.f32 %v9115_v21, %v10869_v43  ;;  %v4434_v21 = vmul.f32 %v8791_v12, %v4294_v23  ;;  %v2602_v18 = vmul.f32 1.442695, %v2413_v35  ;;  %v4575_v23 = vsel %vm393_vm0, %v4442_v4, 0.0 }
 0x407   : > { %v4784_v50 = vpack.c.bf16 %v4573_v13, %v9124_v9  ;;  %v3462_v44 = vpop.f32.mrf.mxu1  ;;  %v2447_v53 = vsub.f32 %v10868_v11, %v2255_v39  ;;  %v4443_v9 = vmul.f32 %v8805_v45, %v4303_v56  ;;  %v10871_v56 = vld [vmem:[#allocation44_spill] sm:$0xff]  ;;  %v4451_v13 = vmul.f32 %v8823_v14, %v4311_v6  ;;  %v9196_v36 = vpop.eup %5645 }
 0x408   : > { %v2150_v42 = vpop.xlane.xlu2 %2149  ;;  %v4318_v51 = vmul.f32 %v5644_v22, %v3462_v44  ;;  %v2979_v41 = vsel %vm1967_vm6, %v10871_v56, 0.0  ;;  %v4435_v30 = vmul.f32 %v8791_v12, %v4295_v40  ;;  %v3536_v33 = vunpack.c.l.b16 %v3179_v49 }
 0x409   : > { %v9180_v48 = vpop.xlane.xlu1 %2329  ;;  %v2670_v25 = vmul.f32 1.442695, %v2447_v53  ;;  %v2412_v24 = vsub.f32 %v10870_v0, %v2150_v42  ;;  %5318 = vmatmul.msk.bf16.vlgmr.msra.gmra.mxu1 %vm393_vm0, %v4784_v50  ;;  %v4582_v39 = vsel %vm393_vm0, %v4443_v9, 0.0  ;;  %v4450_v47 = vmul.f32 %v8823_v14, %v8911_v63  ;;  %v5648_v11 = vpop.eup %5647 }
 0x40a   : > { %v4458_v50 = vmul.f32 %v9090_v59, %v4318_v51  ;;  %v4574_v2 = vsel %vm393_vm0, %v4434_v21, 0.0  ;;  %v3554_v44 = vpack.c.b16 %v3536_v33, %v3535_v38  ;;  %v3214_v43 = vpack.c.bf16 %v9196_v36, %v9196_v36  ;;  %v9224_v38 = vpop.f32.mrf.mxu0 }
 0x40b   : > { %5649 = vpow2.f32 %v2670_v25  ;;  %v2600_v52 = vmul.f32 1.442695, %v2412_v24  ;;  %v9189_v7 = vpop.f32.mrf.mxu2  ;;  %2893 = vadd.xlane.f32.xlu0 %v2892_v34  ;;  %2980 = vadd.xlane.f32.xlu2 %v2979_v41  ;;  %v4581_v4 = vsel %vm393_vm0, %v4435_v30, 0.0  ;;  %v4584_v63 = vsel %vm393_vm0, %v4451_v13, 0.0  ;;  %10873 = vst [vmem:[#allocation67_spill] sm:$0xff] %v9224_v38  ;;  %v10923_v38 = vld [vmem:[#allocation60_spill] sm:$0xff] }
 0x40c   : > { %2956 = vadd.xlane.f32.xlu1 %v2955_v58  ;;  %v4576_v58 = vadd.f32 %v4575_v23, %v4574_v2  ;;  %v4577_v42 = vsel %vm393_vm0, %v4450_v47, 0.0  ;;  %v4583_v22 = vadd.f32 %v4582_v39, %v4581_v4  ;;  %v4579_v9 = vsel %vm393_vm0, %v4458_v50, 0.0  ;;  %v9235_v39 = vpop.f32.mrf.mxu3 }
 0x40d   : > { %5651 = vpow2.f32 %v2600_v52  ;;  %v2907_v24 = vsel %vm1967_vm6, %v9084_v3, 0.0  ;;  %v10874_v52 = vld [vmem:[#allocation68_spill] sm:$0xff]  ;;  %v3000_v41 = vsel %vm1967_vm6, %v8833_v8, 0.0  ;;  %v3768_v13 = vunpack.c.l.b16 %v3214_v43 }
 0x40e   : > { %5653 = vrcp.f32 %v9129_v31  ;;  %v2822_v35 = vpop.xlane.xlu0 %2821  ;;  %v4578_v51 = vadd.f32 %v4577_v42, %v4576_v58  ;;  %v4585_v34 = vadd.f32 %v4584_v63, %v4583_v22  ;;  %v2934_v56 = vsel %vm1967_vm6, %v10874_v52, 0.0 }
 0x40f   : > { %5655 = vpow2.f32 %v2602_v18  ;;  %v3464_v53 = vpop.f32.mrf.mxu1 }
 0x410   : > { %v4319_v40 = vmul.f32 %v5648_v11, %v3464_v53  ;;  %v9210_v6 = vpop.xlane.xlu2 %2806  ;;  %5275 = vmatmul.msk.bf16.gmra.mxu2 %vm1967_vm6, %v3554_v44  ;;  %5657 = vrcp.f32 %v2822_v35  ;;  %v4580_v47 = vadd.f32 %v4579_v9, %v4578_v51  ;;  %v10875_v35 = vld [vmem:[#allocation36_spill] sm:$0xff]  ;;  %v10877_v9 = vld [vmem:[#allocation19_spill] sm:$0xff] }
 0x411   : > { %v2159_v31 = vpop.xlane.xlu1 %2158  ;;  %v9213_v49 = vpop.eup %5649  ;;  %5659 = vrcp.f32 %v9034_v61 }
 0x412   : > { %v3215_v25 = vpack.c.bf16 %v9213_v49, %v9213_v49  ;;  %v4459_v0 = vmul.f32 %v9090_v59, %v4319_v40  ;;  %v2415_v44 = vsub.f32 %v10875_v35, %v2159_v31  ;;  %5661 = vrcp.f32 %v9064_v28  ;;  %v10876_v31 = vld [vmem:[#allocation59_spill] sm:$0xff] }
 0x413   : > { %v9222_v21 = vpop.eup %5651  ;;  %v9226_v18 = vpop.f32.mrf.mxu2  ;;  %2908 = vadd.xlane.f32.xlu0 %v2907_v24  ;;  %2935 = vadd.xlane.f32.xlu2 %v2934_v56  ;;  %5663 = vrcp.f32 %v9134_v37  ;;  %v2913_v28 = vsel %vm1967_vm6, %v9158_v1, 0.0  ;;  %v10880_v1 = vld [vmem:[#allocation71_spill] sm:$0xff] }
 0x414   : > { %v5654_v30 = vpop.eup %5653  ;;  %v3769_v33 = vunpack.c.l.b16 %v3215_v25  ;;  %v4586_v3 = vsel %vm393_vm0, %v4459_v0, 0.0  ;;  %3001 = vadd.xlane.f32.xlu1 %v3000_v41  ;;  %v3180_v2 = vpack.c.bf16 %v9222_v21, %v9222_v21  ;;  %v2976_v25 = vsel %vm1967_vm6, %v10877_v9, 0.0  ;;  %v9261_v37 = vpop.f32.mrf.mxu0 }
 0x415   : > { %v9233_v23 = vpop.eup %5655  ;;  %v4587_v50 = vadd.f32 %v4586_v3, %v4585_v34  ;;  %v4313_v40 = vmul.f32 %v5654_v30, %v8997_v62  ;;  %v2606_v61 = vmul.f32 1.442695, %v2415_v44  ;;  %v10878_v34 = vld [vmem:[#allocation5_spill] sm:$0xff]  ;;  %10879 = vst [vmem:[#allocation53_spill] sm:$0xff] %v9261_v37 }
 0x416   : > { %v2759_v8 = vpop.xlane.xlu0 %2758  ;;  %v3785_v11 = vpack.c.b16 %v3769_v33, %v3768_v13  ;;  %v5658_v58 = vpop.eup %5657  ;;  %v3181_v4 = vpack.c.bf16 %v9233_v23, %v9233_v23  ;;  %v3537_v62 = vunpack.c.l.b16 %v3180_v2  ;;  %v2937_v52 = vsel %vm1967_vm6, %v10878_v34, 0.0  ;;  %v10883_v34 = vld [vmem:[#allocation61_spill] sm:$0xff] }
 0x417   : > { %v3467_v53 = vpop.f32.mrf.mxu1  ;;  %v4785_v43 = vpack.c.bf16 %v4587_v50, %v4580_v47  ;;  %5665 = vrcp.f32 %v2759_v8  ;;  %v4453_v56 = vmul.f32 %v8823_v14, %v4313_v40  ;;  %v5660_v30 = vpop.eup %5659 }
 0x418   : > { %v2156_v63 = vpop.xlane.xlu2 %2155  ;;  %5293 = vmatmul.msk.bf16.gmra.mxu3 %vm1967_vm6, %v3785_v11  ;;  %v4320_v0 = vmul.f32 %v5658_v58, %v3467_v53  ;;  %5667 = vrcp.f32 %v9099_v32  ;;  %v3538_v41 = vunpack.c.l.b16 %v3181_v4  ;;  %v5662_v47 = vpop.eup %5661  ;;  %v2472_v32 = vsub.f32 %v10880_v1, %v9180_v48 }
 0x419   : > { %v9244_v42 = vpop.xlane.xlu1 %2830  ;;  %v2414_v22 = vsub.f32 %v10876_v31, %v2156_v63  ;;  %5319 = vmatmul.msk.bf16.gmra.mxu1 %vm393_vm0, %v4785_v43  ;;  %v9264_v50 = vpop.f32.mrf.mxu3  ;;  %v4598_v8 = vsel %vm393_vm0, %v4453_v56, 0.0  ;;  %v10881_v43 = vld [vmem:[#allocation51_spill] sm:$0xff]  ;;  %v2910_v31 = vsel %vm1967_vm6, %v9144_v57, 0.0 }
 0x41a   : > { %v4460_v13 = vmul.f32 %v9090_v59, %v4320_v0  ;;  %v3555_v3 = vpack.c.b16 %v3538_v41, %v3537_v62  ;;  %v5664_v35 = vpop.eup %5663  ;;  %v2961_v40 = vsel %vm1967_vm6, %v10881_v43, 0.0  ;;  %v2720_v9 = vmul.f32 1.442695, %v2472_v32  ;;  %v10882_v0 = vld [vmem:[#allocation32_spill] sm:$0xff] }
 0x41b   : > { %v2604_v24 = vmul.f32 1.442695, %v2414_v22  ;;  %v9253_v51 = vpop.f32.mrf.mxu2  ;;  %2977 = vadd.xlane.f32.xlu0 %v2976_v25  ;;  %2914 = vadd.xlane.f32.xlu2 %v2913_v28  ;;  %v4599_v25 = vadd.f32 %v4598_v8, %v9169_v29 }
 0x41c   : > { %2938 = vadd.xlane.f32.xlu1 %v2937_v52  ;;  %v4593_v63 = vsel %vm393_vm0, %v4460_v13, 0.0  ;;  %v9289_v56 = vpop.f32.mrf.mxu0 }
 0x41d   : > { %5669 = vpow2.f32 %v2604_v24  ;;  %v5666_v53 = vpop.eup %5665  ;;  %v4306_v24 = vmul.f32 %v5664_v35, %v10882_v0  ;;  %10884 = vst [vmem:[#allocation27_spill] sm:$0xff] %v9289_v56  ;;  %v4594_v41 = vadd.f32 %v4593_v63, %v9162_v19  ;;  %v10886_v35 = vld [vmem:[#allocation20_spill] sm:$0xff] }
 0x41e   : > { %5671 = vpow2.f32 %v2606_v61  ;;  %v2804_v33 = vpop.xlane.xlu0 %2803  ;;  %v5668_v4 = vpop.eup %5667  ;;  %v4299_v52 = vmul.f32 %v5666_v53, %v10883_v34  ;;  %v10888_v34 = vld [vmem:[#allocation70_spill] sm:$0xff] }
 0x41f   : > { %v3469_v2 = vpop.f32.mrf.mxu1  ;;  %5673 = vrcp.f32 %v2804_v33  ;;  %v4307_v29 = vmul.f32 %v5668_v4, %v8787_v17  ;;  %v10885_v33 = vld [vmem:[#allocation48_spill] sm:$0xff]  ;;  %v4446_v17 = vmul.f32 %v8805_v45, %v4306_v24 }
 0x420   : > { %v4321_v44 = vmul.f32 %v5662_v47, %v3469_v2  ;;  %v2828_v11 = vpop.xlane.xlu2 %2827  ;;  %5276 = vmatmul.msk.bf16.gmra.mxu2 %vm1967_vm6, %v3555_v3  ;;  %5675 = vrcp.f32 %v9210_v6  ;;  %v2919_v6 = vsel %vm1967_vm6, %v9233_v23, 0.0  ;;  %v4298_v23 = vmul.f32 %v5660_v30, %v10885_v33 }
 0x421   : > { %v2858_v58 = vpop.xlane.xlu1 %2857  ;;  %v4439_v30 = vmul.f32 %v8791_v12, %v4299_v52  ;;  %v9308_v4 = vpop.f32.mrf.mxu3  ;;  %v4447_v63 = vmul.f32 %v8805_v45, %v4307_v29  ;;  %v4603_v29 = vsel %vm393_vm0, %v4446_v17, 0.0 }
 0x422   : > { %v4461_v48 = vmul.f32 %v9090_v59, %v4321_v44  ;;  %5677 = vrcp.f32 %v2858_v58 }
 0x423   : > { %v9277_v22 = vpop.eup %5669  ;;  %5679 = vrcp.f32 %v2828_v11  ;;  %v9280_v62 = vpop.f32.mrf.mxu2  ;;  %2911 = vadd.xlane.f32.xlu0 %v2910_v31  ;;  %2962 = vadd.xlane.f32.xlu2 %v2961_v40 }
 0x424   : > { %v9284_v61 = vpop.eup %5671  ;;  %v4600_v57 = vsel %vm393_vm0, %v4461_v48, 0.0  ;;  %2920 = vadd.xlane.f32.xlu1 %v2919_v6  ;;  %v3182_v3 = vpack.c.bf16 %v9277_v22, %v9277_v22  ;;  %5681 = vpow2.f32 %v2720_v9  ;;  %v4438_v9 = vmul.f32 %v8791_v12, %v4298_v23 }
 0x425   : > { %v5674_v28 = vpop.eup %5673  ;;  %v4601_v13 = vadd.f32 %v4600_v57, %v4599_v25  ;;  %v3183_v19 = vpack.c.bf16 %v9284_v61, %v9284_v61  ;;  %5683 = vrcp.f32 %v9244_v42  ;;  %v2916_v42 = vsel %vm1967_vm6, %v9222_v21, 0.0 }
 0x426   : > { %v4314_v47 = vmul.f32 %v5674_v28, %v9030_v46  ;;  %v2333_v1 = vpop.xlane.xlu0 %2332  ;;  %v5676_v32 = vpop.eup %5675  ;;  %v10887_v46 = vld [vmem:[#allocation22_spill] sm:$0xff]  ;;  %v3539_v6 = vunpack.c.l.b16 %v3182_v3  ;;  %v4609_v57 = vsel %vm393_vm0, %v4439_v30, 0.0  ;;  %v4602_v33 = vsel %vm393_vm0, %v4438_v9, 0.0 }
 0x427   : > { %v3472_v2 = vpop.f32.mrf.mxu1  ;;  %v2473_v44 = vsub.f32 %v10886_v35, %v2333_v1  ;;  %v4786_v8 = vpack.c.bf16 %v4601_v13, %v4594_v41  ;;  %v3003_v43 = vsel %vm1967_vm6, %v10887_v46, 0.0  ;;  %v4315_v25 = vmul.f32 %v5676_v32, %v9061_v26  ;;  %v9335_v1 = vpop.f32.mrf.mxu0 }
 0x428   : > { %v5678_v11 = vpop.eup %5677  ;;  %v9302_v58 = vpop.xlane.xlu2 %2836  ;;  %v4454_v0 = vmul.f32 %v8823_v14, %v4314_v47  ;;  %v3540_v52 = vunpack.c.l.b16 %v3183_v19  ;;  %v4610_v41 = vsel %vm393_vm0, %v4447_v63, 0.0  ;;  %10889 = vst [vmem:[#allocation81_spill] sm:$0xff] %v9335_v1  ;;  %v4604_v32 = vadd.f32 %v4603_v29, %v4602_v33 }
 0x429   : > { %v9304_v53 = vpop.xlane.xlu1 %2842  ;;  %v5680_v40 = vpop.eup %5679  ;;  %v9313_v48 = vmul.f32 %v5678_v11, %v9149_v60  ;;  %v2722_v31 = vmul.f32 1.442695, %v2473_v44  ;;  %5320 = vmatmul.msk.bf16.gmra.mxu1 %vm393_vm0, %v4786_v8  ;;  %v2982_v60 = vsel %vm1967_vm6, %v10888_v34, 0.0  ;;  %v4455_v13 = vmul.f32 %v8823_v14, %v4315_v25 }
 0x42a   : > { %v4322_v28 = vmul.f32 %v5680_v40, %v3472_v2  ;;  %v9327_v26 = vpop.eup %5681  ;;  %v4605_v21 = vsel %vm393_vm0, %v4454_v0, 0.0  ;;  %v3556_v3 = vpack.c.b16 %v3540_v52, %v3539_v6  ;;  %v4611_v35 = vadd.f32 %v4610_v41, %v4609_v57  ;;  %v9351_v25 = vpop.f32.mrf.mxu3 }
 0x42b   : > { %5685 = vpow2.f32 %v2722_v31  ;;  %v9319_v24 = vpop.f32.mrf.mxu2  ;;  %3004 = vadd.xlane.f32.xlu0 %v3003_v43  ;;  %2917 = vadd.xlane.f32.xlu2 %v2916_v42  ;;  %v5684_v47 = vpop.eup %5683  ;;  %v3240_v44 = vpack.c.bf16 %v9327_v26, %v9327_v26  ;;  %v4606_v46 = vadd.f32 %v4605_v21, %v4604_v32  ;;  %v4612_v63 = vsel %vm393_vm0, %v4455_v13, 0.0  ;;  %v10890_v31 = vld [vmem:[#allocation26_spill] sm:$0xff] }
 0x42c   : > { %2983 = vadd.xlane.f32.xlu1 %v2982_v60  ;;  %v4462_v8 = vmul.f32 %v9090_v59, %v4322_v28  ;;  %v2958_v9 = vsel %vm1967_vm6, %v10890_v31, 0.0  ;;  %v4613_v6 = vadd.f32 %v4612_v63, %v4611_v35  ;;  %v3006_v42 = vsel %vm1967_vm6, %v8929_v10, 0.0  ;;  %v10891_v21 = vld [vmem:[#allocation10_spill] sm:$0xff] }
 0x42d   : > { %v3009_v34 = vsel %vm1967_vm6, %v8921_v15, 0.0  ;;  %v3991_v60 = vunpack.c.l.b16 %v3240_v44 }
 0x42e   : > { %v9333_v23 = vpop.xlane.xlu0 %2833  ;;  %v4607_v52 = vsel %vm393_vm0, %v4462_v8, 0.0 }
 0x42f   : > { %v3474_v2 = vpop.f32.mrf.mxu1  ;;  %v4608_v29 = vadd.f32 %v4607_v52, %v4606_v46  ;;  %v9365_v15 = vpop.f32.mrf.mxu0  ;;  %v2922_v52 = vsel %vm1967_vm6, %v9277_v22, 0.0 }
 0x430   : > { %v4323_v11 = vmul.f32 %v5684_v47, %v3474_v2  ;;  %v2339_v17 = vpop.xlane.xlu2 %2338  ;;  %5277 = vmatmul.msk.bf16.gmra.mxu2 %vm1967_vm6, %v3556_v3  ;;  %10892 = vst [vmem:[#allocation42_spill] sm:$0xff] %v9365_v15  ;;  %v10893_v2 = vld [vmem:[#allocation72_spill] sm:$0xff] }
 0x431   : > { %v9340_v19 = vpop.xlane.xlu1 %2344  ;;  %v9343_v30 = vpop.eup %5685  ;;  %v2475_v3 = vsub.f32 %v10891_v21, %v2339_v17  ;;  %v2985_v35 = vsel %vm1967_vm6, %v10893_v2, 0.0  ;;  %v10894_v17 = vld [vmem:[#allocation45_spill] sm:$0xff] }
 0x432   : > { %v3241_v43 = vpack.c.bf16 %v9343_v30, %v9343_v30  ;;  %v4463_v40 = vmul.f32 %v9090_v59, %v4323_v11  ;;  %v9370_v44 = vpop.f32.mrf.mxu3  ;;  %v2964_v46 = vsel %vm1967_vm6, %v10894_v17, 0.0 }
 0x433   : > { %v9353_v0 = vpop.f32.mrf.mxu2  ;;  %2959 = vadd.xlane.f32.xlu0 %v2958_v9  ;;  %3007 = vadd.xlane.f32.xlu2 %v3006_v42  ;;  %v2726_v8 = vmul.f32 1.442695, %v2475_v3  ;;  %v10895_v9 = vld [vmem:[#allocation77_spill] sm:$0xff] }
 0x434   : > { %v3992_v57 = vunpack.c.l.b16 %v3241_v43  ;;  %v4614_v28 = vsel %vm393_vm0, %v4463_v40, 0.0  ;;  %3010 = vadd.xlane.f32.xlu1 %v3009_v34  ;;  %v2925_v43 = vsel %vm1967_vm6, %v9284_v61, 0.0 }
 0x435   : > { %v4615_v41 = vadd.f32 %v4614_v28, %v4613_v6 }
 0x436   : > { %v2861_v13 = vpop.xlane.xlu0 %2860  ;;  %v4011_v33 = vpack.c.b16 %v3992_v57, %v3991_v60 }
 0x437   : > { %5687 = vrcp.f32 %v2861_v13  ;;  %v4787_v47 = vpack.c.bf16 %v4615_v41, %v4608_v29  ;;  %v9384_v61 = vpop.f32.mrf.mxu0  ;;  %v10898_v29 = vld [vmem:[#allocation13_spill] sm:$0xff] }
 0x438   : > { %v2840_v10 = vpop.xlane.xlu2 %2839  ;;  %5306 = vmatmul.msk.bf16.gmra.mxu0 %vm1967_vm6, %v4011_v33  ;;  %5689 = vpow2.f32 %v2726_v8  ;;  %10896 = vst [vmem:[#allocation55_spill] sm:$0xff] %v9384_v61  ;;  %v2943_v41 = vsel %vm1967_vm6, %v10898_v29, 0.0  ;;  %v10904_v29 = vld [vmem:[#allocation56_spill] sm:$0xff] }
 0x439   : > { %v9362_v32 = vpop.xlane.xlu1 %2845  ;;  %5321 = vmatmul.msk.bf16.gmra.mxu1 %vm393_vm0, %v4787_v47  ;;  %5691 = vrcp.f32 %v2840_v10  ;;  %v10899_v47 = vld [vmem:[#allocation21_spill] sm:$0xff] }
 0x43a   : > { %v9394_v33 = vpop.f32.mrf.mxu3  ;;  %v2477_v10 = vsub.f32 %v10899_v47, %v9340_v19 }
 0x43b   : > { %v9372_v11 = vpop.f32.mrf.mxu2  ;;  %2986 = vadd.xlane.f32.xlu0 %v2985_v35  ;;  %2926 = vadd.xlane.f32.xlu2 %v2925_v43 }
 0x43c   : > { %2965 = vadd.xlane.f32.xlu1 %v2964_v46 }
 0x43d   : > { %v5688_v40 = vpop.eup %5687 }
 0x43e   : > { %v9379_v63 = vmul.f32 %v5688_v40, %v9189_v7  ;;  %v2336_v31 = vpop.xlane.xlu0 %2335  ;;  %v10897_v7 = vld [vmem:[#allocation12_spill] sm:$0xff]  ;;  %v9392_v13 = vpop.eup %5689 }
 0x43f   : > { %v2474_v6 = vsub.f32 %v10895_v9, %v2336_v31  ;;  %v2991_v28 = vsel %vm1967_vm6, %v10897_v7, 0.0  ;;  %v5692_v21 = vpop.eup %5691  ;;  %v3243_v35 = vpack.c.bf16 %v9392_v13, %v9392_v13  ;;  %v10900_v31 = vld [vmem:[#allocation18_spill] sm:$0xff] }
 0x440   : > { %v2867_v42 = vpop.xlane.xlu2 %2866 }
 0x441   : > { %v2873_v34 = vpop.xlane.xlu1 %2872  ;;  %5693 = vrcp.f32 %v2867_v42  ;;  %v2724_v60 = vmul.f32 1.442695, %v2474_v6  ;;  %v10901_v6 = vld [vmem:[#allocation78_spill] sm:$0xff] }
 0x442   : > { %5695 = vrcp.f32 %v2873_v34  ;;  %v4326_v42 = vmul.f32 %v5692_v21, %v10901_v6  ;;  %v10902_v34 = vld [vmem:[#allocation74_spill] sm:$0xff]  ;;  %v3994_v21 = vunpack.c.l.b16 %v3243_v35 }
 0x443   : > { %5697 = vpow2.f32 %v2724_v60  ;;  %v9386_v57 = vpop.f32.mrf.mxu2  ;;  %2923 = vadd.xlane.f32.xlu0 %v2922_v52  ;;  %2944 = vadd.xlane.f32.xlu2 %v2943_v41  ;;  %v2940_v60 = vsel %vm1967_vm6, %v10902_v34, 0.0  ;;  %v9414_v52 = vpop.f32.mrf.mxu0  ;;  %v10905_v41 = vld [vmem:[#allocation29_spill] sm:$0xff] }
 0x444   : > { %2992 = vadd.xlane.f32.xlu1 %v2991_v28  ;;  %10903 = vst [vmem:[#allocation4_spill] sm:$0xff] %v9414_v52 }
 0x446   : > { %v2864_v22 = vpop.xlane.xlu0 %2863 }
 0x447   : > { %v5694_v3 = vpop.eup %5693  ;;  %5699 = vrcp.f32 %v2864_v22  ;;  %v2988_v22 = vsel %vm1967_vm6, %v10905_v41, 0.0 }
 0x448   : > { %v5696_v2 = vpop.eup %5695  ;;  %v9401_v8 = vmul.f32 %v5694_v3, %v9253_v51  ;;  %v2342_v17 = vpop.xlane.xlu2 %2341  ;;  %v2730_v51 = vmul.f32 1.442695, %v2477_v10 }
 0x449   : > { %v2348_v46 = vpop.xlane.xlu1 %2347  ;;  %v9403_v43 = vpop.eup %5697  ;;  %v9406_v40 = vmul.f32 %v5696_v2, %v9319_v24  ;;  %v2476_v9 = vsub.f32 %v10900_v31, %v2342_v17  ;;  %v2946_v24 = vsel %vm1967_vm6, %v10904_v29, 0.0  ;;  %v4466_v2 = vmul.f32 %v8791_v12, %v4326_v42  ;;  %v10907_v42 = vld [vmem:[#allocation62_spill] sm:$0xff] }
 0x44a   : > { %v3242_v19 = vpack.c.bf16 %v9403_v43, %v9403_v43 }
 0x44b   : > { %v2728_v7 = vmul.f32 1.442695, %v2476_v9  ;;  %v9416_v28 = vpop.f32.mrf.mxu2  ;;  %2941 = vadd.xlane.f32.xlu0 %v2940_v60  ;;  %2989 = vadd.xlane.f32.xlu2 %v2988_v22  ;;  %v9426_v9 = vpop.f32.mrf.mxu3  ;;  %v4630_v35 = vsel %vm393_vm0, %v4466_v2, 0.0  ;;  %v10909_v22 = vld [vmem:[#allocation76_spill] sm:$0xff] }
 0x44c   : > { %v3993_v3 = vunpack.c.l.b16 %v3242_v19  ;;  %2947 = vadd.xlane.f32.xlu1 %v2946_v24  ;;  %10906 = vst [vmem:[#allocation50_spill] sm:$0xff] %v9426_v9  ;;  %v10908_v24 = vld [vmem:[#allocation46_spill] sm:$0xff] }
 0x44d   : > { %v5700_v47 = vpop.eup %5699  ;;  %5701 = vpow2.f32 %v2728_v7  ;;  %v2973_v41 = vsel %vm1967_vm6, %v10908_v24, 0.0 }
 0x44e   : > { %v4334_v10 = vmul.f32 %v5700_v47, %v9226_v18  ;;  %v9424_v17 = vpop.xlane.xlu0 %2848  ;;  %v4012_v31 = vpack.c.b16 %v3994_v21, %v3993_v3  ;;  %5703 = vpow2.f32 %v2730_v51  ;;  %v2967_v18 = vsel %vm1967_vm6, %v10907_v42, 0.0  ;;  %v9446_v47 = vpop.f32.mrf.mxu0 }
 0x44f   : > { %v3015_v21 = vsel %vm1967_vm6, %v10909_v22, 0.0  ;;  %10910 = vst [vmem:[#allocation39_spill] sm:$0xff] %v9446_v47 }
 0x450   : > { %v4474_v6 = vmul.f32 %v8805_v45, %v4334_v10  ;;  %v2870_v34 = vpop.xlane.xlu2 %2869  ;;  %5307 = vmatmul.msk.bf16.gmra.mxu0 %vm1967_vm6, %v4012_v31  ;;  %v10911_v10 = vld [vmem:[#allocation38_spill] sm:$0xff] }
 0x451   : > { %v2876_v60 = vpop.xlane.xlu1 %2875  ;;  %5705 = vrcp.f32 %v2870_v34  ;;  %v2478_v31 = vsub.f32 %v10911_v10, %v2348_v46  ;;  %v10914_v10 = vld [vmem:[#allocation49_spill] sm:$0xff] }
 0x452   : > { %v4631_v19 = vsel %vm393_vm0, %v4474_v6, 0.0  ;;  %5707 = vrcp.f32 %v2876_v60  ;;  %v10912_v60 = vld [vmem:[#allocation64_spill] sm:$0xff]  ;;  %v3012_v15 = vsel %vm1967_vm6, %v10914_v10, 0.0  ;;  %v10919_v10 = vld [vmem:[#allocation73_spill] sm:$0xff] }
 0x453   : > { %v9434_v7 = vpop.eup %5701  ;;  %v9436_v29 = vadd.f32 %v4631_v19, %v4630_v35  ;;  %v9438_v51 = vpop.f32.mrf.mxu2  ;;  %2968 = vadd.xlane.f32.xlu0 %v2967_v18  ;;  %3016 = vadd.xlane.f32.xlu2 %v3015_v21  ;;  %v2732_v46 = vmul.f32 1.442695, %v2478_v31 }
 0x454   : > { %2974 = vadd.xlane.f32.xlu1 %v2973_v41  ;;  %v9444_v3 = vpop.eup %5703  ;;  %v3244_v2 = vpack.c.bf16 %v9434_v7, %v9434_v7  ;;  %v9457_v22 = vpop.f32.mrf.mxu3 }
 0x455   : > { %v3245_v42 = vpack.c.bf16 %v9444_v3, %v9444_v3  ;;  %10913 = vst [vmem:[#allocation11_spill] sm:$0xff] %v9457_v22 }
 0x456   : > { %v2351_v6 = vpop.xlane.xlu0 %2350  ;;  %v3995_v52 = vunpack.c.l.b16 %v3244_v2  ;;  %v9469_v31 = vpop.f32.mrf.mxu0 }
 0x457   : > { %v5706_v34 = vpop.eup %5705  ;;  %v2479_v35 = vsub.f32 %v10912_v60, %v2351_v6  ;;  %v3996_v61 = vunpack.c.l.b16 %v3245_v42  ;;  %10916 = vst [vmem:[#allocation57_spill] sm:$0xff] %v9469_v31 }
 0x458   : > { %v5708_v19 = vpop.eup %5707  ;;  %v9455_v18 = vmul.f32 %v5706_v34, %v9280_v62  ;;  %v2855_v24 = vpop.xlane.xlu2 %2854  ;;  %v3018_v62 = vsel %vm1967_vm6, %v9196_v36, 0.0  ;;  %v10915_v34 = vld [vmem:[#allocation7_spill] sm:$0xff] }
 0x459   : > { %v2930_v41 = vpop.xlane.xlu1 %2929  ;;  %v4338_v21 = vmul.f32 %v5708_v19, %v9353_v0  ;;  %v2734_v47 = vmul.f32 1.442695, %v2479_v35  ;;  %v2970_v60 = vsel %vm1967_vm6, %v10915_v34, 0.0  ;;  %v4013_v2 = vpack.c.b16 %v3996_v61, %v3995_v52  ;;  %v10918_v52 = vld [vmem:[#allocation40_spill] sm:$0xff] }
 0x45a   : > { %5709 = vrcp.f32 %v2930_v41  ;;  %v10917_v41 = vld [vmem:[#allocation17_spill] sm:$0xff] }
 0x45b   : > { %v9462_v6 = vpop.f32.mrf.mxu2  ;;  %3013 = vadd.xlane.f32.xlu0 %v3012_v15  ;;  %5711 = vrcp.f32 %v9333_v23  ;;  %2971 = vadd.xlane.f32.xlu2 %v2970_v60  ;;  %v2949_v23 = vsel %vm1967_vm6, %v10917_v41, 0.0  ;;  %v10920_v60 = vld [vmem:[#allocation80_spill] sm:$0xff] }
 0x45c   : > { %3019 = vadd.xlane.f32.xlu1 %v3018_v62  ;;  %5713 = vpow2.f32 %v2734_v47  ;;  %v9478_v47 = vpop.f32.mrf.mxu3  ;;  %v2997_v62 = vsel %vm1967_vm6, %v10919_v10, 0.0 }
 0x45d   : > { %5715 = vpow2.f32 %v2732_v46  ;;  %v3027_v46 = vsel %vm1967_vm6, %v10918_v52, 0.0 }
 0x45e   : > { %v2852_v0 = vpop.xlane.xlu0 %2851 }
 0x45f   : > { %5717 = vrcp.f32 %v2852_v0 }
 0x460   : > { %v2954_v35 = vpop.xlane.xlu2 %2953  ;;  %5308 = vmatmul.msk.bf16.gmra.mxu0 %vm1967_vm6, %v4013_v2  ;;  %v5710_v36 = vpop.eup %5709 }
 0x461   : > { %v9471_v15 = vpop.xlane.xlu1 %2884  ;;  %5719 = vrcp.f32 %v2954_v35  ;;  %v5712_v19 = vpop.eup %5711  ;;  %v4356_v0 = vmul.f32 %v5710_v36, %v10920_v60  ;;  %v10921_v35 = vld [vmem:[#allocation15_spill] sm:$0xff] }
 0x462   : > { %v9476_v42 = vpop.eup %5713  ;;  %5721 = vrcp.f32 %v9302_v58  ;;  %v4324_v41 = vmul.f32 %v5712_v19, %v10921_v35  ;;  %v4478_v58 = vmul.f32 %v8805_v45, %v4338_v21  ;;  %v9504_v35 = vpop.f32.mrf.mxu0 }
 0x463   : > { %v9481_v61 = vpop.f32.mrf.mxu2  ;;  %2950 = vadd.xlane.f32.xlu0 %v2949_v23  ;;  %v9487_v34 = vpop.eup %5715  ;;  %2998 = vadd.xlane.f32.xlu2 %v2997_v62  ;;  %v3247_v23 = vpack.c.bf16 %v9476_v42, %v9476_v42  ;;  %5723 = vrcp.f32 %v2855_v24  ;;  %v4496_v36 = vmul.f32 %v8791_v12, %v4356_v0  ;;  %10922 = vst [vmem:[#allocation6_spill] sm:$0xff] %v9504_v35  ;;  %v2994_v24 = vsel %vm1967_vm6, %v10923_v38, 0.0  ;;  %v10924_v35 = vld [vmem:[#allocation43_spill] sm:$0xff] }
 0x464   : > { %3028 = vadd.xlane.f32.xlu1 %v3027_v46  ;;  %v3246_v10 = vpack.c.bf16 %v9487_v34, %v9487_v34  ;;  %v4659_v0 = vsel %vm393_vm0, %v4478_v58, 0.0 }
 0x465   : > { %v5718_v2 = vpop.eup %5717  ;;  %v4672_v58 = vsel %vm393_vm0, %v4496_v36, 0.0  ;;  %v4473_v36 = vmul.f32 %v8805_v45, %v9379_v63 }
 0x466   : > { %v4330_v1 = vmul.f32 %v5718_v2, %v9077_v20  ;;  %v9495_v52 = vpop.xlane.xlu0 %2932  ;;  %v4472_v20 = vmul.f32 %v8805_v45, %v9313_v48  ;;  %v4464_v2 = vmul.f32 %v8791_v12, %v4324_v41  ;;  %v3072_v48 = vsel %vm1967_vm6, %v10924_v35, 0.0  ;;  %v10925_v41 = vld [vmem:[#allocation34_spill] sm:$0xff] }
 0x467   : > { %v5720_v56 = vpop.eup %5719  ;;  %v3997_v9 = vunpack.c.l.b16 %v3246_v10 }
 0x468   : > { %v4364_v46 = vmul.f32 %v5720_v56, %v9235_v39  ;;  %v4470_v19 = vmul.f32 %v8791_v12, %v4330_v1  ;;  %v2882_v62 = vpop.xlane.xlu2 %2881  ;;  %v5722_v60 = vpop.eup %5721  ;;  %v3998_v39 = vunpack.c.l.b16 %v3247_v23  ;;  %v4616_v35 = vsel %vm393_vm0, %v4464_v2, 0.0 }
 0x469   : > { %v9502_v21 = vpop.xlane.xlu1 %2887  ;;  %5725 = vrcp.f32 %v2882_v62  ;;  %v3024_v62 = vsel %vm1967_vm6, %v10925_v41, 0.0  ;;  %v4325_v38 = vmul.f32 %v5722_v60, %v10926_v55  ;;  %v4617_v41 = vsel %vm393_vm0, %v4472_v20, 0.0 }
 0x46a   : > { %v4504_v56 = vmul.f32 %v8805_v45, %v4364_v46  ;;  %v4658_v1 = vsel %vm393_vm0, %v4470_v19, 0.0  ;;  %v9525_v46 = vpop.f32.mrf.mxu3  ;;  %v4618_v55 = vadd.f32 %v4617_v41, %v4616_v35 }
 0x46b   : > { %v9514_v37 = vadd.f32 %v4659_v0, %v4658_v1  ;;  %v9516_v31 = vpop.f32.mrf.mxu2  ;;  %2995 = vadd.xlane.f32.xlu0 %v2994_v24  ;;  %3025 = vadd.xlane.f32.xlu2 %v3024_v62  ;;  %v5724_v24 = vpop.eup %5723  ;;  %v4014_v1 = vpack.c.b16 %v3998_v39, %v3997_v9  ;;  %v4465_v10 = vmul.f32 %v8791_v12, %v4325_v38  ;;  %v3021_v39 = vsel %vm1967_vm6, %v9213_v49, 0.0 }
 0x46c   : > { %v4673_v23 = vsel %vm393_vm0, %v4504_v56, 0.0  ;;  %3073 = vadd.xlane.f32.xlu1 %v3072_v48  ;;  %v9540_v9 = vpop.f32.mrf.mxu0  ;;  %v4331_v20 = vmul.f32 %v5724_v24, %v9109_v54 }
 0x46d   : > { %v9527_v19 = vadd.f32 %v4673_v23, %v4672_v58  ;;  %10927 = vst [vmem:[#allocation24_spill] sm:$0xff] %v9540_v9  ;;  %v4623_v38 = vsel %vm393_vm0, %v4465_v10, 0.0  ;;  %v4624_v58 = vsel %vm393_vm0, %v4473_v36, 0.0 }
 0x46e   : > { %v2879_v0 = vpop.xlane.xlu0 %2878  ;;  %v4471_v24 = vmul.f32 %v8791_v12, %v4331_v20 }
 0x46f   : > { %v5726_v22 = vpop.eup %5725  ;;  %5727 = vrcp.f32 %v2879_v0 }
 0x470   : > { %v4340_v60 = vmul.f32 %v5726_v22, %v9386_v57  ;;  %v9535_v56 = vpop.xlane.xlu2 %2896  ;;  %5309 = vmatmul.msk.bf16.gmra.mxu0 %vm1967_vm6, %v4014_v1  ;;  %5729 = vrcp.f32 %v9304_v53  ;;  %v3099_v57 = vsel %vm1967_vm6, %v9343_v30, 0.0  ;;  %v10928_v22 = vld [vmem:[#allocation47_spill] sm:$0xff]  ;;  %v9558_v53 = vadd.f32 %v4624_v58, %v4623_v38 }
 0x471   : > { %v9537_v48 = vpop.xlane.xlu1 %2902  ;;  %v3051_v62 = vsel %vm1967_vm6, %v10928_v22, 0.0  ;;  %v4665_v36 = vsel %vm393_vm0, %v4471_v24, 0.0  ;;  %v10931_v22 = vld [vmem:[#allocation65_spill] sm:$0xff]  ;;  %v10932_v38 = vld [vmem:[#allocation75_spill] sm:$0xff]  ;;  %5731 = vrcp.f32 %v9362_v32 }
 0x472   : > { %v4480_v2 = vmul.f32 %v8823_v14, %v4340_v60  ;;  %v9564_v1 = vpop.f32.mrf.mxu3  ;;  %5733 = vrcp.f32 %v9471_v15  ;;  %v10933_v15 = vld [vmem:[#allocation66_spill] sm:$0xff] }
 0x473   : > { %v9547_v63 = vpop.f32.mrf.mxu2  ;;  %3022 = vadd.xlane.f32.xlu0 %v3021_v39  ;;  %3052 = vadd.xlane.f32.xlu2 %v3051_v62  ;;  %v3054_v62 = vsel %vm1967_vm6, %v10931_v22, 0.0  ;;  %5735 = vrcp.f32 %v9502_v21  ;;  %v3075_v21 = vsel %vm1967_vm6, %v10933_v15, 0.0 }
 0x474   : > { %3100 = vadd.xlane.f32.xlu1 %v3099_v57  ;;  %v4619_v54 = vsel %vm393_vm0, %v4480_v2, 0.0  ;;  %v10929_v2 = vld [vmem:[#allocation37_spill] sm:$0xff]  ;;  %v9573_v20 = vpop.f32.mrf.mxu0 }
 0x475   : > { %v5728_v49 = vpop.eup %5727  ;;  %v9556_v23 = vadd.f32 %v4619_v54, %v4618_v55  ;;  %v3048_v39 = vsel %vm1967_vm6, %v10929_v2, 0.0  ;;  %10930 = vst [vmem:[#allocation35_spill] sm:$0xff] %v9573_v20  ;;  %v3096_v54 = vsel %vm1967_vm6, %v9327_v26, 0.0  ;;  %v10934_v2 = vld [vmem:[#allocation30_spill] sm:$0xff] }
 0x476   : > { %v4339_v30 = vmul.f32 %v5728_v49, %v9372_v11  ;;  %v9562_v0 = vpop.xlane.xlu0 %2890  ;;  %v5730_v60 = vpop.eup %5729 }
 0x477   : > { %v4327_v58 = vmul.f32 %v5730_v60, %v10932_v38  ;;  %v5732_v32 = vpop.eup %5731 }
 0x478   : > { %v4479_v35 = vmul.f32 %v8805_v45, %v4339_v30  ;;  %v9567_v41 = vpop.xlane.xlu2 %2899  ;;  %v4475_v30 = vmul.f32 %v8805_v45, %v9401_v8  ;;  %v10935_v8 = vld [vmem:[#allocation3_spill] sm:$0xff] }
 0x479   : > { %v2906_v10 = vpop.xlane.xlu1 %2905  ;;  %v4467_v24 = vmul.f32 %v8791_v12, %v4327_v58  ;;  %v3033_v22 = vsel %vm1967_vm6, %v10935_v8, 0.0 }
 0x47a   : > { %v4666_v55 = vsel %vm393_vm0, %v4479_v35, 0.0  ;;  %v9594_v60 = vpop.f32.mrf.mxu3 }
 0x47b   : > { %v9575_v11 = vpop.f32.mrf.mxu2  ;;  %v9577_v57 = vadd.f32 %v4666_v55, %v4665_v36  ;;  %3049 = vadd.xlane.f32.xlu0 %v3048_v39  ;;  %3097 = vadd.xlane.f32.xlu2 %v3096_v54  ;;  %v5734_v36 = vpop.eup %5733  ;;  %v3081_v39 = vsel %vm1967_vm6, %v10934_v2, 0.0  ;;  %v4638_v54 = vsel %vm393_vm0, %v4475_v30, 0.0 }
 0x47c   : > { %3055 = vadd.xlane.f32.xlu1 %v3054_v62  ;;  %v9606_v62 = vld [vmem:[%s10152_s5] ss:$0 sm:$0xff]  ;;  %v9610_v58 = vpop.f32.mrf.mxu0  ;;  %v4341_v2 = vmul.f32 %v5734_v36, %v9416_v28 }
 0x47d   : > { %10936 = vst [vmem:[#allocation44_spill] sm:$0xff] %v9610_v58 }
 0x47e   : > { %v2894_v49 = vpop.xlane.xlu0 %2893  ;;  %v4481_v36 = vmul.f32 %v8823_v14, %v4341_v2 }
 0x47f   : > { %5737 = vrcp.f32 %v2894_v49  ;;  %v10937_v49 = vld [vmem:[#allocation85_spill] sm:$0xff] }
 0x480   : > { %v9590_v35 = vpop.xlane.xlu2 %2980  ;;  %5739 = vrcp.f32 %v2906_v10  ;;  %v5736_v10 = vpop.eup %5735  ;;  %v4328_v15 = vmul.f32 %v5732_v32, %v10937_v49  ;;  %v10939_v49 = vld [vmem:[#allocation8_spill] sm:$0xff] }
 0x481   : > { %v9592_v26 = vpop.xlane.xlu1 %2956  ;;  %5741 = vrcp.f32 %v9424_v17  ;;  %v4637_v17 = vsel %vm393_vm0, %v4467_v24, 0.0  ;;  %v4342_v30 = vmul.f32 %v5736_v10, %v9438_v51 }
 0x482   : > { %v4468_v32 = vmul.f32 %v8791_v12, %v4328_v15  ;;  %v3036_v15 = vsel %vm1967_vm6, %v10939_v49, 0.0  ;;  %v4626_v49 = vsel %vm393_vm0, %v4481_v36, 0.0 }
 0x483   : > { %v3686_v55 = vpop.f32.mrf.mxu2  ;;  %3076 = vadd.xlane.f32.xlu0 %v3075_v21  ;;  %3034 = vadd.xlane.f32.xlu2 %v3033_v22  ;;  %v9613_v21 = vadd.f32 %v4638_v54, %v4637_v17  ;;  %v9637_v17 = vpop.f32.mrf.mxu3 }
 0x484   : > { %3082 = vadd.xlane.f32.xlu1 %v3081_v39 }
 0x485   : > { %v5738_v38 = vpop.eup %5737 }
 0x486   : > { %v4344_v8 = vmul.f32 %v5738_v38, %v9481_v61  ;;  %v4877_v9 = vpop.f32.mrf.mxu1  ;;  %v2909_v20 = vpop.xlane.xlu0 %2908 }
 0x487   : > { %v5740_v39 = vpop.eup %5739  ;;  %v4878_v22 = vadd.f32 %v9606_v62, %v4877_v9  ;;  %5743 = vrcp.f32 %v2909_v20  ;;  %v4476_v9 = vmul.f32 %v8805_v45, %v9455_v18  ;;  %v10940_v18 = vld [vmem:[#allocation52_spill] sm:$0xff] }
 0x488   : > { %v5742_v24 = vpop.eup %5741  ;;  %v4348_v5 = vmul.f32 %v5740_v39, %v3686_v55  ;;  %v9626_v28 = vpop.xlane.xlu2 %2935  ;;  %v4484_v51 = vmul.f32 %v8823_v14, %v4344_v8  ;;  %v10938_v55 = vld [vmem:[#allocation63_spill] sm:$0xff]  ;;  %v3078_v8 = vsel %vm1967_vm6, %v10940_v18, 0.0  ;;  %v4482_v39 = vmul.f32 %v8823_v14, %v4342_v30 }
 0x489   : > { %v9628_v61 = vpop.xlane.xlu1 %3001  ;;  %v4957_v20 = vpack.c.bf16 %v4878_v22, %v4878_v22  ;;  %v3030_v10 = vsel %vm1967_vm6, %v10938_v55, 0.0  ;;  %v4329_v54 = vmul.f32 %v5742_v24, %v9044_v16  ;;  %5745 = vrcp.f32 %v9562_v0 }
 0x48a   : > { %v4488_v2 = vmul.f32 %v9090_v59, %v4348_v5  ;;  %v4644_v16 = vsel %vm393_vm0, %v4468_v32, 0.0  ;;  %v4645_v24 = vsel %vm393_vm0, %v4476_v9, 0.0  ;;  %v4477_v55 = vmul.f32 %v8805_v45, %v9406_v40 }
 0x48b   : > { %4990 = vst.msk [vmem:[%s9624_s8] sm:$0xf] %vm4989_vm7, %v4957_v20  ;;  %v3688_v38 = vpop.f32.mrf.mxu2  ;;  %3031 = vadd.xlane.f32.xlu0 %v3030_v10  ;;  %3079 = vadd.xlane.f32.xlu2 %v3078_v8  ;;  %v4647_v20 = vsel %vm393_vm0, %v4484_v51, 0.0  ;;  %v4646_v5 = vadd.f32 %v4645_v24, %v4644_v16  ;;  %v4469_v0 = vmul.f32 %v8791_v12, %v4329_v54  ;;  %v4633_v9 = vsel %vm393_vm0, %v4482_v39, 0.0  ;;  %v10942_v24 = vld [vmem:[#allocation28_spill] sm:$0xff] }
 0x48c   : > { %3037 = vadd.xlane.f32.xlu1 %v3036_v15  ;;  %v9657_v15 = vpop.f32.mrf.mxu0  ;;  %v4621_v51 = vsel %vm393_vm0, %v4488_v2, 0.0  ;;  %v3057_v54 = vsel %vm1967_vm6, %v10942_v24, 0.0  ;;  %v3105_v2 = vsel %vm1967_vm6, %v9392_v13, 0.0 }
 0x48d   : > { %v5744_v22 = vpop.eup %5743  ;;  %10941 = vst [vmem:[#allocation68_spill] sm:$0xff] %v9657_v15  ;;  %v9666_v36 = vadd.f32 %v4647_v20, %v4646_v5  ;;  %v10943_v15 = vld [vmem:[#allocation87_spill] sm:$0xff]  ;;  %v4622_v20 = vadd.f32 %v4621_v51, %v9556_v23 }
 0x48e   : > { %v4349_v10 = vmul.f32 %v5744_v22, %v3688_v38  ;;  %v4879_v30 = vpop.f32.mrf.mxu1  ;;  %v9655_v18 = vpop.xlane.xlu0 %2977  ;;  %v4627_v22 = vadd.f32 %v4626_v49, %v9558_v53  ;;  %v3063_v39 = vsel %vm1967_vm6, %v10943_v15, 0.0  ;;  %v4634_v49 = vadd.f32 %v4633_v9, %v9436_v29 }
 0x48f   : > { %v4880_v32 = vadd.f32 %v9606_v62, %v4879_v30  ;;  %v5746_v58 = vpop.eup %5745 }
 0x490   : > { %v4489_v40 = vmul.f32 %v9090_v59, %v4349_v10  ;;  %v2915_v38 = vpop.xlane.xlu2 %2914  ;;  %v4652_v10 = vsel %vm393_vm0, %v4477_v55, 0.0  ;;  %v4343_v23 = vmul.f32 %v5746_v58, %v9462_v6  ;;  %v3108_v58 = vsel %vm1967_vm6, %v9434_v7, 0.0 }
 0x491   : > { %v9664_v8 = vpop.xlane.xlu1 %2938  ;;  %v4958_v16 = vpack.c.bf16 %v4880_v32, %v4880_v32  ;;  %v4651_v32 = vsel %vm393_vm0, %v4469_v0, 0.0  ;;  %5747 = vrcp.f32 %v2915_v38  ;;  %v3102_v38 = vsel %vm1967_vm6, %v9403_v43, 0.0 }
 0x492   : > { %v4628_v30 = vsel %vm393_vm0, %v4489_v40, 0.0  ;;  %v9682_v15 = vadd.f32 %v4652_v10, %v4651_v32  ;;  %v9684_v40 = vpop.f32.mrf.mxu3  ;;  %v4483_v24 = vmul.f32 %v8823_v14, %v4343_v23 }
 0x493   : > { %v4629_v5 = vadd.f32 %v4628_v30, %v4627_v22  ;;  %4991 = vst.msk [vmem:[%s9624_s8 + $0x4] sm:$0xf] %vm4989_vm7, %v4958_v16  ;;  %3058 = vadd.xlane.f32.xlu0 %v3057_v54  ;;  %v3691_v53 = vpop.f32.mrf.mxu2  ;;  %3106 = vadd.xlane.f32.xlu2 %v3105_v2  ;;  %v10944_v30 = vld [vmem:[#allocation86_spill] sm:$0xff] }
 0x494   : > { %3064 = vadd.xlane.f32.xlu1 %v3063_v39  ;;  %v9691_v9 = vpop.f32.mrf.mxu0  ;;  %v3060_v39 = vsel %vm1967_vm6, %v10944_v30, 0.0 }
 0x495   : > { %v4788_v13 = vpack.c.bf16 %v4629_v5, %v4622_v20 }
 0x496   : > { %v4882_v55 = vpop.f32.mrf.mxu1  ;;  %v2912_v51 = vpop.xlane.xlu0 %2911 }
 0x497   : > { %v4883_v22 = vadd.f32 %v9606_v62, %v4882_v55  ;;  %5749 = vrcp.f32 %v2912_v51  ;;  %5322 = vmatmul.msk.bf16.gmra.mxu1 %vm393_vm0, %v4788_v13  ;;  %v5748_v54 = vpop.eup %5747 }
 0x498   : > { %v9689_v29 = vpop.xlane.xlu2 %2962  ;;  %5751 = vrcp.f32 %v9535_v56  ;;  %v4640_v56 = vsel %vm393_vm0, %v4483_v24, 0.0  ;;  %v10945_v24 = vld [vmem:[#allocation14_spill] sm:$0xff] }
 0x499   : > { %v2921_v0 = vpop.xlane.xlu1 %2920  ;;  %v4959_v16 = vpack.c.bf16 %v4883_v22, %v4883_v22  ;;  %5753 = vrcp.f32 %v9567_v41 }
 0x49a   : > { %v9703_v20 = vpop.f32.mrf.mxu3 }
 0x49b   : > { %4992 = vst.msk [vmem:[%s9624_s8 + $0x8] sm:$0xf] %vm4989_vm7, %v4959_v16  ;;  %3103 = vadd.xlane.f32.xlu0 %v3102_v38  ;;  %v3693_v6 = vpop.f32.mrf.mxu2  ;;  %3061 = vadd.xlane.f32.xlu2 %v3060_v39  ;;  %v4641_v16 = vadd.f32 %v4640_v56, %v9613_v21  ;;  %v10946_v39 = vld [vmem:[#allocation9_spill] sm:$0xff] }
 0x49c   : > { %v4351_v2 = vmul.f32 %v5748_v54, %v3693_v6  ;;  %3109 = vadd.xlane.f32.xlu1 %v3108_v58  ;;  %v3039_v54 = vsel %vm1967_vm6, %v10945_v24, 0.0  ;;  %v9719_v58 = vpop.f32.mrf.mxu0 }
 0x49d   : > { %v5750_v10 = vpop.eup %5749 }
 0x49e   : > { %v4350_v43 = vmul.f32 %v5750_v10, %v3691_v53  ;;  %v4491_v5 = vmul.f32 %v9090_v59, %v4351_v2  ;;  %v4884_v32 = vpop.f32.mrf.mxu1  ;;  %v9707_v13 = vpop.xlane.xlu0 %3004  ;;  %v3045_v2 = vsel %vm1967_vm6, %v10946_v39, 0.0  ;;  %v10947_v10 = vld [vmem:[#allocation2_spill] sm:$0xff] }
 0x49f   : > { %v4885_v7 = vadd.f32 %v9606_v62, %v4884_v32  ;;  %v5752_v53 = vpop.eup %5751  ;;  %v3087_v21 = vsel %vm1967_vm6, %v10947_v10, 0.0  ;;  %v10949_v10 = vld [vmem:[#allocation25_spill] sm:$0xff] }
 0x4a0   : > { %v4490_v23 = vmul.f32 %v9090_v59, %v4350_v43  ;;  %v4642_v55 = vsel %vm393_vm0, %v4491_v5, 0.0  ;;  %v2918_v51 = vpop.xlane.xlu2 %2917  ;;  %v4345_v5 = vmul.f32 %v5752_v53, %v9516_v31  ;;  %v5754_v32 = vpop.eup %5753 }
 0x4a1   : > { %v9713_v22 = vpop.xlane.xlu1 %2983  ;;  %v4960_v38 = vpack.c.bf16 %v4885_v7, %v4885_v7  ;;  %5755 = vrcp.f32 %v2918_v51  ;;  %v4643_v41 = vadd.f32 %v4642_v55, %v4641_v16  ;;  %v4346_v24 = vmul.f32 %v5754_v32, %v9547_v63 }
 0x4a2   : > { %v4635_v6 = vsel %vm393_vm0, %v4490_v23, 0.0  ;;  %5757 = vrcp.f32 %v2921_v0  ;;  %v9730_v51 = vpop.f32.mrf.mxu3 }
 0x4a3   : > { %4993 = vst.msk [vmem:[%s9624_s8 + $0xc] sm:$0xf] %vm4989_vm7, %v4960_v38  ;;  %3040 = vadd.xlane.f32.xlu0 %v3039_v54  ;;  %v3696_v30 = vpop.f32.mrf.mxu2  ;;  %v4636_v43 = vadd.f32 %v4635_v6, %v4634_v49  ;;  %3088 = vadd.xlane.f32.xlu2 %v3087_v21  ;;  %v4485_v49 = vmul.f32 %v8823_v14, %v4345_v5  ;;  %v10948_v6 = vld [vmem:[#allocation16_spill] sm:$0xff]  ;;  %v3042_v21 = vsel %vm1967_vm6, %v10949_v10, 0.0  ;;  %5759 = vrcp.f32 %v9537_v48 }
 0x4a4   : > { %3046 = vadd.xlane.f32.xlu1 %v3045_v2  ;;  %v9750_v63 = vpop.f32.mrf.mxu0  ;;  %5761 = vrcp.f32 %v9592_v26 }
 0x4a5   : > { %v4789_v56 = vpack.c.bf16 %v4643_v41, %v4636_v43  ;;  %v3084_v41 = vsel %vm1967_vm6, %v10948_v6, 0.0  ;;  %v4654_v5 = vsel %vm393_vm0, %v4485_v49, 0.0  ;;  %5763 = vrcp.f32 %v9495_v52 }
 0x4a6   : > { %v4887_v7 = vpop.f32.mrf.mxu1  ;;  %v9728_v23 = vpop.xlane.xlu0 %2959  ;;  %5765 = vrcp.f32 %v9655_v18  ;;  %v3117_v52 = vsel %vm1967_vm6, %v9476_v42, 0.0 }
 0x4a7   : > { %v5756_v55 = vpop.eup %5755  ;;  %v4888_v16 = vadd.f32 %v9606_v62, %v4887_v7  ;;  %5323 = vmatmul.msk.bf16.gmra.mxu1 %vm393_vm0, %v4789_v56  ;;  %v4486_v56 = vmul.f32 %v8823_v14, %v4346_v24  ;;  %5767 = vrcp.f32 %v9590_v35 }
 0x4a8   : > { %v4352_v38 = vmul.f32 %v5756_v55, %v3696_v30  ;;  %v9735_v31 = vpop.xlane.xlu2 %3007  ;;  %v5758_v39 = vpop.eup %5757  ;;  %v3090_v30 = vsel %vm1967_vm6, %v9042_v27, 0.0  ;;  %5769 = vrcp.f32 %v9707_v13 }
 0x4a9   : > { %v9737_v53 = vpop.xlane.xlu1 %3010  ;;  %v4961_v0 = vpack.c.bf16 %v4888_v16, %v4888_v16  ;;  %v4655_v16 = vadd.f32 %v4654_v5, %v9682_v15  ;;  %v3111_v15 = vsel %vm1967_vm6, %v9444_v3, 0.0 }
 0x4aa   : > { %v4492_v54 = vmul.f32 %v9090_v59, %v4352_v38  ;;  %v9765_v26 = vpop.f32.mrf.mxu3 }
 0x4ab   : > { %4994 = vst.msk [vmem:[%s9624_s8 + $0x10] sm:$0xf] %vm4989_vm7, %v4961_v0  ;;  %3085 = vadd.xlane.f32.xlu0 %v3084_v41  ;;  %v3698_v2 = vpop.f32.mrf.mxu2  ;;  %3043 = vadd.xlane.f32.xlu2 %v3042_v21  ;;  %v4661_v41 = vsel %vm393_vm0, %v4486_v56, 0.0 }
 0x4ac   : > { %v4353_v43 = vmul.f32 %v5758_v39, %v3698_v2  ;;  %3091 = vadd.xlane.f32.xlu1 %v3090_v30  ;;  %v4649_v32 = vsel %vm393_vm0, %v4492_v54, 0.0  ;;  %v5760_v39 = vpop.eup %5759  ;;  %v10950_v30 = vld [vmem:[#allocation33_spill] sm:$0xff]  ;;  %v9782_v35 = vadd.f32 %v4661_v41, %v9514_v37  ;;  %v9785_v56 = vpop.f32.mrf.mxu0 }
 0x4ad   : > { %v4650_v24 = vadd.f32 %v4649_v32, %v9666_v36  ;;  %v3069_v18 = vsel %vm1967_vm6, %v10950_v30, 0.0  ;;  %v5762_v10 = vpop.eup %5761  ;;  %v4347_v3 = vmul.f32 %v5760_v39, %v9575_v11  ;;  %v3114_v39 = vsel %vm1967_vm6, %v9487_v34, 0.0 }
 0x4ae   : > { %v4493_v27 = vmul.f32 %v9090_v59, %v4353_v43  ;;  %v4889_v7 = vpop.f32.mrf.mxu1  ;;  %v9757_v55 = vpop.xlane.xlu0 %2986  ;;  %v4365_v32 = vmul.f32 %v5762_v10, %v9264_v50  ;;  %v10952_v50 = vld [vmem:[#allocation41_spill] sm:$0xff] }
 0x4af   : > { %v4890_v49 = vadd.f32 %v9606_v62, %v4889_v7  ;;  %v5764_v21 = vpop.eup %5763  ;;  %v10951_v7 = vld [vmem:[#allocation82_spill] sm:$0xff] }
 0x4b0   : > { %v4656_v48 = vsel %vm393_vm0, %v4493_v27, 0.0  ;;  %v2927_v38 = vpop.xlane.xlu2 %2926  ;;  %v5766_v5 = vpop.eup %5765  ;;  %v4505_v41 = vmul.f32 %v8805_v45, %v4365_v32 }
 0x4b1   : > { %v9763_v0 = vpop.xlane.xlu1 %2965  ;;  %v4657_v54 = vadd.f32 %v4656_v48, %v4655_v16  ;;  %v4962_v6 = vpack.c.bf16 %v4890_v49, %v4890_v49  ;;  %5771 = vrcp.f32 %v2927_v38  ;;  %v5768_v27 = vpop.eup %5767  ;;  %v4487_v16 = vmul.f32 %v8823_v14, %v4347_v3 }
 0x4b2   : > { %5773 = vrcp.f32 %v9628_v61  ;;  %v4357_v61 = vmul.f32 %v5764_v21, %v10951_v7  ;;  %v5770_v48 = vpop.eup %5769  ;;  %v4372_v38 = vmul.f32 %v5766_v5, %v9478_v47  ;;  %v4373_v10 = vmul.f32 %v5768_v27, %v9525_v46 }
 0x4b3   : > { %4995 = vst.msk [vmem:[%s9624_s8 + $0x14] sm:$0xf] %vm4989_vm7, %v4962_v6  ;;  %v3701_v2 = vpop.f32.mrf.mxu2  ;;  %3112 = vadd.xlane.f32.xlu0 %v3111_v15  ;;  %v4790_v36 = vpack.c.bf16 %v4657_v54, %v4650_v24  ;;  %3070 = vadd.xlane.f32.xlu2 %v3069_v18  ;;  %v3066_v24 = vsel %vm1967_vm6, %v10952_v50, 0.0  ;;  %v3917_v6 = vpop.f32.mrf.mxu3  ;;  %v4680_v32 = vsel %vm393_vm0, %v4505_v41, 0.0 }
 0x4b4   : > { %3118 = vadd.xlane.f32.xlu1 %v3117_v52  ;;  %v4497_v47 = vmul.f32 %v8791_v12, %v4357_v61  ;;  %v4512_v3 = vmul.f32 %v8823_v14, %v4372_v38  ;;  %v4381_v21 = vmul.f32 %v5770_v48, %v3917_v6  ;;  %v10953_v61 = vld [vmem:[#allocation69_spill] sm:$0xff] }
 0x4b6   : > { %v4892_v42 = vpop.f32.mrf.mxu1  ;;  %v2924_v43 = vpop.xlane.xlu0 %2923  ;;  %v4675_v50 = vsel %vm393_vm0, %v4512_v3, 0.0 }
 0x4b7   : > { %v4893_v13 = vadd.f32 %v9606_v62, %v4892_v42  ;;  %5775 = vrcp.f32 %v2924_v43  ;;  %5324 = vmatmul.msk.bf16.gmra.mxu1 %vm393_vm0, %v4790_v36  ;;  %v5772_v54 = vpop.eup %5771  ;;  %v4668_v36 = vsel %vm393_vm0, %v4487_v16, 0.0  ;;  %v3093_v16 = vsel %vm1967_vm6, %v10953_v61, 0.0 }
 0x4b8   : > { %v9790_v11 = vpop.xlane.xlu2 %2944  ;;  %v5774_v52 = vpop.eup %5773  ;;  %5777 = vrcp.f32 %v9728_v23 }
 0x4b9   : > { %v9792_v37 = vpop.xlane.xlu1 %2992  ;;  %v4963_v49 = vpack.c.bf16 %v4893_v13, %v4893_v13  ;;  %5779 = vrcp.f32 %v9626_v28  ;;  %v4380_v13 = vmul.f32 %v5774_v52, %v9765_v26  ;;  %v4679_v28 = vsel %vm393_vm0, %v4497_v47, 0.0 }
 0x4ba   : > { %v4669_v26 = vadd.f32 %v4668_v36, %v9577_v57  ;;  %v4681_v38 = vadd.f32 %v4680_v32, %v4679_v28  ;;  %5781 = vrcp.f32 %v9713_v22  ;;  %v4676_v47 = vadd.f32 %v4675_v50, %v9527_v19 }
 0x4bb   : > { %4996 = vst.msk [vmem:[%s9624_s8 + $0x18] sm:$0xf] %vm4989_vm7, %v4963_v49  ;;  %v3703_v15 = vpop.f32.mrf.mxu2  ;;  %3067 = vadd.xlane.f32.xlu0 %v3066_v24  ;;  %3115 = vadd.xlane.f32.xlu2 %v3114_v39  ;;  %v9824_v49 = vpop.f32.mrf.mxu0  ;;  %v4521_v24 = vmul.f32 %v9090_v59, %v4381_v21  ;;  %v4520_v41 = vmul.f32 %v9090_v59, %v4380_v13  ;;  %5783 = vrcp.f32 %v9689_v29 }
 0x4bc   : > { %v4355_v30 = vmul.f32 %v5772_v54, %v3703_v15  ;;  %v3920_v52 = vpop.f32.mrf.mxu3  ;;  %5785 = vrcp.f32 %v9664_v8 }
 0x4bd   : > { %v5776_v18 = vpop.eup %5775  ;;  %v4684_v21 = vsel %vm393_vm0, %v4521_v24, 0.0  ;;  %v4677_v22 = vsel %vm393_vm0, %v4520_v41, 0.0  ;;  %5787 = vrcp.f32 %v9757_v55 }
 0x4be   : > { %v4354_v42 = vmul.f32 %v5776_v18, %v3701_v2  ;;  %v4495_v43 = vmul.f32 %v9090_v59, %v4355_v30  ;;  %v4894_v5 = vpop.f32.mrf.mxu1  ;;  %v9810_v34 = vpop.xlane.xlu0 %2941  ;;  %v4678_v19 = vadd.f32 %v4677_v22, %v4676_v47  ;;  %5789 = vrcp.f32 %v9737_v53 }
 0x4bf   : > { %v4895_v7 = vadd.f32 %v9606_v62, %v4894_v5  ;;  %v4513_v62 = vmul.f32 %v8823_v14, %v4373_v10  ;;  %v5778_v6 = vpop.eup %5777  ;;  %5791 = vrcp.f32 %v9735_v31 }
 0x4c0   : > { %v4494_v46 = vmul.f32 %v9090_v59, %v4354_v42  ;;  %v4670_v23 = vsel %vm393_vm0, %v4495_v43, 0.0  ;;  %v9818_v27 = vpop.xlane.xlu2 %2989  ;;  %v5780_v39 = vpop.eup %5779  ;;  %v4366_v36 = vmul.f32 %v5778_v6, %v9308_v4  ;;  %5793 = vrcp.f32 %v9810_v34 }
 0x4c1   : > { %v9820_v2 = vpop.xlane.xlu1 %2947  ;;  %v4964_v48 = vpack.c.bf16 %v4895_v7, %v4895_v7  ;;  %v4671_v15 = vadd.f32 %v4670_v23, %v4669_v26  ;;  %v4682_v30 = vsel %vm393_vm0, %v4513_v62, 0.0  ;;  %v5782_v32 = vpop.eup %5781 }
 0x4c2   : > { %v4663_v54 = vsel %vm393_vm0, %v4494_v46, 0.0  ;;  %v4683_v3 = vadd.f32 %v4682_v30, %v4681_v38  ;;  %v4506_v13 = vmul.f32 %v8805_v45, %v4366_v36  ;;  %v4374_v23 = vmul.f32 %v5782_v32, %v9564_v1  ;;  %v5784_v61 = vpop.eup %5783 }
 0x4c3   : > { %4997 = vst.msk [vmem:[%s9624_s8 + $0x1c] sm:$0xf] %vm4989_vm7, %v4964_v48  ;;  %3094 = vadd.xlane.f32.xlu0 %v3093_v16  ;;  %v4664_v57 = vadd.f32 %v4663_v54, %v9782_v35  ;;  %v10954_v35 = vld [vmem:[#allocation23_spill] sm:$0xff]  ;;  %v9852_v7 = vpop.f32.mrf.mxu0  ;;  %v5786_v8 = vpop.eup %5785  ;;  %v4367_v48 = vmul.f32 %v5784_v61, %v9351_v25 }
 0x4c4   : > { %v4358_v42 = vmul.f32 %v5780_v39, %v10954_v35  ;;  %v4685_v4 = vadd.f32 %v4684_v21, %v4683_v3  ;;  %v4687_v16 = vsel %vm393_vm0, %v4506_v13, 0.0  ;;  %v5788_v26 = vpop.eup %5787  ;;  %v3922_v62 = vpop.f32.mrf.mxu3  ;;  %v4514_v38 = vmul.f32 %v8823_v14, %v4374_v23  ;;  %v10955_v54 = vld [vmem:[#allocation79_spill] sm:$0xff] }
 0x4c5   : > { %v4791_v18 = vpack.c.bf16 %v4671_v15, %v4664_v57  ;;  %v4359_v6 = vmul.f32 %v5786_v8, %v10955_v54  ;;  %v4375_v41 = vmul.f32 %v5788_v26, %v9594_v60  ;;  %v4507_v53 = vmul.f32 %v8805_v45, %v4367_v48  ;;  %v5790_v25 = vpop.eup %5789  ;;  %v10956_v23 = vld [vmem:[#allocation83_spill] sm:$0xff]  ;;  %v10957_v48 = vld [vmem:[#allocation58_spill] sm:$0xff] }
 0x4c6   : > { %v2969_v10 = vpop.xlane.xlu0 %2968  ;;  %v4792_v29 = vpack.c.bf16 %v4685_v4, %v4678_v19  ;;  %v4498_v46 = vmul.f32 %v8791_v12, %v4358_v42  ;;  %v4689_v57 = vsel %vm393_vm0, %v4514_v38, 0.0  ;;  %v5792_v31 = vpop.eup %5791  ;;  %v4383_v36 = vmul.f32 %v5790_v25, %v3922_v62 }
 0x4c7   : > { %5325 = vmatmul.msk.bf16.gmra.mxu1 %vm393_vm0, %v4791_v18  ;;  %v4499_v30 = vmul.f32 %v8791_v12, %v4359_v6  ;;  %v4515_v18 = vmul.f32 %v8823_v14, %v4375_v41  ;;  %5795 = vrcp.f32 %v2969_v10  ;;  %v4694_v60 = vsel %vm393_vm0, %v4507_v53, 0.0  ;;  %v5794_v19 = vpop.eup %5793 }
 0x4c8   : > { %v9846_v43 = vpop.xlane.xlu2 %3016  ;;  %v4686_v55 = vsel %vm393_vm0, %v4498_v46, 0.0  ;;  %5797 = vrcp.f32 %v9763_v0  ;;  %v4382_v34 = vmul.f32 %v5792_v31, %v3920_v52  ;;  %v4523_v4 = vmul.f32 %v9090_v59, %v4383_v36 }
 0x4c9   : > { %v9848_v5 = vpop.xlane.xlu1 %2974  ;;  %v4688_v1 = vadd.f32 %v4687_v16, %v4686_v55  ;;  %5799 = vrcp.f32 %v9790_v11  ;;  %v4693_v35 = vsel %vm393_vm0, %v4499_v30, 0.0  ;;  %v4696_v42 = vsel %vm393_vm0, %v4515_v18, 0.0 }
 0x4ca   : > { %v4695_v10 = vadd.f32 %v4694_v60, %v4693_v35  ;;  %5801 = vrcp.f32 %v9792_v37  ;;  %v4522_v11 = vmul.f32 %v9090_v59, %v4382_v34  ;;  %v4360_v61 = vmul.f32 %v5794_v19, %v10956_v23 }
 0x4cb   : > { %v9868_v15 = vpop.f32.mrf.mxu0  ;;  %v4690_v39 = vadd.f32 %v4689_v57, %v4688_v1  ;;  %5803 = vrcp.f32 %v9818_v27  ;;  %v4698_v27 = vsel %vm393_vm0, %v4523_v4, 0.0 }
 0x4cc   : > { %v3925_v22 = vpop.f32.mrf.mxu3  ;;  %v4697_v13 = vadd.f32 %v4696_v42, %v4695_v10  ;;  %v4691_v1 = vsel %vm393_vm0, %v4522_v11, 0.0  ;;  %v4500_v41 = vmul.f32 %v8791_v12, %v4360_v61 }
 0x4cd   : > { %v5796_v0 = vpop.eup %5795 }
 0x4ce   : > { %v3014_v28 = vpop.xlane.xlu0 %3013  ;;  %v4369_v8 = vmul.f32 %v5796_v0, %v9394_v33  ;;  %v4692_v33 = vadd.f32 %v4691_v1, %v4690_v39  ;;  %v4700_v36 = vsel %vm393_vm0, %v4500_v41, 0.0 }
 0x4cf   : > { %5805 = vrcp.f32 %v3014_v28  ;;  %v4699_v28 = vadd.f32 %v4698_v27, %v4697_v13 }
 0x4d0   : > { %v9861_v50 = vpop.xlane.xlu2 %2971  ;;  %5807 = vrcp.f32 %v9846_v43  ;;  %v4509_v53 = vmul.f32 %v8805_v45, %v4369_v8 }
 0x4d1   : > { %v9863_v24 = vpop.xlane.xlu1 %3019  ;;  %v4793_v43 = vpack.c.bf16 %v4699_v28, %v4692_v33  ;;  %5809 = vrcp.f32 %v9820_v2  ;;  %v10960_v33 = vld [vmem:[#allocation50_spill] sm:$0xff] }
 0x4d2   : > { %v4708_v35 = vsel %vm393_vm0, %v4509_v53, 0.0 }
 0x4d3   : > { %v9888_v32 = vpop.f32.mrf.mxu0 }
 0x4d4   : > { %v3927_v6 = vpop.f32.mrf.mxu3 }
 0x4d6   : > { %v2951_v47 = vpop.xlane.xlu0 %2950 }
 0x4d7   : > { %5326 = vmatmul.msk.bf16.gmra.mxu1 %vm393_vm0, %v4792_v29  ;;  %v5798_v29 = vpop.eup %5797  ;;  %5811 = vrcp.f32 %v2951_v47 }
 0x4d8   : > { %v9878_v3 = vpop.xlane.xlu2 %2998  ;;  %v5800_v52 = vpop.eup %5799  ;;  %v4368_v62 = vmul.f32 %v5798_v29, %v9370_v44  ;;  %5813 = vrcp.f32 %v9848_v5 }
 0x4d9   : > { %v9880_v21 = vpop.xlane.xlu1 %3028  ;;  %v5802_v26 = vpop.eup %5801  ;;  %v4361_v38 = vmul.f32 %v5800_v52, %v10957_v48  ;;  %5815 = vrcp.f32 %v9861_v50 }
 0x4da   : > { %v5804_v55 = vpop.eup %5803  ;;  %v4508_v25 = vmul.f32 %v8805_v45, %v4368_v62  ;;  %v4377_v44 = vmul.f32 %v5802_v26, %v9684_v40  ;;  %v10958_v62 = vld [vmem:[#allocation31_spill] sm:$0xff] }
 0x4db   : > { %v5806_v54 = vpop.eup %5805  ;;  %v9904_v57 = vpop.f32.mrf.mxu0  ;;  %v4501_v30 = vmul.f32 %v8791_v12, %v4361_v38  ;;  %v4376_v18 = vmul.f32 %v5804_v55, %v9637_v17  ;;  %v10959_v38 = vld [vmem:[#allocation11_spill] sm:$0xff] }
 0x4dc   : > { %v4384_v31 = vmul.f32 %v5806_v54, %v3925_v22  ;;  %v5808_v39 = vpop.eup %5807  ;;  %v4701_v42 = vsel %vm393_vm0, %v4508_v25, 0.0  ;;  %v4517_v17 = vmul.f32 %v8823_v14, %v4377_v44  ;;  %v3930_v19 = vpop.f32.mrf.mxu3 }
 0x4dd   : > { %v4707_v2 = vsel %vm393_vm0, %v4501_v30, 0.0  ;;  %v4516_v47 = vmul.f32 %v8823_v14, %v4376_v18  ;;  %v4385_v22 = vmul.f32 %v5808_v39, %v3927_v6  ;;  %v4702_v4 = vadd.f32 %v4701_v42, %v4700_v36  ;;  %v5810_v5 = vpop.eup %5809 }
 0x4de   : > { %v2996_v46 = vpop.xlane.xlu0 %2995  ;;  %v4524_v10 = vmul.f32 %v9090_v59, %v4384_v31  ;;  %v4709_v0 = vadd.f32 %v4708_v35, %v4707_v2  ;;  %v5812_v13 = vpop.eup %5811  ;;  %v4710_v11 = vsel %vm393_vm0, %v4517_v17, 0.0 }
 0x4df   : > { %5817 = vrcp.f32 %v2996_v46  ;;  %v5814_v29 = vpop.eup %5813  ;;  %v4703_v50 = vsel %vm393_vm0, %v4516_v47, 0.0  ;;  %v4525_v52 = vmul.f32 %v9090_v59, %v4385_v22  ;;  %v4363_v28 = vmul.f32 %v5812_v13, %v10958_v62 }
 0x4e0   : > { %v9893_v37 = vpop.xlane.xlu2 %3025  ;;  %5819 = vrcp.f32 %v9878_v3  ;;  %v4705_v61 = vsel %vm393_vm0, %v4524_v10, 0.0  ;;  %v5816_v8 = vpop.eup %5815  ;;  %v4704_v26 = vadd.f32 %v4703_v50, %v4702_v4  ;;  %v4711_v46 = vadd.f32 %v4710_v11, %v4709_v0 }
 0x4e1   : > { %v9895_v16 = vpop.xlane.xlu1 %3073  ;;  %v4371_v1 = vmul.f32 %v5814_v29, %v10959_v38  ;;  %v4370_v41 = vmul.f32 %v5816_v8, %v10960_v33  ;;  %v4712_v53 = vsel %vm393_vm0, %v4525_v52, 0.0  ;;  %v4503_v18 = vmul.f32 %v8791_v12, %v4363_v28 }
 0x4e2   : > { %v4706_v54 = vadd.f32 %v4705_v61, %v4704_v26  ;;  %v4713_v44 = vadd.f32 %v4712_v53, %v4711_v46 }
 0x4e3   : > { %v9928_v27 = vpop.f32.mrf.mxu0  ;;  %v4511_v39 = vmul.f32 %v8805_v45, %v4371_v1  ;;  %v4510_v36 = vmul.f32 %v8805_v45, %v4370_v41  ;;  %v4721_v22 = vsel %vm393_vm0, %v4503_v18, 0.0  ;;  %v10962_v1 = vld [vmem:[#allocation6_spill] sm:$0xff] }
 0x4e5   : > { %v5818_v48 = vpop.eup %5817 }
 0x4e6   : > { %v3023_v60 = vpop.xlane.xlu0 %3022  ;;  %v5820_v6 = vpop.eup %5819  ;;  %v4378_v31 = vmul.f32 %v5818_v48, %v9703_v20 }
 0x4e7   : > { %5327 = vmatmul.msk.bf16.gmra.mxu1 %vm393_vm0, %v4793_v43  ;;  %5821 = vrcp.f32 %v3023_v60  ;;  %v10961_v43 = vld [vmem:[#allocation54_spill] sm:$0xff]  ;;  %v3932_v60 = vpop.f32.mrf.mxu3  ;;  %v4379_v35 = vmul.f32 %v5820_v6, %v9730_v51  ;;  %v4722_v51 = vsel %vm393_vm0, %v4511_v39, 0.0  ;;  %v10963_v6 = vld [vmem:[#allocation57_spill] sm:$0xff] }
 0x4e8   : > { %v3053_v40 = vpop.xlane.xlu2 %3052  ;;  %5823 = vrcp.f32 %v9863_v24  ;;  %v4362_v30 = vmul.f32 %v5810_v5, %v10961_v43  ;;  %v4794_v24 = vpack.c.bf16 %v4713_v44, %v4706_v54  ;;  %v4723_v11 = vadd.f32 %v4722_v51, %v4721_v22 }
 0x4e9   : > { %v9915_v34 = vpop.xlane.xlu1 %3100  ;;  %5825 = vrcp.f32 %v9880_v21  ;;  %v4518_v21 = vmul.f32 %v8823_v14, %v4378_v31  ;;  %v4519_v5 = vmul.f32 %v8823_v14, %v4379_v35 }
 0x4ea   : > { %5827 = vrcp.f32 %v3053_v40  ;;  %v4502_v20 = vmul.f32 %v8791_v12, %v4362_v30  ;;  %v4715_v40 = vsel %vm393_vm0, %v4510_v36, 0.0  ;;  %v10965_v30 = vld [vmem:[#allocation67_spill] sm:$0xff] }
 0x4eb   : > { %v9944_v47 = vpop.f32.mrf.mxu0 }
 0x4ec   : > { %v4714_v52 = vsel %vm393_vm0, %v4502_v20, 0.0 }
 0x4ed   : > { %v5822_v25 = vpop.eup %5821  ;;  %v4716_v61 = vadd.f32 %v4715_v40, %v4714_v52 }
 0x4ee   : > { %v3050_v23 = vpop.xlane.xlu0 %3049  ;;  %v4387_v42 = vmul.f32 %v5822_v25, %v3932_v60  ;;  %v5824_v2 = vpop.eup %5823  ;;  %v10964_v25 = vld [vmem:[#allocation53_spill] sm:$0xff] }
 0x4ef   : > { %5829 = vrcp.f32 %v3050_v23  ;;  %v4386_v0 = vmul.f32 %v5824_v2, %v3930_v19  ;;  %v5826_v29 = vpop.eup %5825  ;;  %v4724_v19 = vsel %vm393_vm0, %v4519_v5, 0.0 }
 0x4f0   : > { %v3098_v3 = vpop.xlane.xlu2 %3097  ;;  %5831 = vrcp.f32 %v9893_v37  ;;  %v4527_v13 = vmul.f32 %v9090_v59, %v4387_v42  ;;  %v5828_v50 = vpop.eup %5827  ;;  %v4717_v37 = vsel %vm393_vm0, %v4518_v21, 0.0  ;;  %v4725_v38 = vadd.f32 %v4724_v19, %v4723_v11 }
 0x4f1   : > { %v9931_v55 = vpop.xlane.xlu1 %3055  ;;  %v4526_v26 = vmul.f32 %v9090_v59, %v4386_v0  ;;  %v4718_v48 = vadd.f32 %v4717_v37, %v4716_v61  ;;  %v4397_v54 = vmul.f32 %v5828_v50, %v10962_v1  ;;  %v4389_v44 = vmul.f32 %v5826_v29, %v10964_v25  ;;  %v10967_v1 = vld [vmem:[#allocation35_spill] sm:$0xff] }
 0x4f2   : > { %v4726_v62 = vsel %vm393_vm0, %v4527_v13, 0.0 }
 0x4f3   : > { %v4727_v43 = vadd.f32 %v4726_v62, %v4725_v38  ;;  %v4529_v42 = vmul.f32 %v8791_v12, %v4389_v44 }
 0x4f5   : > { %v5830_v23 = vpop.eup %5829 }
 0x4f6   : > { %v3077_v17 = vpop.xlane.xlu0 %3076  ;;  %v5832_v8 = vpop.eup %5831  ;;  %v4396_v33 = vmul.f32 %v5830_v23, %v10963_v6 }
 0x4f7   : > { %5328 = vmatmul.msk.bf16.gmra.mxu1 %vm393_vm0, %v4794_v24  ;;  %5833 = vrcp.f32 %v3077_v17  ;;  %v4388_v18 = vmul.f32 %v5832_v8, %v10965_v30  ;;  %v4537_v24 = vmul.f32 %v8805_v45, %v4397_v54 }
 0x4f8   : > { %v3035_v10 = vpop.xlane.xlu2 %3034  ;;  %5835 = vrcp.f32 %v9895_v16  ;;  %v4146_v16 = vpop.f32.mrf.mxu0  ;;  %v4536_v36 = vmul.f32 %v8805_v45, %v4396_v33 }
 0x4f9   : > { %v9951_v4 = vpop.xlane.xlu1 %3082  ;;  %5837 = vrcp.f32 %v9915_v34  ;;  %v4719_v34 = vsel %vm393_vm0, %v4526_v26, 0.0  ;;  %v4528_v2 = vmul.f32 %v8791_v12, %v4388_v18  ;;  %v4736_v21 = vsel %vm393_vm0, %v4537_v24, 0.0 }
 0x4fa   : > { %5839 = vrcp.f32 %v3098_v3  ;;  %v4720_v39 = vadd.f32 %v4719_v34, %v4718_v48  ;;  %v4729_v40 = vsel %vm393_vm0, %v4536_v36, 0.0  ;;  %v10966_v48 = vld [vmem:[#allocation27_spill] sm:$0xff] }
 0x4fb   : > { %v4728_v29 = vsel %vm393_vm0, %v4528_v2, 0.0  ;;  %v10006_v2 = vld [vmem:[%s10152_s5] ss:$0 sm:$0xff] }
 0x4fc   : > { %v4795_v17 = vpack.c.bf16 %v4727_v43, %v4720_v39  ;;  %v4730_v23 = vadd.f32 %v4729_v40, %v4728_v29  ;;  %v10969_v43 = vld [vmem:[#allocation81_spill] sm:$0xff] }
 0x4fd   : > { %v5834_v28 = vpop.eup %5833 }
 0x4fe   : > { %v3032_v46 = vpop.xlane.xlu0 %3031  ;;  %v4405_v31 = vmul.f32 %v5834_v28, %v9785_v56  ;;  %v5836_v60 = vpop.eup %5835 }
 0x4ff   : > { %v5838_v35 = vpop.eup %5837  ;;  %v4404_v3 = vmul.f32 %v5836_v60, %v9750_v63  ;;  %5841 = vrcp.f32 %v3032_v46  ;;  %v4735_v63 = vsel %vm393_vm0, %v4529_v42, 0.0 }
 0x500   : > { %v3080_v41 = vpop.xlane.xlu2 %3079  ;;  %v4545_v20 = vmul.f32 %v8823_v14, %v4405_v31  ;;  %v5840_v22 = vpop.eup %5839  ;;  %v4413_v51 = vmul.f32 %v5838_v35, %v4146_v16  ;;  %v4737_v37 = vadd.f32 %v4736_v21, %v4735_v63 }
 0x501   : > { %v9966_v53 = vpop.xlane.xlu1 %3037  ;;  %v4149_v13 = vpop.f32.mrf.mxu0  ;;  %v4544_v11 = vmul.f32 %v8823_v14, %v4404_v3  ;;  %v4412_v50 = vmul.f32 %v5840_v22, %v9944_v47 }
 0x502   : > { %v4738_v52 = vsel %vm393_vm0, %v4545_v20, 0.0 }
 0x503   : > { %v4739_v26 = vadd.f32 %v4738_v52, %v4737_v37  ;;  %v4552_v46 = vmul.f32 %v9090_v59, %v4412_v50 }
 0x505   : > { %v5842_v61 = vpop.eup %5841  ;;  %v4733_v18 = vsel %vm393_vm0, %v4552_v46, 0.0 }
 0x506   : > { %v3059_v56 = vpop.xlane.xlu0 %3058  ;;  %v4390_v38 = vmul.f32 %v5842_v61, %v10966_v48 }
 0x507   : > { %5843 = vrcp.f32 %v3059_v56  ;;  %5329 = vmatmul.msk.bf16.gmra.mxu1 %vm393_vm0, %v4795_v17 }
 0x508   : > { %5845 = vrcp.f32 %v9931_v55  ;;  %v3107_v0 = vpop.xlane.xlu2 %3106  ;;  %v4553_v55 = vmul.f32 %v9090_v59, %v4413_v51  ;;  %v4530_v39 = vmul.f32 %v8791_v12, %v4390_v38 }
 0x509   : > { %v9982_v5 = vpop.xlane.xlu1 %3064  ;;  %5847 = vrcp.f32 %v3035_v10  ;;  %v4731_v10 = vsel %vm393_vm0, %v4544_v11, 0.0  ;;  %v4151_v34 = vpop.f32.mrf.mxu0 }
 0x50a   : > { %5849 = vrcp.f32 %v9951_v4  ;;  %v4732_v47 = vadd.f32 %v4731_v10, %v4730_v23  ;;  %v4740_v33 = vsel %vm393_vm0, %v4553_v55, 0.0  ;;  %v10968_v4 = vld [vmem:[#allocation24_spill] sm:$0xff] }
 0x50b   : > { %5851 = vrcp.f32 %v3080_v41  ;;  %v4741_v25 = vadd.f32 %v4740_v33, %v4739_v26 }
 0x50c   : > { %v4734_v60 = vadd.f32 %v4733_v18, %v4732_v47  ;;  %v10972_v18 = vld [vmem:[#allocation42_spill] sm:$0xff] }
 0x50d   : > { %v5844_v8 = vpop.eup %5843 }
 0x50e   : > { %v5846_v19 = vpop.eup %5845  ;;  %v3104_v62 = vpop.xlane.xlu0 %3103  ;;  %v4399_v54 = vmul.f32 %v5844_v8, %v10967_v1  ;;  %v4796_v20 = vpack.c.bf16 %v4741_v25, %v4734_v60 }
 0x50f   : > { %v5848_v28 = vpop.eup %5847  ;;  %5853 = vrcp.f32 %v3104_v62  ;;  %v4398_v16 = vmul.f32 %v5846_v19, %v10968_v4 }
 0x510   : > { %v3062_v6 = vpop.xlane.xlu2 %3061  ;;  %5855 = vrcp.f32 %v3107_v0  ;;  %v5850_v44 = vpop.eup %5849  ;;  %v4391_v30 = vmul.f32 %v5848_v28, %v10969_v43  ;;  %v4539_v24 = vmul.f32 %v8805_v45, %v4399_v54 }
 0x511   : > { %v3110_v41 = vpop.xlane.xlu1 %3109  ;;  %v5852_v31 = vpop.eup %5851  ;;  %v4538_v42 = vmul.f32 %v8805_v45, %v4398_v16  ;;  %v4407_v17 = vmul.f32 %v5850_v44, %v9852_v7  ;;  %5857 = vrcp.f32 %v9966_v53  ;;  %v4742_v7 = vsel %vm393_vm0, %v4530_v39, 0.0  ;;  %v10970_v16 = vld [vmem:[#allocation44_spill] sm:$0xff]  ;;  %v10971_v44 = vld [vmem:[#allocation55_spill] sm:$0xff] }
 0x512   : > { %v4531_v56 = vmul.f32 %v8791_v12, %v4391_v30  ;;  %v4406_v22 = vmul.f32 %v5852_v31, %v9824_v49  ;;  %v4750_v63 = vsel %vm393_vm0, %v4539_v24, 0.0  ;;  %5859 = vrcp.f32 %v3062_v6  ;;  %v4154_v26 = vpop.f32.mrf.mxu0  ;;  %v10973_v39 = vld [vmem:[#allocation68_spill] sm:$0xff] }
 0x513   : > { %v4743_v11 = vsel %vm393_vm0, %v4538_v42, 0.0  ;;  %v4547_v50 = vmul.f32 %v8823_v14, %v4407_v17 }
 0x514   : > { %v4897_v36 = vpop.f32.mrf.mxu1  ;;  %v4749_v49 = vsel %vm393_vm0, %v4531_v56, 0.0  ;;  %v4546_v53 = vmul.f32 %v8823_v14, %v4406_v22  ;;  %v4744_v37 = vadd.f32 %v4743_v11, %v4742_v7 }
 0x515   : > { %v5854_v35 = vpop.eup %5853  ;;  %v4898_v3 = vadd.f32 %v10006_v2, %v4897_v36  ;;  %v4751_v23 = vadd.f32 %v4750_v63, %v4749_v49  ;;  %v4752_v19 = vsel %vm393_vm0, %v4547_v50, 0.0 }
 0x516   : > { %v4414_v21 = vmul.f32 %v5854_v35, %v4149_v13  ;;  %v3041_v51 = vpop.xlane.xlu0 %3040  ;;  %v5856_v40 = vpop.eup %5855  ;;  %v4745_v62 = vsel %vm393_vm0, %v4546_v53, 0.0 }
 0x517   : > { %v4965_v0 = vpack.c.bf16 %v4898_v3, %v4898_v3  ;;  %5330 = vmatmul.msk.bf16.gmra.mxu1 %vm393_vm0, %v4796_v20  ;;  %5861 = vrcp.f32 %v3041_v51  ;;  %v4415_v13 = vmul.f32 %v5856_v40, %v4151_v34  ;;  %v5858_v8 = vpop.eup %5857  ;;  %v4746_v1 = vadd.f32 %v4745_v62, %v4744_v37 }
 0x518   : > { %v3089_v29 = vpop.xlane.xlu2 %3088  ;;  %v4554_v52 = vmul.f32 %v9090_v59, %v4414_v21  ;;  %5863 = vrcp.f32 %v9982_v5  ;;  %v5860_v46 = vpop.eup %5859  ;;  %v4753_v54 = vadd.f32 %v4752_v19, %v4751_v23  ;;  %v4392_v31 = vmul.f32 %v5858_v8, %v10972_v18 }
 0x519   : > { %4998 = vst.msk [vmem:[%s9624_s8 + $0x20] sm:$0xf] %vm4989_vm7, %v4965_v0  ;;  %v3047_v61 = vpop.xlane.xlu1 %3046  ;;  %v4555_v28 = vmul.f32 %v9090_v59, %v4415_v13  ;;  %5865 = vrcp.f32 %v3089_v29  ;;  %v4400_v25 = vmul.f32 %v5860_v46, %v10970_v16 }
 0x51a   : > { %v4747_v48 = vsel %vm393_vm0, %v4554_v52, 0.0  ;;  %v4156_v51 = vpop.f32.mrf.mxu0  ;;  %v4532_v40 = vmul.f32 %v8791_v12, %v4392_v31 }
 0x51b   : > { %v4748_v4 = vadd.f32 %v4747_v48, %v4746_v1  ;;  %v4754_v30 = vsel %vm393_vm0, %v4555_v28, 0.0  ;;  %v4540_v3 = vmul.f32 %v8805_v45, %v4400_v25 }
 0x51c   : > { %v4899_v55 = vpop.f32.mrf.mxu1  ;;  %v4755_v34 = vadd.f32 %v4754_v30, %v4753_v54  ;;  %v4756_v53 = vsel %vm393_vm0, %v4532_v40, 0.0  ;;  %v10974_v30 = vld [vmem:[#allocation4_spill] sm:$0xff] }
 0x51d   : > { %v4900_v10 = vadd.f32 %v10006_v2, %v4899_v55  ;;  %v5862_v38 = vpop.eup %5861 }
 0x51e   : > { %v3086_v47 = vpop.xlane.xlu0 %3085  ;;  %v5864_v33 = vpop.eup %5863  ;;  %v4393_v43 = vmul.f32 %v5862_v38, %v10971_v44  ;;  %v4797_v17 = vpack.c.bf16 %v4755_v34, %v4748_v4 }
 0x51f   : > { %v4966_v5 = vpack.c.bf16 %v4900_v10, %v4900_v10  ;;  %5867 = vrcp.f32 %v3086_v47  ;;  %v5866_v60 = vpop.eup %5865  ;;  %v4401_v24 = vmul.f32 %v5864_v33, %v10973_v39 }
 0x520   : > { %v3044_v6 = vpop.xlane.xlu2 %3043  ;;  %5869 = vrcp.f32 %v3110_v41  ;;  %v4533_v20 = vmul.f32 %v8791_v12, %v4393_v43  ;;  %v4409_v63 = vmul.f32 %v5866_v60, %v9888_v32 }
 0x521   : > { %4999 = vst.msk [vmem:[%s9624_s8 + $0x24] sm:$0xf] %vm4989_vm7, %v4966_v5  ;;  %v3092_v42 = vpop.xlane.xlu1 %3091  ;;  %v4541_v7 = vmul.f32 %v8805_v45, %v4401_v24 }
 0x522   : > { %v4763_v49 = vsel %vm393_vm0, %v4533_v20, 0.0  ;;  %v4549_v52 = vmul.f32 %v8823_v14, %v4409_v63  ;;  %v4159_v1 = vpop.f32.mrf.mxu0 }
 0x523   : > { %v4764_v13 = vsel %vm393_vm0, %v4541_v7, 0.0 }
 0x524   : > { %v4902_v36 = vpop.f32.mrf.mxu1  ;;  %v4765_v8 = vadd.f32 %v4764_v13, %v4763_v49 }
 0x525   : > { %v5868_v35 = vpop.eup %5867  ;;  %v4903_v41 = vadd.f32 %v10006_v2, %v4902_v36 }
 0x526   : > { %v4408_v56 = vmul.f32 %v5868_v35, %v9868_v15  ;;  %v3113_v22 = vpop.xlane.xlu0 %3112  ;;  %v5870_v21 = vpop.eup %5869  ;;  %v4757_v15 = vsel %vm393_vm0, %v4540_v3, 0.0 }
 0x527   : > { %v4967_v0 = vpack.c.bf16 %v4903_v41, %v4903_v41  ;;  %5871 = vrcp.f32 %v3113_v22  ;;  %5331 = vmatmul.msk.bf16.gmra.mxu1 %vm393_vm0, %v4797_v17  ;;  %v4416_v50 = vmul.f32 %v5870_v21, %v4154_v26  ;;  %v4758_v55 = vadd.f32 %v4757_v15, %v4756_v53 }
 0x528   : > { %v4548_v29 = vmul.f32 %v8823_v14, %v4408_v56  ;;  %v3071_v11 = vpop.xlane.xlu2 %3070  ;;  %5873 = vrcp.f32 %v3044_v6 }
 0x529   : > { %5000 = vst.msk [vmem:[%s9624_s8 + $0x28] sm:$0xf] %vm4989_vm7, %v4967_v0  ;;  %5875 = vrcp.f32 %v3047_v61  ;;  %v4556_v19 = vmul.f32 %v9090_v59, %v4416_v50  ;;  %v3119_v62 = vpop.xlane.xlu1 %3118  ;;  %v4766_v61 = vsel %vm393_vm0, %v4549_v52, 0.0 }
 0x52a   : > { %v4759_v32 = vsel %vm393_vm0, %v4548_v29, 0.0  ;;  %5877 = vrcp.f32 %v3071_v11  ;;  %v4767_v54 = vadd.f32 %v4766_v61, %v4765_v8 }
 0x52b   : > { %5879 = vrcp.f32 %v3092_v42  ;;  %v4760_v47 = vadd.f32 %v4759_v32, %v4758_v55  ;;  %v4761_v33 = vsel %vm393_vm0, %v4556_v19, 0.0  ;;  %v10975_v42 = vld [vmem:[#allocation39_spill] sm:$0xff] }
 0x52c   : > { %v4904_v37 = vpop.f32.mrf.mxu1 }
 0x52d   : > { %v5872_v23 = vpop.eup %5871  ;;  %v4905_v26 = vadd.f32 %v10006_v2, %v4904_v37  ;;  %v4762_v25 = vadd.f32 %v4761_v33, %v4760_v47 }
 0x52e   : > { %v4417_v10 = vmul.f32 %v5872_v23, %v4156_v51  ;;  %v3068_v46 = vpop.xlane.xlu0 %3067  ;;  %v5874_v5 = vpop.eup %5873 }
 0x52f   : > { %v4968_v28 = vpack.c.bf16 %v4905_v26, %v4905_v26  ;;  %5881 = vrcp.f32 %v3068_v46  ;;  %v5876_v6 = vpop.eup %5875  ;;  %v4394_v18 = vmul.f32 %v5874_v5, %v10974_v30  ;;  %v4161_v51 = vpop.f32.mrf.mxu0 }
 0x530   : > { %v4557_v48 = vmul.f32 %v9090_v59, %v4417_v10  ;;  %v3116_v38 = vpop.xlane.xlu2 %3115  ;;  %5883 = vrcp.f32 %v3119_v62  ;;  %v5878_v16 = vpop.eup %5877  ;;  %v4395_v41 = vmul.f32 %v5876_v6, %v10975_v42 }
 0x531   : > { %5001 = vst.msk [vmem:[%s9624_s8 + $0x2c] sm:$0xf] %vm4989_vm7, %v4968_v28  ;;  %5885 = vrcp.f32 %v3116_v38  ;;  %v5880_v43 = vpop.eup %5879  ;;  %v4403_v24 = vmul.f32 %v5878_v16, %v9719_v58  ;;  %v4534_v20 = vmul.f32 %v8791_v12, %v4394_v18 }
 0x532   : > { %v4768_v4 = vsel %vm393_vm0, %v4557_v48, 0.0  ;;  %v4410_v56 = vmul.f32 %v5880_v43, %v9904_v57  ;;  %v4535_v40 = vmul.f32 %v8791_v12, %v4395_v41 }
 0x533   : > { %v4769_v44 = vadd.f32 %v4768_v4, %v4767_v54  ;;  %v4543_v58 = vmul.f32 %v8805_v45, %v4403_v24  ;;  %v4770_v0 = vsel %vm393_vm0, %v4534_v20, 0.0 }
 0x534   : > { %v4907_v31 = vpop.f32.mrf.mxu1  ;;  %v4550_v7 = vmul.f32 %v8823_v14, %v4410_v56  ;;  %v4777_v53 = vsel %vm393_vm0, %v4535_v40, 0.0 }
 0x535   : > { %v5882_v34 = vpop.eup %5881  ;;  %v4908_v60 = vadd.f32 %v10006_v2, %v4907_v31  ;;  %v4798_v39 = vpack.c.bf16 %v4769_v44, %v4762_v25  ;;  %v4778_v49 = vsel %vm393_vm0, %v4543_v58, 0.0 }
 0x536   : > { %v4402_v36 = vmul.f32 %v5882_v34, %v9691_v9  ;;  %v3095_v35 = vpop.xlane.xlu0 %3094  ;;  %v5884_v3 = vpop.eup %5883  ;;  %v4773_v12 = vsel %vm393_vm0, %v4550_v7, 0.0  ;;  %v4779_v23 = vadd.f32 %v4778_v49, %v4777_v53 }
 0x537   : > { %v4969_v17 = vpack.c.bf16 %v4908_v60, %v4908_v60  ;;  %5887 = vrcp.f32 %v3095_v35  ;;  %5332 = vmatmul.msk.bf16.gmra.mxu1 %vm393_vm0, %v4798_v39  ;;  %v5886_v21 = vpop.eup %5885  ;;  %v4419_v63 = vmul.f32 %v5884_v3, %v4161_v51 }
 0x538   : > { %v4542_v22 = vmul.f32 %v8805_v45, %v4402_v36  ;;  %v4418_v29 = vmul.f32 %v5886_v21, %v4159_v1 }
 0x539   : > { %5002 = vst.msk [vmem:[%s9624_s8 + $0x30] sm:$0xf] %vm4989_vm7, %v4969_v17  ;;  %v4559_v52 = vmul.f32 %v9090_v59, %v4419_v63 }
 0x53a   : > { %v4771_v9 = vsel %vm393_vm0, %v4542_v22, 0.0  ;;  %v4558_v32 = vmul.f32 %v9090_v59, %v4418_v29 }
 0x53b   : > { %v4772_v15 = vadd.f32 %v4771_v9, %v4770_v0  ;;  %v4782_v10 = vsel %vm393_vm0, %v4559_v52, 0.0 }
 0x53c   : > { %v4909_v57 = vpop.f32.mrf.mxu1  ;;  %v4775_v19 = vsel %vm393_vm0, %v4558_v32, 0.0 }
 0x53d   : > { %v5888_v11 = vpop.eup %5887  ;;  %v4910_v50 = vadd.f32 %v10006_v2, %v4909_v57  ;;  %v4774_v55 = vadd.f32 %v4773_v12, %v4772_v15 }
 0x53e   : > { %v4411_v45 = vmul.f32 %v5888_v11, %v9928_v27 }
 0x53f   : > { %v4970_v13 = vpack.c.bf16 %v4910_v50, %v4910_v50  ;;  %v4776_v62 = vadd.f32 %v4775_v19, %v4774_v55 }
 0x540   : > { %v4551_v37 = vmul.f32 %v8823_v14, %v4411_v45 }
 0x541   : > { %5003 = vst.msk [vmem:[%s9624_s8 + $0x34] sm:$0xf] %vm4989_vm7, %v4970_v13 }
 0x542   : > { %v4780_v8 = vsel %vm393_vm0, %v4551_v37, 0.0 }
 0x543   : > { %v4781_v27 = vadd.f32 %v4780_v8, %v4779_v23 }
 0x544   : > { %v4912_v26 = vpop.f32.mrf.mxu1 }
 0x545   : > { %v4913_v46 = vadd.f32 %v10006_v2, %v4912_v26  ;;  %v4783_v59 = vadd.f32 %v4782_v10, %v4781_v27 }
 0x547   : > { %v4971_v14 = vpack.c.bf16 %v4913_v46, %v4913_v46  ;;  %v4799_v28 = vpack.c.bf16 %v4783_v59, %v4776_v62 }
 0x549   : > { %5004 = vst.msk [vmem:[%s9624_s8 + $0x38] sm:$0xf] %vm4989_vm7, %v4971_v14  ;;  %5333 = vmatmul.msk.bf16.gmra.mxu1 %vm393_vm0, %v4799_v28 }
 0x54c   : > { %v4914_v47 = vpop.f32.mrf.mxu1 }
 0x54d   : > { %v4915_v61 = vadd.f32 %v10006_v2, %v4914_v47 }
 0x54f   : > { %v4972_v48 = vpack.c.bf16 %v4915_v61, %v4915_v61 }
 0x551   : > { %5005 = vst.msk [vmem:[%s9624_s8 + $0x3c] sm:$0xf] %vm4989_vm7, %v4972_v48 }
 0x554   : > { %v4917_v38 = vpop.f32.mrf.mxu1 }
 0x555   : > { %v4918_v5 = vadd.f32 %v10006_v2, %v4917_v38 }
 0x557   : > { %v4973_v1 = vpack.c.bf16 %v4918_v5, %v4918_v5 }
 0x559   : > { %5006 = vst.msk [vmem:[%s9624_s8 + $0x40] sm:$0xf] %vm4989_vm7, %v4973_v1 }
 0x55c   : > { %v4919_v54 = vpop.f32.mrf.mxu1 }
 0x55d   : > { %v4920_v6 = vadd.f32 %v10006_v2, %v4919_v54 }
 0x55f   : > { %v4974_v33 = vpack.c.bf16 %v4920_v6, %v4920_v6 }
 0x561   : > { %5007 = vst.msk [vmem:[%s9624_s8 + $0x44] sm:$0xf] %vm4989_vm7, %v4974_v33 }
 0x564   : > { %v4922_v4 = vpop.f32.mrf.mxu1 }
 0x565   : > { %v4923_v16 = vadd.f32 %v10006_v2, %v4922_v4 }
 0x567   : > { %v4975_v25 = vpack.c.bf16 %v4923_v16, %v4923_v16 }
 0x569   : > { %5008 = vst.msk [vmem:[%s9624_s8 + $0x48] sm:$0xf] %vm4989_vm7, %v4975_v25 }
 0x56c   : > { %v4924_v44 = vpop.f32.mrf.mxu1 }
 0x56d   : > { %v4925_v43 = vadd.f32 %v10006_v2, %v4924_v44 }
 0x56f   : > { %v4976_v30 = vpack.c.bf16 %v4925_v43, %v4925_v43 }
 0x571   : > { %5009 = vst.msk [vmem:[%s9624_s8 + $0x4c] sm:$0xf] %vm4989_vm7, %v4976_v30 }
 0x574   : > { %v4927_v18 = vpop.f32.mrf.mxu1 }
 0x575   : > { %v4928_v31 = vadd.f32 %v10006_v2, %v4927_v18 }
 0x577   : > { %v4977_v34 = vpack.c.bf16 %v4928_v31, %v4928_v31 }
 0x579   : > { %5010 = vst.msk [vmem:[%s9624_s8 + $0x50] sm:$0xf] %vm4989_vm7, %v4977_v34 }
 0x57c   : > { %v4929_v60 = vpop.f32.mrf.mxu1 }
 0x57d   : > { %v4930_v39 = vadd.f32 %v10006_v2, %v4929_v60 }
 0x57f   : > { %v4978_v24 = vpack.c.bf16 %v4930_v39, %v4930_v39 }
 0x581   : > { %5011 = vst.msk [vmem:[%s9624_s8 + $0x54] sm:$0xf] %vm4989_vm7, %v4978_v24 }
 0x584   : > { %v4932_v36 = vpop.f32.mrf.mxu1 }
 0x585   : > { %v4933_v35 = vadd.f32 %v10006_v2, %v4932_v36 }
 0x587   : > { %v4979_v42 = vpack.c.bf16 %v4933_v35, %v4933_v35 }
 0x589   : > { %5012 = vst.msk [vmem:[%s9624_s8 + $0x58] sm:$0xf] %vm4989_vm7, %v4979_v42 }
 0x58c   : > { %v4934_v41 = vpop.f32.mrf.mxu1 }
 0x58d   : > { %v4935_v17 = vadd.f32 %v10006_v2, %v4934_v41 }
 0x58f   : > { %v4980_v3 = vpack.c.bf16 %v4935_v17, %v4935_v17 }
 0x591   : > { %5013 = vst.msk [vmem:[%s9624_s8 + $0x5c] sm:$0xf] %vm4989_vm7, %v4980_v3 }
 0x594   : > { %v4937_v20 = vpop.f32.mrf.mxu1 }
 0x595   : > { %v4938_v56 = vadd.f32 %v10006_v2, %v4937_v20 }
 0x597   : > { %v4981_v22 = vpack.c.bf16 %v4938_v56, %v4938_v56 }
 0x599   : > { %5014 = vst.msk [vmem:[%s9624_s8 + $0x60] sm:$0xf] %vm4989_vm7, %v4981_v22 }
 0x59c   : > { %v4939_v21 = vpop.f32.mrf.mxu1 }
 0x59d   : > { %v4940_v58 = vadd.f32 %v10006_v2, %v4939_v21 }
 0x59f   : > { %v4982_v9 = vpack.c.bf16 %v4940_v58, %v4940_v58 }
 0x5a1   : > { %5015 = vst.msk [vmem:[%s9624_s8 + $0x64] sm:$0xf] %vm4989_vm7, %v4982_v9 }
 0x5a4   : > { %v4942_v51 = vpop.f32.mrf.mxu1 }
 0x5a5   : > { %v4943_v40 = vadd.f32 %v10006_v2, %v4942_v51 }
 0x5a7   : > { %v4983_v0 = vpack.c.bf16 %v4943_v40, %v4943_v40 }
 0x5a9   : > { %5016 = vst.msk [vmem:[%s9624_s8 + $0x68] sm:$0xf] %vm4989_vm7, %v4983_v0 }
 0x5ac   : > { %v4944_v7 = vpop.f32.mrf.mxu1 }
 0x5ad   : > { %v4945_v63 = vadd.f32 %v10006_v2, %v4944_v7 }
 0x5af   : > { %v4984_v29 = vpack.c.bf16 %v4945_v63, %v4945_v63 }
 0x5b1   : > { %5017 = vst.msk [vmem:[%s9624_s8 + $0x6c] sm:$0xf] %vm4989_vm7, %v4984_v29 }
 0x5b4   : > { %v4947_v57 = vpop.f32.mrf.mxu1 }
 0x5b5   : > { %v4948_v11 = vadd.f32 %v10006_v2, %v4947_v57 }
 0x5b7   : > { %v4985_v15 = vpack.c.bf16 %v4948_v11, %v4948_v11 }
 0x5b9   : > { %5018 = vst.msk [vmem:[%s9624_s8 + $0x70] sm:$0xf] %vm4989_vm7, %v4985_v15 }
 0x5bc   : > { %v4949_v50 = vpop.f32.mrf.mxu1 }
 0x5bd   : > { %v4950_v49 = vadd.f32 %v10006_v2, %v4949_v50 }
 0x5bf   : > { %v4986_v45 = vpack.c.bf16 %v4950_v49, %v4950_v49 }
 0x5c1   : > { %5019 = vst.msk [vmem:[%s9624_s8 + $0x74] sm:$0xf] %vm4989_vm7, %v4986_v45 }
 0x5c6   : > { %v4952_v53 = vpop.f32.mrf.mxu1 }
 0x5c7   : > { %v4953_v13 = vadd.f32 %v10006_v2, %v4952_v53 }
 0x5c9   : > { %v4987_v12 = vpack.c.bf16 %v4953_v13, %v4953_v13 }
 0x5cb   : > { %5020 = vst.msk [vmem:[%s9624_s8 + $0x78] sm:$0xf] %vm4989_vm7, %v4987_v12 }
 0x5ce   : > { %v4954_v52 = vpop.f32.mrf.mxu1 }
 0x5cf   : > { %v4955_v32 = vadd.f32 %v10006_v2, %v4954_v52 }
 0x5d1   : > { %v4988_v37 = vpack.c.bf16 %v4955_v32, %v4955_v32 }
 0x5d3   : > { %5021 = vst.msk [vmem:[%s9624_s8 + $0x7c] sm:$0xf] %vm4989_vm7, %v4988_v37 }
 0x5d4 PF: > { %s16_s21 = sadd.s32 1, %s5921_s21  }
 0x5d5   : > { %p13_p4 = scmp.ge.s32.totalorder %s16_s21, 10  }
 0x5d7   :  { %15 = sbr.rel (!%p13_p4) target bundleno = 1 (0x1), region = 74 }

</bundles_post_ra>
